<compile_context>
chip_gen: v6e
topology: v6e:2x2x1
jax: 0.10.0
libtpu: 0.0.40
codegen_flags: <defaults>
</compile_context>

<pallas_src>
import jax
import jax.numpy as jnp
import numpy as np
from jax.experimental import pallas as pl
from jax.experimental.pallas import tpu as pltpu

BN_EPS = 1e-5
KW = 3  # every conv has kernel width 3 along W with pad 1


# ----------------------------------------------------------------------------
# Kernel
# ----------------------------------------------------------------------------
def _make_kernel(c_in, planes, w, tn, w_offs, b_offs):
    wp = w + 2  # padded W (sublane axis)

    def kernel(x_ref, w_ref, b_ref, o_ref, mid_ref, sens_ref):
        # x_ref   : (1, c_in, 16, WP, TN)   W pre-padded by the wrapper
        # mid_ref : (planes, 4, WP, TN)     stage-1 output (one branch at a time)
        # sens_ref: (planes, 2, WP, TN)     stage-2 outputs (row 0 = acc, 1 = gyro)
        # o_ref   : (1, planes, W, TN)      full-width conv3 output (wrapper strides)

        # Zero the W-pad rows of the scratch buffers (scratch is not zero-init;
        # re-done every grid step so megacore partitioning stays correct).
        zero_m = jnp.zeros((planes, 4, 1, tn), jnp.float32)
        mid_ref[:, :, 0:1, :] = zero_m
        mid_ref[:, :, wp - 1:wp, :] = zero_m
        zero_s = jnp.zeros((planes, 2, 1, tn), jnp.float32)
        sens_ref[:, :, 0:1, :] = zero_s
        sens_ref[:, :, wp - 1:wp, :] = zero_s

        def conv_bn_relu(read_tap, write_out, stage, *, cin, cout, hin, kh, sh):
            hout = (hin - kh) // sh + 1
            woff, boff = w_offs[stage], b_offs[stage]
            # Hoist every SMEM weight / shift load out of the spatial loops;
            # JAX does not CSE ref loads.
            wv = [[[[w_ref[woff + ((o * cin + c) * kh + ih) * KW + iw]
                     for iw in range(KW)]
                    for ih in range(kh)]
                   for c in range(cin)]
                  for o in range(cout)]
            shifts = [b_ref[boff + o] for o in range(cout)]
            for ho in range(hout):
                accs = [None] * cout
                for c in range(cin):
                    for ih in range(kh):
                        # Taps read once per (c, ih) row group and reused for
                        # every output channel; only 3 taps + cout accumulators
                        # live at a time -> no vreg-spill blow-up at large TN.
                        taps = [read_tap(c, sh * ho + ih, iw) for iw in range(KW)]
                        for o in range(cout):
                            for iw in range(KW):
                                term = wv[o][c][ih][iw] * taps[iw]
                                accs[o] = term if accs[o] is None else accs[o] + term
                for o in range(cout):
                    # BN scale already folded into the weights host-side.
                    write_out(o, ho, jnp.maximum(accs[o] + shifts[o], 0.0))

        def run_branch(h_base, stage1, stage2, sens_row):
            # stage 1: (c_in, 8, W) -> (planes, 4, W);  kh=2, sh=2
            def rd_x(c, h, iw):
                return x_ref[0, c, h_base + h, iw:iw + w, :]

            def wr_mid(o, ho, y):
                mid_ref[o, ho, 1:1 + w, :] = y

            conv_bn_relu(rd_x, wr_mid, stage1,
                         cin=c_in, cout=planes, hin=8, kh=2, sh=2)

            # stage 2: (planes, 4, W) -> (planes, 1, W);  kh=4, sh=4
            def rd_mid(c, h, iw):
                return mid_ref[c, h, iw:iw + w, :]

            def wr_sens(o, ho, y):
                del ho
                sens_ref[o, sens_row, 1:1 + w, :] = y

            conv_bn_relu(rd_mid, wr_sens, stage2,
                         cin=planes, cout=planes, hin=4, kh=4, sh=4)

        run_branch(0, 0, 1, 0)   # acc  -> sens_ref[:, 0]
        run_branch(8, 2, 3, 1)   # gyro -> sens_ref[:, 1]

        # stage 3: (planes, 2, W) -> (planes, 1, W) at FULL width (stride 1);
        # the stride-2 selection along W is done by the wrapper on the tiny
        # output.  All taps are plain contiguous sublane slices.
        def rd_sens(c, h, iw):
            return sens_ref[c, h, iw:iw + w, :]

        def wr_out(o, ho, y):
            del ho
            o_ref[0, o, :, :] = y   # aligned (W, TN) slab store per channel

        conv_bn_relu(rd_sens, wr_out, 4,
                     cin=planes, cout=planes, hin=2, kh=2, sh=1)

    return kernel


# ----------------------------------------------------------------------------
# Host-side glue
# ----------------------------------------------------------------------------
def _choose_blocks(n):
    """Pick (nblocks, TN) for the merged batch axis N = B*D.

    TN is always a multiple of 128 so every VPU op and the output store are
    lane-dense (unmasked vst).  Small N stays in a single grid step (no forced
    2-way split into masked, overhead-dominated blocks); large N is split into
    ~512-lane blocks, which amortises the ~0.35 us per-grid-step overhead and
    still leaves the whole working set (~1.3 MiB) far inside VMEM on v5e/v6e/v7x.
    """
    lane = 128
    tn_target = 512
    n_pad = ((n + lane - 1) // lane) * lane
    if n_pad <= tn_target:
        return 1, n_pad
    nblocks = (n_pad + tn_target - 1) // tn_target
    tn = ((n_pad + nblocks - 1) // nblocks + lane - 1) // lane * lane
    return nblocks, tn


def _fold_bn(p):
    # BN(conv(x)+cb) == conv_{w*scale}(x) + (beta + scale*(cb - mean))
    scale = p["gamma"] / jnp.sqrt(p["var"] + BN_EPS)
    w = p["w"] * scale[:, None, None, None]
    shift = p["beta"] + scale * (p["cb"] - p["mean"])
    return w.reshape(-1), shift


def init_params(key, in_planes, planes):
    specs = {
        "acc1":  (planes, in_planes, 2, 3),
        "acc2":  (planes, planes, 4, 3),
        "gyro1": (planes, in_planes, 2, 3),
        "gyro2": (planes, planes, 4, 3),
        "conv3": (planes, planes, 2, 3),
    }
    params = {}
    for name, shp in specs.items():
        key, k1, k2, k3, k4, k5, k6 = jax.random.split(key, 7)
        params[name] = dict(
            w=jax.random.normal(k1, shp, jnp.float32) * 0.2,          # conv weight (kD=1 squeezed)
            cb=jax.random.normal(k2, (planes,), jnp.float32) * 0.1,   # conv bias
            gamma=jax.random.uniform(k3, (planes,), jnp.float32, minval=0.5, maxval=1.5),
            beta=jax.random.normal(k4, (planes,), jnp.float32) * 0.1,
            mean=jax.random.normal(k5, (planes,), jnp.float32) * 0.1,
            var=jax.random.uniform(k6, (planes,), jnp.float32, minval=0.5, maxval=1.5),
        )
    return params


def norm_sensor_block_forward(x_ncdhw, params, in_planes, planes):
    """x_ncdhw: (B, C_in, D, H=16, W). Returns (B, planes, D, 1, Wout) like PyTorch."""
    B, C_in, D, H, W = x_ncdhw.shape
    assert C_in == in_planes and H == 16
    Wout = (W + 2 - KW) // 2 + 1
    WP = W + 2

    N = B * D
    nblocks, TN = _choose_blocks(N)
    N_pad = nblocks * TN

    # (B, C, D, H, W) -> (C, H, W, B*D) -> pad N and W -> (nblocks, C, H, WP, TN)
    x_k = jnp.transpose(x_ncdhw.astype(jnp.float32), (1, 3, 4, 0, 2))
    x_k = x_k.reshape(C_in, H, W, N)
    if N_pad != N:
        x_k = jnp.pad(x_k, ((0, 0), (0, 0), (0, 0), (0, N_pad - N)))
    x_k = jnp.pad(x_k, ((0, 0), (0, 0), (1, 1), (0, 0)))
    x_k = x_k.reshape(C_in, H, WP, nblocks, TN).transpose(3, 0, 1, 2, 4)

    # Pack scale-folded conv weights + BN shifts into flat SMEM operands.
    w_parts, b_parts, w_offs, b_offs = [], [], [], []
    woff = boff = 0
    for name in ("acc1", "acc2", "gyro1", "gyro2", "conv3"):
        wf, sh = _fold_bn(params[name])
        w_offs.append(woff)
        b_offs.append(boff)
        woff += wf.shape[0]
        boff += sh.shape[0]
        w_parts.append(wf)
        b_parts.append(sh)
    w_flat = jnp.concatenate(w_parts)
    b_flat = jnp.concatenate(b_parts)

    smem = pl.BlockSpec(memory_space=pltpu.MemorySpace.SMEM)
    out_k = pl.pallas_call(
        _make_kernel(C_in, planes, W, TN, tuple(w_offs), tuple(b_offs)),
        grid=(nblocks,),
        in_specs=[pl.BlockSpec((1, C_in, H, WP, TN), lambda n: (n, 0, 0, 0, 0)),
                  smem, smem],
        out_specs=pl.BlockSpec((1, planes, W, TN), lambda n: (n, 0, 0, 0)),
        out_shape=jax.ShapeDtypeStruct((nblocks, planes, W, TN), jnp.float32),
        scratch_shapes=[pltpu.VMEM((planes, 4, WP, TN), jnp.float32),
                        pltpu.VMEM((planes, 2, WP, TN), jnp.float32)],
        compiler_params=pltpu.CompilerParams(
            dimension_semantics=("parallel",)),
    )(x_k, w_flat, b_flat)

    # Full-width conv3 output: keep every other W column (stride 2), then
    # (nblocks, planes, Wout, TN) -> (B, planes, D, 1, Wout).
    out = out_k[:, :, 0::2, :][:, :, :Wout, :]
    out = out.transpose(0, 3, 1, 2).reshape(N_pad, planes, Wout)[:N]
    out = out.reshape(B, D, planes, Wout).transpose(0, 2, 1, 3)
    return out[:, :, :, None, :]


# ----------------------------------------------------------------------------
# Pure-JAX reference (mirrors the PyTorch forward, eval-mode BN)
# ----------------------------------------------------------------------------
def reference_forward(x, params):
    def conv(x, p, stride_hw):
        w5 = p["w"][:, :, None, :, :]  # (O, I, 1, KH, KW)
        out = jax.lax.conv_general_dilated(
            x, w5, window_strides=(1,) + stride_hw,
            padding=((0, 0), (0, 0), (1, 1)),
            dimension_numbers=("NCDHW", "OIDHW", "NCDHW"),
            precision=jax.lax.Precision.HIGHEST)
        return out + p["cb"][None, :, None, None, None]

    def bn_relu(z, p):
        s = p["gamma"] / jnp.sqrt(p["var"] + BN_EPS)
        y = (z - p["mean"][None, :, None, None, None]) * s[None, :, None, None, None] \
            + p["beta"][None, :, None, None, None]
        return jnp.maximum(y, 0.0)

    xa, xg = x[:, :, :, 0:8, :], x[:, :, :, 8:16, :]
    a = bn_relu(conv(xa, params["acc1"], (2, 1)), params["acc1"])
    a = bn_relu(conv(a, params["acc2"], (4, 1)), params["acc2"])
    g = bn_relu(conv(xg, params["gyro1"], (2, 1)), params["gyro1"])
    g = bn_relu(conv(g, params["gyro2"], (4, 1)), params["gyro2"])
    sd = jnp.concatenate([a, g], axis=3)
    return bn_relu(conv(sd, params["conv3"], (1, 2)), params["conv3"])


if __name__ == "__main__":
    B, in_planes, planes = 2, 1, 4
    D, H, W = 4, 16, 8                      # seq_len, sensor_dim, interval_len

    key = jax.random.PRNGKey(0)
    key, kx = jax.random.split(key)
    x = jax.random.normal(kx, (B, in_planes, D, H, W), jnp.float32)
    params = init_params(key, in_planes, planes)

    out = jax.block_until_ready(
        norm_sensor_block_forward(x, params, in_planes, planes))

    ref = jax.block_until_ready(reference_forward(x, params))
    assert out.shape == ref.shape, (out.shape, ref.shape)
    np.testing.assert_allclose(np.asarray(out), np.asarray(ref), rtol=1e-4, atol=1e-4)

    print("KERNEL_OK")
</pallas_src>

<mosaic_0001>
module attributes {stable_mosaic.version = 11 : i64} {
  func.func @kernel(%arg0: i32, %arg1: memref<1x1x16x10x128xf32, #tpu.memory_space<vmem>>, %arg2: memref<528xf32, #tpu.memory_space<smem>>, %arg3: memref<20xf32, #tpu.memory_space<smem>>, %arg4: memref<1x4x8x128xf32, #tpu.memory_space<vmem>>, %arg5: memref<4x4x10x128xf32, #tpu.memory_space<vmem>>, %arg6: memref<4x2x10x128xf32, #tpu.memory_space<vmem>>) attributes {dimension_semantics = [#tpu.dimension_semantics<parallel>], iteration_bounds = array<i64: 1>, scalar_prefetch = 0 : i64, scratch_operands = 2 : i64, tpu.core_type = #tpu.core_type<tc>, window_params = [{transform_indices = @transform_0, window_bounds = array<i64: 1, 1, 16, 10, 128>}, {transform_indices = @transform_1, window_bounds = array<i64: 528>}, {transform_indices = @transform_2, window_bounds = array<i64: 20>}, {transform_indices = @transform_3, window_bounds = array<i64: 1, 4, 8, 128>}]} {
    %cst = arith.constant 0.000000e+00 : f32
    %0 = vector.broadcast %cst : f32 to vector<4x4x1x128xf32>
    %c0 = arith.constant 0 : index
    %c0_0 = arith.constant 0 : index
    %c0_1 = arith.constant 0 : index
    %c0_2 = arith.constant 0 : index
    %1 = vector.load %arg5[%c0, %c0_0, %c0_1, %c0_2] : memref<4x4x10x128xf32, #tpu.memory_space<vmem>>, vector<4x4x1x128xf32>
    tpu.vector_store %arg5[%c0, %c0_0, %c0_1, %c0_2], %0 {strides = array<i32>} : memref<4x4x10x128xf32, #tpu.memory_space<vmem>>, vector<4x4x1x128xf32>,
    %c0_3 = arith.constant 0 : index
    %c0_4 = arith.constant 0 : index
    %c9 = arith.constant 9 : index
    %c0_5 = arith.constant 0 : index
    %2 = vector.load %arg5[%c0_3, %c0_4, %c9, %c0_5] : memref<4x4x10x128xf32, #tpu.memory_space<vmem>>, vector<4x4x1x128xf32>
    tpu.vector_store %arg5[%c0_3, %c0_4, %c9, %c0_5], %0 {strides = array<i32>} : memref<4x4x10x128xf32, #tpu.memory_space<vmem>>, vector<4x4x1x128xf32>,
    %cst_6 = arith.constant 0.000000e+00 : f32
    %3 = vector.broadcast %cst_6 : f32 to vector<4x2x1x128xf32>
    %c0_7 = arith.constant 0 : index
    %c0_8 = arith.constant 0 : index
    %c0_9 = arith.constant 0 : index
    %c0_10 = arith.constant 0 : index
    %4 = vector.load %arg6[%c0_7, %c0_8, %c0_9, %c0_10] : memref<4x2x10x128xf32, #tpu.memory_space<vmem>>, vector<4x2x1x128xf32>
    tpu.vector_store %arg6[%c0_7, %c0_8, %c0_9, %c0_10], %3 {strides = array<i32>} : memref<4x2x10x128xf32, #tpu.memory_space<vmem>>, vector<4x2x1x128xf32>,
    %c0_11 = arith.constant 0 : index
    %c0_12 = arith.constant 0 : index
    %c9_13 = arith.constant 9 : index
    %c0_14 = arith.constant 0 : index
    %5 = vector.load %arg6[%c0_11, %c0_12, %c9_13, %c0_14] : memref<4x2x10x128xf32, #tpu.memory_space<vmem>>, vector<4x2x1x128xf32>
    tpu.vector_store %arg6[%c0_11, %c0_12, %c9_13, %c0_14], %3 {strides = array<i32>} : memref<4x2x10x128xf32, #tpu.memory_space<vmem>>, vector<4x2x1x128xf32>,
    %c0_15 = arith.constant 0 : index
    %6 = memref.load %arg2[%c0_15] : memref<528xf32, #tpu.memory_space<smem>>
    %c1 = arith.constant 1 : index
    %7 = memref.load %arg2[%c1] : memref<528xf32, #tpu.memory_space<smem>>
    %c2 = arith.constant 2 : index
    %8 = memref.load %arg2[%c2] : memref<528xf32, #tpu.memory_space<smem>>
    %c3 = arith.constant 3 : index
    %9 = memref.load %arg2[%c3] : memref<528xf32, #tpu.memory_space<smem>>
    %c4 = arith.constant 4 : index
    %10 = memref.load %arg2[%c4] : memref<528xf32, #tpu.memory_space<smem>>
    %c5 = arith.constant 5 : index
    %11 = memref.load %arg2[%c5] : memref<528xf32, #tpu.memory_space<smem>>
    %c6 = arith.constant 6 : index
    %12 = memref.load %arg2[%c6] : memref<528xf32, #tpu.memory_space<smem>>
    %c7 = arith.constant 7 : index
    %13 = memref.load %arg2[%c7] : memref<528xf32, #tpu.memory_space<smem>>
    %c8 = arith.constant 8 : index
    %14 = memref.load %arg2[%c8] : memref<528xf32, #tpu.memory_space<smem>>
    %c9_16 = arith.constant 9 : index
    %15 = memref.load %arg2[%c9_16] : memref<528xf32, #tpu.memory_space<smem>>
    %c10 = arith.constant 10 : index
    %16 = memref.load %arg2[%c10] : memref<528xf32, #tpu.memory_space<smem>>
    %c11 = arith.constant 11 : index
    %17 = memref.load %arg2[%c11] : memref<528xf32, #tpu.memory_space<smem>>
    %c12 = arith.constant 12 : index
    %18 = memref.load %arg2[%c12] : memref<528xf32, #tpu.memory_space<smem>>
    %c13 = arith.constant 13 : index
    %19 = memref.load %arg2[%c13] : memref<528xf32, #tpu.memory_space<smem>>
    %c14 = arith.constant 14 : index
    %20 = memref.load %arg2[%c14] : memref<528xf32, #tpu.memory_space<smem>>
    %c15 = arith.constant 15 : index
    %21 = memref.load %arg2[%c15] : memref<528xf32, #tpu.memory_space<smem>>
    %c16 = arith.constant 16 : index
    %22 = memref.load %arg2[%c16] : memref<528xf32, #tpu.memory_space<smem>>
    %c17 = arith.constant 17 : index
    %23 = memref.load %arg2[%c17] : memref<528xf32, #tpu.memory_space<smem>>
    %c18 = arith.constant 18 : index
    %24 = memref.load %arg2[%c18] : memref<528xf32, #tpu.memory_space<smem>>
    %c19 = arith.constant 19 : index
    %25 = memref.load %arg2[%c19] : memref<528xf32, #tpu.memory_space<smem>>
    %c20 = arith.constant 20 : index
    %26 = memref.load %arg2[%c20] : memref<528xf32, #tpu.memory_space<smem>>
    %c21 = arith.constant 21 : index
    %27 = memref.load %arg2[%c21] : memref<528xf32, #tpu.memory_space<smem>>
    %c22 = arith.constant 22 : index
    %28 = memref.load %arg2[%c22] : memref<528xf32, #tpu.memory_space<smem>>
    %c23 = arith.constant 23 : index
    %29 = memref.load %arg2[%c23] : memref<528xf32, #tpu.memory_space<smem>>
    %c0_17 = arith.constant 0 : index
    %30 = memref.load %arg3[%c0_17] : memref<20xf32, #tpu.memory_space<smem>>
    %c1_18 = arith.constant 1 : index
    %31 = memref.load %arg3[%c1_18] : memref<20xf32, #tpu.memory_space<smem>>
    %c2_19 = arith.constant 2 : index
    %32 = memref.load %arg3[%c2_19] : memref<20xf32, #tpu.memory_space<smem>>
    %c3_20 = arith.constant 3 : index
    %33 = memref.load %arg3[%c3_20] : memref<20xf32, #tpu.memory_space<smem>>
    %c0_21 = arith.constant 0 : index
    %c0_22 = arith.constant 0 : index
    %c0_23 = arith.constant 0 : index
    %c0_24 = arith.constant 0 : index
    %c0_25 = arith.constant 0 : index
    %34 = vector.load %arg1[%c0_21, %c0_22, %c0_23, %c0_24, %c0_25] : memref<1x1x16x10x128xf32, #tpu.memory_space<vmem>>, vector<1x1x1x8x128xf32>
    %35 = vector.shape_cast %34 : vector<1x1x1x8x128xf32> to vector<8x128xf32>
    %c0_26 = arith.constant 0 : index
    %c0_27 = arith.constant 0 : index
    %c0_28 = arith.constant 0 : index
    %c1_29 = arith.constant 1 : index
    %c0_30 = arith.constant 0 : index
    %36 = vector.load %arg1[%c0_26, %c0_27, %c0_28, %c1_29, %c0_30] : memref<1x1x16x10x128xf32, #tpu.memory_space<vmem>>, vector<1x1x1x8x128xf32>
    %37 = vector.shape_cast %36 : vector<1x1x1x8x128xf32> to vector<8x128xf32>
    %c0_31 = arith.constant 0 : index
    %c0_32 = arith.constant 0 : index
    %c0_33 = arith.constant 0 : index
    %c2_34 = arith.constant 2 : index
    %c0_35 = arith.constant 0 : index
    %38 = vector.load %arg1[%c0_31, %c0_32, %c0_33, %c2_34, %c0_35] : memref<1x1x16x10x128xf32, #tpu.memory_space<vmem>>, vector<1x1x1x8x128xf32>
    %39 = vector.shape_cast %38 : vector<1x1x1x8x128xf32> to vector<8x128xf32>
    %40 = vector.broadcast %6 : f32 to vector<8x128xf32>
    %41 = arith.mulf %40, %35 : vector<8x128xf32>
    %42 = vector.broadcast %7 : f32 to vector<8x128xf32>
    %43 = arith.mulf %42, %37 : vector<8x128xf32>
    %44 = arith.addf %41, %43 : vector<8x128xf32>
    %45 = vector.broadcast %8 : f32 to vector<8x128xf32>
    %46 = arith.mulf %45, %39 : vector<8x128xf32>
    %47 = arith.addf %44, %46 : vector<8x128xf32>
    %48 = vector.broadcast %12 : f32 to vector<8x128xf32>
    %49 = arith.mulf %48, %35 : vector<8x128xf32>
    %50 = vector.broadcast %13 : f32 to vector<8x128xf32>
    %51 = arith.mulf %50, %37 : vector<8x128xf32>
    %52 = arith.addf %49, %51 : vector<8x128xf32>
    %53 = vector.broadcast %14 : f32 to vector<8x128xf32>
    %54 = arith.mulf %53, %39 : vector<8x128xf32>
    %55 = arith.addf %52, %54 : vector<8x128xf32>
    %56 = vector.broadcast %18 : f32 to vector<8x128xf32>
    %57 = arith.mulf %56, %35 : vector<8x128xf32>
    %58 = vector.broadcast %19 : f32 to vector<8x128xf32>
    %59 = arith.mulf %58, %37 : vector<8x128xf32>
    %60 = arith.addf %57, %59 : vector<8x128xf32>
    %61 = vector.broadcast %20 : f32 to vector<8x128xf32>
    %62 = arith.mulf %61, %39 : vector<8x128xf32>
    %63 = arith.addf %60, %62 : vector<8x128xf32>
    %64 = vector.broadcast %24 : f32 to vector<8x128xf32>
    %65 = arith.mulf %64, %35 : vector<8x128xf32>
    %66 = vector.broadcast %25 : f32 to vector<8x128xf32>
    %67 = arith.mulf %66, %37 : vector<8x128xf32>
    %68 = arith.addf %65, %67 : vector<8x128xf32>
    %69 = vector.broadcast %26 : f32 to vector<8x128xf32>
    %70 = arith.mulf %69, %39 : vector<8x128xf32>
    %71 = arith.addf %68, %70 : vector<8x128xf32>
    %c0_36 = arith.constant 0 : index
    %c0_37 = arith.constant 0 : index
    %c1_38 = arith.constant 1 : index
    %c0_39 = arith.constant 0 : index
    %c0_40 = arith.constant 0 : index
    %72 = vector.load %arg1[%c0_36, %c0_37, %c1_38, %c0_39, %c0_40] : memref<1x1x16x10x128xf32, #tpu.memory_space<vmem>>, vector<1x1x1x8x128xf32>
    %73 = vector.shape_cast %72 : vector<1x1x1x8x128xf32> to vector<8x128xf32>
    %c0_41 = arith.constant 0 : index
    %c0_42 = arith.constant 0 : index
    %c1_43 = arith.constant 1 : index
    %c1_44 = arith.constant 1 : index
    %c0_45 = arith.constant 0 : index
    %74 = vector.load %arg1[%c0_41, %c0_42, %c1_43, %c1_44, %c0_45] : memref<1x1x16x10x128xf32, #tpu.memory_space<vmem>>, vector<1x1x1x8x128xf32>
    %75 = vector.shape_cast %74 : vector<1x1x1x8x128xf32> to vector<8x128xf32>
    %c0_46 = arith.constant 0 : index
    %c0_47 = arith.constant 0 : index
    %c1_48 = arith.constant 1 : index
    %c2_49 = arith.constant 2 : index
    %c0_50 = arith.constant 0 : index
    %76 = vector.load %arg1[%c0_46, %c0_47, %c1_48, %c2_49, %c0_50] : memref<1x1x16x10x128xf32, #tpu.memory_space<vmem>>, vector<1x1x1x8x128xf32>
    %77 = vector.shape_cast %76 : vector<1x1x1x8x128xf32> to vector<8x128xf32>
    %78 = vector.broadcast %9 : f32 to vector<8x128xf32>
    %79 = arith.mulf %78, %73 : vector<8x128xf32>
    %80 = arith.addf %47, %79 : vector<8x128xf32>
    %81 = vector.broadcast %10 : f32 to vector<8x128xf32>
    %82 = arith.mulf %81, %75 : vector<8x128xf32>
    %83 = arith.addf %80, %82 : vector<8x128xf32>
    %84 = vector.broadcast %11 : f32 to vector<8x128xf32>
    %85 = arith.mulf %84, %77 : vector<8x128xf32>
    %86 = arith.addf %83, %85 : vector<8x128xf32>
    %87 = vector.broadcast %15 : f32 to vector<8x128xf32>
    %88 = arith.mulf %87, %73 : vector<8x128xf32>
    %89 = arith.addf %55, %88 : vector<8x128xf32>
    %90 = vector.broadcast %16 : f32 to vector<8x128xf32>
    %91 = arith.mulf %90, %75 : vector<8x128xf32>
    %92 = arith.addf %89, %91 : vector<8x128xf32>
    %93 = vector.broadcast %17 : f32 to vector<8x128xf32>
    %94 = arith.mulf %93, %77 : vector<8x128xf32>
    %95 = arith.addf %92, %94 : vector<8x128xf32>
    %96 = vector.broadcast %21 : f32 to vector<8x128xf32>
    %97 = arith.mulf %96, %73 : vector<8x128xf32>
    %98 = arith.addf %63, %97 : vector<8x128xf32>
    %99 = vector.broadcast %22 : f32 to vector<8x128xf32>
    %100 = arith.mulf %99, %75 : vector<8x128xf32>
    %101 = arith.addf %98, %100 : vector<8x128xf32>
    %102 = vector.broadcast %23 : f32 to vector<8x128xf32>
    %103 = arith.mulf %102, %77 : vector<8x128xf32>
    %104 = arith.addf %101, %103 : vector<8x128xf32>
    %105 = vector.broadcast %27 : f32 to vector<8x128xf32>
    %106 = arith.mulf %105, %73 : vector<8x128xf32>
    %107 = arith.addf %71, %106 : vector<8x128xf32>
    %108 = vector.broadcast %28 : f32 to vector<8x128xf32>
    %109 = arith.mulf %108, %75 : vector<8x128xf32>
    %110 = arith.addf %107, %109 : vector<8x128xf32>
    %111 = vector.broadcast %29 : f32 to vector<8x128xf32>
    %112 = arith.mulf %111, %77 : vector<8x128xf32>
    %113 = arith.addf %110, %112 : vector<8x128xf32>
    %114 = vector.broadcast %30 : f32 to vector<8x128xf32>
    %115 = arith.addf %86, %114 : vector<8x128xf32>
    %cst_51 = arith.constant 0.000000e+00 : f32
    %116 = vector.broadcast %cst_51 : f32 to vector<8x128xf32>
    %117 = arith.maximumf %115, %116 : vector<8x128xf32>
    %c0_52 = arith.constant 0 : index
    %c0_53 = arith.constant 0 : index
    %c1_54 = arith.constant 1 : index
    %c0_55 = arith.constant 0 : index
    %118 = vector.load %arg5[%c0_52, %c0_53, %c1_54, %c0_55] : memref<4x4x10x128xf32, #tpu.memory_space<vmem>>, vector<1x1x8x128xf32>
    %119 = vector.shape_cast %118 : vector<1x1x8x128xf32> to vector<8x128xf32>
    %120 = vector.shape_cast %117 : vector<8x128xf32> to vector<1x1x8x128xf32>
    tpu.vector_store %arg5[%c0_52, %c0_53, %c1_54, %c0_55], %120 {strides = array<i32>} : memref<4x4x10x128xf32, #tpu.memory_space<vmem>>, vector<1x1x8x128xf32>,
    %121 = vector.broadcast %31 : f32 to vector<8x128xf32>
    %122 = arith.addf %95, %121 : vector<8x128xf32>
    %cst_56 = arith.constant 0.000000e+00 : f32
    %123 = vector.broadcast %cst_56 : f32 to vector<8x128xf32>
    %124 = arith.maximumf %122, %123 : vector<8x128xf32>
    %c1_57 = arith.constant 1 : index
    %c0_58 = arith.constant 0 : index
    %c1_59 = arith.constant 1 : index
    %c0_60 = arith.constant 0 : index
    %125 = vector.load %arg5[%c1_57, %c0_58, %c1_59, %c0_60] : memref<4x4x10x128xf32, #tpu.memory_space<vmem>>, vector<1x1x8x128xf32>
    %126 = vector.shape_cast %125 : vector<1x1x8x128xf32> to vector<8x128xf32>
    %127 = vector.shape_cast %124 : vector<8x128xf32> to vector<1x1x8x128xf32>
    tpu.vector_store %arg5[%c1_57, %c0_58, %c1_59, %c0_60], %127 {strides = array<i32>} : memref<4x4x10x128xf32, #tpu.memory_space<vmem>>, vector<1x1x8x128xf32>,
    %128 = vector.broadcast %32 : f32 to vector<8x128xf32>
    %129 = arith.addf %104, %128 : vector<8x128xf32>
    %cst_61 = arith.constant 0.000000e+00 : f32
    %130 = vector.broadcast %cst_61 : f32 to vector<8x128xf32>
    %131 = arith.maximumf %129, %130 : vector<8x128xf32>
    %c2_62 = arith.constant 2 : index
    %c0_63 = arith.constant 0 : index
    %c1_64 = arith.constant 1 : index
    %c0_65 = arith.constant 0 : index
    %132 = vector.load %arg5[%c2_62, %c0_63, %c1_64, %c0_65] : memref<4x4x10x128xf32, #tpu.memory_space<vmem>>, vector<1x1x8x128xf32>
    %133 = vector.shape_cast %132 : vector<1x1x8x128xf32> to vector<8x128xf32>
    %134 = vector.shape_cast %131 : vector<8x128xf32> to vector<1x1x8x128xf32>
    tpu.vector_store %arg5[%c2_62, %c0_63, %c1_64, %c0_65], %134 {strides = array<i32>} : memref<4x4x10x128xf32, #tpu.memory_space<vmem>>, vector<1x1x8x128xf32>,
    %135 = vector.broadcast %33 : f32 to vector<8x128xf32>
    %136 = arith.addf %113, %135 : vector<8x128xf32>
    %cst_66 = arith.constant 0.000000e+00 : f32
    %137 = vector.broadcast %cst_66 : f32 to vector<8x128xf32>
    %138 = arith.maximumf %136, %137 : vector<8x128xf32>
    %c3_67 = arith.constant 3 : index
    %c0_68 = arith.constant 0 : index
    %c1_69 = arith.constant 1 : index
    %c0_70 = arith.constant 0 : index
    %139 = vector.load %arg5[%c3_67, %c0_68, %c1_69, %c0_70] : memref<4x4x10x128xf32, #tpu.memory_space<vmem>>, vector<1x1x8x128xf32>
    %140 = vector.shape_cast %139 : vector<1x1x8x128xf32> to vector<8x128xf32>
    %141 = vector.shape_cast %138 : vector<8x128xf32> to vector<1x1x8x128xf32>
    tpu.vector_store %arg5[%c3_67, %c0_68, %c1_69, %c0_70], %141 {strides = array<i32>} : memref<4x4x10x128xf32, #tpu.memory_space<vmem>>, vector<1x1x8x128xf32>,
    %c0_71 = arith.constant 0 : index
    %c0_72 = arith.constant 0 : index
    %c2_73 = arith.constant 2 : index
    %c0_74 = arith.constant 0 : index
    %c0_75 = arith.constant 0 : index
    %142 = vector.load %arg1[%c0_71, %c0_72, %c2_73, %c0_74, %c0_75] : memref<1x1x16x10x128xf32, #tpu.memory_space<vmem>>, vector<1x1x1x8x128xf32>
    %143 = vector.shape_cast %142 : vector<1x1x1x8x128xf32> to vector<8x128xf32>
    %c0_76 = arith.constant 0 : index
    %c0_77 = arith.constant 0 : index
    %c2_78 = arith.constant 2 : index
    %c1_79 = arith.constant 1 : index
    %c0_80 = arith.constant 0 : index
    %144 = vector.load %arg1[%c0_76, %c0_77, %c2_78, %c1_79, %c0_80] : memref<1x1x16x10x128xf32, #tpu.memory_space<vmem>>, vector<1x1x1x8x128xf32>
    %145 = vector.shape_cast %144 : vector<1x1x1x8x128xf32> to vector<8x128xf32>
    %c0_81 = arith.constant 0 : index
    %c0_82 = arith.constant 0 : index
    %c2_83 = arith.constant 2 : index
    %c2_84 = arith.constant 2 : index
    %c0_85 = arith.constant 0 : index
    %146 = vector.load %arg1[%c0_81, %c0_82, %c2_83, %c2_84, %c0_85] : memref<1x1x16x10x128xf32, #tpu.memory_space<vmem>>, vector<1x1x1x8x128xf32>
    %147 = vector.shape_cast %146 : vector<1x1x1x8x128xf32> to vector<8x128xf32>
    %148 = vector.broadcast %6 : f32 to vector<8x128xf32>
    %149 = arith.mulf %148, %143 : vector<8x128xf32>
    %150 = vector.broadcast %7 : f32 to vector<8x128xf32>
    %151 = arith.mulf %150, %145 : vector<8x128xf32>
    %152 = arith.addf %149, %151 : vector<8x128xf32>
    %153 = vector.broadcast %8 : f32 to vector<8x128xf32>
    %154 = arith.mulf %153, %147 : vector<8x128xf32>
    %155 = arith.addf %152, %154 : vector<8x128xf32>
    %156 = vector.broadcast %12 : f32 to vector<8x128xf32>
    %157 = arith.mulf %156, %143 : vector<8x128xf32>
    %158 = vector.broadcast %13 : f32 to vector<8x128xf32>
    %159 = arith.mulf %158, %145 : vector<8x128xf32>
    %160 = arith.addf %157, %159 : vector<8x128xf32>
    %161 = vector.broadcast %14 : f32 to vector<8x128xf32>
    %162 = arith.mulf %161, %147 : vector<8x128xf32>
    %163 = arith.addf %160, %162 : vector<8x128xf32>
    %164 = vector.broadcast %18 : f32 to vector<8x128xf32>
    %165 = arith.mulf %164, %143 : vector<8x128xf32>
    %166 = vector.broadcast %19 : f32 to vector<8x128xf32>
    %167 = arith.mulf %166, %145 : vector<8x128xf32>
    %168 = arith.addf %165, %167 : vector<8x128xf32>
    %169 = vector.broadcast %20 : f32 to vector<8x128xf32>
    %170 = arith.mulf %169, %147 : vector<8x128xf32>
    %171 = arith.addf %168, %170 : vector<8x128xf32>
    %172 = vector.broadcast %24 : f32 to vector<8x128xf32>
    %173 = arith.mulf %172, %143 : vector<8x128xf32>
    %174 = vector.broadcast %25 : f32 to vector<8x128xf32>
    %175 = arith.mulf %174, %145 : vector<8x128xf32>
    %176 = arith.addf %173, %175 : vector<8x128xf32>
    %177 = vector.broadcast %26 : f32 to vector<8x128xf32>
    %178 = arith.mulf %177, %147 : vector<8x128xf32>
    %179 = arith.addf %176, %178 : vector<8x128xf32>
    %c0_86 = arith.constant 0 : index
    %c0_87 = arith.constant 0 : index
    %c3_88 = arith.constant 3 : index
    %c0_89 = arith.constant 0 : index
    %c0_90 = arith.constant 0 : index
    %180 = vector.load %arg1[%c0_86, %c0_87, %c3_88, %c0_89, %c0_90] : memref<1x1x16x10x128xf32, #tpu.memory_space<vmem>>, vector<1x1x1x8x128xf32>
    %181 = vector.shape_cast %180 : vector<1x1x1x8x128xf32> to vector<8x128xf32>
    %c0_91 = arith.constant 0 : index
    %c0_92 = arith.constant 0 : index
    %c3_93 = arith.constant 3 : index
    %c1_94 = arith.constant 1 : index
    %c0_95 = arith.constant 0 : index
    %182 = vector.load %arg1[%c0_91, %c0_92, %c3_93, %c1_94, %c0_95] : memref<1x1x16x10x128xf32, #tpu.memory_space<vmem>>, vector<1x1x1x8x128xf32>
    %183 = vector.shape_cast %182 : vector<1x1x1x8x128xf32> to vector<8x128xf32>
    %c0_96 = arith.constant 0 : index
    %c0_97 = arith.constant 0 : index
    %c3_98 = arith.constant 3 : index
    %c2_99 = arith.constant 2 : index
    %c0_100 = arith.constant 0 : index
    %184 = vector.load %arg1[%c0_96, %c0_97, %c3_98, %c2_99, %c0_100] : memref<1x1x16x10x128xf32, #tpu.memory_space<vmem>>, vector<1x1x1x8x128xf32>
    %185 = vector.shape_cast %184 : vector<1x1x1x8x128xf32> to vector<8x128xf32>
    %186 = vector.broadcast %9 : f32 to vector<8x128xf32>
    %187 = arith.mulf %186, %181 : vector<8x128xf32>
    %188 = arith.addf %155, %187 : vector<8x128xf32>
    %189 = vector.broadcast %10 : f32 to vector<8x128xf32>
    %190 = arith.mulf %189, %183 : vector<8x128xf32>
    %191 = arith.addf %188, %190 : vector<8x128xf32>
    %192 = vector.broadcast %11 : f32 to vector<8x128xf32>
    %193 = arith.mulf %192, %185 : vector<8x128xf32>
    %194 = arith.addf %191, %193 : vector<8x128xf32>
    %195 = vector.broadcast %15 : f32 to vector<8x128xf32>
    %196 = arith.mulf %195, %181 : vector<8x128xf32>
    %197 = arith.addf %163, %196 : vector<8x128xf32>
    %198 = vector.broadcast %16 : f32 to vector<8x128xf32>
    %199 = arith.mulf %198, %183 : vector<8x128xf32>
    %200 = arith.addf %197, %199 : vector<8x128xf32>
    %201 = vector.broadcast %17 : f32 to vector<8x128xf32>
    %202 = arith.mulf %201, %185 : vector<8x128xf32>
    %203 = arith.addf %200, %202 : vector<8x128xf32>
    %204 = vector.broadcast %21 : f32 to vector<8x128xf32>
    %205 = arith.mulf %204, %181 : vector<8x128xf32>
    %206 = arith.addf %171, %205 : vector<8x128xf32>
    %207 = vector.broadcast %22 : f32 to vector<8x128xf32>
    %208 = arith.mulf %207, %183 : vector<8x128xf32>
    %209 = arith.addf %206, %208 : vector<8x128xf32>
    %210 = vector.broadcast %23 : f32 to vector<8x128xf32>
    %211 = arith.mulf %210, %185 : vector<8x128xf32>
    %212 = arith.addf %209, %211 : vector<8x128xf32>
    %213 = vector.broadcast %27 : f32 to vector<8x128xf32>
    %214 = arith.mulf %213, %181 : vector<8x128xf32>
    %215 = arith.addf %179, %214 : vector<8x128xf32>
    %216 = vector.broadcast %28 : f32 to vector<8x128xf32>
    %217 = arith.mulf %216, %183 : vector<8x128xf32>
    %218 = arith.addf %215, %217 : vector<8x128xf32>
    %219 = vector.broadcast %29 : f32 to vector<8x128xf32>
    %220 = arith.mulf %219, %185 : vector<8x128xf32>
    %221 = arith.addf %218, %220 : vector<8x128xf32>
    %222 = vector.broadcast %30 : f32 to vector<8x128xf32>
    %223 = arith.addf %194, %222 : vector<8x128xf32>
    %cst_101 = arith.constant 0.000000e+00 : f32
    %224 = vector.broadcast %cst_101 : f32 to vector<8x128xf32>
    %225 = arith.maximumf %223, %224 : vector<8x128xf32>
    %c0_102 = arith.constant 0 : index
    %c1_103 = arith.constant 1 : index
    %c1_104 = arith.constant 1 : index
    %c0_105 = arith.constant 0 : index
    %226 = vector.load %arg5[%c0_102, %c1_103, %c1_104, %c0_105] : memref<4x4x10x128xf32, #tpu.memory_space<vmem>>, vector<1x1x8x128xf32>
    %227 = vector.shape_cast %226 : vector<1x1x8x128xf32> to vector<8x128xf32>
    %228 = vector.shape_cast %225 : vector<8x128xf32> to vector<1x1x8x128xf32>
    tpu.vector_store %arg5[%c0_102, %c1_103, %c1_104, %c0_105], %228 {strides = array<i32>} : memref<4x4x10x128xf32, #tpu.memory_space<vmem>>, vector<1x1x8x128xf32>,
    %229 = vector.broadcast %31 : f32 to vector<8x128xf32>
    %230 = arith.addf %203, %229 : vector<8x128xf32>
    %cst_106 = arith.constant 0.000000e+00 : f32
    %231 = vector.broadcast %cst_106 : f32 to vector<8x128xf32>
    %232 = arith.maximumf %230, %231 : vector<8x128xf32>
    %c1_107 = arith.constant 1 : index
    %c1_108 = arith.constant 1 : index
    %c1_109 = arith.constant 1 : index
    %c0_110 = arith.constant 0 : index
    %233 = vector.load %arg5[%c1_107, %c1_108, %c1_109, %c0_110] : memref<4x4x10x128xf32, #tpu.memory_space<vmem>>, vector<1x1x8x128xf32>
    %234 = vector.shape_cast %233 : vector<1x1x8x128xf32> to vector<8x128xf32>
    %235 = vector.shape_cast %232 : vector<8x128xf32> to vector<1x1x8x128xf32>
    tpu.vector_store %arg5[%c1_107, %c1_108, %c1_109, %c0_110], %235 {strides = array<i32>} : memref<4x4x10x128xf32, #tpu.memory_space<vmem>>, vector<1x1x8x128xf32>,
    %236 = vector.broadcast %32 : f32 to vector<8x128xf32>
    %237 = arith.addf %212, %236 : vector<8x128xf32>
    %cst_111 = arith.constant 0.000000e+00 : f32
    %238 = vector.broadcast %cst_111 : f32 to vector<8x128xf32>
    %239 = arith.maximumf %237, %238 : vector<8x128xf32>
    %c2_112 = arith.constant 2 : index
    %c1_113 = arith.constant 1 : index
    %c1_114 = arith.constant 1 : index
    %c0_115 = arith.constant 0 : index
    %240 = vector.load %arg5[%c2_112, %c1_113, %c1_114, %c0_115] : memref<4x4x10x128xf32, #tpu.memory_space<vmem>>, vector<1x1x8x128xf32>
    %241 = vector.shape_cast %240 : vector<1x1x8x128xf32> to vector<8x128xf32>
    %242 = vector.shape_cast %239 : vector<8x128xf32> to vector<1x1x8x128xf32>
    tpu.vector_store %arg5[%c2_112, %c1_113, %c1_114, %c0_115], %242 {strides = array<i32>} : memref<4x4x10x128xf32, #tpu.memory_space<vmem>>, vector<1x1x8x128xf32>,
    %243 = vector.broadcast %33 : f32 to vector<8x128xf32>
    %244 = arith.addf %221, %243 : vector<8x128xf32>
    %cst_116 = arith.constant 0.000000e+00 : f32
    %245 = vector.broadcast %cst_116 : f32 to vector<8x128xf32>
    %246 = arith.maximumf %244, %245 : vector<8x128xf32>
    %c3_117 = arith.constant 3 : index
    %c1_118 = arith.constant 1 : index
    %c1_119 = arith.constant 1 : index
    %c0_120 = arith.constant 0 : index
    %247 = vector.load %arg5[%c3_117, %c1_118, %c1_119, %c0_120] : memref<4x4x10x128xf32, #tpu.memory_space<vmem>>, vector<1x1x8x128xf32>
    %248 = vector.shape_cast %247 : vector<1x1x8x128xf32> to vector<8x128xf32>
    %249 = vector.shape_cast %246 : vector<8x128xf32> to vector<1x1x8x128xf32>
    tpu.vector_store %arg5[%c3_117, %c1_118, %c1_119, %c0_120], %249 {strides = array<i32>} : memref<4x4x10x128xf32, #tpu.memory_space<vmem>>, vector<1x1x8x128xf32>,
    %c0_121 = arith.constant 0 : index
    %c0_122 = arith.constant 0 : index
    %c4_123 = arith.constant 4 : index
    %c0_124 = arith.constant 0 : index
    %c0_125 = arith.constant 0 : index
    %250 = vector.load %arg1[%c0_121, %c0_122, %c4_123, %c0_124, %c0_125] : memref<1x1x16x10x128xf32, #tpu.memory_space<vmem>>, vector<1x1x1x8x128xf32>
    %251 = vector.shape_cast %250 : vector<1x1x1x8x128xf32> to vector<8x128xf32>
    %c0_126 = arith.constant 0 : index
    %c0_127 = arith.constant 0 : index
    %c4_128 = arith.constant 4 : index
    %c1_129 = arith.constant 1 : index
    %c0_130 = arith.constant 0 : index
    %252 = vector.load %arg1[%c0_126, %c0_127, %c4_128, %c1_129, %c0_130] : memref<1x1x16x10x128xf32, #tpu.memory_space<vmem>>, vector<1x1x1x8x128xf32>
    %253 = vector.shape_cast %252 : vector<1x1x1x8x128xf32> to vector<8x128xf32>
    %c0_131 = arith.constant 0 : index
    %c0_132 = arith.constant 0 : index
    %c4_133 = arith.constant 4 : index
    %c2_134 = arith.constant 2 : index
    %c0_135 = arith.constant 0 : index
    %254 = vector.load %arg1[%c0_131, %c0_132, %c4_133, %c2_134, %c0_135] : memref<1x1x16x10x128xf32, #tpu.memory_space<vmem>>, vector<1x1x1x8x128xf32>
    %255 = vector.shape_cast %254 : vector<1x1x1x8x128xf32> to vector<8x128xf32>
    %256 = vector.broadcast %6 : f32 to vector<8x128xf32>
    %257 = arith.mulf %256, %251 : vector<8x128xf32>
    %258 = vector.broadcast %7 : f32 to vector<8x128xf32>
    %259 = arith.mulf %258, %253 : vector<8x128xf32>
    %260 = arith.addf %257, %259 : vector<8x128xf32>
    %261 = vector.broadcast %8 : f32 to vector<8x128xf32>
    %262 = arith.mulf %261, %255 : vector<8x128xf32>
    %263 = arith.addf %260, %262 : vector<8x128xf32>
    %264 = vector.broadcast %12 : f32 to vector<8x128xf32>
    %265 = arith.mulf %264, %251 : vector<8x128xf32>
    %266 = vector.broadcast %13 : f32 to vector<8x128xf32>
    %267 = arith.mulf %266, %253 : vector<8x128xf32>
    %268 = arith.addf %265, %267 : vector<8x128xf32>
    %269 = vector.broadcast %14 : f32 to vector<8x128xf32>
    %270 = arith.mulf %269, %255 : vector<8x128xf32>
    %271 = arith.addf %268, %270 : vector<8x128xf32>
    %272 = vector.broadcast %18 : f32 to vector<8x128xf32>
    %273 = arith.mulf %272, %251 : vector<8x128xf32>
    %274 = vector.broadcast %19 : f32 to vector<8x128xf32>
    %275 = arith.mulf %274, %253 : vector<8x128xf32>
    %276 = arith.addf %273, %275 : vector<8x128xf32>
    %277 = vector.broadcast %20 : f32 to vector<8x128xf32>
    %278 = arith.mulf %277, %255 : vector<8x128xf32>
    %279 = arith.addf %276, %278 : vector<8x128xf32>
    %280 = vector.broadcast %24 : f32 to vector<8x128xf32>
    %281 = arith.mulf %280, %251 : vector<8x128xf32>
    %282 = vector.broadcast %25 : f32 to vector<8x128xf32>
    %283 = arith.mulf %282, %253 : vector<8x128xf32>
    %284 = arith.addf %281, %283 : vector<8x128xf32>
    %285 = vector.broadcast %26 : f32 to vector<8x128xf32>
    %286 = arith.mulf %285, %255 : vector<8x128xf32>
    %287 = arith.addf %284, %286 : vector<8x128xf32>
    %c0_136 = arith.constant 0 : index
    %c0_137 = arith.constant 0 : index
    %c5_138 = arith.constant 5 : index
    %c0_139 = arith.constant 0 : index
    %c0_140 = arith.constant 0 : index
    %288 = vector.load %arg1[%c0_136, %c0_137, %c5_138, %c0_139, %c0_140] : memref<1x1x16x10x128xf32, #tpu.memory_space<vmem>>, vector<1x1x1x8x128xf32>
    %289 = vector.shape_cast %288 : vector<1x1x1x8x128xf32> to vector<8x128xf32>
    %c0_141 = arith.constant 0 : index
    %c0_142 = arith.constant 0 : index
    %c5_143 = arith.constant 5 : index
    %c1_144 = arith.constant 1 : index
    %c0_145 = arith.constant 0 : index
    %290 = vector.load %arg1[%c0_141, %c0_142, %c5_143, %c1_144, %c0_145] : memref<1x1x16x10x128xf32, #tpu.memory_space<vmem>>, vector<1x1x1x8x128xf32>
    %291 = vector.shape_cast %290 : vector<1x1x1x8x128xf32> to vector<8x128xf32>
    %c0_146 = arith.constant 0 : index
    %c0_147 = arith.constant 0 : index
    %c5_148 = arith.constant 5 : index
    %c2_149 = arith.constant 2 : index
    %c0_150 = arith.constant 0 : index
    %292 = vector.load %arg1[%c0_146, %c0_147, %c5_148, %c2_149, %c0_150] : memref<1x1x16x10x128xf32, #tpu.memory_space<vmem>>, vector<1x1x1x8x128xf32>
    %293 = vector.shape_cast %292 : vector<1x1x1x8x128xf32> to vector<8x128xf32>
    %294 = vector.broadcast %9 : f32 to vector<8x128xf32>
    %295 = arith.mulf %294, %289 : vector<8x128xf32>
    %296 = arith.addf %263, %295 : vector<8x128xf32>
    %297 = vector.broadcast %10 : f32 to vector<8x128xf32>
    %298 = arith.mulf %297, %291 : vector<8x128xf32>
    %299 = arith.addf %296, %298 : vector<8x128xf32>
    %300 = vector.broadcast %11 : f32 to vector<8x128xf32>
    %301 = arith.mulf %300, %293 : vector<8x128xf32>
    %302 = arith.addf %299, %301 : vector<8x128xf32>
    %303 = vector.broadcast %15 : f32 to vector<8x128xf32>
    %304 = arith.mulf %303, %289 : vector<8x128xf32>
    %305 = arith.addf %271, %304 : vector<8x128xf32>
    %306 = vector.broadcast %16 : f32 to vector<8x128xf32>
    %307 = arith.mulf %306, %291 : vector<8x128xf32>
    %308 = arith.addf %305, %307 : vector<8x128xf32>
    %309 = vector.broadcast %17 : f32 to vector<8x128xf32>
    %310 = arith.mulf %309, %293 : vector<8x128xf32>
    %311 = arith.addf %308, %310 : vector<8x128xf32>
    %312 = vector.broadcast %21 : f32 to vector<8x128xf32>
    %313 = arith.mulf %312, %289 : vector<8x128xf32>
    %314 = arith.addf %279, %313 : vector<8x128xf32>
    %315 = vector.broadcast %22 : f32 to vector<8x128xf32>
    %316 = arith.mulf %315, %291 : vector<8x128xf32>
    %317 = arith.addf %314, %316 : vector<8x128xf32>
    %318 = vector.broadcast %23 : f32 to vector<8x128xf32>
    %319 = arith.mulf %318, %293 : vector<8x128xf32>
    %320 = arith.addf %317, %319 : vector<8x128xf32>
    %321 = vector.broadcast %27 : f32 to vector<8x128xf32>
    %322 = arith.mulf %321, %289 : vector<8x128xf32>
    %323 = arith.addf %287, %322 : vector<8x128xf32>
    %324 = vector.broadcast %28 : f32 to vector<8x128xf32>
    %325 = arith.mulf %324, %291 : vector<8x128xf32>
    %326 = arith.addf %323, %325 : vector<8x128xf32>
    %327 = vector.broadcast %29 : f32 to vector<8x128xf32>
    %328 = arith.mulf %327, %293 : vector<8x128xf32>
    %329 = arith.addf %326, %328 : vector<8x128xf32>
    %330 = vector.broadcast %30 : f32 to vector<8x128xf32>
    %331 = arith.addf %302, %330 : vector<8x128xf32>
    %cst_151 = arith.constant 0.000000e+00 : f32
    %332 = vector.broadcast %cst_151 : f32 to vector<8x128xf32>
    %333 = arith.maximumf %331, %332 : vector<8x128xf32>
    %c0_152 = arith.constant 0 : index
    %c2_153 = arith.constant 2 : index
    %c1_154 = arith.constant 1 : index
    %c0_155 = arith.constant 0 : index
    %334 = vector.load %arg5[%c0_152, %c2_153, %c1_154, %c0_155] : memref<4x4x10x128xf32, #tpu.memory_space<vmem>>, vector<1x1x8x128xf32>
    %335 = vector.shape_cast %334 : vector<1x1x8x128xf32> to vector<8x128xf32>
    %336 = vector.shape_cast %333 : vector<8x128xf32> to vector<1x1x8x128xf32>
    tpu.vector_store %arg5[%c0_152, %c2_153, %c1_154, %c0_155], %336 {strides = array<i32>} : memref<4x4x10x128xf32, #tpu.memory_space<vmem>>, vector<1x1x8x128xf32>,
    %337 = vector.broadcast %31 : f32 to vector<8x128xf32>
    %338 = arith.addf %311, %337 : vector<8x128xf32>
    %cst_156 = arith.constant 0.000000e+00 : f32
    %339 = vector.broadcast %cst_156 : f32 to vector<8x128xf32>
    %340 = arith.maximumf %338, %339 : vector<8x128xf32>
    %c1_157 = arith.constant 1 : index
    %c2_158 = arith.constant 2 : index
    %c1_159 = arith.constant 1 : index
    %c0_160 = arith.constant 0 : index
    %341 = vector.load %arg5[%c1_157, %c2_158, %c1_159, %c0_160] : memref<4x4x10x128xf32, #tpu.memory_space<vmem>>, vector<1x1x8x128xf32>
    %342 = vector.shape_cast %341 : vector<1x1x8x128xf32> to vector<8x128xf32>
    %343 = vector.shape_cast %340 : vector<8x128xf32> to vector<1x1x8x128xf32>
    tpu.vector_store %arg5[%c1_157, %c2_158, %c1_159, %c0_160], %343 {strides = array<i32>} : memref<4x4x10x128xf32, #tpu.memory_space<vmem>>, vector<1x1x8x128xf32>,
    %344 = vector.broadcast %32 : f32 to vector<8x128xf32>
    %345 = arith.addf %320, %344 : vector<8x128xf32>
    %cst_161 = arith.constant 0.000000e+00 : f32
    %346 = vector.broadcast %cst_161 : f32 to vector<8x128xf32>
    %347 = arith.maximumf %345, %346 : vector<8x128xf32>
    %c2_162 = arith.constant 2 : index
    %c2_163 = arith.constant 2 : index
    %c1_164 = arith.constant 1 : index
    %c0_165 = arith.constant 0 : index
    %348 = vector.load %arg5[%c2_162, %c2_163, %c1_164, %c0_165] : memref<4x4x10x128xf32, #tpu.memory_space<vmem>>, vector<1x1x8x128xf32>
    %349 = vector.shape_cast %348 : vector<1x1x8x128xf32> to vector<8x128xf32>
    %350 = vector.shape_cast %347 : vector<8x128xf32> to vector<1x1x8x128xf32>
    tpu.vector_store %arg5[%c2_162, %c2_163, %c1_164, %c0_165], %350 {strides = array<i32>} : memref<4x4x10x128xf32, #tpu.memory_space<vmem>>, vector<1x1x8x128xf32>,
    %351 = vector.broadcast %33 : f32 to vector<8x128xf32>
    %352 = arith.addf %329, %351 : vector<8x128xf32>
    %cst_166 = arith.constant 0.000000e+00 : f32
    %353 = vector.broadcast %cst_166 : f32 to vector<8x128xf32>
    %354 = arith.maximumf %352, %353 : vector<8x128xf32>
    %c3_167 = arith.constant 3 : index
    %c2_168 = arith.constant 2 : index
    %c1_169 = arith.constant 1 : index
    %c0_170 = arith.constant 0 : index
    %355 = vector.load %arg5[%c3_167, %c2_168, %c1_169, %c0_170] : memref<4x4x10x128xf32, #tpu.memory_space<vmem>>, vector<1x1x8x128xf32>
    %356 = vector.shape_cast %355 : vector<1x1x8x128xf32> to vector<8x128xf32>
    %357 = vector.shape_cast %354 : vector<8x128xf32> to vector<1x1x8x128xf32>
    tpu.vector_store %arg5[%c3_167, %c2_168, %c1_169, %c0_170], %357 {strides = array<i32>} : memref<4x4x10x128xf32, #tpu.memory_space<vmem>>, vector<1x1x8x128xf32>,
    %c0_171 = arith.constant 0 : index
    %c0_172 = arith.constant 0 : index
    %c6_173 = arith.constant 6 : index
    %c0_174 = arith.constant 0 : index
    %c0_175 = arith.constant 0 : index
    %358 = vector.load %arg1[%c0_171, %c0_172, %c6_173, %c0_174, %c0_175] : memref<1x1x16x10x128xf32, #tpu.memory_space<vmem>>, vector<1x1x1x8x128xf32>
    %359 = vector.shape_cast %358 : vector<1x1x1x8x128xf32> to vector<8x128xf32>
    %c0_176 = arith.constant 0 : index
    %c0_177 = arith.constant 0 : index
    %c6_178 = arith.constant 6 : index
    %c1_179 = arith.constant 1 : index
    %c0_180 = arith.constant 0 : index
    %360 = vector.load %arg1[%c0_176, %c0_177, %c6_178, %c1_179, %c0_180] : memref<1x1x16x10x128xf32, #tpu.memory_space<vmem>>, vector<1x1x1x8x128xf32>
    %361 = vector.shape_cast %360 : vector<1x1x1x8x128xf32> to vector<8x128xf32>
    %c0_181 = arith.constant 0 : index
    %c0_182 = arith.constant 0 : index
    %c6_183 = arith.constant 6 : index
    %c2_184 = arith.constant 2 : index
    %c0_185 = arith.constant 0 : index
    %362 = vector.load %arg1[%c0_181, %c0_182, %c6_183, %c2_184, %c0_185] : memref<1x1x16x10x128xf32, #tpu.memory_space<vmem>>, vector<1x1x1x8x128xf32>
    %363 = vector.shape_cast %362 : vector<1x1x1x8x128xf32> to vector<8x128xf32>
    %364 = vector.broadcast %6 : f32 to vector<8x128xf32>
    %365 = arith.mulf %364, %359 : vector<8x128xf32>
    %366 = vector.broadcast %7 : f32 to vector<8x128xf32>
    %367 = arith.mulf %366, %361 : vector<8x128xf32>
    %368 = arith.addf %365, %367 : vector<8x128xf32>
    %369 = vector.broadcast %8 : f32 to vector<8x128xf32>
    %370 = arith.mulf %369, %363 : vector<8x128xf32>
    %371 = arith.addf %368, %370 : vector<8x128xf32>
    %372 = vector.broadcast %12 : f32 to vector<8x128xf32>
    %373 = arith.mulf %372, %359 : vector<8x128xf32>
    %374 = vector.broadcast %13 : f32 to vector<8x128xf32>
    %375 = arith.mulf %374, %361 : vector<8x128xf32>
    %376 = arith.addf %373, %375 : vector<8x128xf32>
    %377 = vector.broadcast %14 : f32 to vector<8x128xf32>
    %378 = arith.mulf %377, %363 : vector<8x128xf32>
    %379 = arith.addf %376, %378 : vector<8x128xf32>
    %380 = vector.broadcast %18 : f32 to vector<8x128xf32>
    %381 = arith.mulf %380, %359 : vector<8x128xf32>
    %382 = vector.broadcast %19 : f32 to vector<8x128xf32>
    %383 = arith.mulf %382, %361 : vector<8x128xf32>
    %384 = arith.addf %381, %383 : vector<8x128xf32>
    %385 = vector.broadcast %20 : f32 to vector<8x128xf32>
    %386 = arith.mulf %385, %363 : vector<8x128xf32>
    %387 = arith.addf %384, %386 : vector<8x128xf32>
    %388 = vector.broadcast %24 : f32 to vector<8x128xf32>
    %389 = arith.mulf %388, %359 : vector<8x128xf32>
    %390 = vector.broadcast %25 : f32 to vector<8x128xf32>
    %391 = arith.mulf %390, %361 : vector<8x128xf32>
    %392 = arith.addf %389, %391 : vector<8x128xf32>
    %393 = vector.broadcast %26 : f32 to vector<8x128xf32>
    %394 = arith.mulf %393, %363 : vector<8x128xf32>
    %395 = arith.addf %392, %394 : vector<8x128xf32>
    %c0_186 = arith.constant 0 : index
    %c0_187 = arith.constant 0 : index
    %c7_188 = arith.constant 7 : index
    %c0_189 = arith.constant 0 : index
    %c0_190 = arith.constant 0 : index
    %396 = vector.load %arg1[%c0_186, %c0_187, %c7_188, %c0_189, %c0_190] : memref<1x1x16x10x128xf32, #tpu.memory_space<vmem>>, vector<1x1x1x8x128xf32>
    %397 = vector.shape_cast %396 : vector<1x1x1x8x128xf32> to vector<8x128xf32>
    %c0_191 = arith.constant 0 : index
    %c0_192 = arith.constant 0 : index
    %c7_193 = arith.constant 7 : index
    %c1_194 = arith.constant 1 : index
    %c0_195 = arith.constant 0 : index
    %398 = vector.load %arg1[%c0_191, %c0_192, %c7_193, %c1_194, %c0_195] : memref<1x1x16x10x128xf32, #tpu.memory_space<vmem>>, vector<1x1x1x8x128xf32>
    %399 = vector.shape_cast %398 : vector<1x1x1x8x128xf32> to vector<8x128xf32>
    %c0_196 = arith.constant 0 : index
    %c0_197 = arith.constant 0 : index
    %c7_198 = arith.constant 7 : index
    %c2_199 = arith.constant 2 : index
    %c0_200 = arith.constant 0 : index
    %400 = vector.load %arg1[%c0_196, %c0_197, %c7_198, %c2_199, %c0_200] : memref<1x1x16x10x128xf32, #tpu.memory_space<vmem>>, vector<1x1x1x8x128xf32>
    %401 = vector.shape_cast %400 : vector<1x1x1x8x128xf32> to vector<8x128xf32>
    %402 = vector.broadcast %9 : f32 to vector<8x128xf32>
    %403 = arith.mulf %402, %397 : vector<8x128xf32>
    %404 = arith.addf %371, %403 : vector<8x128xf32>
    %405 = vector.broadcast %10 : f32 to vector<8x128xf32>
    %406 = arith.mulf %405, %399 : vector<8x128xf32>
    %407 = arith.addf %404, %406 : vector<8x128xf32>
    %408 = vector.broadcast %11 : f32 to vector<8x128xf32>
    %409 = arith.mulf %408, %401 : vector<8x128xf32>
    %410 = arith.addf %407, %409 : vector<8x128xf32>
    %411 = vector.broadcast %15 : f32 to vector<8x128xf32>
    %412 = arith.mulf %411, %397 : vector<8x128xf32>
    %413 = arith.addf %379, %412 : vector<8x128xf32>
    %414 = vector.broadcast %16 : f32 to vector<8x128xf32>
    %415 = arith.mulf %414, %399 : vector<8x128xf32>
    %416 = arith.addf %413, %415 : vector<8x128xf32>
    %417 = vector.broadcast %17 : f32 to vector<8x128xf32>
    %418 = arith.mulf %417, %401 : vector<8x128xf32>
    %419 = arith.addf %416, %418 : vector<8x128xf32>
    %420 = vector.broadcast %21 : f32 to vector<8x128xf32>
    %421 = arith.mulf %420, %397 : vector<8x128xf32>
    %422 = arith.addf %387, %421 : vector<8x128xf32>
    %423 = vector.broadcast %22 : f32 to vector<8x128xf32>
    %424 = arith.mulf %423, %399 : vector<8x128xf32>
    %425 = arith.addf %422, %424 : vector<8x128xf32>
    %426 = vector.broadcast %23 : f32 to vector<8x128xf32>
    %427 = arith.mulf %426, %401 : vector<8x128xf32>
    %428 = arith.addf %425, %427 : vector<8x128xf32>
    %429 = vector.broadcast %27 : f32 to vector<8x128xf32>
    %430 = arith.mulf %429, %397 : vector<8x128xf32>
    %431 = arith.addf %395, %430 : vector<8x128xf32>
    %432 = vector.broadcast %28 : f32 to vector<8x128xf32>
    %433 = arith.mulf %432, %399 : vector<8x128xf32>
    %434 = arith.addf %431, %433 : vector<8x128xf32>
    %435 = vector.broadcast %29 : f32 to vector<8x128xf32>
    %436 = arith.mulf %435, %401 : vector<8x128xf32>
    %437 = arith.addf %434, %436 : vector<8x128xf32>
    %438 = vector.broadcast %30 : f32 to vector<8x128xf32>
    %439 = arith.addf %410, %438 : vector<8x128xf32>
    %cst_201 = arith.constant 0.000000e+00 : f32
    %440 = vector.broadcast %cst_201 : f32 to vector<8x128xf32>
    %441 = arith.maximumf %439, %440 : vector<8x128xf32>
    %c0_202 = arith.constant 0 : index
    %c3_203 = arith.constant 3 : index
    %c1_204 = arith.constant 1 : index
    %c0_205 = arith.constant 0 : index
    %442 = vector.load %arg5[%c0_202, %c3_203, %c1_204, %c0_205] : memref<4x4x10x128xf32, #tpu.memory_space<vmem>>, vector<1x1x8x128xf32>
    %443 = vector.shape_cast %442 : vector<1x1x8x128xf32> to vector<8x128xf32>
    %444 = vector.shape_cast %441 : vector<8x128xf32> to vector<1x1x8x128xf32>
    tpu.vector_store %arg5[%c0_202, %c3_203, %c1_204, %c0_205], %444 {strides = array<i32>} : memref<4x4x10x128xf32, #tpu.memory_space<vmem>>, vector<1x1x8x128xf32>,
    %445 = vector.broadcast %31 : f32 to vector<8x128xf32>
    %446 = arith.addf %419, %445 : vector<8x128xf32>
    %cst_206 = arith.constant 0.000000e+00 : f32
    %447 = vector.broadcast %cst_206 : f32 to vector<8x128xf32>
    %448 = arith.maximumf %446, %447 : vector<8x128xf32>
    %c1_207 = arith.constant 1 : index
    %c3_208 = arith.constant 3 : index
    %c1_209 = arith.constant 1 : index
    %c0_210 = arith.constant 0 : index
    %449 = vector.load %arg5[%c1_207, %c3_208, %c1_209, %c0_210] : memref<4x4x10x128xf32, #tpu.memory_space<vmem>>, vector<1x1x8x128xf32>
    %450 = vector.shape_cast %449 : vector<1x1x8x128xf32> to vector<8x128xf32>
    %451 = vector.shape_cast %448 : vector<8x128xf32> to vector<1x1x8x128xf32>
    tpu.vector_store %arg5[%c1_207, %c3_208, %c1_209, %c0_210], %451 {strides = array<i32>} : memref<4x4x10x128xf32, #tpu.memory_space<vmem>>, vector<1x1x8x128xf32>,
    %452 = vector.broadcast %32 : f32 to vector<8x128xf32>
    %453 = arith.addf %428, %452 : vector<8x128xf32>
    %cst_211 = arith.constant 0.000000e+00 : f32
    %454 = vector.broadcast %cst_211 : f32 to vector<8x128xf32>
    %455 = arith.maximumf %453, %454 : vector<8x128xf32>
    %c2_212 = arith.constant 2 : index
    %c3_213 = arith.constant 3 : index
    %c1_214 = arith.constant 1 : index
    %c0_215 = arith.constant 0 : index
    %456 = vector.load %arg5[%c2_212, %c3_213, %c1_214, %c0_215] : memref<4x4x10x128xf32, #tpu.memory_space<vmem>>, vector<1x1x8x128xf32>
    %457 = vector.shape_cast %456 : vector<1x1x8x128xf32> to vector<8x128xf32>
    %458 = vector.shape_cast %455 : vector<8x128xf32> to vector<1x1x8x128xf32>
    tpu.vector_store %arg5[%c2_212, %c3_213, %c1_214, %c0_215], %458 {strides = array<i32>} : memref<4x4x10x128xf32, #tpu.memory_space<vmem>>, vector<1x1x8x128xf32>,
    %459 = vector.broadcast %33 : f32 to vector<8x128xf32>
    %460 = arith.addf %437, %459 : vector<8x128xf32>
    %cst_216 = arith.constant 0.000000e+00 : f32
    %461 = vector.broadcast %cst_216 : f32 to vector<8x128xf32>
    %462 = arith.maximumf %460, %461 : vector<8x128xf32>
    %c3_217 = arith.constant 3 : index
    %c3_218 = arith.constant 3 : index
    %c1_219 = arith.constant 1 : index
    %c0_220 = arith.constant 0 : index
    %463 = vector.load %arg5[%c3_217, %c3_218, %c1_219, %c0_220] : memref<4x4x10x128xf32, #tpu.memory_space<vmem>>, vector<1x1x8x128xf32>
    %464 = vector.shape_cast %463 : vector<1x1x8x128xf32> to vector<8x128xf32>
    %465 = vector.shape_cast %462 : vector<8x128xf32> to vector<1x1x8x128xf32>
    tpu.vector_store %arg5[%c3_217, %c3_218, %c1_219, %c0_220], %465 {strides = array<i32>} : memref<4x4x10x128xf32, #tpu.memory_space<vmem>>, vector<1x1x8x128xf32>,
    %c24 = arith.constant 24 : index
    %466 = memref.load %arg2[%c24] : memref<528xf32, #tpu.memory_space<smem>>
    %c25 = arith.constant 25 : index
    %467 = memref.load %arg2[%c25] : memref<528xf32, #tpu.memory_space<smem>>
    %c26 = arith.constant 26 : index
    %468 = memref.load %arg2[%c26] : memref<528xf32, #tpu.memory_space<smem>>
    %c27 = arith.constant 27 : index
    %469 = memref.load %arg2[%c27] : memref<528xf32, #tpu.memory_space<smem>>
    %c28 = arith.constant 28 : index
    %470 = memref.load %arg2[%c28] : memref<528xf32, #tpu.memory_space<smem>>
    %c29 = arith.constant 29 : index
    %471 = memref.load %arg2[%c29] : memref<528xf32, #tpu.memory_space<smem>>
    %c30 = arith.constant 30 : index
    %472 = memref.load %arg2[%c30] : memref<528xf32, #tpu.memory_space<smem>>
    %c31 = arith.constant 31 : index
    %473 = memref.load %arg2[%c31] : memref<528xf32, #tpu.memory_space<smem>>
    %c32 = arith.constant 32 : index
    %474 = memref.load %arg2[%c32] : memref<528xf32, #tpu.memory_space<smem>>
    %c33 = arith.constant 33 : index
    %475 = memref.load %arg2[%c33] : memref<528xf32, #tpu.memory_space<smem>>
    %c34 = arith.constant 34 : index
    %476 = memref.load %arg2[%c34] : memref<528xf32, #tpu.memory_space<smem>>
    %c35 = arith.constant 35 : index
    %477 = memref.load %arg2[%c35] : memref<528xf32, #tpu.memory_space<smem>>
    %c36 = arith.constant 36 : index
    %478 = memref.load %arg2[%c36] : memref<528xf32, #tpu.memory_space<smem>>
    %c37 = arith.constant 37 : index
    %479 = memref.load %arg2[%c37] : memref<528xf32, #tpu.memory_space<smem>>
    %c38 = arith.constant 38 : index
    %480 = memref.load %arg2[%c38] : memref<528xf32, #tpu.memory_space<smem>>
    %c39 = arith.constant 39 : index
    %481 = memref.load %arg2[%c39] : memref<528xf32, #tpu.memory_space<smem>>
    %c40 = arith.constant 40 : index
    %482 = memref.load %arg2[%c40] : memref<528xf32, #tpu.memory_space<smem>>
    %c41 = arith.constant 41 : index
    %483 = memref.load %arg2[%c41] : memref<528xf32, #tpu.memory_space<smem>>
    %c42 = arith.constant 42 : index
    %484 = memref.load %arg2[%c42] : memref<528xf32, #tpu.memory_space<smem>>
    %c43 = arith.constant 43 : index
    %485 = memref.load %arg2[%c43] : memref<528xf32, #tpu.memory_space<smem>>
    %c44 = arith.constant 44 : index
    %486 = memref.load %arg2[%c44] : memref<528xf32, #tpu.memory_space<smem>>
    %c45 = arith.constant 45 : index
    %487 = memref.load %arg2[%c45] : memref<528xf32, #tpu.memory_space<smem>>
    %c46 = arith.constant 46 : index
    %488 = memref.load %arg2[%c46] : memref<528xf32, #tpu.memory_space<smem>>
    %c47 = arith.constant 47 : index
    %489 = memref.load %arg2[%c47] : memref<528xf32, #tpu.memory_space<smem>>
    %c48 = arith.constant 48 : index
    %490 = memref.load %arg2[%c48] : memref<528xf32, #tpu.memory_space<smem>>
    %c49 = arith.constant 49 : index
    %491 = memref.load %arg2[%c49] : memref<528xf32, #tpu.memory_space<smem>>
    %c50 = arith.constant 50 : index
    %492 = memref.load %arg2[%c50] : memref<528xf32, #tpu.memory_space<smem>>
    %c51 = arith.constant 51 : index
    %493 = memref.load %arg2[%c51] : memref<528xf32, #tpu.memory_space<smem>>
    %c52 = arith.constant 52 : index
    %494 = memref.load %arg2[%c52] : memref<528xf32, #tpu.memory_space<smem>>
    %c53 = arith.constant 53 : index
    %495 = memref.load %arg2[%c53] : memref<528xf32, #tpu.memory_space<smem>>
    %c54 = arith.constant 54 : index
    %496 = memref.load %arg2[%c54] : memref<528xf32, #tpu.memory_space<smem>>
    %c55 = arith.constant 55 : index
    %497 = memref.load %arg2[%c55] : memref<528xf32, #tpu.memory_space<smem>>
    %c56 = arith.constant 56 : index
    %498 = memref.load %arg2[%c56] : memref<528xf32, #tpu.memory_space<smem>>
    %c57 = arith.constant 57 : index
    %499 = memref.load %arg2[%c57] : memref<528xf32, #tpu.memory_space<smem>>
    %c58 = arith.constant 58 : index
    %500 = memref.load %arg2[%c58] : memref<528xf32, #tpu.memory_space<smem>>
    %c59 = arith.constant 59 : index
    %501 = memref.load %arg2[%c59] : memref<528xf32, #tpu.memory_space<smem>>
    %c60 = arith.constant 60 : index
    %502 = memref.load %arg2[%c60] : memref<528xf32, #tpu.memory_space<smem>>
    %c61 = arith.constant 61 : index
    %503 = memref.load %arg2[%c61] : memref<528xf32, #tpu.memory_space<smem>>
    %c62 = arith.constant 62 : index
    %504 = memref.load %arg2[%c62] : memref<528xf32, #tpu.memory_space<smem>>
    %c63 = arith.constant 63 : index
    %505 = memref.load %arg2[%c63] : memref<528xf32, #tpu.memory_space<smem>>
    %c64 = arith.constant 64 : index
    %506 = memref.load %arg2[%c64] : memref<528xf32, #tpu.memory_space<smem>>
    %c65 = arith.constant 65 : index
    %507 = memref.load %arg2[%c65] : memref<528xf32, #tpu.memory_space<smem>>
    %c66 = arith.constant 66 : index
    %508 = memref.load %arg2[%c66] : memref<528xf32, #tpu.memory_space<smem>>
    %c67 = arith.constant 67 : index
    %509 = memref.load %arg2[%c67] : memref<528xf32, #tpu.memory_space<smem>>
    %c68 = arith.constant 68 : index
    %510 = memref.load %arg2[%c68] : memref<528xf32, #tpu.memory_space<smem>>
    %c69 = arith.constant 69 : index
    %511 = memref.load %arg2[%c69] : memref<528xf32, #tpu.memory_space<smem>>
    %c70 = arith.constant 70 : index
    %512 = memref.load %arg2[%c70] : memref<528xf32, #tpu.memory_space<smem>>
    %c71 = arith.constant 71 : index
    %513 = memref.load %arg2[%c71] : memref<528xf32, #tpu.memory_space<smem>>
    %c72 = arith.constant 72 : index
    %514 = memref.load %arg2[%c72] : memref<528xf32, #tpu.memory_space<smem>>
    %c73 = arith.constant 73 : index
    %515 = memref.load %arg2[%c73] : memref<528xf32, #tpu.memory_space<smem>>
    %c74 = arith.constant 74 : index
    %516 = memref.load %arg2[%c74] : memref<528xf32, #tpu.memory_space<smem>>
    %c75 = arith.constant 75 : index
    %517 = memref.load %arg2[%c75] : memref<528xf32, #tpu.memory_space<smem>>
    %c76 = arith.constant 76 : index
    %518 = memref.load %arg2[%c76] : memref<528xf32, #tpu.memory_space<smem>>
    %c77 = arith.constant 77 : index
    %519 = memref.load %arg2[%c77] : memref<528xf32, #tpu.memory_space<smem>>
    %c78 = arith.constant 78 : index
    %520 = memref.load %arg2[%c78] : memref<528xf32, #tpu.memory_space<smem>>
    %c79 = arith.constant 79 : index
    %521 = memref.load %arg2[%c79] : memref<528xf32, #tpu.memory_space<smem>>
    %c80 = arith.constant 80 : index
    %522 = memref.load %arg2[%c80] : memref<528xf32, #tpu.memory_space<smem>>
    %c81 = arith.constant 81 : index
    %523 = memref.load %arg2[%c81] : memref<528xf32, #tpu.memory_space<smem>>
    %c82 = arith.constant 82 : index
    %524 = memref.load %arg2[%c82] : memref<528xf32, #tpu.memory_space<smem>>
    %c83 = arith.constant 83 : index
    %525 = memref.load %arg2[%c83] : memref<528xf32, #tpu.memory_space<smem>>
    %c84 = arith.constant 84 : index
    %526 = memref.load %arg2[%c84] : memref<528xf32, #tpu.memory_space<smem>>
    %c85 = arith.constant 85 : index
    %527 = memref.load %arg2[%c85] : memref<528xf32, #tpu.memory_space<smem>>
    %c86 = arith.constant 86 : index
    %528 = memref.load %arg2[%c86] : memref<528xf32, #tpu.memory_space<smem>>
    %c87 = arith.constant 87 : index
    %529 = memref.load %arg2[%c87] : memref<528xf32, #tpu.memory_space<smem>>
    %c88 = arith.constant 88 : index
    %530 = memref.load %arg2[%c88] : memref<528xf32, #tpu.memory_space<smem>>
    %c89 = arith.constant 89 : index
    %531 = memref.load %arg2[%c89] : memref<528xf32, #tpu.memory_space<smem>>
    %c90 = arith.constant 90 : index
    %532 = memref.load %arg2[%c90] : memref<528xf32, #tpu.memory_space<smem>>
    %c91 = arith.constant 91 : index
    %533 = memref.load %arg2[%c91] : memref<528xf32, #tpu.memory_space<smem>>
    %c92 = arith.constant 92 : index
    %534 = memref.load %arg2[%c92] : memref<528xf32, #tpu.memory_space<smem>>
    %c93 = arith.constant 93 : index
    %535 = memref.load %arg2[%c93] : memref<528xf32, #tpu.memory_space<smem>>
    %c94 = arith.constant 94 : index
    %536 = memref.load %arg2[%c94] : memref<528xf32, #tpu.memory_space<smem>>
    %c95 = arith.constant 95 : index
    %537 = memref.load %arg2[%c95] : memref<528xf32, #tpu.memory_space<smem>>
    %c96 = arith.constant 96 : index
    %538 = memref.load %arg2[%c96] : memref<528xf32, #tpu.memory_space<smem>>
    %c97 = arith.constant 97 : index
    %539 = memref.load %arg2[%c97] : memref<528xf32, #tpu.memory_space<smem>>
    %c98 = arith.constant 98 : index
    %540 = memref.load %arg2[%c98] : memref<528xf32, #tpu.memory_space<smem>>
    %c99 = arith.constant 99 : index
    %541 = memref.load %arg2[%c99] : memref<528xf32, #tpu.memory_space<smem>>
    %c100 = arith.constant 100 : index
    %542 = memref.load %arg2[%c100] : memref<528xf32, #tpu.memory_space<smem>>
    %c101 = arith.constant 101 : index
    %543 = memref.load %arg2[%c101] : memref<528xf32, #tpu.memory_space<smem>>
    %c102 = arith.constant 102 : index
    %544 = memref.load %arg2[%c102] : memref<528xf32, #tpu.memory_space<smem>>
    %c103 = arith.constant 103 : index
    %545 = memref.load %arg2[%c103] : memref<528xf32, #tpu.memory_space<smem>>
    %c104 = arith.constant 104 : index
    %546 = memref.load %arg2[%c104] : memref<528xf32, #tpu.memory_space<smem>>
    %c105 = arith.constant 105 : index
    %547 = memref.load %arg2[%c105] : memref<528xf32, #tpu.memory_space<smem>>
    %c106 = arith.constant 106 : index
    %548 = memref.load %arg2[%c106] : memref<528xf32, #tpu.memory_space<smem>>
    %c107 = arith.constant 107 : index
    %549 = memref.load %arg2[%c107] : memref<528xf32, #tpu.memory_space<smem>>
    %c108 = arith.constant 108 : index
    %550 = memref.load %arg2[%c108] : memref<528xf32, #tpu.memory_space<smem>>
    %c109 = arith.constant 109 : index
    %551 = memref.load %arg2[%c109] : memref<528xf32, #tpu.memory_space<smem>>
    %c110 = arith.constant 110 : index
    %552 = memref.load %arg2[%c110] : memref<528xf32, #tpu.memory_space<smem>>
    %c111 = arith.constant 111 : index
    %553 = memref.load %arg2[%c111] : memref<528xf32, #tpu.memory_space<smem>>
    %c112 = arith.constant 112 : index
    %554 = memref.load %arg2[%c112] : memref<528xf32, #tpu.memory_space<smem>>
    %c113 = arith.constant 113 : index
    %555 = memref.load %arg2[%c113] : memref<528xf32, #tpu.memory_space<smem>>
    %c114 = arith.constant 114 : index
    %556 = memref.load %arg2[%c114] : memref<528xf32, #tpu.memory_space<smem>>
    %c115 = arith.constant 115 : index
    %557 = memref.load %arg2[%c115] : memref<528xf32, #tpu.memory_space<smem>>
    %c116 = arith.constant 116 : index
    %558 = memref.load %arg2[%c116] : memref<528xf32, #tpu.memory_space<smem>>
    %c117 = arith.constant 117 : index
    %559 = memref.load %arg2[%c117] : memref<528xf32, #tpu.memory_space<smem>>
    %c118 = arith.constant 118 : index
    %560 = memref.load %arg2[%c118] : memref<528xf32, #tpu.memory_space<smem>>
    %c119 = arith.constant 119 : index
    %561 = memref.load %arg2[%c119] : memref<528xf32, #tpu.memory_space<smem>>
    %c120 = arith.constant 120 : index
    %562 = memref.load %arg2[%c120] : memref<528xf32, #tpu.memory_space<smem>>
    %c121 = arith.constant 121 : index
    %563 = memref.load %arg2[%c121] : memref<528xf32, #tpu.memory_space<smem>>
    %c122 = arith.constant 122 : index
    %564 = memref.load %arg2[%c122] : memref<528xf32, #tpu.memory_space<smem>>
    %c123 = arith.constant 123 : index
    %565 = memref.load %arg2[%c123] : memref<528xf32, #tpu.memory_space<smem>>
    %c124 = arith.constant 124 : index
    %566 = memref.load %arg2[%c124] : memref<528xf32, #tpu.memory_space<smem>>
    %c125 = arith.constant 125 : index
    %567 = memref.load %arg2[%c125] : memref<528xf32, #tpu.memory_space<smem>>
    %c126 = arith.constant 126 : index
    %568 = memref.load %arg2[%c126] : memref<528xf32, #tpu.memory_space<smem>>
    %c127 = arith.constant 127 : index
    %569 = memref.load %arg2[%c127] : memref<528xf32, #tpu.memory_space<smem>>
    %c128 = arith.constant 128 : index
    %570 = memref.load %arg2[%c128] : memref<528xf32, #tpu.memory_space<smem>>
    %c129 = arith.constant 129 : index
    %571 = memref.load %arg2[%c129] : memref<528xf32, #tpu.memory_space<smem>>
    %c130 = arith.constant 130 : index
    %572 = memref.load %arg2[%c130] : memref<528xf32, #tpu.memory_space<smem>>
    %c131 = arith.constant 131 : index
    %573 = memref.load %arg2[%c131] : memref<528xf32, #tpu.memory_space<smem>>
    %c132 = arith.constant 132 : index
    %574 = memref.load %arg2[%c132] : memref<528xf32, #tpu.memory_space<smem>>
    %c133 = arith.constant 133 : index
    %575 = memref.load %arg2[%c133] : memref<528xf32, #tpu.memory_space<smem>>
    %c134 = arith.constant 134 : index
    %576 = memref.load %arg2[%c134] : memref<528xf32, #tpu.memory_space<smem>>
    %c135 = arith.constant 135 : index
    %577 = memref.load %arg2[%c135] : memref<528xf32, #tpu.memory_space<smem>>
    %c136 = arith.constant 136 : index
    %578 = memref.load %arg2[%c136] : memref<528xf32, #tpu.memory_space<smem>>
    %c137 = arith.constant 137 : index
    %579 = memref.load %arg2[%c137] : memref<528xf32, #tpu.memory_space<smem>>
    %c138 = arith.constant 138 : index
    %580 = memref.load %arg2[%c138] : memref<528xf32, #tpu.memory_space<smem>>
    %c139 = arith.constant 139 : index
    %581 = memref.load %arg2[%c139] : memref<528xf32, #tpu.memory_space<smem>>
    %c140 = arith.constant 140 : index
    %582 = memref.load %arg2[%c140] : memref<528xf32, #tpu.memory_space<smem>>
    %c141 = arith.constant 141 : index
    %583 = memref.load %arg2[%c141] : memref<528xf32, #tpu.memory_space<smem>>
    %c142 = arith.constant 142 : index
    %584 = memref.load %arg2[%c142] : memref<528xf32, #tpu.memory_space<smem>>
    %c143 = arith.constant 143 : index
    %585 = memref.load %arg2[%c143] : memref<528xf32, #tpu.memory_space<smem>>
    %c144 = arith.constant 144 : index
    %586 = memref.load %arg2[%c144] : memref<528xf32, #tpu.memory_space<smem>>
    %c145 = arith.constant 145 : index
    %587 = memref.load %arg2[%c145] : memref<528xf32, #tpu.memory_space<smem>>
    %c146 = arith.constant 146 : index
    %588 = memref.load %arg2[%c146] : memref<528xf32, #tpu.memory_space<smem>>
    %c147 = arith.constant 147 : index
    %589 = memref.load %arg2[%c147] : memref<528xf32, #tpu.memory_space<smem>>
    %c148 = arith.constant 148 : index
    %590 = memref.load %arg2[%c148] : memref<528xf32, #tpu.memory_space<smem>>
    %c149 = arith.constant 149 : index
    %591 = memref.load %arg2[%c149] : memref<528xf32, #tpu.memory_space<smem>>
    %c150 = arith.constant 150 : index
    %592 = memref.load %arg2[%c150] : memref<528xf32, #tpu.memory_space<smem>>
    %c151 = arith.constant 151 : index
    %593 = memref.load %arg2[%c151] : memref<528xf32, #tpu.memory_space<smem>>
    %c152 = arith.constant 152 : index
    %594 = memref.load %arg2[%c152] : memref<528xf32, #tpu.memory_space<smem>>
    %c153 = arith.constant 153 : index
    %595 = memref.load %arg2[%c153] : memref<528xf32, #tpu.memory_space<smem>>
    %c154 = arith.constant 154 : index
    %596 = memref.load %arg2[%c154] : memref<528xf32, #tpu.memory_space<smem>>
    %c155 = arith.constant 155 : index
    %597 = memref.load %arg2[%c155] : memref<528xf32, #tpu.memory_space<smem>>
    %c156 = arith.constant 156 : index
    %598 = memref.load %arg2[%c156] : memref<528xf32, #tpu.memory_space<smem>>
    %c157 = arith.constant 157 : index
    %599 = memref.load %arg2[%c157] : memref<528xf32, #tpu.memory_space<smem>>
    %c158 = arith.constant 158 : index
    %600 = memref.load %arg2[%c158] : memref<528xf32, #tpu.memory_space<smem>>
    %c159 = arith.constant 159 : index
    %601 = memref.load %arg2[%c159] : memref<528xf32, #tpu.memory_space<smem>>
    %c160 = arith.constant 160 : index
    %602 = memref.load %arg2[%c160] : memref<528xf32, #tpu.memory_space<smem>>
    %c161 = arith.constant 161 : index
    %603 = memref.load %arg2[%c161] : memref<528xf32, #tpu.memory_space<smem>>
    %c162 = arith.constant 162 : index
    %604 = memref.load %arg2[%c162] : memref<528xf32, #tpu.memory_space<smem>>
    %c163 = arith.constant 163 : index
    %605 = memref.load %arg2[%c163] : memref<528xf32, #tpu.memory_space<smem>>
    %c164 = arith.constant 164 : index
    %606 = memref.load %arg2[%c164] : memref<528xf32, #tpu.memory_space<smem>>
    %c165 = arith.constant 165 : index
    %607 = memref.load %arg2[%c165] : memref<528xf32, #tpu.memory_space<smem>>
    %c166 = arith.constant 166 : index
    %608 = memref.load %arg2[%c166] : memref<528xf32, #tpu.memory_space<smem>>
    %c167 = arith.constant 167 : index
    %609 = memref.load %arg2[%c167] : memref<528xf32, #tpu.memory_space<smem>>
    %c168 = arith.constant 168 : index
    %610 = memref.load %arg2[%c168] : memref<528xf32, #tpu.memory_space<smem>>
    %c169 = arith.constant 169 : index
    %611 = memref.load %arg2[%c169] : memref<528xf32, #tpu.memory_space<smem>>
    %c170 = arith.constant 170 : index
    %612 = memref.load %arg2[%c170] : memref<528xf32, #tpu.memory_space<smem>>
    %c171 = arith.constant 171 : index
    %613 = memref.load %arg2[%c171] : memref<528xf32, #tpu.memory_space<smem>>
    %c172 = arith.constant 172 : index
    %614 = memref.load %arg2[%c172] : memref<528xf32, #tpu.memory_space<smem>>
    %c173 = arith.constant 173 : index
    %615 = memref.load %arg2[%c173] : memref<528xf32, #tpu.memory_space<smem>>
    %c174 = arith.constant 174 : index
    %616 = memref.load %arg2[%c174] : memref<528xf32, #tpu.memory_space<smem>>
    %c175 = arith.constant 175 : index
    %617 = memref.load %arg2[%c175] : memref<528xf32, #tpu.memory_space<smem>>
    %c176 = arith.constant 176 : index
    %618 = memref.load %arg2[%c176] : memref<528xf32, #tpu.memory_space<smem>>
    %c177 = arith.constant 177 : index
    %619 = memref.load %arg2[%c177] : memref<528xf32, #tpu.memory_space<smem>>
    %c178 = arith.constant 178 : index
    %620 = memref.load %arg2[%c178] : memref<528xf32, #tpu.memory_space<smem>>
    %c179 = arith.constant 179 : index
    %621 = memref.load %arg2[%c179] : memref<528xf32, #tpu.memory_space<smem>>
    %c180 = arith.constant 180 : index
    %622 = memref.load %arg2[%c180] : memref<528xf32, #tpu.memory_space<smem>>
    %c181 = arith.constant 181 : index
    %623 = memref.load %arg2[%c181] : memref<528xf32, #tpu.memory_space<smem>>
    %c182 = arith.constant 182 : index
    %624 = memref.load %arg2[%c182] : memref<528xf32, #tpu.memory_space<smem>>
    %c183 = arith.constant 183 : index
    %625 = memref.load %arg2[%c183] : memref<528xf32, #tpu.memory_space<smem>>
    %c184 = arith.constant 184 : index
    %626 = memref.load %arg2[%c184] : memref<528xf32, #tpu.memory_space<smem>>
    %c185 = arith.constant 185 : index
    %627 = memref.load %arg2[%c185] : memref<528xf32, #tpu.memory_space<smem>>
    %c186 = arith.constant 186 : index
    %628 = memref.load %arg2[%c186] : memref<528xf32, #tpu.memory_space<smem>>
    %c187 = arith.constant 187 : index
    %629 = memref.load %arg2[%c187] : memref<528xf32, #tpu.memory_space<smem>>
    %c188 = arith.constant 188 : index
    %630 = memref.load %arg2[%c188] : memref<528xf32, #tpu.memory_space<smem>>
    %c189 = arith.constant 189 : index
    %631 = memref.load %arg2[%c189] : memref<528xf32, #tpu.memory_space<smem>>
    %c190 = arith.constant 190 : index
    %632 = memref.load %arg2[%c190] : memref<528xf32, #tpu.memory_space<smem>>
    %c191 = arith.constant 191 : index
    %633 = memref.load %arg2[%c191] : memref<528xf32, #tpu.memory_space<smem>>
    %c192 = arith.constant 192 : index
    %634 = memref.load %arg2[%c192] : memref<528xf32, #tpu.memory_space<smem>>
    %c193 = arith.constant 193 : index
    %635 = memref.load %arg2[%c193] : memref<528xf32, #tpu.memory_space<smem>>
    %c194 = arith.constant 194 : index
    %636 = memref.load %arg2[%c194] : memref<528xf32, #tpu.memory_space<smem>>
    %c195 = arith.constant 195 : index
    %637 = memref.load %arg2[%c195] : memref<528xf32, #tpu.memory_space<smem>>
    %c196 = arith.constant 196 : index
    %638 = memref.load %arg2[%c196] : memref<528xf32, #tpu.memory_space<smem>>
    %c197 = arith.constant 197 : index
    %639 = memref.load %arg2[%c197] : memref<528xf32, #tpu.memory_space<smem>>
    %c198 = arith.constant 198 : index
    %640 = memref.load %arg2[%c198] : memref<528xf32, #tpu.memory_space<smem>>
    %c199 = arith.constant 199 : index
    %641 = memref.load %arg2[%c199] : memref<528xf32, #tpu.memory_space<smem>>
    %c200 = arith.constant 200 : index
    %642 = memref.load %arg2[%c200] : memref<528xf32, #tpu.memory_space<smem>>
    %c201 = arith.constant 201 : index
    %643 = memref.load %arg2[%c201] : memref<528xf32, #tpu.memory_space<smem>>
    %c202 = arith.constant 202 : index
    %644 = memref.load %arg2[%c202] : memref<528xf32, #tpu.memory_space<smem>>
    %c203 = arith.constant 203 : index
    %645 = memref.load %arg2[%c203] : memref<528xf32, #tpu.memory_space<smem>>
    %c204 = arith.constant 204 : index
    %646 = memref.load %arg2[%c204] : memref<528xf32, #tpu.memory_space<smem>>
    %c205 = arith.constant 205 : index
    %647 = memref.load %arg2[%c205] : memref<528xf32, #tpu.memory_space<smem>>
    %c206 = arith.constant 206 : index
    %648 = memref.load %arg2[%c206] : memref<528xf32, #tpu.memory_space<smem>>
    %c207 = arith.constant 207 : index
    %649 = memref.load %arg2[%c207] : memref<528xf32, #tpu.memory_space<smem>>
    %c208 = arith.constant 208 : index
    %650 = memref.load %arg2[%c208] : memref<528xf32, #tpu.memory_space<smem>>
    %c209 = arith.constant 209 : index
    %651 = memref.load %arg2[%c209] : memref<528xf32, #tpu.memory_space<smem>>
    %c210 = arith.constant 210 : index
    %652 = memref.load %arg2[%c210] : memref<528xf32, #tpu.memory_space<smem>>
    %c211 = arith.constant 211 : index
    %653 = memref.load %arg2[%c211] : memref<528xf32, #tpu.memory_space<smem>>
    %c212 = arith.constant 212 : index
    %654 = memref.load %arg2[%c212] : memref<528xf32, #tpu.memory_space<smem>>
    %c213 = arith.constant 213 : index
    %655 = memref.load %arg2[%c213] : memref<528xf32, #tpu.memory_space<smem>>
    %c214 = arith.constant 214 : index
    %656 = memref.load %arg2[%c214] : memref<528xf32, #tpu.memory_space<smem>>
    %c215 = arith.constant 215 : index
    %657 = memref.load %arg2[%c215] : memref<528xf32, #tpu.memory_space<smem>>
    %c4_221 = arith.constant 4 : index
    %658 = memref.load %arg3[%c4_221] : memref<20xf32, #tpu.memory_space<smem>>
    %c5_222 = arith.constant 5 : index
    %659 = memref.load %arg3[%c5_222] : memref<20xf32, #tpu.memory_space<smem>>
    %c6_223 = arith.constant 6 : index
    %660 = memref.load %arg3[%c6_223] : memref<20xf32, #tpu.memory_space<smem>>
    %c7_224 = arith.constant 7 : index
    %661 = memref.load %arg3[%c7_224] : memref<20xf32, #tpu.memory_space<smem>>
    %c0_225 = arith.constant 0 : index
    %c0_226 = arith.constant 0 : index
    %c0_227 = arith.constant 0 : index
    %c0_228 = arith.constant 0 : index
    %662 = vector.load %arg5[%c0_225, %c0_226, %c0_227, %c0_228] : memref<4x4x10x128xf32, #tpu.memory_space<vmem>>, vector<1x1x8x128xf32>
    %663 = vector.shape_cast %662 : vector<1x1x8x128xf32> to vector<8x128xf32>
    %c0_229 = arith.constant 0 : index
    %c0_230 = arith.constant 0 : index
    %c1_231 = arith.constant 1 : index
    %c0_232 = arith.constant 0 : index
    %664 = vector.load %arg5[%c0_229, %c0_230, %c1_231, %c0_232] : memref<4x4x10x128xf32, #tpu.memory_space<vmem>>, vector<1x1x8x128xf32>
    %665 = vector.shape_cast %664 : vector<1x1x8x128xf32> to vector<8x128xf32>
    %c0_233 = arith.constant 0 : index
    %c0_234 = arith.constant 0 : index
    %c2_235 = arith.constant 2 : index
    %c0_236 = arith.constant 0 : index
    %666 = vector.load %arg5[%c0_233, %c0_234, %c2_235, %c0_236] : memref<4x4x10x128xf32, #tpu.memory_space<vmem>>, vector<1x1x8x128xf32>
    %667 = vector.shape_cast %666 : vector<1x1x8x128xf32> to vector<8x128xf32>
    %668 = vector.broadcast %466 : f32 to vector<8x128xf32>
    %669 = arith.mulf %668, %663 : vector<8x128xf32>
    %670 = vector.broadcast %467 : f32 to vector<8x128xf32>
    %671 = arith.mulf %670, %665 : vector<8x128xf32>
    %672 = arith.addf %669, %671 : vector<8x128xf32>
    %673 = vector.broadcast %468 : f32 to vector<8x128xf32>
    %674 = arith.mulf %673, %667 : vector<8x128xf32>
    %675 = arith.addf %672, %674 : vector<8x128xf32>
    %676 = vector.broadcast %514 : f32 to vector<8x128xf32>
    %677 = arith.mulf %676, %663 : vector<8x128xf32>
    %678 = vector.broadcast %515 : f32 to vector<8x128xf32>
    %679 = arith.mulf %678, %665 : vector<8x128xf32>
    %680 = arith.addf %677, %679 : vector<8x128xf32>
    %681 = vector.broadcast %516 : f32 to vector<8x128xf32>
    %682 = arith.mulf %681, %667 : vector<8x128xf32>
    %683 = arith.addf %680, %682 : vector<8x128xf32>
    %684 = vector.broadcast %562 : f32 to vector<8x128xf32>
    %685 = arith.mulf %684, %663 : vector<8x128xf32>
    %686 = vector.broadcast %563 : f32 to vector<8x128xf32>
    %687 = arith.mulf %686, %665 : vector<8x128xf32>
    %688 = arith.addf %685, %687 : vector<8x128xf32>
    %689 = vector.broadcast %564 : f32 to vector<8x128xf32>
    %690 = arith.mulf %689, %667 : vector<8x128xf32>
    %691 = arith.addf %688, %690 : vector<8x128xf32>
    %692 = vector.broadcast %610 : f32 to vector<8x128xf32>
    %693 = arith.mulf %692, %663 : vector<8x128xf32>
    %694 = vector.broadcast %611 : f32 to vector<8x128xf32>
    %695 = arith.mulf %694, %665 : vector<8x128xf32>
    %696 = arith.addf %693, %695 : vector<8x128xf32>
    %697 = vector.broadcast %612 : f32 to vector<8x128xf32>
    %698 = arith.mulf %697, %667 : vector<8x128xf32>
    %699 = arith.addf %696, %698 : vector<8x128xf32>
    %c0_237 = arith.constant 0 : index
    %c1_238 = arith.constant 1 : index
    %c0_239 = arith.constant 0 : index
    %c0_240 = arith.constant 0 : index
    %700 = vector.load %arg5[%c0_237, %c1_238, %c0_239, %c0_240] : memref<4x4x10x128xf32, #tpu.memory_space<vmem>>, vector<1x1x8x128xf32>
    %701 = vector.shape_cast %700 : vector<1x1x8x128xf32> to vector<8x128xf32>
    %c0_241 = arith.constant 0 : index
    %c1_242 = arith.constant 1 : index
    %c1_243 = arith.constant 1 : index
    %c0_244 = arith.constant 0 : index
    %702 = vector.load %arg5[%c0_241, %c1_242, %c1_243, %c0_244] : memref<4x4x10x128xf32, #tpu.memory_space<vmem>>, vector<1x1x8x128xf32>
    %703 = vector.shape_cast %702 : vector<1x1x8x128xf32> to vector<8x128xf32>
    %c0_245 = arith.constant 0 : index
    %c1_246 = arith.constant 1 : index
    %c2_247 = arith.constant 2 : index
    %c0_248 = arith.constant 0 : index
    %704 = vector.load %arg5[%c0_245, %c1_246, %c2_247, %c0_248] : memref<4x4x10x128xf32, #tpu.memory_space<vmem>>, vector<1x1x8x128xf32>
    %705 = vector.shape_cast %704 : vector<1x1x8x128xf32> to vector<8x128xf32>
    %706 = vector.broadcast %469 : f32 to vector<8x128xf32>
    %707 = arith.mulf %706, %701 : vector<8x128xf32>
    %708 = arith.addf %675, %707 : vector<8x128xf32>
    %709 = vector.broadcast %470 : f32 to vector<8x128xf32>
    %710 = arith.mulf %709, %703 : vector<8x128xf32>
    %711 = arith.addf %708, %710 : vector<8x128xf32>
    %712 = vector.broadcast %471 : f32 to vector<8x128xf32>
    %713 = arith.mulf %712, %705 : vector<8x128xf32>
    %714 = arith.addf %711, %713 : vector<8x128xf32>
    %715 = vector.broadcast %517 : f32 to vector<8x128xf32>
    %716 = arith.mulf %715, %701 : vector<8x128xf32>
    %717 = arith.addf %683, %716 : vector<8x128xf32>
    %718 = vector.broadcast %518 : f32 to vector<8x128xf32>
    %719 = arith.mulf %718, %703 : vector<8x128xf32>
    %720 = arith.addf %717, %719 : vector<8x128xf32>
    %721 = vector.broadcast %519 : f32 to vector<8x128xf32>
    %722 = arith.mulf %721, %705 : vector<8x128xf32>
    %723 = arith.addf %720, %722 : vector<8x128xf32>
    %724 = vector.broadcast %565 : f32 to vector<8x128xf32>
    %725 = arith.mulf %724, %701 : vector<8x128xf32>
    %726 = arith.addf %691, %725 : vector<8x128xf32>
    %727 = vector.broadcast %566 : f32 to vector<8x128xf32>
    %728 = arith.mulf %727, %703 : vector<8x128xf32>
    %729 = arith.addf %726, %728 : vector<8x128xf32>
    %730 = vector.broadcast %567 : f32 to vector<8x128xf32>
    %731 = arith.mulf %730, %705 : vector<8x128xf32>
    %732 = arith.addf %729, %731 : vector<8x128xf32>
    %733 = vector.broadcast %613 : f32 to vector<8x128xf32>
    %734 = arith.mulf %733, %701 : vector<8x128xf32>
    %735 = arith.addf %699, %734 : vector<8x128xf32>
    %736 = vector.broadcast %614 : f32 to vector<8x128xf32>
    %737 = arith.mulf %736, %703 : vector<8x128xf32>
    %738 = arith.addf %735, %737 : vector<8x128xf32>
    %739 = vector.broadcast %615 : f32 to vector<8x128xf32>
    %740 = arith.mulf %739, %705 : vector<8x128xf32>
    %741 = arith.addf %738, %740 : vector<8x128xf32>
    %c0_249 = arith.constant 0 : index
    %c2_250 = arith.constant 2 : index
    %c0_251 = arith.constant 0 : index
    %c0_252 = arith.constant 0 : index
    %742 = vector.load %arg5[%c0_249, %c2_250, %c0_251, %c0_252] : memref<4x4x10x128xf32, #tpu.memory_space<vmem>>, vector<1x1x8x128xf32>
    %743 = vector.shape_cast %742 : vector<1x1x8x128xf32> to vector<8x128xf32>
    %c0_253 = arith.constant 0 : index
    %c2_254 = arith.constant 2 : index
    %c1_255 = arith.constant 1 : index
    %c0_256 = arith.constant 0 : index
    %744 = vector.load %arg5[%c0_253, %c2_254, %c1_255, %c0_256] : memref<4x4x10x128xf32, #tpu.memory_space<vmem>>, vector<1x1x8x128xf32>
    %745 = vector.shape_cast %744 : vector<1x1x8x128xf32> to vector<8x128xf32>
    %c0_257 = arith.constant 0 : index
    %c2_258 = arith.constant 2 : index
    %c2_259 = arith.constant 2 : index
    %c0_260 = arith.constant 0 : index
    %746 = vector.load %arg5[%c0_257, %c2_258, %c2_259, %c0_260] : memref<4x4x10x128xf32, #tpu.memory_space<vmem>>, vector<1x1x8x128xf32>
    %747 = vector.shape_cast %746 : vector<1x1x8x128xf32> to vector<8x128xf32>
    %748 = vector.broadcast %472 : f32 to vector<8x128xf32>
    %749 = arith.mulf %748, %743 : vector<8x128xf32>
    %750 = arith.addf %714, %749 : vector<8x128xf32>
    %751 = vector.broadcast %473 : f32 to vector<8x128xf32>
    %752 = arith.mulf %751, %745 : vector<8x128xf32>
    %753 = arith.addf %750, %752 : vector<8x128xf32>
    %754 = vector.broadcast %474 : f32 to vector<8x128xf32>
    %755 = arith.mulf %754, %747 : vector<8x128xf32>
    %756 = arith.addf %753, %755 : vector<8x128xf32>
    %757 = vector.broadcast %520 : f32 to vector<8x128xf32>
    %758 = arith.mulf %757, %743 : vector<8x128xf32>
    %759 = arith.addf %723, %758 : vector<8x128xf32>
    %760 = vector.broadcast %521 : f32 to vector<8x128xf32>
    %761 = arith.mulf %760, %745 : vector<8x128xf32>
    %762 = arith.addf %759, %761 : vector<8x128xf32>
    %763 = vector.broadcast %522 : f32 to vector<8x128xf32>
    %764 = arith.mulf %763, %747 : vector<8x128xf32>
    %765 = arith.addf %762, %764 : vector<8x128xf32>
    %766 = vector.broadcast %568 : f32 to vector<8x128xf32>
    %767 = arith.mulf %766, %743 : vector<8x128xf32>
    %768 = arith.addf %732, %767 : vector<8x128xf32>
    %769 = vector.broadcast %569 : f32 to vector<8x128xf32>
    %770 = arith.mulf %769, %745 : vector<8x128xf32>
    %771 = arith.addf %768, %770 : vector<8x128xf32>
    %772 = vector.broadcast %570 : f32 to vector<8x128xf32>
    %773 = arith.mulf %772, %747 : vector<8x128xf32>
    %774 = arith.addf %771, %773 : vector<8x128xf32>
    %775 = vector.broadcast %616 : f32 to vector<8x128xf32>
    %776 = arith.mulf %775, %743 : vector<8x128xf32>
    %777 = arith.addf %741, %776 : vector<8x128xf32>
    %778 = vector.broadcast %617 : f32 to vector<8x128xf32>
    %779 = arith.mulf %778, %745 : vector<8x128xf32>
    %780 = arith.addf %777, %779 : vector<8x128xf32>
    %781 = vector.broadcast %618 : f32 to vector<8x128xf32>
    %782 = arith.mulf %781, %747 : vector<8x128xf32>
    %783 = arith.addf %780, %782 : vector<8x128xf32>
    %c0_261 = arith.constant 0 : index
    %c3_262 = arith.constant 3 : index
    %c0_263 = arith.constant 0 : index
    %c0_264 = arith.constant 0 : index
    %784 = vector.load %arg5[%c0_261, %c3_262, %c0_263, %c0_264] : memref<4x4x10x128xf32, #tpu.memory_space<vmem>>, vector<1x1x8x128xf32>
    %785 = vector.shape_cast %784 : vector<1x1x8x128xf32> to vector<8x128xf32>
    %c0_265 = arith.constant 0 : index
    %c3_266 = arith.constant 3 : index
    %c1_267 = arith.constant 1 : index
    %c0_268 = arith.constant 0 : index
    %786 = vector.load %arg5[%c0_265, %c3_266, %c1_267, %c0_268] : memref<4x4x10x128xf32, #tpu.memory_space<vmem>>, vector<1x1x8x128xf32>
    %787 = vector.shape_cast %786 : vector<1x1x8x128xf32> to vector<8x128xf32>
    %c0_269 = arith.constant 0 : index
    %c3_270 = arith.constant 3 : index
    %c2_271 = arith.constant 2 : index
    %c0_272 = arith.constant 0 : index
    %788 = vector.load %arg5[%c0_269, %c3_270, %c2_271, %c0_272] : memref<4x4x10x128xf32, #tpu.memory_space<vmem>>, vector<1x1x8x128xf32>
    %789 = vector.shape_cast %788 : vector<1x1x8x128xf32> to vector<8x128xf32>
    %790 = vector.broadcast %475 : f32 to vector<8x128xf32>
    %791 = arith.mulf %790, %785 : vector<8x128xf32>
    %792 = arith.addf %756, %791 : vector<8x128xf32>
    %793 = vector.broadcast %476 : f32 to vector<8x128xf32>
    %794 = arith.mulf %793, %787 : vector<8x128xf32>
    %795 = arith.addf %792, %794 : vector<8x128xf32>
    %796 = vector.broadcast %477 : f32 to vector<8x128xf32>
    %797 = arith.mulf %796, %789 : vector<8x128xf32>
    %798 = arith.addf %795, %797 : vector<8x128xf32>
    %799 = vector.broadcast %523 : f32 to vector<8x128xf32>
    %800 = arith.mulf %799, %785 : vector<8x128xf32>
    %801 = arith.addf %765, %800 : vector<8x128xf32>
    %802 = vector.broadcast %524 : f32 to vector<8x128xf32>
    %803 = arith.mulf %802, %787 : vector<8x128xf32>
    %804 = arith.addf %801, %803 : vector<8x128xf32>
    %805 = vector.broadcast %525 : f32 to vector<8x128xf32>
    %806 = arith.mulf %805, %789 : vector<8x128xf32>
    %807 = arith.addf %804, %806 : vector<8x128xf32>
    %808 = vector.broadcast %571 : f32 to vector<8x128xf32>
    %809 = arith.mulf %808, %785 : vector<8x128xf32>
    %810 = arith.addf %774, %809 : vector<8x128xf32>
    %811 = vector.broadcast %572 : f32 to vector<8x128xf32>
    %812 = arith.mulf %811, %787 : vector<8x128xf32>
    %813 = arith.addf %810, %812 : vector<8x128xf32>
    %814 = vector.broadcast %573 : f32 to vector<8x128xf32>
    %815 = arith.mulf %814, %789 : vector<8x128xf32>
    %816 = arith.addf %813, %815 : vector<8x128xf32>
    %817 = vector.broadcast %619 : f32 to vector<8x128xf32>
    %818 = arith.mulf %817, %785 : vector<8x128xf32>
    %819 = arith.addf %783, %818 : vector<8x128xf32>
    %820 = vector.broadcast %620 : f32 to vector<8x128xf32>
    %821 = arith.mulf %820, %787 : vector<8x128xf32>
    %822 = arith.addf %819, %821 : vector<8x128xf32>
    %823 = vector.broadcast %621 : f32 to vector<8x128xf32>
    %824 = arith.mulf %823, %789 : vector<8x128xf32>
    %825 = arith.addf %822, %824 : vector<8x128xf32>
    %c1_273 = arith.constant 1 : index
    %c0_274 = arith.constant 0 : index
    %c0_275 = arith.constant 0 : index
    %c0_276 = arith.constant 0 : index
    %826 = vector.load %arg5[%c1_273, %c0_274, %c0_275, %c0_276] : memref<4x4x10x128xf32, #tpu.memory_space<vmem>>, vector<1x1x8x128xf32>
    %827 = vector.shape_cast %826 : vector<1x1x8x128xf32> to vector<8x128xf32>
    %c1_277 = arith.constant 1 : index
    %c0_278 = arith.constant 0 : index
    %c1_279 = arith.constant 1 : index
    %c0_280 = arith.constant 0 : index
    %828 = vector.load %arg5[%c1_277, %c0_278, %c1_279, %c0_280] : memref<4x4x10x128xf32, #tpu.memory_space<vmem>>, vector<1x1x8x128xf32>
    %829 = vector.shape_cast %828 : vector<1x1x8x128xf32> to vector<8x128xf32>
    %c1_281 = arith.constant 1 : index
    %c0_282 = arith.constant 0 : index
    %c2_283 = arith.constant 2 : index
    %c0_284 = arith.constant 0 : index
    %830 = vector.load %arg5[%c1_281, %c0_282, %c2_283, %c0_284] : memref<4x4x10x128xf32, #tpu.memory_space<vmem>>, vector<1x1x8x128xf32>
    %831 = vector.shape_cast %830 : vector<1x1x8x128xf32> to vector<8x128xf32>
    %832 = vector.broadcast %478 : f32 to vector<8x128xf32>
    %833 = arith.mulf %832, %827 : vector<8x128xf32>
    %834 = arith.addf %798, %833 : vector<8x128xf32>
    %835 = vector.broadcast %479 : f32 to vector<8x128xf32>
    %836 = arith.mulf %835, %829 : vector<8x128xf32>
    %837 = arith.addf %834, %836 : vector<8x128xf32>
    %838 = vector.broadcast %480 : f32 to vector<8x128xf32>
    %839 = arith.mulf %838, %831 : vector<8x128xf32>
    %840 = arith.addf %837, %839 : vector<8x128xf32>
    %841 = vector.broadcast %526 : f32 to vector<8x128xf32>
    %842 = arith.mulf %841, %827 : vector<8x128xf32>
    %843 = arith.addf %807, %842 : vector<8x128xf32>
    %844 = vector.broadcast %527 : f32 to vector<8x128xf32>
    %845 = arith.mulf %844, %829 : vector<8x128xf32>
    %846 = arith.addf %843, %845 : vector<8x128xf32>
    %847 = vector.broadcast %528 : f32 to vector<8x128xf32>
    %848 = arith.mulf %847, %831 : vector<8x128xf32>
    %849 = arith.addf %846, %848 : vector<8x128xf32>
    %850 = vector.broadcast %574 : f32 to vector<8x128xf32>
    %851 = arith.mulf %850, %827 : vector<8x128xf32>
    %852 = arith.addf %816, %851 : vector<8x128xf32>
    %853 = vector.broadcast %575 : f32 to vector<8x128xf32>
    %854 = arith.mulf %853, %829 : vector<8x128xf32>
    %855 = arith.addf %852, %854 : vector<8x128xf32>
    %856 = vector.broadcast %576 : f32 to vector<8x128xf32>
    %857 = arith.mulf %856, %831 : vector<8x128xf32>
    %858 = arith.addf %855, %857 : vector<8x128xf32>
    %859 = vector.broadcast %622 : f32 to vector<8x128xf32>
    %860 = arith.mulf %859, %827 : vector<8x128xf32>
    %861 = arith.addf %825, %860 : vector<8x128xf32>
    %862 = vector.broadcast %623 : f32 to vector<8x128xf32>
    %863 = arith.mulf %862, %829 : vector<8x128xf32>
    %864 = arith.addf %861, %863 : vector<8x128xf32>
    %865 = vector.broadcast %624 : f32 to vector<8x128xf32>
    %866 = arith.mulf %865, %831 : vector<8x128xf32>
    %867 = arith.addf %864, %866 : vector<8x128xf32>
    %c1_285 = arith.constant 1 : index
    %c1_286 = arith.constant 1 : index
    %c0_287 = arith.constant 0 : index
    %c0_288 = arith.constant 0 : index
    %868 = vector.load %arg5[%c1_285, %c1_286, %c0_287, %c0_288] : memref<4x4x10x128xf32, #tpu.memory_space<vmem>>, vector<1x1x8x128xf32>
    %869 = vector.shape_cast %868 : vector<1x1x8x128xf32> to vector<8x128xf32>
    %c1_289 = arith.constant 1 : index
    %c1_290 = arith.constant 1 : index
    %c1_291 = arith.constant 1 : index
    %c0_292 = arith.constant 0 : index
    %870 = vector.load %arg5[%c1_289, %c1_290, %c1_291, %c0_292] : memref<4x4x10x128xf32, #tpu.memory_space<vmem>>, vector<1x1x8x128xf32>
    %871 = vector.shape_cast %870 : vector<1x1x8x128xf32> to vector<8x128xf32>
    %c1_293 = arith.constant 1 : index
    %c1_294 = arith.constant 1 : index
    %c2_295 = arith.constant 2 : index
    %c0_296 = arith.constant 0 : index
    %872 = vector.load %arg5[%c1_293, %c1_294, %c2_295, %c0_296] : memref<4x4x10x128xf32, #tpu.memory_space<vmem>>, vector<1x1x8x128xf32>
    %873 = vector.shape_cast %872 : vector<1x1x8x128xf32> to vector<8x128xf32>
    %874 = vector.broadcast %481 : f32 to vector<8x128xf32>
    %875 = arith.mulf %874, %869 : vector<8x128xf32>
    %876 = arith.addf %840, %875 : vector<8x128xf32>
    %877 = vector.broadcast %482 : f32 to vector<8x128xf32>
    %878 = arith.mulf %877, %871 : vector<8x128xf32>
    %879 = arith.addf %876, %878 : vector<8x128xf32>
    %880 = vector.broadcast %483 : f32 to vector<8x128xf32>
    %881 = arith.mulf %880, %873 : vector<8x128xf32>
    %882 = arith.addf %879, %881 : vector<8x128xf32>
    %883 = vector.broadcast %529 : f32 to vector<8x128xf32>
    %884 = arith.mulf %883, %869 : vector<8x128xf32>
    %885 = arith.addf %849, %884 : vector<8x128xf32>
    %886 = vector.broadcast %530 : f32 to vector<8x128xf32>
    %887 = arith.mulf %886, %871 : vector<8x128xf32>
    %888 = arith.addf %885, %887 : vector<8x128xf32>
    %889 = vector.broadcast %531 : f32 to vector<8x128xf32>
    %890 = arith.mulf %889, %873 : vector<8x128xf32>
    %891 = arith.addf %888, %890 : vector<8x128xf32>
    %892 = vector.broadcast %577 : f32 to vector<8x128xf32>
    %893 = arith.mulf %892, %869 : vector<8x128xf32>
    %894 = arith.addf %858, %893 : vector<8x128xf32>
    %895 = vector.broadcast %578 : f32 to vector<8x128xf32>
    %896 = arith.mulf %895, %871 : vector<8x128xf32>
    %897 = arith.addf %894, %896 : vector<8x128xf32>
    %898 = vector.broadcast %579 : f32 to vector<8x128xf32>
    %899 = arith.mulf %898, %873 : vector<8x128xf32>
    %900 = arith.addf %897, %899 : vector<8x128xf32>
    %901 = vector.broadcast %625 : f32 to vector<8x128xf32>
    %902 = arith.mulf %901, %869 : vector<8x128xf32>
    %903 = arith.addf %867, %902 : vector<8x128xf32>
    %904 = vector.broadcast %626 : f32 to vector<8x128xf32>
    %905 = arith.mulf %904, %871 : vector<8x128xf32>
    %906 = arith.addf %903, %905 : vector<8x128xf32>
    %907 = vector.broadcast %627 : f32 to vector<8x128xf32>
    %908 = arith.mulf %907, %873 : vector<8x128xf32>
    %909 = arith.addf %906, %908 : vector<8x128xf32>
    %c1_297 = arith.constant 1 : index
    %c2_298 = arith.constant 2 : index
    %c0_299 = arith.constant 0 : index
    %c0_300 = arith.constant 0 : index
    %910 = vector.load %arg5[%c1_297, %c2_298, %c0_299, %c0_300] : memref<4x4x10x128xf32, #tpu.memory_space<vmem>>, vector<1x1x8x128xf32>
    %911 = vector.shape_cast %910 : vector<1x1x8x128xf32> to vector<8x128xf32>
    %c1_301 = arith.constant 1 : index
    %c2_302 = arith.constant 2 : index
    %c1_303 = arith.constant 1 : index
    %c0_304 = arith.constant 0 : index
    %912 = vector.load %arg5[%c1_301, %c2_302, %c1_303, %c0_304] : memref<4x4x10x128xf32, #tpu.memory_space<vmem>>, vector<1x1x8x128xf32>
    %913 = vector.shape_cast %912 : vector<1x1x8x128xf32> to vector<8x128xf32>
    %c1_305 = arith.constant 1 : index
    %c2_306 = arith.constant 2 : index
    %c2_307 = arith.constant 2 : index
    %c0_308 = arith.constant 0 : index
    %914 = vector.load %arg5[%c1_305, %c2_306, %c2_307, %c0_308] : memref<4x4x10x128xf32, #tpu.memory_space<vmem>>, vector<1x1x8x128xf32>
    %915 = vector.shape_cast %914 : vector<1x1x8x128xf32> to vector<8x128xf32>
    %916 = vector.broadcast %484 : f32 to vector<8x128xf32>
    %917 = arith.mulf %916, %911 : vector<8x128xf32>
    %918 = arith.addf %882, %917 : vector<8x128xf32>
    %919 = vector.broadcast %485 : f32 to vector<8x128xf32>
    %920 = arith.mulf %919, %913 : vector<8x128xf32>
    %921 = arith.addf %918, %920 : vector<8x128xf32>
    %922 = vector.broadcast %486 : f32 to vector<8x128xf32>
    %923 = arith.mulf %922, %915 : vector<8x128xf32>
    %924 = arith.addf %921, %923 : vector<8x128xf32>
    %925 = vector.broadcast %532 : f32 to vector<8x128xf32>
    %926 = arith.mulf %925, %911 : vector<8x128xf32>
    %927 = arith.addf %891, %926 : vector<8x128xf32>
    %928 = vector.broadcast %533 : f32 to vector<8x128xf32>
    %929 = arith.mulf %928, %913 : vector<8x128xf32>
    %930 = arith.addf %927, %929 : vector<8x128xf32>
    %931 = vector.broadcast %534 : f32 to vector<8x128xf32>
    %932 = arith.mulf %931, %915 : vector<8x128xf32>
    %933 = arith.addf %930, %932 : vector<8x128xf32>
    %934 = vector.broadcast %580 : f32 to vector<8x128xf32>
    %935 = arith.mulf %934, %911 : vector<8x128xf32>
    %936 = arith.addf %900, %935 : vector<8x128xf32>
    %937 = vector.broadcast %581 : f32 to vector<8x128xf32>
    %938 = arith.mulf %937, %913 : vector<8x128xf32>
    %939 = arith.addf %936, %938 : vector<8x128xf32>
    %940 = vector.broadcast %582 : f32 to vector<8x128xf32>
    %941 = arith.mulf %940, %915 : vector<8x128xf32>
    %942 = arith.addf %939, %941 : vector<8x128xf32>
    %943 = vector.broadcast %628 : f32 to vector<8x128xf32>
    %944 = arith.mulf %943, %911 : vector<8x128xf32>
    %945 = arith.addf %909, %944 : vector<8x128xf32>
    %946 = vector.broadcast %629 : f32 to vector<8x128xf32>
    %947 = arith.mulf %946, %913 : vector<8x128xf32>
    %948 = arith.addf %945, %947 : vector<8x128xf32>
    %949 = vector.broadcast %630 : f32 to vector<8x128xf32>
    %950 = arith.mulf %949, %915 : vector<8x128xf32>
    %951 = arith.addf %948, %950 : vector<8x128xf32>
    %c1_309 = arith.constant 1 : index
    %c3_310 = arith.constant 3 : index
    %c0_311 = arith.constant 0 : index
    %c0_312 = arith.constant 0 : index
    %952 = vector.load %arg5[%c1_309, %c3_310, %c0_311, %c0_312] : memref<4x4x10x128xf32, #tpu.memory_space<vmem>>, vector<1x1x8x128xf32>
    %953 = vector.shape_cast %952 : vector<1x1x8x128xf32> to vector<8x128xf32>
    %c1_313 = arith.constant 1 : index
    %c3_314 = arith.constant 3 : index
    %c1_315 = arith.constant 1 : index
    %c0_316 = arith.constant 0 : index
    %954 = vector.load %arg5[%c1_313, %c3_314, %c1_315, %c0_316] : memref<4x4x10x128xf32, #tpu.memory_space<vmem>>, vector<1x1x8x128xf32>
    %955 = vector.shape_cast %954 : vector<1x1x8x128xf32> to vector<8x128xf32>
    %c1_317 = arith.constant 1 : index
    %c3_318 = arith.constant 3 : index
    %c2_319 = arith.constant 2 : index
    %c0_320 = arith.constant 0 : index
    %956 = vector.load %arg5[%c1_317, %c3_318, %c2_319, %c0_320] : memref<4x4x10x128xf32, #tpu.memory_space<vmem>>, vector<1x1x8x128xf32>
    %957 = vector.shape_cast %956 : vector<1x1x8x128xf32> to vector<8x128xf32>
    %958 = vector.broadcast %487 : f32 to vector<8x128xf32>
    %959 = arith.mulf %958, %953 : vector<8x128xf32>
    %960 = arith.addf %924, %959 : vector<8x128xf32>
    %961 = vector.broadcast %488 : f32 to vector<8x128xf32>
    %962 = arith.mulf %961, %955 : vector<8x128xf32>
    %963 = arith.addf %960, %962 : vector<8x128xf32>
    %964 = vector.broadcast %489 : f32 to vector<8x128xf32>
    %965 = arith.mulf %964, %957 : vector<8x128xf32>
    %966 = arith.addf %963, %965 : vector<8x128xf32>
    %967 = vector.broadcast %535 : f32 to vector<8x128xf32>
    %968 = arith.mulf %967, %953 : vector<8x128xf32>
    %969 = arith.addf %933, %968 : vector<8x128xf32>
    %970 = vector.broadcast %536 : f32 to vector<8x128xf32>
    %971 = arith.mulf %970, %955 : vector<8x128xf32>
    %972 = arith.addf %969, %971 : vector<8x128xf32>
    %973 = vector.broadcast %537 : f32 to vector<8x128xf32>
    %974 = arith.mulf %973, %957 : vector<8x128xf32>
    %975 = arith.addf %972, %974 : vector<8x128xf32>
    %976 = vector.broadcast %583 : f32 to vector<8x128xf32>
    %977 = arith.mulf %976, %953 : vector<8x128xf32>
    %978 = arith.addf %942, %977 : vector<8x128xf32>
    %979 = vector.broadcast %584 : f32 to vector<8x128xf32>
    %980 = arith.mulf %979, %955 : vector<8x128xf32>
    %981 = arith.addf %978, %980 : vector<8x128xf32>
    %982 = vector.broadcast %585 : f32 to vector<8x128xf32>
    %983 = arith.mulf %982, %957 : vector<8x128xf32>
    %984 = arith.addf %981, %983 : vector<8x128xf32>
    %985 = vector.broadcast %631 : f32 to vector<8x128xf32>
    %986 = arith.mulf %985, %953 : vector<8x128xf32>
    %987 = arith.addf %951, %986 : vector<8x128xf32>
    %988 = vector.broadcast %632 : f32 to vector<8x128xf32>
    %989 = arith.mulf %988, %955 : vector<8x128xf32>
    %990 = arith.addf %987, %989 : vector<8x128xf32>
    %991 = vector.broadcast %633 : f32 to vector<8x128xf32>
    %992 = arith.mulf %991, %957 : vector<8x128xf32>
    %993 = arith.addf %990, %992 : vector<8x128xf32>
    %c2_321 = arith.constant 2 : index
    %c0_322 = arith.constant 0 : index
    %c0_323 = arith.constant 0 : index
    %c0_324 = arith.constant 0 : index
    %994 = vector.load %arg5[%c2_321, %c0_322, %c0_323, %c0_324] : memref<4x4x10x128xf32, #tpu.memory_space<vmem>>, vector<1x1x8x128xf32>
    %995 = vector.shape_cast %994 : vector<1x1x8x128xf32> to vector<8x128xf32>
    %c2_325 = arith.constant 2 : index
    %c0_326 = arith.constant 0 : index
    %c1_327 = arith.constant 1 : index
    %c0_328 = arith.constant 0 : index
    %996 = vector.load %arg5[%c2_325, %c0_326, %c1_327, %c0_328] : memref<4x4x10x128xf32, #tpu.memory_space<vmem>>, vector<1x1x8x128xf32>
    %997 = vector.shape_cast %996 : vector<1x1x8x128xf32> to vector<8x128xf32>
    %c2_329 = arith.constant 2 : index
    %c0_330 = arith.constant 0 : index
    %c2_331 = arith.constant 2 : index
    %c0_332 = arith.constant 0 : index
    %998 = vector.load %arg5[%c2_329, %c0_330, %c2_331, %c0_332] : memref<4x4x10x128xf32, #tpu.memory_space<vmem>>, vector<1x1x8x128xf32>
    %999 = vector.shape_cast %998 : vector<1x1x8x128xf32> to vector<8x128xf32>
    %1000 = vector.broadcast %490 : f32 to vector<8x128xf32>
    %1001 = arith.mulf %1000, %995 : vector<8x128xf32>
    %1002 = arith.addf %966, %1001 : vector<8x128xf32>
    %1003 = vector.broadcast %491 : f32 to vector<8x128xf32>
    %1004 = arith.mulf %1003, %997 : vector<8x128xf32>
    %1005 = arith.addf %1002, %1004 : vector<8x128xf32>
    %1006 = vector.broadcast %492 : f32 to vector<8x128xf32>
    %1007 = arith.mulf %1006, %999 : vector<8x128xf32>
    %1008 = arith.addf %1005, %1007 : vector<8x128xf32>
    %1009 = vector.broadcast %538 : f32 to vector<8x128xf32>
    %1010 = arith.mulf %1009, %995 : vector<8x128xf32>
    %1011 = arith.addf %975, %1010 : vector<8x128xf32>
    %1012 = vector.broadcast %539 : f32 to vector<8x128xf32>
    %1013 = arith.mulf %1012, %997 : vector<8x128xf32>
    %1014 = arith.addf %1011, %1013 : vector<8x128xf32>
    %1015 = vector.broadcast %540 : f32 to vector<8x128xf32>
    %1016 = arith.mulf %1015, %999 : vector<8x128xf32>
    %1017 = arith.addf %1014, %1016 : vector<8x128xf32>
    %1018 = vector.broadcast %586 : f32 to vector<8x128xf32>
    %1019 = arith.mulf %1018, %995 : vector<8x128xf32>
    %1020 = arith.addf %984, %1019 : vector<8x128xf32>
    %1021 = vector.broadcast %587 : f32 to vector<8x128xf32>
    %1022 = arith.mulf %1021, %997 : vector<8x128xf32>
    %1023 = arith.addf %1020, %1022 : vector<8x128xf32>
    %1024 = vector.broadcast %588 : f32 to vector<8x128xf32>
    %1025 = arith.mulf %1024, %999 : vector<8x128xf32>
    %1026 = arith.addf %1023, %1025 : vector<8x128xf32>
    %1027 = vector.broadcast %634 : f32 to vector<8x128xf32>
    %1028 = arith.mulf %1027, %995 : vector<8x128xf32>
    %1029 = arith.addf %993, %1028 : vector<8x128xf32>
    %1030 = vector.broadcast %635 : f32 to vector<8x128xf32>
    %1031 = arith.mulf %1030, %997 : vector<8x128xf32>
    %1032 = arith.addf %1029, %1031 : vector<8x128xf32>
    %1033 = vector.broadcast %636 : f32 to vector<8x128xf32>
    %1034 = arith.mulf %1033, %999 : vector<8x128xf32>
    %1035 = arith.addf %1032, %1034 : vector<8x128xf32>
    %c2_333 = arith.constant 2 : index
    %c1_334 = arith.constant 1 : index
    %c0_335 = arith.constant 0 : index
    %c0_336 = arith.constant 0 : index
    %1036 = vector.load %arg5[%c2_333, %c1_334, %c0_335, %c0_336] : memref<4x4x10x128xf32, #tpu.memory_space<vmem>>, vector<1x1x8x128xf32>
    %1037 = vector.shape_cast %1036 : vector<1x1x8x128xf32> to vector<8x128xf32>
    %c2_337 = arith.constant 2 : index
    %c1_338 = arith.constant 1 : index
    %c1_339 = arith.constant 1 : index
    %c0_340 = arith.constant 0 : index
    %1038 = vector.load %arg5[%c2_337, %c1_338, %c1_339, %c0_340] : memref<4x4x10x128xf32, #tpu.memory_space<vmem>>, vector<1x1x8x128xf32>
    %1039 = vector.shape_cast %1038 : vector<1x1x8x128xf32> to vector<8x128xf32>
    %c2_341 = arith.constant 2 : index
    %c1_342 = arith.constant 1 : index
    %c2_343 = arith.constant 2 : index
    %c0_344 = arith.constant 0 : index
    %1040 = vector.load %arg5[%c2_341, %c1_342, %c2_343, %c0_344] : memref<4x4x10x128xf32, #tpu.memory_space<vmem>>, vector<1x1x8x128xf32>
    %1041 = vector.shape_cast %1040 : vector<1x1x8x128xf32> to vector<8x128xf32>
    %1042 = vector.broadcast %493 : f32 to vector<8x128xf32>
    %1043 = arith.mulf %1042, %1037 : vector<8x128xf32>
    %1044 = arith.addf %1008, %1043 : vector<8x128xf32>
    %1045 = vector.broadcast %494 : f32 to vector<8x128xf32>
    %1046 = arith.mulf %1045, %1039 : vector<8x128xf32>
    %1047 = arith.addf %1044, %1046 : vector<8x128xf32>
    %1048 = vector.broadcast %495 : f32 to vector<8x128xf32>
    %1049 = arith.mulf %1048, %1041 : vector<8x128xf32>
    %1050 = arith.addf %1047, %1049 : vector<8x128xf32>
    %1051 = vector.broadcast %541 : f32 to vector<8x128xf32>
    %1052 = arith.mulf %1051, %1037 : vector<8x128xf32>
    %1053 = arith.addf %1017, %1052 : vector<8x128xf32>
    %1054 = vector.broadcast %542 : f32 to vector<8x128xf32>
    %1055 = arith.mulf %1054, %1039 : vector<8x128xf32>
    %1056 = arith.addf %1053, %1055 : vector<8x128xf32>
    %1057 = vector.broadcast %543 : f32 to vector<8x128xf32>
    %1058 = arith.mulf %1057, %1041 : vector<8x128xf32>
    %1059 = arith.addf %1056, %1058 : vector<8x128xf32>
    %1060 = vector.broadcast %589 : f32 to vector<8x128xf32>
    %1061 = arith.mulf %1060, %1037 : vector<8x128xf32>
    %1062 = arith.addf %1026, %1061 : vector<8x128xf32>
    %1063 = vector.broadcast %590 : f32 to vector<8x128xf32>
    %1064 = arith.mulf %1063, %1039 : vector<8x128xf32>
    %1065 = arith.addf %1062, %1064 : vector<8x128xf32>
    %1066 = vector.broadcast %591 : f32 to vector<8x128xf32>
    %1067 = arith.mulf %1066, %1041 : vector<8x128xf32>
    %1068 = arith.addf %1065, %1067 : vector<8x128xf32>
    %1069 = vector.broadcast %637 : f32 to vector<8x128xf32>
    %1070 = arith.mulf %1069, %1037 : vector<8x128xf32>
    %1071 = arith.addf %1035, %1070 : vector<8x128xf32>
    %1072 = vector.broadcast %638 : f32 to vector<8x128xf32>
    %1073 = arith.mulf %1072, %1039 : vector<8x128xf32>
    %1074 = arith.addf %1071, %1073 : vector<8x128xf32>
    %1075 = vector.broadcast %639 : f32 to vector<8x128xf32>
    %1076 = arith.mulf %1075, %1041 : vector<8x128xf32>
    %1077 = arith.addf %1074, %1076 : vector<8x128xf32>
    %c2_345 = arith.constant 2 : index
    %c2_346 = arith.constant 2 : index
    %c0_347 = arith.constant 0 : index
    %c0_348 = arith.constant 0 : index
    %1078 = vector.load %arg5[%c2_345, %c2_346, %c0_347, %c0_348] : memref<4x4x10x128xf32, #tpu.memory_space<vmem>>, vector<1x1x8x128xf32>
    %1079 = vector.shape_cast %1078 : vector<1x1x8x128xf32> to vector<8x128xf32>
    %c2_349 = arith.constant 2 : index
    %c2_350 = arith.constant 2 : index
    %c1_351 = arith.constant 1 : index
    %c0_352 = arith.constant 0 : index
    %1080 = vector.load %arg5[%c2_349, %c2_350, %c1_351, %c0_352] : memref<4x4x10x128xf32, #tpu.memory_space<vmem>>, vector<1x1x8x128xf32>
    %1081 = vector.shape_cast %1080 : vector<1x1x8x128xf32> to vector<8x128xf32>
    %c2_353 = arith.constant 2 : index
    %c2_354 = arith.constant 2 : index
    %c2_355 = arith.constant 2 : index
    %c0_356 = arith.constant 0 : index
    %1082 = vector.load %arg5[%c2_353, %c2_354, %c2_355, %c0_356] : memref<4x4x10x128xf32, #tpu.memory_space<vmem>>, vector<1x1x8x128xf32>
    %1083 = vector.shape_cast %1082 : vector<1x1x8x128xf32> to vector<8x128xf32>
    %1084 = vector.broadcast %496 : f32 to vector<8x128xf32>
    %1085 = arith.mulf %1084, %1079 : vector<8x128xf32>
    %1086 = arith.addf %1050, %1085 : vector<8x128xf32>
    %1087 = vector.broadcast %497 : f32 to vector<8x128xf32>
    %1088 = arith.mulf %1087, %1081 : vector<8x128xf32>
    %1089 = arith.addf %1086, %1088 : vector<8x128xf32>
    %1090 = vector.broadcast %498 : f32 to vector<8x128xf32>
    %1091 = arith.mulf %1090, %1083 : vector<8x128xf32>
    %1092 = arith.addf %1089, %1091 : vector<8x128xf32>
    %1093 = vector.broadcast %544 : f32 to vector<8x128xf32>
    %1094 = arith.mulf %1093, %1079 : vector<8x128xf32>
    %1095 = arith.addf %1059, %1094 : vector<8x128xf32>
    %1096 = vector.broadcast %545 : f32 to vector<8x128xf32>
    %1097 = arith.mulf %1096, %1081 : vector<8x128xf32>
    %1098 = arith.addf %1095, %1097 : vector<8x128xf32>
    %1099 = vector.broadcast %546 : f32 to vector<8x128xf32>
    %1100 = arith.mulf %1099, %1083 : vector<8x128xf32>
    %1101 = arith.addf %1098, %1100 : vector<8x128xf32>
    %1102 = vector.broadcast %592 : f32 to vector<8x128xf32>
    %1103 = arith.mulf %1102, %1079 : vector<8x128xf32>
    %1104 = arith.addf %1068, %1103 : vector<8x128xf32>
    %1105 = vector.broadcast %593 : f32 to vector<8x128xf32>
    %1106 = arith.mulf %1105, %1081 : vector<8x128xf32>
    %1107 = arith.addf %1104, %1106 : vector<8x128xf32>
    %1108 = vector.broadcast %594 : f32 to vector<8x128xf32>
    %1109 = arith.mulf %1108, %1083 : vector<8x128xf32>
    %1110 = arith.addf %1107, %1109 : vector<8x128xf32>
    %1111 = vector.broadcast %640 : f32 to vector<8x128xf32>
    %1112 = arith.mulf %1111, %1079 : vector<8x128xf32>
    %1113 = arith.addf %1077, %1112 : vector<8x128xf32>
    %1114 = vector.broadcast %641 : f32 to vector<8x128xf32>
    %1115 = arith.mulf %1114, %1081 : vector<8x128xf32>
    %1116 = arith.addf %1113, %1115 : vector<8x128xf32>
    %1117 = vector.broadcast %642 : f32 to vector<8x128xf32>
    %1118 = arith.mulf %1117, %1083 : vector<8x128xf32>
    %1119 = arith.addf %1116, %1118 : vector<8x128xf32>
    %c2_357 = arith.constant 2 : index
    %c3_358 = arith.constant 3 : index
    %c0_359 = arith.constant 0 : index
    %c0_360 = arith.constant 0 : index
    %1120 = vector.load %arg5[%c2_357, %c3_358, %c0_359, %c0_360] : memref<4x4x10x128xf32, #tpu.memory_space<vmem>>, vector<1x1x8x128xf32>
    %1121 = vector.shape_cast %1120 : vector<1x1x8x128xf32> to vector<8x128xf32>
    %c2_361 = arith.constant 2 : index
    %c3_362 = arith.constant 3 : index
    %c1_363 = arith.constant 1 : index
    %c0_364 = arith.constant 0 : index
    %1122 = vector.load %arg5[%c2_361, %c3_362, %c1_363, %c0_364] : memref<4x4x10x128xf32, #tpu.memory_space<vmem>>, vector<1x1x8x128xf32>
    %1123 = vector.shape_cast %1122 : vector<1x1x8x128xf32> to vector<8x128xf32>
    %c2_365 = arith.constant 2 : index
    %c3_366 = arith.constant 3 : index
    %c2_367 = arith.constant 2 : index
    %c0_368 = arith.constant 0 : index
    %1124 = vector.load %arg5[%c2_365, %c3_366, %c2_367, %c0_368] : memref<4x4x10x128xf32, #tpu.memory_space<vmem>>, vector<1x1x8x128xf32>
    %1125 = vector.shape_cast %1124 : vector<1x1x8x128xf32> to vector<8x128xf32>
    %1126 = vector.broadcast %499 : f32 to vector<8x128xf32>
    %1127 = arith.mulf %1126, %1121 : vector<8x128xf32>
    %1128 = arith.addf %1092, %1127 : vector<8x128xf32>
    %1129 = vector.broadcast %500 : f32 to vector<8x128xf32>
    %1130 = arith.mulf %1129, %1123 : vector<8x128xf32>
    %1131 = arith.addf %1128, %1130 : vector<8x128xf32>
    %1132 = vector.broadcast %501 : f32 to vector<8x128xf32>
    %1133 = arith.mulf %1132, %1125 : vector<8x128xf32>
    %1134 = arith.addf %1131, %1133 : vector<8x128xf32>
    %1135 = vector.broadcast %547 : f32 to vector<8x128xf32>
    %1136 = arith.mulf %1135, %1121 : vector<8x128xf32>
    %1137 = arith.addf %1101, %1136 : vector<8x128xf32>
    %1138 = vector.broadcast %548 : f32 to vector<8x128xf32>
    %1139 = arith.mulf %1138, %1123 : vector<8x128xf32>
    %1140 = arith.addf %1137, %1139 : vector<8x128xf32>
    %1141 = vector.broadcast %549 : f32 to vector<8x128xf32>
    %1142 = arith.mulf %1141, %1125 : vector<8x128xf32>
    %1143 = arith.addf %1140, %1142 : vector<8x128xf32>
    %1144 = vector.broadcast %595 : f32 to vector<8x128xf32>
    %1145 = arith.mulf %1144, %1121 : vector<8x128xf32>
    %1146 = arith.addf %1110, %1145 : vector<8x128xf32>
    %1147 = vector.broadcast %596 : f32 to vector<8x128xf32>
    %1148 = arith.mulf %1147, %1123 : vector<8x128xf32>
    %1149 = arith.addf %1146, %1148 : vector<8x128xf32>
    %1150 = vector.broadcast %597 : f32 to vector<8x128xf32>
    %1151 = arith.mulf %1150, %1125 : vector<8x128xf32>
    %1152 = arith.addf %1149, %1151 : vector<8x128xf32>
    %1153 = vector.broadcast %643 : f32 to vector<8x128xf32>
    %1154 = arith.mulf %1153, %1121 : vector<8x128xf32>
    %1155 = arith.addf %1119, %1154 : vector<8x128xf32>
    %1156 = vector.broadcast %644 : f32 to vector<8x128xf32>
    %1157 = arith.mulf %1156, %1123 : vector<8x128xf32>
    %1158 = arith.addf %1155, %1157 : vector<8x128xf32>
    %1159 = vector.broadcast %645 : f32 to vector<8x128xf32>
    %1160 = arith.mulf %1159, %1125 : vector<8x128xf32>
    %1161 = arith.addf %1158, %1160 : vector<8x128xf32>
    %c3_369 = arith.constant 3 : index
    %c0_370 = arith.constant 0 : index
    %c0_371 = arith.constant 0 : index
    %c0_372 = arith.constant 0 : index
    %1162 = vector.load %arg5[%c3_369, %c0_370, %c0_371, %c0_372] : memref<4x4x10x128xf32, #tpu.memory_space<vmem>>, vector<1x1x8x128xf32>
    %1163 = vector.shape_cast %1162 : vector<1x1x8x128xf32> to vector<8x128xf32>
    %c3_373 = arith.constant 3 : index
    %c0_374 = arith.constant 0 : index
    %c1_375 = arith.constant 1 : index
    %c0_376 = arith.constant 0 : index
    %1164 = vector.load %arg5[%c3_373, %c0_374, %c1_375, %c0_376] : memref<4x4x10x128xf32, #tpu.memory_space<vmem>>, vector<1x1x8x128xf32>
    %1165 = vector.shape_cast %1164 : vector<1x1x8x128xf32> to vector<8x128xf32>
    %c3_377 = arith.constant 3 : index
    %c0_378 = arith.constant 0 : index
    %c2_379 = arith.constant 2 : index
    %c0_380 = arith.constant 0 : index
    %1166 = vector.load %arg5[%c3_377, %c0_378, %c2_379, %c0_380] : memref<4x4x10x128xf32, #tpu.memory_space<vmem>>, vector<1x1x8x128xf32>
    %1167 = vector.shape_cast %1166 : vector<1x1x8x128xf32> to vector<8x128xf32>
    %1168 = vector.broadcast %502 : f32 to vector<8x128xf32>
    %1169 = arith.mulf %1168, %1163 : vector<8x128xf32>
    %1170 = arith.addf %1134, %1169 : vector<8x128xf32>
    %1171 = vector.broadcast %503 : f32 to vector<8x128xf32>
    %1172 = arith.mulf %1171, %1165 : vector<8x128xf32>
    %1173 = arith.addf %1170, %1172 : vector<8x128xf32>
    %1174 = vector.broadcast %504 : f32 to vector<8x128xf32>
    %1175 = arith.mulf %1174, %1167 : vector<8x128xf32>
    %1176 = arith.addf %1173, %1175 : vector<8x128xf32>
    %1177 = vector.broadcast %550 : f32 to vector<8x128xf32>
    %1178 = arith.mulf %1177, %1163 : vector<8x128xf32>
    %1179 = arith.addf %1143, %1178 : vector<8x128xf32>
    %1180 = vector.broadcast %551 : f32 to vector<8x128xf32>
    %1181 = arith.mulf %1180, %1165 : vector<8x128xf32>
    %1182 = arith.addf %1179, %1181 : vector<8x128xf32>
    %1183 = vector.broadcast %552 : f32 to vector<8x128xf32>
    %1184 = arith.mulf %1183, %1167 : vector<8x128xf32>
    %1185 = arith.addf %1182, %1184 : vector<8x128xf32>
    %1186 = vector.broadcast %598 : f32 to vector<8x128xf32>
    %1187 = arith.mulf %1186, %1163 : vector<8x128xf32>
    %1188 = arith.addf %1152, %1187 : vector<8x128xf32>
    %1189 = vector.broadcast %599 : f32 to vector<8x128xf32>
    %1190 = arith.mulf %1189, %1165 : vector<8x128xf32>
    %1191 = arith.addf %1188, %1190 : vector<8x128xf32>
    %1192 = vector.broadcast %600 : f32 to vector<8x128xf32>
    %1193 = arith.mulf %1192, %1167 : vector<8x128xf32>
    %1194 = arith.addf %1191, %1193 : vector<8x128xf32>
    %1195 = vector.broadcast %646 : f32 to vector<8x128xf32>
    %1196 = arith.mulf %1195, %1163 : vector<8x128xf32>
    %1197 = arith.addf %1161, %1196 : vector<8x128xf32>
    %1198 = vector.broadcast %647 : f32 to vector<8x128xf32>
    %1199 = arith.mulf %1198, %1165 : vector<8x128xf32>
    %1200 = arith.addf %1197, %1199 : vector<8x128xf32>
    %1201 = vector.broadcast %648 : f32 to vector<8x128xf32>
    %1202 = arith.mulf %1201, %1167 : vector<8x128xf32>
    %1203 = arith.addf %1200, %1202 : vector<8x128xf32>
    %c3_381 = arith.constant 3 : index
    %c1_382 = arith.constant 1 : index
    %c0_383 = arith.constant 0 : index
    %c0_384 = arith.constant 0 : index
    %1204 = vector.load %arg5[%c3_381, %c1_382, %c0_383, %c0_384] : memref<4x4x10x128xf32, #tpu.memory_space<vmem>>, vector<1x1x8x128xf32>
    %1205 = vector.shape_cast %1204 : vector<1x1x8x128xf32> to vector<8x128xf32>
    %c3_385 = arith.constant 3 : index
    %c1_386 = arith.constant 1 : index
    %c1_387 = arith.constant 1 : index
    %c0_388 = arith.constant 0 : index
    %1206 = vector.load %arg5[%c3_385, %c1_386, %c1_387, %c0_388] : memref<4x4x10x128xf32, #tpu.memory_space<vmem>>, vector<1x1x8x128xf32>
    %1207 = vector.shape_cast %1206 : vector<1x1x8x128xf32> to vector<8x128xf32>
    %c3_389 = arith.constant 3 : index
    %c1_390 = arith.constant 1 : index
    %c2_391 = arith.constant 2 : index
    %c0_392 = arith.constant 0 : index
    %1208 = vector.load %arg5[%c3_389, %c1_390, %c2_391, %c0_392] : memref<4x4x10x128xf32, #tpu.memory_space<vmem>>, vector<1x1x8x128xf32>
    %1209 = vector.shape_cast %1208 : vector<1x1x8x128xf32> to vector<8x128xf32>
    %1210 = vector.broadcast %505 : f32 to vector<8x128xf32>
    %1211 = arith.mulf %1210, %1205 : vector<8x128xf32>
    %1212 = arith.addf %1176, %1211 : vector<8x128xf32>
    %1213 = vector.broadcast %506 : f32 to vector<8x128xf32>
    %1214 = arith.mulf %1213, %1207 : vector<8x128xf32>
    %1215 = arith.addf %1212, %1214 : vector<8x128xf32>
    %1216 = vector.broadcast %507 : f32 to vector<8x128xf32>
    %1217 = arith.mulf %1216, %1209 : vector<8x128xf32>
    %1218 = arith.addf %1215, %1217 : vector<8x128xf32>
    %1219 = vector.broadcast %553 : f32 to vector<8x128xf32>
    %1220 = arith.mulf %1219, %1205 : vector<8x128xf32>
    %1221 = arith.addf %1185, %1220 : vector<8x128xf32>
    %1222 = vector.broadcast %554 : f32 to vector<8x128xf32>
    %1223 = arith.mulf %1222, %1207 : vector<8x128xf32>
    %1224 = arith.addf %1221, %1223 : vector<8x128xf32>
    %1225 = vector.broadcast %555 : f32 to vector<8x128xf32>
    %1226 = arith.mulf %1225, %1209 : vector<8x128xf32>
    %1227 = arith.addf %1224, %1226 : vector<8x128xf32>
    %1228 = vector.broadcast %601 : f32 to vector<8x128xf32>
    %1229 = arith.mulf %1228, %1205 : vector<8x128xf32>
    %1230 = arith.addf %1194, %1229 : vector<8x128xf32>
    %1231 = vector.broadcast %602 : f32 to vector<8x128xf32>
    %1232 = arith.mulf %1231, %1207 : vector<8x128xf32>
    %1233 = arith.addf %1230, %1232 : vector<8x128xf32>
    %1234 = vector.broadcast %603 : f32 to vector<8x128xf32>
    %1235 = arith.mulf %1234, %1209 : vector<8x128xf32>
    %1236 = arith.addf %1233, %1235 : vector<8x128xf32>
    %1237 = vector.broadcast %649 : f32 to vector<8x128xf32>
    %1238 = arith.mulf %1237, %1205 : vector<8x128xf32>
    %1239 = arith.addf %1203, %1238 : vector<8x128xf32>
    %1240 = vector.broadcast %650 : f32 to vector<8x128xf32>
    %1241 = arith.mulf %1240, %1207 : vector<8x128xf32>
    %1242 = arith.addf %1239, %1241 : vector<8x128xf32>
    %1243 = vector.broadcast %651 : f32 to vector<8x128xf32>
    %1244 = arith.mulf %1243, %1209 : vector<8x128xf32>
    %1245 = arith.addf %1242, %1244 : vector<8x128xf32>
    %c3_393 = arith.constant 3 : index
    %c2_394 = arith.constant 2 : index
    %c0_395 = arith.constant 0 : index
    %c0_396 = arith.constant 0 : index
    %1246 = vector.load %arg5[%c3_393, %c2_394, %c0_395, %c0_396] : memref<4x4x10x128xf32, #tpu.memory_space<vmem>>, vector<1x1x8x128xf32>
    %1247 = vector.shape_cast %1246 : vector<1x1x8x128xf32> to vector<8x128xf32>
    %c3_397 = arith.constant 3 : index
    %c2_398 = arith.constant 2 : index
    %c1_399 = arith.constant 1 : index
    %c0_400 = arith.constant 0 : index
    %1248 = vector.load %arg5[%c3_397, %c2_398, %c1_399, %c0_400] : memref<4x4x10x128xf32, #tpu.memory_space<vmem>>, vector<1x1x8x128xf32>
    %1249 = vector.shape_cast %1248 : vector<1x1x8x128xf32> to vector<8x128xf32>
    %c3_401 = arith.constant 3 : index
    %c2_402 = arith.constant 2 : index
    %c2_403 = arith.constant 2 : index
    %c0_404 = arith.constant 0 : index
    %1250 = vector.load %arg5[%c3_401, %c2_402, %c2_403, %c0_404] : memref<4x4x10x128xf32, #tpu.memory_space<vmem>>, vector<1x1x8x128xf32>
    %1251 = vector.shape_cast %1250 : vector<1x1x8x128xf32> to vector<8x128xf32>
    %1252 = vector.broadcast %508 : f32 to vector<8x128xf32>
    %1253 = arith.mulf %1252, %1247 : vector<8x128xf32>
    %1254 = arith.addf %1218, %1253 : vector<8x128xf32>
    %1255 = vector.broadcast %509 : f32 to vector<8x128xf32>
    %1256 = arith.mulf %1255, %1249 : vector<8x128xf32>
    %1257 = arith.addf %1254, %1256 : vector<8x128xf32>
    %1258 = vector.broadcast %510 : f32 to vector<8x128xf32>
    %1259 = arith.mulf %1258, %1251 : vector<8x128xf32>
    %1260 = arith.addf %1257, %1259 : vector<8x128xf32>
    %1261 = vector.broadcast %556 : f32 to vector<8x128xf32>
    %1262 = arith.mulf %1261, %1247 : vector<8x128xf32>
    %1263 = arith.addf %1227, %1262 : vector<8x128xf32>
    %1264 = vector.broadcast %557 : f32 to vector<8x128xf32>
    %1265 = arith.mulf %1264, %1249 : vector<8x128xf32>
    %1266 = arith.addf %1263, %1265 : vector<8x128xf32>
    %1267 = vector.broadcast %558 : f32 to vector<8x128xf32>
    %1268 = arith.mulf %1267, %1251 : vector<8x128xf32>
    %1269 = arith.addf %1266, %1268 : vector<8x128xf32>
    %1270 = vector.broadcast %604 : f32 to vector<8x128xf32>
    %1271 = arith.mulf %1270, %1247 : vector<8x128xf32>
    %1272 = arith.addf %1236, %1271 : vector<8x128xf32>
    %1273 = vector.broadcast %605 : f32 to vector<8x128xf32>
    %1274 = arith.mulf %1273, %1249 : vector<8x128xf32>
    %1275 = arith.addf %1272, %1274 : vector<8x128xf32>
    %1276 = vector.broadcast %606 : f32 to vector<8x128xf32>
    %1277 = arith.mulf %1276, %1251 : vector<8x128xf32>
    %1278 = arith.addf %1275, %1277 : vector<8x128xf32>
    %1279 = vector.broadcast %652 : f32 to vector<8x128xf32>
    %1280 = arith.mulf %1279, %1247 : vector<8x128xf32>
    %1281 = arith.addf %1245, %1280 : vector<8x128xf32>
    %1282 = vector.broadcast %653 : f32 to vector<8x128xf32>
    %1283 = arith.mulf %1282, %1249 : vector<8x128xf32>
    %1284 = arith.addf %1281, %1283 : vector<8x128xf32>
    %1285 = vector.broadcast %654 : f32 to vector<8x128xf32>
    %1286 = arith.mulf %1285, %1251 : vector<8x128xf32>
    %1287 = arith.addf %1284, %1286 : vector<8x128xf32>
    %c3_405 = arith.constant 3 : index
    %c3_406 = arith.constant 3 : index
    %c0_407 = arith.constant 0 : index
    %c0_408 = arith.constant 0 : index
    %1288 = vector.load %arg5[%c3_405, %c3_406, %c0_407, %c0_408] : memref<4x4x10x128xf32, #tpu.memory_space<vmem>>, vector<1x1x8x128xf32>
    %1289 = vector.shape_cast %1288 : vector<1x1x8x128xf32> to vector<8x128xf32>
    %c3_409 = arith.constant 3 : index
    %c3_410 = arith.constant 3 : index
    %c1_411 = arith.constant 1 : index
    %c0_412 = arith.constant 0 : index
    %1290 = vector.load %arg5[%c3_409, %c3_410, %c1_411, %c0_412] : memref<4x4x10x128xf32, #tpu.memory_space<vmem>>, vector<1x1x8x128xf32>
    %1291 = vector.shape_cast %1290 : vector<1x1x8x128xf32> to vector<8x128xf32>
    %c3_413 = arith.constant 3 : index
    %c3_414 = arith.constant 3 : index
    %c2_415 = arith.constant 2 : index
    %c0_416 = arith.constant 0 : index
    %1292 = vector.load %arg5[%c3_413, %c3_414, %c2_415, %c0_416] : memref<4x4x10x128xf32, #tpu.memory_space<vmem>>, vector<1x1x8x128xf32>
    %1293 = vector.shape_cast %1292 : vector<1x1x8x128xf32> to vector<8x128xf32>
    %1294 = vector.broadcast %511 : f32 to vector<8x128xf32>
    %1295 = arith.mulf %1294, %1289 : vector<8x128xf32>
    %1296 = arith.addf %1260, %1295 : vector<8x128xf32>
    %1297 = vector.broadcast %512 : f32 to vector<8x128xf32>
    %1298 = arith.mulf %1297, %1291 : vector<8x128xf32>
    %1299 = arith.addf %1296, %1298 : vector<8x128xf32>
    %1300 = vector.broadcast %513 : f32 to vector<8x128xf32>
    %1301 = arith.mulf %1300, %1293 : vector<8x128xf32>
    %1302 = arith.addf %1299, %1301 : vector<8x128xf32>
    %1303 = vector.broadcast %559 : f32 to vector<8x128xf32>
    %1304 = arith.mulf %1303, %1289 : vector<8x128xf32>
    %1305 = arith.addf %1269, %1304 : vector<8x128xf32>
    %1306 = vector.broadcast %560 : f32 to vector<8x128xf32>
    %1307 = arith.mulf %1306, %1291 : vector<8x128xf32>
    %1308 = arith.addf %1305, %1307 : vector<8x128xf32>
    %1309 = vector.broadcast %561 : f32 to vector<8x128xf32>
    %1310 = arith.mulf %1309, %1293 : vector<8x128xf32>
    %1311 = arith.addf %1308, %1310 : vector<8x128xf32>
    %1312 = vector.broadcast %607 : f32 to vector<8x128xf32>
    %1313 = arith.mulf %1312, %1289 : vector<8x128xf32>
    %1314 = arith.addf %1278, %1313 : vector<8x128xf32>
    %1315 = vector.broadcast %608 : f32 to vector<8x128xf32>
    %1316 = arith.mulf %1315, %1291 : vector<8x128xf32>
    %1317 = arith.addf %1314, %1316 : vector<8x128xf32>
    %1318 = vector.broadcast %609 : f32 to vector<8x128xf32>
    %1319 = arith.mulf %1318, %1293 : vector<8x128xf32>
    %1320 = arith.addf %1317, %1319 : vector<8x128xf32>
    %1321 = vector.broadcast %655 : f32 to vector<8x128xf32>
    %1322 = arith.mulf %1321, %1289 : vector<8x128xf32>
    %1323 = arith.addf %1287, %1322 : vector<8x128xf32>
    %1324 = vector.broadcast %656 : f32 to vector<8x128xf32>
    %1325 = arith.mulf %1324, %1291 : vector<8x128xf32>
    %1326 = arith.addf %1323, %1325 : vector<8x128xf32>
    %1327 = vector.broadcast %657 : f32 to vector<8x128xf32>
    %1328 = arith.mulf %1327, %1293 : vector<8x128xf32>
    %1329 = arith.addf %1326, %1328 : vector<8x128xf32>
    %1330 = vector.broadcast %658 : f32 to vector<8x128xf32>
    %1331 = arith.addf %1302, %1330 : vector<8x128xf32>
    %cst_417 = arith.constant 0.000000e+00 : f32
    %1332 = vector.broadcast %cst_417 : f32 to vector<8x128xf32>
    %1333 = arith.maximumf %1331, %1332 : vector<8x128xf32>
    %c0_418 = arith.constant 0 : index
    %c0_419 = arith.constant 0 : index
    %c1_420 = arith.constant 1 : index
    %c0_421 = arith.constant 0 : index
    %1334 = vector.load %arg6[%c0_418, %c0_419, %c1_420, %c0_421] : memref<4x2x10x128xf32, #tpu.memory_space<vmem>>, vector<1x1x8x128xf32>
    %1335 = vector.shape_cast %1334 : vector<1x1x8x128xf32> to vector<8x128xf32>
    %1336 = vector.shape_cast %1333 : vector<8x128xf32> to vector<1x1x8x128xf32>
    tpu.vector_store %arg6[%c0_418, %c0_419, %c1_420, %c0_421], %1336 {strides = array<i32>} : memref<4x2x10x128xf32, #tpu.memory_space<vmem>>, vector<1x1x8x128xf32>,
    %1337 = vector.broadcast %659 : f32 to vector<8x128xf32>
    %1338 = arith.addf %1311, %1337 : vector<8x128xf32>
    %cst_422 = arith.constant 0.000000e+00 : f32
    %1339 = vector.broadcast %cst_422 : f32 to vector<8x128xf32>
    %1340 = arith.maximumf %1338, %1339 : vector<8x128xf32>
    %c1_423 = arith.constant 1 : index
    %c0_424 = arith.constant 0 : index
    %c1_425 = arith.constant 1 : index
    %c0_426 = arith.constant 0 : index
    %1341 = vector.load %arg6[%c1_423, %c0_424, %c1_425, %c0_426] : memref<4x2x10x128xf32, #tpu.memory_space<vmem>>, vector<1x1x8x128xf32>
    %1342 = vector.shape_cast %1341 : vector<1x1x8x128xf32> to vector<8x128xf32>
    %1343 = vector.shape_cast %1340 : vector<8x128xf32> to vector<1x1x8x128xf32>
    tpu.vector_store %arg6[%c1_423, %c0_424, %c1_425, %c0_426], %1343 {strides = array<i32>} : memref<4x2x10x128xf32, #tpu.memory_space<vmem>>, vector<1x1x8x128xf32>,
    %1344 = vector.broadcast %660 : f32 to vector<8x128xf32>
    %1345 = arith.addf %1320, %1344 : vector<8x128xf32>
    %cst_427 = arith.constant 0.000000e+00 : f32
    %1346 = vector.broadcast %cst_427 : f32 to vector<8x128xf32>
    %1347 = arith.maximumf %1345, %1346 : vector<8x128xf32>
    %c2_428 = arith.constant 2 : index
    %c0_429 = arith.constant 0 : index
    %c1_430 = arith.constant 1 : index
    %c0_431 = arith.constant 0 : index
    %1348 = vector.load %arg6[%c2_428, %c0_429, %c1_430, %c0_431] : memref<4x2x10x128xf32, #tpu.memory_space<vmem>>, vector<1x1x8x128xf32>
    %1349 = vector.shape_cast %1348 : vector<1x1x8x128xf32> to vector<8x128xf32>
    %1350 = vector.shape_cast %1347 : vector<8x128xf32> to vector<1x1x8x128xf32>
    tpu.vector_store %arg6[%c2_428, %c0_429, %c1_430, %c0_431], %1350 {strides = array<i32>} : memref<4x2x10x128xf32, #tpu.memory_space<vmem>>, vector<1x1x8x128xf32>,
    %1351 = vector.broadcast %661 : f32 to vector<8x128xf32>
    %1352 = arith.addf %1329, %1351 : vector<8x128xf32>
    %cst_432 = arith.constant 0.000000e+00 : f32
    %1353 = vector.broadcast %cst_432 : f32 to vector<8x128xf32>
    %1354 = arith.maximumf %1352, %1353 : vector<8x128xf32>
    %c3_433 = arith.constant 3 : index
    %c0_434 = arith.constant 0 : index
    %c1_435 = arith.constant 1 : index
    %c0_436 = arith.constant 0 : index
    %1355 = vector.load %arg6[%c3_433, %c0_434, %c1_435, %c0_436] : memref<4x2x10x128xf32, #tpu.memory_space<vmem>>, vector<1x1x8x128xf32>
    %1356 = vector.shape_cast %1355 : vector<1x1x8x128xf32> to vector<8x128xf32>
    %1357 = vector.shape_cast %1354 : vector<8x128xf32> to vector<1x1x8x128xf32>
    tpu.vector_store %arg6[%c3_433, %c0_434, %c1_435, %c0_436], %1357 {strides = array<i32>} : memref<4x2x10x128xf32, #tpu.memory_space<vmem>>, vector<1x1x8x128xf32>,
    %c216 = arith.constant 216 : index
    %1358 = memref.load %arg2[%c216] : memref<528xf32, #tpu.memory_space<smem>>
    %c217 = arith.constant 217 : index
    %1359 = memref.load %arg2[%c217] : memref<528xf32, #tpu.memory_space<smem>>
    %c218 = arith.constant 218 : index
    %1360 = memref.load %arg2[%c218] : memref<528xf32, #tpu.memory_space<smem>>
    %c219 = arith.constant 219 : index
    %1361 = memref.load %arg2[%c219] : memref<528xf32, #tpu.memory_space<smem>>
    %c220 = arith.constant 220 : index
    %1362 = memref.load %arg2[%c220] : memref<528xf32, #tpu.memory_space<smem>>
    %c221 = arith.constant 221 : index
    %1363 = memref.load %arg2[%c221] : memref<528xf32, #tpu.memory_space<smem>>
    %c222 = arith.constant 222 : index
    %1364 = memref.load %arg2[%c222] : memref<528xf32, #tpu.memory_space<smem>>
    %c223 = arith.constant 223 : index
    %1365 = memref.load %arg2[%c223] : memref<528xf32, #tpu.memory_space<smem>>
    %c224 = arith.constant 224 : index
    %1366 = memref.load %arg2[%c224] : memref<528xf32, #tpu.memory_space<smem>>
    %c225 = arith.constant 225 : index
    %1367 = memref.load %arg2[%c225] : memref<528xf32, #tpu.memory_space<smem>>
    %c226 = arith.constant 226 : index
    %1368 = memref.load %arg2[%c226] : memref<528xf32, #tpu.memory_space<smem>>
    %c227 = arith.constant 227 : index
    %1369 = memref.load %arg2[%c227] : memref<528xf32, #tpu.memory_space<smem>>
    %c228 = arith.constant 228 : index
    %1370 = memref.load %arg2[%c228] : memref<528xf32, #tpu.memory_space<smem>>
    %c229 = arith.constant 229 : index
    %1371 = memref.load %arg2[%c229] : memref<528xf32, #tpu.memory_space<smem>>
    %c230 = arith.constant 230 : index
    %1372 = memref.load %arg2[%c230] : memref<528xf32, #tpu.memory_space<smem>>
    %c231 = arith.constant 231 : index
    %1373 = memref.load %arg2[%c231] : memref<528xf32, #tpu.memory_space<smem>>
    %c232 = arith.constant 232 : index
    %1374 = memref.load %arg2[%c232] : memref<528xf32, #tpu.memory_space<smem>>
    %c233 = arith.constant 233 : index
    %1375 = memref.load %arg2[%c233] : memref<528xf32, #tpu.memory_space<smem>>
    %c234 = arith.constant 234 : index
    %1376 = memref.load %arg2[%c234] : memref<528xf32, #tpu.memory_space<smem>>
    %c235 = arith.constant 235 : index
    %1377 = memref.load %arg2[%c235] : memref<528xf32, #tpu.memory_space<smem>>
    %c236 = arith.constant 236 : index
    %1378 = memref.load %arg2[%c236] : memref<528xf32, #tpu.memory_space<smem>>
    %c237 = arith.constant 237 : index
    %1379 = memref.load %arg2[%c237] : memref<528xf32, #tpu.memory_space<smem>>
    %c238 = arith.constant 238 : index
    %1380 = memref.load %arg2[%c238] : memref<528xf32, #tpu.memory_space<smem>>
    %c239 = arith.constant 239 : index
    %1381 = memref.load %arg2[%c239] : memref<528xf32, #tpu.memory_space<smem>>
    %c8_437 = arith.constant 8 : index
    %1382 = memref.load %arg3[%c8_437] : memref<20xf32, #tpu.memory_space<smem>>
    %c9_438 = arith.constant 9 : index
    %1383 = memref.load %arg3[%c9_438] : memref<20xf32, #tpu.memory_space<smem>>
    %c10_439 = arith.constant 10 : index
    %1384 = memref.load %arg3[%c10_439] : memref<20xf32, #tpu.memory_space<smem>>
    %c11_440 = arith.constant 11 : index
    %1385 = memref.load %arg3[%c11_440] : memref<20xf32, #tpu.memory_space<smem>>
    %c0_441 = arith.constant 0 : index
    %c0_442 = arith.constant 0 : index
    %c8_443 = arith.constant 8 : index
    %c0_444 = arith.constant 0 : index
    %c0_445 = arith.constant 0 : index
    %1386 = vector.load %arg1[%c0_441, %c0_442, %c8_443, %c0_444, %c0_445] : memref<1x1x16x10x128xf32, #tpu.memory_space<vmem>>, vector<1x1x1x8x128xf32>
    %1387 = vector.shape_cast %1386 : vector<1x1x1x8x128xf32> to vector<8x128xf32>
    %c0_446 = arith.constant 0 : index
    %c0_447 = arith.constant 0 : index
    %c8_448 = arith.constant 8 : index
    %c1_449 = arith.constant 1 : index
    %c0_450 = arith.constant 0 : index
    %1388 = vector.load %arg1[%c0_446, %c0_447, %c8_448, %c1_449, %c0_450] : memref<1x1x16x10x128xf32, #tpu.memory_space<vmem>>, vector<1x1x1x8x128xf32>
    %1389 = vector.shape_cast %1388 : vector<1x1x1x8x128xf32> to vector<8x128xf32>
    %c0_451 = arith.constant 0 : index
    %c0_452 = arith.constant 0 : index
    %c8_453 = arith.constant 8 : index
    %c2_454 = arith.constant 2 : index
    %c0_455 = arith.constant 0 : index
    %1390 = vector.load %arg1[%c0_451, %c0_452, %c8_453, %c2_454, %c0_455] : memref<1x1x16x10x128xf32, #tpu.memory_space<vmem>>, vector<1x1x1x8x128xf32>
    %1391 = vector.shape_cast %1390 : vector<1x1x1x8x128xf32> to vector<8x128xf32>
    %1392 = vector.broadcast %1358 : f32 to vector<8x128xf32>
    %1393 = arith.mulf %1392, %1387 : vector<8x128xf32>
    %1394 = vector.broadcast %1359 : f32 to vector<8x128xf32>
    %1395 = arith.mulf %1394, %1389 : vector<8x128xf32>
    %1396 = arith.addf %1393, %1395 : vector<8x128xf32>
    %1397 = vector.broadcast %1360 : f32 to vector<8x128xf32>
    %1398 = arith.mulf %1397, %1391 : vector<8x128xf32>
    %1399 = arith.addf %1396, %1398 : vector<8x128xf32>
    %1400 = vector.broadcast %1364 : f32 to vector<8x128xf32>
    %1401 = arith.mulf %1400, %1387 : vector<8x128xf32>
    %1402 = vector.broadcast %1365 : f32 to vector<8x128xf32>
    %1403 = arith.mulf %1402, %1389 : vector<8x128xf32>
    %1404 = arith.addf %1401, %1403 : vector<8x128xf32>
    %1405 = vector.broadcast %1366 : f32 to vector<8x128xf32>
    %1406 = arith.mulf %1405, %1391 : vector<8x128xf32>
    %1407 = arith.addf %1404, %1406 : vector<8x128xf32>
    %1408 = vector.broadcast %1370 : f32 to vector<8x128xf32>
    %1409 = arith.mulf %1408, %1387 : vector<8x128xf32>
    %1410 = vector.broadcast %1371 : f32 to vector<8x128xf32>
    %1411 = arith.mulf %1410, %1389 : vector<8x128xf32>
    %1412 = arith.addf %1409, %1411 : vector<8x128xf32>
    %1413 = vector.broadcast %1372 : f32 to vector<8x128xf32>
    %1414 = arith.mulf %1413, %1391 : vector<8x128xf32>
    %1415 = arith.addf %1412, %1414 : vector<8x128xf32>
    %1416 = vector.broadcast %1376 : f32 to vector<8x128xf32>
    %1417 = arith.mulf %1416, %1387 : vector<8x128xf32>
    %1418 = vector.broadcast %1377 : f32 to vector<8x128xf32>
    %1419 = arith.mulf %1418, %1389 : vector<8x128xf32>
    %1420 = arith.addf %1417, %1419 : vector<8x128xf32>
    %1421 = vector.broadcast %1378 : f32 to vector<8x128xf32>
    %1422 = arith.mulf %1421, %1391 : vector<8x128xf32>
    %1423 = arith.addf %1420, %1422 : vector<8x128xf32>
    %c0_456 = arith.constant 0 : index
    %c0_457 = arith.constant 0 : index
    %c9_458 = arith.constant 9 : index
    %c0_459 = arith.constant 0 : index
    %c0_460 = arith.constant 0 : index
    %1424 = vector.load %arg1[%c0_456, %c0_457, %c9_458, %c0_459, %c0_460] : memref<1x1x16x10x128xf32, #tpu.memory_space<vmem>>, vector<1x1x1x8x128xf32>
    %1425 = vector.shape_cast %1424 : vector<1x1x1x8x128xf32> to vector<8x128xf32>
    %c0_461 = arith.constant 0 : index
    %c0_462 = arith.constant 0 : index
    %c9_463 = arith.constant 9 : index
    %c1_464 = arith.constant 1 : index
    %c0_465 = arith.constant 0 : index
    %1426 = vector.load %arg1[%c0_461, %c0_462, %c9_463, %c1_464, %c0_465] : memref<1x1x16x10x128xf32, #tpu.memory_space<vmem>>, vector<1x1x1x8x128xf32>
    %1427 = vector.shape_cast %1426 : vector<1x1x1x8x128xf32> to vector<8x128xf32>
    %c0_466 = arith.constant 0 : index
    %c0_467 = arith.constant 0 : index
    %c9_468 = arith.constant 9 : index
    %c2_469 = arith.constant 2 : index
    %c0_470 = arith.constant 0 : index
    %1428 = vector.load %arg1[%c0_466, %c0_467, %c9_468, %c2_469, %c0_470] : memref<1x1x16x10x128xf32, #tpu.memory_space<vmem>>, vector<1x1x1x8x128xf32>
    %1429 = vector.shape_cast %1428 : vector<1x1x1x8x128xf32> to vector<8x128xf32>
    %1430 = vector.broadcast %1361 : f32 to vector<8x128xf32>
    %1431 = arith.mulf %1430, %1425 : vector<8x128xf32>
    %1432 = arith.addf %1399, %1431 : vector<8x128xf32>
    %1433 = vector.broadcast %1362 : f32 to vector<8x128xf32>
    %1434 = arith.mulf %1433, %1427 : vector<8x128xf32>
    %1435 = arith.addf %1432, %1434 : vector<8x128xf32>
    %1436 = vector.broadcast %1363 : f32 to vector<8x128xf32>
    %1437 = arith.mulf %1436, %1429 : vector<8x128xf32>
    %1438 = arith.addf %1435, %1437 : vector<8x128xf32>
    %1439 = vector.broadcast %1367 : f32 to vector<8x128xf32>
    %1440 = arith.mulf %1439, %1425 : vector<8x128xf32>
    %1441 = arith.addf %1407, %1440 : vector<8x128xf32>
    %1442 = vector.broadcast %1368 : f32 to vector<8x128xf32>
    %1443 = arith.mulf %1442, %1427 : vector<8x128xf32>
    %1444 = arith.addf %1441, %1443 : vector<8x128xf32>
    %1445 = vector.broadcast %1369 : f32 to vector<8x128xf32>
    %1446 = arith.mulf %1445, %1429 : vector<8x128xf32>
    %1447 = arith.addf %1444, %1446 : vector<8x128xf32>
    %1448 = vector.broadcast %1373 : f32 to vector<8x128xf32>
    %1449 = arith.mulf %1448, %1425 : vector<8x128xf32>
    %1450 = arith.addf %1415, %1449 : vector<8x128xf32>
    %1451 = vector.broadcast %1374 : f32 to vector<8x128xf32>
    %1452 = arith.mulf %1451, %1427 : vector<8x128xf32>
    %1453 = arith.addf %1450, %1452 : vector<8x128xf32>
    %1454 = vector.broadcast %1375 : f32 to vector<8x128xf32>
    %1455 = arith.mulf %1454, %1429 : vector<8x128xf32>
    %1456 = arith.addf %1453, %1455 : vector<8x128xf32>
    %1457 = vector.broadcast %1379 : f32 to vector<8x128xf32>
    %1458 = arith.mulf %1457, %1425 : vector<8x128xf32>
    %1459 = arith.addf %1423, %1458 : vector<8x128xf32>
    %1460 = vector.broadcast %1380 : f32 to vector<8x128xf32>
    %1461 = arith.mulf %1460, %1427 : vector<8x128xf32>
    %1462 = arith.addf %1459, %1461 : vector<8x128xf32>
    %1463 = vector.broadcast %1381 : f32 to vector<8x128xf32>
    %1464 = arith.mulf %1463, %1429 : vector<8x128xf32>
    %1465 = arith.addf %1462, %1464 : vector<8x128xf32>
    %1466 = vector.broadcast %1382 : f32 to vector<8x128xf32>
    %1467 = arith.addf %1438, %1466 : vector<8x128xf32>
    %cst_471 = arith.constant 0.000000e+00 : f32
    %1468 = vector.broadcast %cst_471 : f32 to vector<8x128xf32>
    %1469 = arith.maximumf %1467, %1468 : vector<8x128xf32>
    %c0_472 = arith.constant 0 : index
    %c0_473 = arith.constant 0 : index
    %c1_474 = arith.constant 1 : index
    %c0_475 = arith.constant 0 : index
    %1470 = vector.load %arg5[%c0_472, %c0_473, %c1_474, %c0_475] : memref<4x4x10x128xf32, #tpu.memory_space<vmem>>, vector<1x1x8x128xf32>
    %1471 = vector.shape_cast %1470 : vector<1x1x8x128xf32> to vector<8x128xf32>
    %1472 = vector.shape_cast %1469 : vector<8x128xf32> to vector<1x1x8x128xf32>
    tpu.vector_store %arg5[%c0_472, %c0_473, %c1_474, %c0_475], %1472 {strides = array<i32>} : memref<4x4x10x128xf32, #tpu.memory_space<vmem>>, vector<1x1x8x128xf32>,
    %1473 = vector.broadcast %1383 : f32 to vector<8x128xf32>
    %1474 = arith.addf %1447, %1473 : vector<8x128xf32>
    %cst_476 = arith.constant 0.000000e+00 : f32
    %1475 = vector.broadcast %cst_476 : f32 to vector<8x128xf32>
    %1476 = arith.maximumf %1474, %1475 : vector<8x128xf32>
    %c1_477 = arith.constant 1 : index
    %c0_478 = arith.constant 0 : index
    %c1_479 = arith.constant 1 : index
    %c0_480 = arith.constant 0 : index
    %1477 = vector.load %arg5[%c1_477, %c0_478, %c1_479, %c0_480] : memref<4x4x10x128xf32, #tpu.memory_space<vmem>>, vector<1x1x8x128xf32>
    %1478 = vector.shape_cast %1477 : vector<1x1x8x128xf32> to vector<8x128xf32>
    %1479 = vector.shape_cast %1476 : vector<8x128xf32> to vector<1x1x8x128xf32>
    tpu.vector_store %arg5[%c1_477, %c0_478, %c1_479, %c0_480], %1479 {strides = array<i32>} : memref<4x4x10x128xf32, #tpu.memory_space<vmem>>, vector<1x1x8x128xf32>,
    %1480 = vector.broadcast %1384 : f32 to vector<8x128xf32>
    %1481 = arith.addf %1456, %1480 : vector<8x128xf32>
    %cst_481 = arith.constant 0.000000e+00 : f32
    %1482 = vector.broadcast %cst_481 : f32 to vector<8x128xf32>
    %1483 = arith.maximumf %1481, %1482 : vector<8x128xf32>
    %c2_482 = arith.constant 2 : index
    %c0_483 = arith.constant 0 : index
    %c1_484 = arith.constant 1 : index
    %c0_485 = arith.constant 0 : index
    %1484 = vector.load %arg5[%c2_482, %c0_483, %c1_484, %c0_485] : memref<4x4x10x128xf32, #tpu.memory_space<vmem>>, vector<1x1x8x128xf32>
    %1485 = vector.shape_cast %1484 : vector<1x1x8x128xf32> to vector<8x128xf32>
    %1486 = vector.shape_cast %1483 : vector<8x128xf32> to vector<1x1x8x128xf32>
    tpu.vector_store %arg5[%c2_482, %c0_483, %c1_484, %c0_485], %1486 {strides = array<i32>} : memref<4x4x10x128xf32, #tpu.memory_space<vmem>>, vector<1x1x8x128xf32>,
    %1487 = vector.broadcast %1385 : f32 to vector<8x128xf32>
    %1488 = arith.addf %1465, %1487 : vector<8x128xf32>
    %cst_486 = arith.constant 0.000000e+00 : f32
    %1489 = vector.broadcast %cst_486 : f32 to vector<8x128xf32>
    %1490 = arith.maximumf %1488, %1489 : vector<8x128xf32>
    %c3_487 = arith.constant 3 : index
    %c0_488 = arith.constant 0 : index
    %c1_489 = arith.constant 1 : index
    %c0_490 = arith.constant 0 : index
    %1491 = vector.load %arg5[%c3_487, %c0_488, %c1_489, %c0_490] : memref<4x4x10x128xf32, #tpu.memory_space<vmem>>, vector<1x1x8x128xf32>
    %1492 = vector.shape_cast %1491 : vector<1x1x8x128xf32> to vector<8x128xf32>
    %1493 = vector.shape_cast %1490 : vector<8x128xf32> to vector<1x1x8x128xf32>
    tpu.vector_store %arg5[%c3_487, %c0_488, %c1_489, %c0_490], %1493 {strides = array<i32>} : memref<4x4x10x128xf32, #tpu.memory_space<vmem>>, vector<1x1x8x128xf32>,
    %c0_491 = arith.constant 0 : index
    %c0_492 = arith.constant 0 : index
    %c10_493 = arith.constant 10 : index
    %c0_494 = arith.constant 0 : index
    %c0_495 = arith.constant 0 : index
    %1494 = vector.load %arg1[%c0_491, %c0_492, %c10_493, %c0_494, %c0_495] : memref<1x1x16x10x128xf32, #tpu.memory_space<vmem>>, vector<1x1x1x8x128xf32>
    %1495 = vector.shape_cast %1494 : vector<1x1x1x8x128xf32> to vector<8x128xf32>
    %c0_496 = arith.constant 0 : index
    %c0_497 = arith.constant 0 : index
    %c10_498 = arith.constant 10 : index
    %c1_499 = arith.constant 1 : index
    %c0_500 = arith.constant 0 : index
    %1496 = vector.load %arg1[%c0_496, %c0_497, %c10_498, %c1_499, %c0_500] : memref<1x1x16x10x128xf32, #tpu.memory_space<vmem>>, vector<1x1x1x8x128xf32>
    %1497 = vector.shape_cast %1496 : vector<1x1x1x8x128xf32> to vector<8x128xf32>
    %c0_501 = arith.constant 0 : index
    %c0_502 = arith.constant 0 : index
    %c10_503 = arith.constant 10 : index
    %c2_504 = arith.constant 2 : index
    %c0_505 = arith.constant 0 : index
    %1498 = vector.load %arg1[%c0_501, %c0_502, %c10_503, %c2_504, %c0_505] : memref<1x1x16x10x128xf32, #tpu.memory_space<vmem>>, vector<1x1x1x8x128xf32>
    %1499 = vector.shape_cast %1498 : vector<1x1x1x8x128xf32> to vector<8x128xf32>
    %1500 = vector.broadcast %1358 : f32 to vector<8x128xf32>
    %1501 = arith.mulf %1500, %1495 : vector<8x128xf32>
    %1502 = vector.broadcast %1359 : f32 to vector<8x128xf32>
    %1503 = arith.mulf %1502, %1497 : vector<8x128xf32>
    %1504 = arith.addf %1501, %1503 : vector<8x128xf32>
    %1505 = vector.broadcast %1360 : f32 to vector<8x128xf32>
    %1506 = arith.mulf %1505, %1499 : vector<8x128xf32>
    %1507 = arith.addf %1504, %1506 : vector<8x128xf32>
    %1508 = vector.broadcast %1364 : f32 to vector<8x128xf32>
    %1509 = arith.mulf %1508, %1495 : vector<8x128xf32>
    %1510 = vector.broadcast %1365 : f32 to vector<8x128xf32>
    %1511 = arith.mulf %1510, %1497 : vector<8x128xf32>
    %1512 = arith.addf %1509, %1511 : vector<8x128xf32>
    %1513 = vector.broadcast %1366 : f32 to vector<8x128xf32>
    %1514 = arith.mulf %1513, %1499 : vector<8x128xf32>
    %1515 = arith.addf %1512, %1514 : vector<8x128xf32>
    %1516 = vector.broadcast %1370 : f32 to vector<8x128xf32>
    %1517 = arith.mulf %1516, %1495 : vector<8x128xf32>
    %1518 = vector.broadcast %1371 : f32 to vector<8x128xf32>
    %1519 = arith.mulf %1518, %1497 : vector<8x128xf32>
    %1520 = arith.addf %1517, %1519 : vector<8x128xf32>
    %1521 = vector.broadcast %1372 : f32 to vector<8x128xf32>
    %1522 = arith.mulf %1521, %1499 : vector<8x128xf32>
    %1523 = arith.addf %1520, %1522 : vector<8x128xf32>
    %1524 = vector.broadcast %1376 : f32 to vector<8x128xf32>
    %1525 = arith.mulf %1524, %1495 : vector<8x128xf32>
    %1526 = vector.broadcast %1377 : f32 to vector<8x128xf32>
    %1527 = arith.mulf %1526, %1497 : vector<8x128xf32>
    %1528 = arith.addf %1525, %1527 : vector<8x128xf32>
    %1529 = vector.broadcast %1378 : f32 to vector<8x128xf32>
    %1530 = arith.mulf %1529, %1499 : vector<8x128xf32>
    %1531 = arith.addf %1528, %1530 : vector<8x128xf32>
    %c0_506 = arith.constant 0 : index
    %c0_507 = arith.constant 0 : index
    %c11_508 = arith.constant 11 : index
    %c0_509 = arith.constant 0 : index
    %c0_510 = arith.constant 0 : index
    %1532 = vector.load %arg1[%c0_506, %c0_507, %c11_508, %c0_509, %c0_510] : memref<1x1x16x10x128xf32, #tpu.memory_space<vmem>>, vector<1x1x1x8x128xf32>
    %1533 = vector.shape_cast %1532 : vector<1x1x1x8x128xf32> to vector<8x128xf32>
    %c0_511 = arith.constant 0 : index
    %c0_512 = arith.constant 0 : index
    %c11_513 = arith.constant 11 : index
    %c1_514 = arith.constant 1 : index
    %c0_515 = arith.constant 0 : index
    %1534 = vector.load %arg1[%c0_511, %c0_512, %c11_513, %c1_514, %c0_515] : memref<1x1x16x10x128xf32, #tpu.memory_space<vmem>>, vector<1x1x1x8x128xf32>
    %1535 = vector.shape_cast %1534 : vector<1x1x1x8x128xf32> to vector<8x128xf32>
    %c0_516 = arith.constant 0 : index
    %c0_517 = arith.constant 0 : index
    %c11_518 = arith.constant 11 : index
    %c2_519 = arith.constant 2 : index
    %c0_520 = arith.constant 0 : index
    %1536 = vector.load %arg1[%c0_516, %c0_517, %c11_518, %c2_519, %c0_520] : memref<1x1x16x10x128xf32, #tpu.memory_space<vmem>>, vector<1x1x1x8x128xf32>
    %1537 = vector.shape_cast %1536 : vector<1x1x1x8x128xf32> to vector<8x128xf32>
    %1538 = vector.broadcast %1361 : f32 to vector<8x128xf32>
    %1539 = arith.mulf %1538, %1533 : vector<8x128xf32>
    %1540 = arith.addf %1507, %1539 : vector<8x128xf32>
    %1541 = vector.broadcast %1362 : f32 to vector<8x128xf32>
    %1542 = arith.mulf %1541, %1535 : vector<8x128xf32>
    %1543 = arith.addf %1540, %1542 : vector<8x128xf32>
    %1544 = vector.broadcast %1363 : f32 to vector<8x128xf32>
    %1545 = arith.mulf %1544, %1537 : vector<8x128xf32>
    %1546 = arith.addf %1543, %1545 : vector<8x128xf32>
    %1547 = vector.broadcast %1367 : f32 to vector<8x128xf32>
    %1548 = arith.mulf %1547, %1533 : vector<8x128xf32>
    %1549 = arith.addf %1515, %1548 : vector<8x128xf32>
    %1550 = vector.broadcast %1368 : f32 to vector<8x128xf32>
    %1551 = arith.mulf %1550, %1535 : vector<8x128xf32>
    %1552 = arith.addf %1549, %1551 : vector<8x128xf32>
    %1553 = vector.broadcast %1369 : f32 to vector<8x128xf32>
    %1554 = arith.mulf %1553, %1537 : vector<8x128xf32>
    %1555 = arith.addf %1552, %1554 : vector<8x128xf32>
    %1556 = vector.broadcast %1373 : f32 to vector<8x128xf32>
    %1557 = arith.mulf %1556, %1533 : vector<8x128xf32>
    %1558 = arith.addf %1523, %1557 : vector<8x128xf32>
    %1559 = vector.broadcast %1374 : f32 to vector<8x128xf32>
    %1560 = arith.mulf %1559, %1535 : vector<8x128xf32>
    %1561 = arith.addf %1558, %1560 : vector<8x128xf32>
    %1562 = vector.broadcast %1375 : f32 to vector<8x128xf32>
    %1563 = arith.mulf %1562, %1537 : vector<8x128xf32>
    %1564 = arith.addf %1561, %1563 : vector<8x128xf32>
    %1565 = vector.broadcast %1379 : f32 to vector<8x128xf32>
    %1566 = arith.mulf %1565, %1533 : vector<8x128xf32>
    %1567 = arith.addf %1531, %1566 : vector<8x128xf32>
    %1568 = vector.broadcast %1380 : f32 to vector<8x128xf32>
    %1569 = arith.mulf %1568, %1535 : vector<8x128xf32>
    %1570 = arith.addf %1567, %1569 : vector<8x128xf32>
    %1571 = vector.broadcast %1381 : f32 to vector<8x128xf32>
    %1572 = arith.mulf %1571, %1537 : vector<8x128xf32>
    %1573 = arith.addf %1570, %1572 : vector<8x128xf32>
    %1574 = vector.broadcast %1382 : f32 to vector<8x128xf32>
    %1575 = arith.addf %1546, %1574 : vector<8x128xf32>
    %cst_521 = arith.constant 0.000000e+00 : f32
    %1576 = vector.broadcast %cst_521 : f32 to vector<8x128xf32>
    %1577 = arith.maximumf %1575, %1576 : vector<8x128xf32>
    %c0_522 = arith.constant 0 : index
    %c1_523 = arith.constant 1 : index
    %c1_524 = arith.constant 1 : index
    %c0_525 = arith.constant 0 : index
    %1578 = vector.load %arg5[%c0_522, %c1_523, %c1_524, %c0_525] : memref<4x4x10x128xf32, #tpu.memory_space<vmem>>, vector<1x1x8x128xf32>
    %1579 = vector.shape_cast %1578 : vector<1x1x8x128xf32> to vector<8x128xf32>
    %1580 = vector.shape_cast %1577 : vector<8x128xf32> to vector<1x1x8x128xf32>
    tpu.vector_store %arg5[%c0_522, %c1_523, %c1_524, %c0_525], %1580 {strides = array<i32>} : memref<4x4x10x128xf32, #tpu.memory_space<vmem>>, vector<1x1x8x128xf32>,
    %1581 = vector.broadcast %1383 : f32 to vector<8x128xf32>
    %1582 = arith.addf %1555, %1581 : vector<8x128xf32>
    %cst_526 = arith.constant 0.000000e+00 : f32
    %1583 = vector.broadcast %cst_526 : f32 to vector<8x128xf32>
    %1584 = arith.maximumf %1582, %1583 : vector<8x128xf32>
    %c1_527 = arith.constant 1 : index
    %c1_528 = arith.constant 1 : index
    %c1_529 = arith.constant 1 : index
    %c0_530 = arith.constant 0 : index
    %1585 = vector.load %arg5[%c1_527, %c1_528, %c1_529, %c0_530] : memref<4x4x10x128xf32, #tpu.memory_space<vmem>>, vector<1x1x8x128xf32>
    %1586 = vector.shape_cast %1585 : vector<1x1x8x128xf32> to vector<8x128xf32>
    %1587 = vector.shape_cast %1584 : vector<8x128xf32> to vector<1x1x8x128xf32>
    tpu.vector_store %arg5[%c1_527, %c1_528, %c1_529, %c0_530], %1587 {strides = array<i32>} : memref<4x4x10x128xf32, #tpu.memory_space<vmem>>, vector<1x1x8x128xf32>,
    %1588 = vector.broadcast %1384 : f32 to vector<8x128xf32>
    %1589 = arith.addf %1564, %1588 : vector<8x128xf32>
    %cst_531 = arith.constant 0.000000e+00 : f32
    %1590 = vector.broadcast %cst_531 : f32 to vector<8x128xf32>
    %1591 = arith.maximumf %1589, %1590 : vector<8x128xf32>
    %c2_532 = arith.constant 2 : index
    %c1_533 = arith.constant 1 : index
    %c1_534 = arith.constant 1 : index
    %c0_535 = arith.constant 0 : index
    %1592 = vector.load %arg5[%c2_532, %c1_533, %c1_534, %c0_535] : memref<4x4x10x128xf32, #tpu.memory_space<vmem>>, vector<1x1x8x128xf32>
    %1593 = vector.shape_cast %1592 : vector<1x1x8x128xf32> to vector<8x128xf32>
    %1594 = vector.shape_cast %1591 : vector<8x128xf32> to vector<1x1x8x128xf32>
    tpu.vector_store %arg5[%c2_532, %c1_533, %c1_534, %c0_535], %1594 {strides = array<i32>} : memref<4x4x10x128xf32, #tpu.memory_space<vmem>>, vector<1x1x8x128xf32>,
    %1595 = vector.broadcast %1385 : f32 to vector<8x128xf32>
    %1596 = arith.addf %1573, %1595 : vector<8x128xf32>
    %cst_536 = arith.constant 0.000000e+00 : f32
    %1597 = vector.broadcast %cst_536 : f32 to vector<8x128xf32>
    %1598 = arith.maximumf %1596, %1597 : vector<8x128xf32>
    %c3_537 = arith.constant 3 : index
    %c1_538 = arith.constant 1 : index
    %c1_539 = arith.constant 1 : index
    %c0_540 = arith.constant 0 : index
    %1599 = vector.load %arg5[%c3_537, %c1_538, %c1_539, %c0_540] : memref<4x4x10x128xf32, #tpu.memory_space<vmem>>, vector<1x1x8x128xf32>
    %1600 = vector.shape_cast %1599 : vector<1x1x8x128xf32> to vector<8x128xf32>
    %1601 = vector.shape_cast %1598 : vector<8x128xf32> to vector<1x1x8x128xf32>
    tpu.vector_store %arg5[%c3_537, %c1_538, %c1_539, %c0_540], %1601 {strides = array<i32>} : memref<4x4x10x128xf32, #tpu.memory_space<vmem>>, vector<1x1x8x128xf32>,
    %c0_541 = arith.constant 0 : index
    %c0_542 = arith.constant 0 : index
    %c12_543 = arith.constant 12 : index
    %c0_544 = arith.constant 0 : index
    %c0_545 = arith.constant 0 : index
    %1602 = vector.load %arg1[%c0_541, %c0_542, %c12_543, %c0_544, %c0_545] : memref<1x1x16x10x128xf32, #tpu.memory_space<vmem>>, vector<1x1x1x8x128xf32>
    %1603 = vector.shape_cast %1602 : vector<1x1x1x8x128xf32> to vector<8x128xf32>
    %c0_546 = arith.constant 0 : index
    %c0_547 = arith.constant 0 : index
    %c12_548 = arith.constant 12 : index
    %c1_549 = arith.constant 1 : index
    %c0_550 = arith.constant 0 : index
    %1604 = vector.load %arg1[%c0_546, %c0_547, %c12_548, %c1_549, %c0_550] : memref<1x1x16x10x128xf32, #tpu.memory_space<vmem>>, vector<1x1x1x8x128xf32>
    %1605 = vector.shape_cast %1604 : vector<1x1x1x8x128xf32> to vector<8x128xf32>
    %c0_551 = arith.constant 0 : index
    %c0_552 = arith.constant 0 : index
    %c12_553 = arith.constant 12 : index
    %c2_554 = arith.constant 2 : index
    %c0_555 = arith.constant 0 : index
    %1606 = vector.load %arg1[%c0_551, %c0_552, %c12_553, %c2_554, %c0_555] : memref<1x1x16x10x128xf32, #tpu.memory_space<vmem>>, vector<1x1x1x8x128xf32>
    %1607 = vector.shape_cast %1606 : vector<1x1x1x8x128xf32> to vector<8x128xf32>
    %1608 = vector.broadcast %1358 : f32 to vector<8x128xf32>
    %1609 = arith.mulf %1608, %1603 : vector<8x128xf32>
    %1610 = vector.broadcast %1359 : f32 to vector<8x128xf32>
    %1611 = arith.mulf %1610, %1605 : vector<8x128xf32>
    %1612 = arith.addf %1609, %1611 : vector<8x128xf32>
    %1613 = vector.broadcast %1360 : f32 to vector<8x128xf32>
    %1614 = arith.mulf %1613, %1607 : vector<8x128xf32>
    %1615 = arith.addf %1612, %1614 : vector<8x128xf32>
    %1616 = vector.broadcast %1364 : f32 to vector<8x128xf32>
    %1617 = arith.mulf %1616, %1603 : vector<8x128xf32>
    %1618 = vector.broadcast %1365 : f32 to vector<8x128xf32>
    %1619 = arith.mulf %1618, %1605 : vector<8x128xf32>
    %1620 = arith.addf %1617, %1619 : vector<8x128xf32>
    %1621 = vector.broadcast %1366 : f32 to vector<8x128xf32>
    %1622 = arith.mulf %1621, %1607 : vector<8x128xf32>
    %1623 = arith.addf %1620, %1622 : vector<8x128xf32>
    %1624 = vector.broadcast %1370 : f32 to vector<8x128xf32>
    %1625 = arith.mulf %1624, %1603 : vector<8x128xf32>
    %1626 = vector.broadcast %1371 : f32 to vector<8x128xf32>
    %1627 = arith.mulf %1626, %1605 : vector<8x128xf32>
    %1628 = arith.addf %1625, %1627 : vector<8x128xf32>
    %1629 = vector.broadcast %1372 : f32 to vector<8x128xf32>
    %1630 = arith.mulf %1629, %1607 : vector<8x128xf32>
    %1631 = arith.addf %1628, %1630 : vector<8x128xf32>
    %1632 = vector.broadcast %1376 : f32 to vector<8x128xf32>
    %1633 = arith.mulf %1632, %1603 : vector<8x128xf32>
    %1634 = vector.broadcast %1377 : f32 to vector<8x128xf32>
    %1635 = arith.mulf %1634, %1605 : vector<8x128xf32>
    %1636 = arith.addf %1633, %1635 : vector<8x128xf32>
    %1637 = vector.broadcast %1378 : f32 to vector<8x128xf32>
    %1638 = arith.mulf %1637, %1607 : vector<8x128xf32>
    %1639 = arith.addf %1636, %1638 : vector<8x128xf32>
    %c0_556 = arith.constant 0 : index
    %c0_557 = arith.constant 0 : index
    %c13_558 = arith.constant 13 : index
    %c0_559 = arith.constant 0 : index
    %c0_560 = arith.constant 0 : index
    %1640 = vector.load %arg1[%c0_556, %c0_557, %c13_558, %c0_559, %c0_560] : memref<1x1x16x10x128xf32, #tpu.memory_space<vmem>>, vector<1x1x1x8x128xf32>
    %1641 = vector.shape_cast %1640 : vector<1x1x1x8x128xf32> to vector<8x128xf32>
    %c0_561 = arith.constant 0 : index
    %c0_562 = arith.constant 0 : index
    %c13_563 = arith.constant 13 : index
    %c1_564 = arith.constant 1 : index
    %c0_565 = arith.constant 0 : index
    %1642 = vector.load %arg1[%c0_561, %c0_562, %c13_563, %c1_564, %c0_565] : memref<1x1x16x10x128xf32, #tpu.memory_space<vmem>>, vector<1x1x1x8x128xf32>
    %1643 = vector.shape_cast %1642 : vector<1x1x1x8x128xf32> to vector<8x128xf32>
    %c0_566 = arith.constant 0 : index
    %c0_567 = arith.constant 0 : index
    %c13_568 = arith.constant 13 : index
    %c2_569 = arith.constant 2 : index
    %c0_570 = arith.constant 0 : index
    %1644 = vector.load %arg1[%c0_566, %c0_567, %c13_568, %c2_569, %c0_570] : memref<1x1x16x10x128xf32, #tpu.memory_space<vmem>>, vector<1x1x1x8x128xf32>
    %1645 = vector.shape_cast %1644 : vector<1x1x1x8x128xf32> to vector<8x128xf32>
    %1646 = vector.broadcast %1361 : f32 to vector<8x128xf32>
    %1647 = arith.mulf %1646, %1641 : vector<8x128xf32>
    %1648 = arith.addf %1615, %1647 : vector<8x128xf32>
    %1649 = vector.broadcast %1362 : f32 to vector<8x128xf32>
    %1650 = arith.mulf %1649, %1643 : vector<8x128xf32>
    %1651 = arith.addf %1648, %1650 : vector<8x128xf32>
    %1652 = vector.broadcast %1363 : f32 to vector<8x128xf32>
    %1653 = arith.mulf %1652, %1645 : vector<8x128xf32>
    %1654 = arith.addf %1651, %1653 : vector<8x128xf32>
    %1655 = vector.broadcast %1367 : f32 to vector<8x128xf32>
    %1656 = arith.mulf %1655, %1641 : vector<8x128xf32>
    %1657 = arith.addf %1623, %1656 : vector<8x128xf32>
    %1658 = vector.broadcast %1368 : f32 to vector<8x128xf32>
    %1659 = arith.mulf %1658, %1643 : vector<8x128xf32>
    %1660 = arith.addf %1657, %1659 : vector<8x128xf32>
    %1661 = vector.broadcast %1369 : f32 to vector<8x128xf32>
    %1662 = arith.mulf %1661, %1645 : vector<8x128xf32>
    %1663 = arith.addf %1660, %1662 : vector<8x128xf32>
    %1664 = vector.broadcast %1373 : f32 to vector<8x128xf32>
    %1665 = arith.mulf %1664, %1641 : vector<8x128xf32>
    %1666 = arith.addf %1631, %1665 : vector<8x128xf32>
    %1667 = vector.broadcast %1374 : f32 to vector<8x128xf32>
    %1668 = arith.mulf %1667, %1643 : vector<8x128xf32>
    %1669 = arith.addf %1666, %1668 : vector<8x128xf32>
    %1670 = vector.broadcast %1375 : f32 to vector<8x128xf32>
    %1671 = arith.mulf %1670, %1645 : vector<8x128xf32>
    %1672 = arith.addf %1669, %1671 : vector<8x128xf32>
    %1673 = vector.broadcast %1379 : f32 to vector<8x128xf32>
    %1674 = arith.mulf %1673, %1641 : vector<8x128xf32>
    %1675 = arith.addf %1639, %1674 : vector<8x128xf32>
    %1676 = vector.broadcast %1380 : f32 to vector<8x128xf32>
    %1677 = arith.mulf %1676, %1643 : vector<8x128xf32>
    %1678 = arith.addf %1675, %1677 : vector<8x128xf32>
    %1679 = vector.broadcast %1381 : f32 to vector<8x128xf32>
    %1680 = arith.mulf %1679, %1645 : vector<8x128xf32>
    %1681 = arith.addf %1678, %1680 : vector<8x128xf32>
    %1682 = vector.broadcast %1382 : f32 to vector<8x128xf32>
    %1683 = arith.addf %1654, %1682 : vector<8x128xf32>
    %cst_571 = arith.constant 0.000000e+00 : f32
    %1684 = vector.broadcast %cst_571 : f32 to vector<8x128xf32>
    %1685 = arith.maximumf %1683, %1684 : vector<8x128xf32>
    %c0_572 = arith.constant 0 : index
    %c2_573 = arith.constant 2 : index
    %c1_574 = arith.constant 1 : index
    %c0_575 = arith.constant 0 : index
    %1686 = vector.load %arg5[%c0_572, %c2_573, %c1_574, %c0_575] : memref<4x4x10x128xf32, #tpu.memory_space<vmem>>, vector<1x1x8x128xf32>
    %1687 = vector.shape_cast %1686 : vector<1x1x8x128xf32> to vector<8x128xf32>
    %1688 = vector.shape_cast %1685 : vector<8x128xf32> to vector<1x1x8x128xf32>
    tpu.vector_store %arg5[%c0_572, %c2_573, %c1_574, %c0_575], %1688 {strides = array<i32>} : memref<4x4x10x128xf32, #tpu.memory_space<vmem>>, vector<1x1x8x128xf32>,
    %1689 = vector.broadcast %1383 : f32 to vector<8x128xf32>
    %1690 = arith.addf %1663, %1689 : vector<8x128xf32>
    %cst_576 = arith.constant 0.000000e+00 : f32
    %1691 = vector.broadcast %cst_576 : f32 to vector<8x128xf32>
    %1692 = arith.maximumf %1690, %1691 : vector<8x128xf32>
    %c1_577 = arith.constant 1 : index
    %c2_578 = arith.constant 2 : index
    %c1_579 = arith.constant 1 : index
    %c0_580 = arith.constant 0 : index
    %1693 = vector.load %arg5[%c1_577, %c2_578, %c1_579, %c0_580] : memref<4x4x10x128xf32, #tpu.memory_space<vmem>>, vector<1x1x8x128xf32>
    %1694 = vector.shape_cast %1693 : vector<1x1x8x128xf32> to vector<8x128xf32>
    %1695 = vector.shape_cast %1692 : vector<8x128xf32> to vector<1x1x8x128xf32>
    tpu.vector_store %arg5[%c1_577, %c2_578, %c1_579, %c0_580], %1695 {strides = array<i32>} : memref<4x4x10x128xf32, #tpu.memory_space<vmem>>, vector<1x1x8x128xf32>,
    %1696 = vector.broadcast %1384 : f32 to vector<8x128xf32>
    %1697 = arith.addf %1672, %1696 : vector<8x128xf32>
    %cst_581 = arith.constant 0.000000e+00 : f32
    %1698 = vector.broadcast %cst_581 : f32 to vector<8x128xf32>
    %1699 = arith.maximumf %1697, %1698 : vector<8x128xf32>
    %c2_582 = arith.constant 2 : index
    %c2_583 = arith.constant 2 : index
    %c1_584 = arith.constant 1 : index
    %c0_585 = arith.constant 0 : index
    %1700 = vector.load %arg5[%c2_582, %c2_583, %c1_584, %c0_585] : memref<4x4x10x128xf32, #tpu.memory_space<vmem>>, vector<1x1x8x128xf32>
    %1701 = vector.shape_cast %1700 : vector<1x1x8x128xf32> to vector<8x128xf32>
    %1702 = vector.shape_cast %1699 : vector<8x128xf32> to vector<1x1x8x128xf32>
    tpu.vector_store %arg5[%c2_582, %c2_583, %c1_584, %c0_585], %1702 {strides = array<i32>} : memref<4x4x10x128xf32, #tpu.memory_space<vmem>>, vector<1x1x8x128xf32>,
    %1703 = vector.broadcast %1385 : f32 to vector<8x128xf32>
    %1704 = arith.addf %1681, %1703 : vector<8x128xf32>
    %cst_586 = arith.constant 0.000000e+00 : f32
    %1705 = vector.broadcast %cst_586 : f32 to vector<8x128xf32>
    %1706 = arith.maximumf %1704, %1705 : vector<8x128xf32>
    %c3_587 = arith.constant 3 : index
    %c2_588 = arith.constant 2 : index
    %c1_589 = arith.constant 1 : index
    %c0_590 = arith.constant 0 : index
    %1707 = vector.load %arg5[%c3_587, %c2_588, %c1_589, %c0_590] : memref<4x4x10x128xf32, #tpu.memory_space<vmem>>, vector<1x1x8x128xf32>
    %1708 = vector.shape_cast %1707 : vector<1x1x8x128xf32> to vector<8x128xf32>
    %1709 = vector.shape_cast %1706 : vector<8x128xf32> to vector<1x1x8x128xf32>
    tpu.vector_store %arg5[%c3_587, %c2_588, %c1_589, %c0_590], %1709 {strides = array<i32>} : memref<4x4x10x128xf32, #tpu.memory_space<vmem>>, vector<1x1x8x128xf32>,
    %c0_591 = arith.constant 0 : index
    %c0_592 = arith.constant 0 : index
    %c14_593 = arith.constant 14 : index
    %c0_594 = arith.constant 0 : index
    %c0_595 = arith.constant 0 : index
    %1710 = vector.load %arg1[%c0_591, %c0_592, %c14_593, %c0_594, %c0_595] : memref<1x1x16x10x128xf32, #tpu.memory_space<vmem>>, vector<1x1x1x8x128xf32>
    %1711 = vector.shape_cast %1710 : vector<1x1x1x8x128xf32> to vector<8x128xf32>
    %c0_596 = arith.constant 0 : index
    %c0_597 = arith.constant 0 : index
    %c14_598 = arith.constant 14 : index
    %c1_599 = arith.constant 1 : index
    %c0_600 = arith.constant 0 : index
    %1712 = vector.load %arg1[%c0_596, %c0_597, %c14_598, %c1_599, %c0_600] : memref<1x1x16x10x128xf32, #tpu.memory_space<vmem>>, vector<1x1x1x8x128xf32>
    %1713 = vector.shape_cast %1712 : vector<1x1x1x8x128xf32> to vector<8x128xf32>
    %c0_601 = arith.constant 0 : index
    %c0_602 = arith.constant 0 : index
    %c14_603 = arith.constant 14 : index
    %c2_604 = arith.constant 2 : index
    %c0_605 = arith.constant 0 : index
    %1714 = vector.load %arg1[%c0_601, %c0_602, %c14_603, %c2_604, %c0_605] : memref<1x1x16x10x128xf32, #tpu.memory_space<vmem>>, vector<1x1x1x8x128xf32>
    %1715 = vector.shape_cast %1714 : vector<1x1x1x8x128xf32> to vector<8x128xf32>
    %1716 = vector.broadcast %1358 : f32 to vector<8x128xf32>
    %1717 = arith.mulf %1716, %1711 : vector<8x128xf32>
    %1718 = vector.broadcast %1359 : f32 to vector<8x128xf32>
    %1719 = arith.mulf %1718, %1713 : vector<8x128xf32>
    %1720 = arith.addf %1717, %1719 : vector<8x128xf32>
    %1721 = vector.broadcast %1360 : f32 to vector<8x128xf32>
    %1722 = arith.mulf %1721, %1715 : vector<8x128xf32>
    %1723 = arith.addf %1720, %1722 : vector<8x128xf32>
    %1724 = vector.broadcast %1364 : f32 to vector<8x128xf32>
    %1725 = arith.mulf %1724, %1711 : vector<8x128xf32>
    %1726 = vector.broadcast %1365 : f32 to vector<8x128xf32>
    %1727 = arith.mulf %1726, %1713 : vector<8x128xf32>
    %1728 = arith.addf %1725, %1727 : vector<8x128xf32>
    %1729 = vector.broadcast %1366 : f32 to vector<8x128xf32>
    %1730 = arith.mulf %1729, %1715 : vector<8x128xf32>
    %1731 = arith.addf %1728, %1730 : vector<8x128xf32>
    %1732 = vector.broadcast %1370 : f32 to vector<8x128xf32>
    %1733 = arith.mulf %1732, %1711 : vector<8x128xf32>
    %1734 = vector.broadcast %1371 : f32 to vector<8x128xf32>
    %1735 = arith.mulf %1734, %1713 : vector<8x128xf32>
    %1736 = arith.addf %1733, %1735 : vector<8x128xf32>
    %1737 = vector.broadcast %1372 : f32 to vector<8x128xf32>
    %1738 = arith.mulf %1737, %1715 : vector<8x128xf32>
    %1739 = arith.addf %1736, %1738 : vector<8x128xf32>
    %1740 = vector.broadcast %1376 : f32 to vector<8x128xf32>
    %1741 = arith.mulf %1740, %1711 : vector<8x128xf32>
    %1742 = vector.broadcast %1377 : f32 to vector<8x128xf32>
    %1743 = arith.mulf %1742, %1713 : vector<8x128xf32>
    %1744 = arith.addf %1741, %1743 : vector<8x128xf32>
    %1745 = vector.broadcast %1378 : f32 to vector<8x128xf32>
    %1746 = arith.mulf %1745, %1715 : vector<8x128xf32>
    %1747 = arith.addf %1744, %1746 : vector<8x128xf32>
    %c0_606 = arith.constant 0 : index
    %c0_607 = arith.constant 0 : index
    %c15_608 = arith.constant 15 : index
    %c0_609 = arith.constant 0 : index
    %c0_610 = arith.constant 0 : index
    %1748 = vector.load %arg1[%c0_606, %c0_607, %c15_608, %c0_609, %c0_610] : memref<1x1x16x10x128xf32, #tpu.memory_space<vmem>>, vector<1x1x1x8x128xf32>
    %1749 = vector.shape_cast %1748 : vector<1x1x1x8x128xf32> to vector<8x128xf32>
    %c0_611 = arith.constant 0 : index
    %c0_612 = arith.constant 0 : index
    %c15_613 = arith.constant 15 : index
    %c1_614 = arith.constant 1 : index
    %c0_615 = arith.constant 0 : index
    %1750 = vector.load %arg1[%c0_611, %c0_612, %c15_613, %c1_614, %c0_615] : memref<1x1x16x10x128xf32, #tpu.memory_space<vmem>>, vector<1x1x1x8x128xf32>
    %1751 = vector.shape_cast %1750 : vector<1x1x1x8x128xf32> to vector<8x128xf32>
    %c0_616 = arith.constant 0 : index
    %c0_617 = arith.constant 0 : index
    %c15_618 = arith.constant 15 : index
    %c2_619 = arith.constant 2 : index
    %c0_620 = arith.constant 0 : index
    %1752 = vector.load %arg1[%c0_616, %c0_617, %c15_618, %c2_619, %c0_620] : memref<1x1x16x10x128xf32, #tpu.memory_space<vmem>>, vector<1x1x1x8x128xf32>
    %1753 = vector.shape_cast %1752 : vector<1x1x1x8x128xf32> to vector<8x128xf32>
    %1754 = vector.broadcast %1361 : f32 to vector<8x128xf32>
    %1755 = arith.mulf %1754, %1749 : vector<8x128xf32>
    %1756 = arith.addf %1723, %1755 : vector<8x128xf32>
    %1757 = vector.broadcast %1362 : f32 to vector<8x128xf32>
    %1758 = arith.mulf %1757, %1751 : vector<8x128xf32>
    %1759 = arith.addf %1756, %1758 : vector<8x128xf32>
    %1760 = vector.broadcast %1363 : f32 to vector<8x128xf32>
    %1761 = arith.mulf %1760, %1753 : vector<8x128xf32>
    %1762 = arith.addf %1759, %1761 : vector<8x128xf32>
    %1763 = vector.broadcast %1367 : f32 to vector<8x128xf32>
    %1764 = arith.mulf %1763, %1749 : vector<8x128xf32>
    %1765 = arith.addf %1731, %1764 : vector<8x128xf32>
    %1766 = vector.broadcast %1368 : f32 to vector<8x128xf32>
    %1767 = arith.mulf %1766, %1751 : vector<8x128xf32>
    %1768 = arith.addf %1765, %1767 : vector<8x128xf32>
    %1769 = vector.broadcast %1369 : f32 to vector<8x128xf32>
    %1770 = arith.mulf %1769, %1753 : vector<8x128xf32>
    %1771 = arith.addf %1768, %1770 : vector<8x128xf32>
    %1772 = vector.broadcast %1373 : f32 to vector<8x128xf32>
    %1773 = arith.mulf %1772, %1749 : vector<8x128xf32>
    %1774 = arith.addf %1739, %1773 : vector<8x128xf32>
    %1775 = vector.broadcast %1374 : f32 to vector<8x128xf32>
    %1776 = arith.mulf %1775, %1751 : vector<8x128xf32>
    %1777 = arith.addf %1774, %1776 : vector<8x128xf32>
    %1778 = vector.broadcast %1375 : f32 to vector<8x128xf32>
    %1779 = arith.mulf %1778, %1753 : vector<8x128xf32>
    %1780 = arith.addf %1777, %1779 : vector<8x128xf32>
    %1781 = vector.broadcast %1379 : f32 to vector<8x128xf32>
    %1782 = arith.mulf %1781, %1749 : vector<8x128xf32>
    %1783 = arith.addf %1747, %1782 : vector<8x128xf32>
    %1784 = vector.broadcast %1380 : f32 to vector<8x128xf32>
    %1785 = arith.mulf %1784, %1751 : vector<8x128xf32>
    %1786 = arith.addf %1783, %1785 : vector<8x128xf32>
    %1787 = vector.broadcast %1381 : f32 to vector<8x128xf32>
    %1788 = arith.mulf %1787, %1753 : vector<8x128xf32>
    %1789 = arith.addf %1786, %1788 : vector<8x128xf32>
    %1790 = vector.broadcast %1382 : f32 to vector<8x128xf32>
    %1791 = arith.addf %1762, %1790 : vector<8x128xf32>
    %cst_621 = arith.constant 0.000000e+00 : f32
    %1792 = vector.broadcast %cst_621 : f32 to vector<8x128xf32>
    %1793 = arith.maximumf %1791, %1792 : vector<8x128xf32>
    %c0_622 = arith.constant 0 : index
    %c3_623 = arith.constant 3 : index
    %c1_624 = arith.constant 1 : index
    %c0_625 = arith.constant 0 : index
    %1794 = vector.load %arg5[%c0_622, %c3_623, %c1_624, %c0_625] : memref<4x4x10x128xf32, #tpu.memory_space<vmem>>, vector<1x1x8x128xf32>
    %1795 = vector.shape_cast %1794 : vector<1x1x8x128xf32> to vector<8x128xf32>
    %1796 = vector.shape_cast %1793 : vector<8x128xf32> to vector<1x1x8x128xf32>
    tpu.vector_store %arg5[%c0_622, %c3_623, %c1_624, %c0_625], %1796 {strides = array<i32>} : memref<4x4x10x128xf32, #tpu.memory_space<vmem>>, vector<1x1x8x128xf32>,
    %1797 = vector.broadcast %1383 : f32 to vector<8x128xf32>
    %1798 = arith.addf %1771, %1797 : vector<8x128xf32>
    %cst_626 = arith.constant 0.000000e+00 : f32
    %1799 = vector.broadcast %cst_626 : f32 to vector<8x128xf32>
    %1800 = arith.maximumf %1798, %1799 : vector<8x128xf32>
    %c1_627 = arith.constant 1 : index
    %c3_628 = arith.constant 3 : index
    %c1_629 = arith.constant 1 : index
    %c0_630 = arith.constant 0 : index
    %1801 = vector.load %arg5[%c1_627, %c3_628, %c1_629, %c0_630] : memref<4x4x10x128xf32, #tpu.memory_space<vmem>>, vector<1x1x8x128xf32>
    %1802 = vector.shape_cast %1801 : vector<1x1x8x128xf32> to vector<8x128xf32>
    %1803 = vector.shape_cast %1800 : vector<8x128xf32> to vector<1x1x8x128xf32>
    tpu.vector_store %arg5[%c1_627, %c3_628, %c1_629, %c0_630], %1803 {strides = array<i32>} : memref<4x4x10x128xf32, #tpu.memory_space<vmem>>, vector<1x1x8x128xf32>,
    %1804 = vector.broadcast %1384 : f32 to vector<8x128xf32>
    %1805 = arith.addf %1780, %1804 : vector<8x128xf32>
    %cst_631 = arith.constant 0.000000e+00 : f32
    %1806 = vector.broadcast %cst_631 : f32 to vector<8x128xf32>
    %1807 = arith.maximumf %1805, %1806 : vector<8x128xf32>
    %c2_632 = arith.constant 2 : index
    %c3_633 = arith.constant 3 : index
    %c1_634 = arith.constant 1 : index
    %c0_635 = arith.constant 0 : index
    %1808 = vector.load %arg5[%c2_632, %c3_633, %c1_634, %c0_635] : memref<4x4x10x128xf32, #tpu.memory_space<vmem>>, vector<1x1x8x128xf32>
    %1809 = vector.shape_cast %1808 : vector<1x1x8x128xf32> to vector<8x128xf32>
    %1810 = vector.shape_cast %1807 : vector<8x128xf32> to vector<1x1x8x128xf32>
    tpu.vector_store %arg5[%c2_632, %c3_633, %c1_634, %c0_635], %1810 {strides = array<i32>} : memref<4x4x10x128xf32, #tpu.memory_space<vmem>>, vector<1x1x8x128xf32>,
    %1811 = vector.broadcast %1385 : f32 to vector<8x128xf32>
    %1812 = arith.addf %1789, %1811 : vector<8x128xf32>
    %cst_636 = arith.constant 0.000000e+00 : f32
    %1813 = vector.broadcast %cst_636 : f32 to vector<8x128xf32>
    %1814 = arith.maximumf %1812, %1813 : vector<8x128xf32>
    %c3_637 = arith.constant 3 : index
    %c3_638 = arith.constant 3 : index
    %c1_639 = arith.constant 1 : index
    %c0_640 = arith.constant 0 : index
    %1815 = vector.load %arg5[%c3_637, %c3_638, %c1_639, %c0_640] : memref<4x4x10x128xf32, #tpu.memory_space<vmem>>, vector<1x1x8x128xf32>
    %1816 = vector.shape_cast %1815 : vector<1x1x8x128xf32> to vector<8x128xf32>
    %1817 = vector.shape_cast %1814 : vector<8x128xf32> to vector<1x1x8x128xf32>
    tpu.vector_store %arg5[%c3_637, %c3_638, %c1_639, %c0_640], %1817 {strides = array<i32>} : memref<4x4x10x128xf32, #tpu.memory_space<vmem>>, vector<1x1x8x128xf32>,
    %c240 = arith.constant 240 : index
    %1818 = memref.load %arg2[%c240] : memref<528xf32, #tpu.memory_space<smem>>
    %c241 = arith.constant 241 : index
    %1819 = memref.load %arg2[%c241] : memref<528xf32, #tpu.memory_space<smem>>
    %c242 = arith.constant 242 : index
    %1820 = memref.load %arg2[%c242] : memref<528xf32, #tpu.memory_space<smem>>
    %c243 = arith.constant 243 : index
    %1821 = memref.load %arg2[%c243] : memref<528xf32, #tpu.memory_space<smem>>
    %c244 = arith.constant 244 : index
    %1822 = memref.load %arg2[%c244] : memref<528xf32, #tpu.memory_space<smem>>
    %c245 = arith.constant 245 : index
    %1823 = memref.load %arg2[%c245] : memref<528xf32, #tpu.memory_space<smem>>
    %c246 = arith.constant 246 : index
    %1824 = memref.load %arg2[%c246] : memref<528xf32, #tpu.memory_space<smem>>
    %c247 = arith.constant 247 : index
    %1825 = memref.load %arg2[%c247] : memref<528xf32, #tpu.memory_space<smem>>
    %c248 = arith.constant 248 : index
    %1826 = memref.load %arg2[%c248] : memref<528xf32, #tpu.memory_space<smem>>
    %c249 = arith.constant 249 : index
    %1827 = memref.load %arg2[%c249] : memref<528xf32, #tpu.memory_space<smem>>
    %c250 = arith.constant 250 : index
    %1828 = memref.load %arg2[%c250] : memref<528xf32, #tpu.memory_space<smem>>
    %c251 = arith.constant 251 : index
    %1829 = memref.load %arg2[%c251] : memref<528xf32, #tpu.memory_space<smem>>
    %c252 = arith.constant 252 : index
    %1830 = memref.load %arg2[%c252] : memref<528xf32, #tpu.memory_space<smem>>
    %c253 = arith.constant 253 : index
    %1831 = memref.load %arg2[%c253] : memref<528xf32, #tpu.memory_space<smem>>
    %c254 = arith.constant 254 : index
    %1832 = memref.load %arg2[%c254] : memref<528xf32, #tpu.memory_space<smem>>
    %c255 = arith.constant 255 : index
    %1833 = memref.load %arg2[%c255] : memref<528xf32, #tpu.memory_space<smem>>
    %c256 = arith.constant 256 : index
    %1834 = memref.load %arg2[%c256] : memref<528xf32, #tpu.memory_space<smem>>
    %c257 = arith.constant 257 : index
    %1835 = memref.load %arg2[%c257] : memref<528xf32, #tpu.memory_space<smem>>
    %c258 = arith.constant 258 : index
    %1836 = memref.load %arg2[%c258] : memref<528xf32, #tpu.memory_space<smem>>
    %c259 = arith.constant 259 : index
    %1837 = memref.load %arg2[%c259] : memref<528xf32, #tpu.memory_space<smem>>
    %c260 = arith.constant 260 : index
    %1838 = memref.load %arg2[%c260] : memref<528xf32, #tpu.memory_space<smem>>
    %c261 = arith.constant 261 : index
    %1839 = memref.load %arg2[%c261] : memref<528xf32, #tpu.memory_space<smem>>
    %c262 = arith.constant 262 : index
    %1840 = memref.load %arg2[%c262] : memref<528xf32, #tpu.memory_space<smem>>
    %c263 = arith.constant 263 : index
    %1841 = memref.load %arg2[%c263] : memref<528xf32, #tpu.memory_space<smem>>
    %c264 = arith.constant 264 : index
    %1842 = memref.load %arg2[%c264] : memref<528xf32, #tpu.memory_space<smem>>
    %c265 = arith.constant 265 : index
    %1843 = memref.load %arg2[%c265] : memref<528xf32, #tpu.memory_space<smem>>
    %c266 = arith.constant 266 : index
    %1844 = memref.load %arg2[%c266] : memref<528xf32, #tpu.memory_space<smem>>
    %c267 = arith.constant 267 : index
    %1845 = memref.load %arg2[%c267] : memref<528xf32, #tpu.memory_space<smem>>
    %c268 = arith.constant 268 : index
    %1846 = memref.load %arg2[%c268] : memref<528xf32, #tpu.memory_space<smem>>
    %c269 = arith.constant 269 : index
    %1847 = memref.load %arg2[%c269] : memref<528xf32, #tpu.memory_space<smem>>
    %c270 = arith.constant 270 : index
    %1848 = memref.load %arg2[%c270] : memref<528xf32, #tpu.memory_space<smem>>
    %c271 = arith.constant 271 : index
    %1849 = memref.load %arg2[%c271] : memref<528xf32, #tpu.memory_space<smem>>
    %c272 = arith.constant 272 : index
    %1850 = memref.load %arg2[%c272] : memref<528xf32, #tpu.memory_space<smem>>
    %c273 = arith.constant 273 : index
    %1851 = memref.load %arg2[%c273] : memref<528xf32, #tpu.memory_space<smem>>
    %c274 = arith.constant 274 : index
    %1852 = memref.load %arg2[%c274] : memref<528xf32, #tpu.memory_space<smem>>
    %c275 = arith.constant 275 : index
    %1853 = memref.load %arg2[%c275] : memref<528xf32, #tpu.memory_space<smem>>
    %c276 = arith.constant 276 : index
    %1854 = memref.load %arg2[%c276] : memref<528xf32, #tpu.memory_space<smem>>
    %c277 = arith.constant 277 : index
    %1855 = memref.load %arg2[%c277] : memref<528xf32, #tpu.memory_space<smem>>
    %c278 = arith.constant 278 : index
    %1856 = memref.load %arg2[%c278] : memref<528xf32, #tpu.memory_space<smem>>
    %c279 = arith.constant 279 : index
    %1857 = memref.load %arg2[%c279] : memref<528xf32, #tpu.memory_space<smem>>
    %c280 = arith.constant 280 : index
    %1858 = memref.load %arg2[%c280] : memref<528xf32, #tpu.memory_space<smem>>
    %c281 = arith.constant 281 : index
    %1859 = memref.load %arg2[%c281] : memref<528xf32, #tpu.memory_space<smem>>
    %c282 = arith.constant 282 : index
    %1860 = memref.load %arg2[%c282] : memref<528xf32, #tpu.memory_space<smem>>
    %c283 = arith.constant 283 : index
    %1861 = memref.load %arg2[%c283] : memref<528xf32, #tpu.memory_space<smem>>
    %c284 = arith.constant 284 : index
    %1862 = memref.load %arg2[%c284] : memref<528xf32, #tpu.memory_space<smem>>
    %c285 = arith.constant 285 : index
    %1863 = memref.load %arg2[%c285] : memref<528xf32, #tpu.memory_space<smem>>
    %c286 = arith.constant 286 : index
    %1864 = memref.load %arg2[%c286] : memref<528xf32, #tpu.memory_space<smem>>
    %c287 = arith.constant 287 : index
    %1865 = memref.load %arg2[%c287] : memref<528xf32, #tpu.memory_space<smem>>
    %c288 = arith.constant 288 : index
    %1866 = memref.load %arg2[%c288] : memref<528xf32, #tpu.memory_space<smem>>
    %c289 = arith.constant 289 : index
    %1867 = memref.load %arg2[%c289] : memref<528xf32, #tpu.memory_space<smem>>
    %c290 = arith.constant 290 : index
    %1868 = memref.load %arg2[%c290] : memref<528xf32, #tpu.memory_space<smem>>
    %c291 = arith.constant 291 : index
    %1869 = memref.load %arg2[%c291] : memref<528xf32, #tpu.memory_space<smem>>
    %c292 = arith.constant 292 : index
    %1870 = memref.load %arg2[%c292] : memref<528xf32, #tpu.memory_space<smem>>
    %c293 = arith.constant 293 : index
    %1871 = memref.load %arg2[%c293] : memref<528xf32, #tpu.memory_space<smem>>
    %c294 = arith.constant 294 : index
    %1872 = memref.load %arg2[%c294] : memref<528xf32, #tpu.memory_space<smem>>
    %c295 = arith.constant 295 : index
    %1873 = memref.load %arg2[%c295] : memref<528xf32, #tpu.memory_space<smem>>
    %c296 = arith.constant 296 : index
    %1874 = memref.load %arg2[%c296] : memref<528xf32, #tpu.memory_space<smem>>
    %c297 = arith.constant 297 : index
    %1875 = memref.load %arg2[%c297] : memref<528xf32, #tpu.memory_space<smem>>
    %c298 = arith.constant 298 : index
    %1876 = memref.load %arg2[%c298] : memref<528xf32, #tpu.memory_space<smem>>
    %c299 = arith.constant 299 : index
    %1877 = memref.load %arg2[%c299] : memref<528xf32, #tpu.memory_space<smem>>
    %c300 = arith.constant 300 : index
    %1878 = memref.load %arg2[%c300] : memref<528xf32, #tpu.memory_space<smem>>
    %c301 = arith.constant 301 : index
    %1879 = memref.load %arg2[%c301] : memref<528xf32, #tpu.memory_space<smem>>
    %c302 = arith.constant 302 : index
    %1880 = memref.load %arg2[%c302] : memref<528xf32, #tpu.memory_space<smem>>
    %c303 = arith.constant 303 : index
    %1881 = memref.load %arg2[%c303] : memref<528xf32, #tpu.memory_space<smem>>
    %c304 = arith.constant 304 : index
    %1882 = memref.load %arg2[%c304] : memref<528xf32, #tpu.memory_space<smem>>
    %c305 = arith.constant 305 : index
    %1883 = memref.load %arg2[%c305] : memref<528xf32, #tpu.memory_space<smem>>
    %c306 = arith.constant 306 : index
    %1884 = memref.load %arg2[%c306] : memref<528xf32, #tpu.memory_space<smem>>
    %c307 = arith.constant 307 : index
    %1885 = memref.load %arg2[%c307] : memref<528xf32, #tpu.memory_space<smem>>
    %c308 = arith.constant 308 : index
    %1886 = memref.load %arg2[%c308] : memref<528xf32, #tpu.memory_space<smem>>
    %c309 = arith.constant 309 : index
    %1887 = memref.load %arg2[%c309] : memref<528xf32, #tpu.memory_space<smem>>
    %c310 = arith.constant 310 : index
    %1888 = memref.load %arg2[%c310] : memref<528xf32, #tpu.memory_space<smem>>
    %c311 = arith.constant 311 : index
    %1889 = memref.load %arg2[%c311] : memref<528xf32, #tpu.memory_space<smem>>
    %c312 = arith.constant 312 : index
    %1890 = memref.load %arg2[%c312] : memref<528xf32, #tpu.memory_space<smem>>
    %c313 = arith.constant 313 : index
    %1891 = memref.load %arg2[%c313] : memref<528xf32, #tpu.memory_space<smem>>
    %c314 = arith.constant 314 : index
    %1892 = memref.load %arg2[%c314] : memref<528xf32, #tpu.memory_space<smem>>
    %c315 = arith.constant 315 : index
    %1893 = memref.load %arg2[%c315] : memref<528xf32, #tpu.memory_space<smem>>
    %c316 = arith.constant 316 : index
    %1894 = memref.load %arg2[%c316] : memref<528xf32, #tpu.memory_space<smem>>
    %c317 = arith.constant 317 : index
    %1895 = memref.load %arg2[%c317] : memref<528xf32, #tpu.memory_space<smem>>
    %c318 = arith.constant 318 : index
    %1896 = memref.load %arg2[%c318] : memref<528xf32, #tpu.memory_space<smem>>
    %c319 = arith.constant 319 : index
    %1897 = memref.load %arg2[%c319] : memref<528xf32, #tpu.memory_space<smem>>
    %c320 = arith.constant 320 : index
    %1898 = memref.load %arg2[%c320] : memref<528xf32, #tpu.memory_space<smem>>
    %c321 = arith.constant 321 : index
    %1899 = memref.load %arg2[%c321] : memref<528xf32, #tpu.memory_space<smem>>
    %c322 = arith.constant 322 : index
    %1900 = memref.load %arg2[%c322] : memref<528xf32, #tpu.memory_space<smem>>
    %c323 = arith.constant 323 : index
    %1901 = memref.load %arg2[%c323] : memref<528xf32, #tpu.memory_space<smem>>
    %c324 = arith.constant 324 : index
    %1902 = memref.load %arg2[%c324] : memref<528xf32, #tpu.memory_space<smem>>
    %c325 = arith.constant 325 : index
    %1903 = memref.load %arg2[%c325] : memref<528xf32, #tpu.memory_space<smem>>
    %c326 = arith.constant 326 : index
    %1904 = memref.load %arg2[%c326] : memref<528xf32, #tpu.memory_space<smem>>
    %c327 = arith.constant 327 : index
    %1905 = memref.load %arg2[%c327] : memref<528xf32, #tpu.memory_space<smem>>
    %c328 = arith.constant 328 : index
    %1906 = memref.load %arg2[%c328] : memref<528xf32, #tpu.memory_space<smem>>
    %c329 = arith.constant 329 : index
    %1907 = memref.load %arg2[%c329] : memref<528xf32, #tpu.memory_space<smem>>
    %c330 = arith.constant 330 : index
    %1908 = memref.load %arg2[%c330] : memref<528xf32, #tpu.memory_space<smem>>
    %c331 = arith.constant 331 : index
    %1909 = memref.load %arg2[%c331] : memref<528xf32, #tpu.memory_space<smem>>
    %c332 = arith.constant 332 : index
    %1910 = memref.load %arg2[%c332] : memref<528xf32, #tpu.memory_space<smem>>
    %c333 = arith.constant 333 : index
    %1911 = memref.load %arg2[%c333] : memref<528xf32, #tpu.memory_space<smem>>
    %c334 = arith.constant 334 : index
    %1912 = memref.load %arg2[%c334] : memref<528xf32, #tpu.memory_space<smem>>
    %c335 = arith.constant 335 : index
    %1913 = memref.load %arg2[%c335] : memref<528xf32, #tpu.memory_space<smem>>
    %c336 = arith.constant 336 : index
    %1914 = memref.load %arg2[%c336] : memref<528xf32, #tpu.memory_space<smem>>
    %c337 = arith.constant 337 : index
    %1915 = memref.load %arg2[%c337] : memref<528xf32, #tpu.memory_space<smem>>
    %c338 = arith.constant 338 : index
    %1916 = memref.load %arg2[%c338] : memref<528xf32, #tpu.memory_space<smem>>
    %c339 = arith.constant 339 : index
    %1917 = memref.load %arg2[%c339] : memref<528xf32, #tpu.memory_space<smem>>
    %c340 = arith.constant 340 : index
    %1918 = memref.load %arg2[%c340] : memref<528xf32, #tpu.memory_space<smem>>
    %c341 = arith.constant 341 : index
    %1919 = memref.load %arg2[%c341] : memref<528xf32, #tpu.memory_space<smem>>
    %c342 = arith.constant 342 : index
    %1920 = memref.load %arg2[%c342] : memref<528xf32, #tpu.memory_space<smem>>
    %c343 = arith.constant 343 : index
    %1921 = memref.load %arg2[%c343] : memref<528xf32, #tpu.memory_space<smem>>
    %c344 = arith.constant 344 : index
    %1922 = memref.load %arg2[%c344] : memref<528xf32, #tpu.memory_space<smem>>
    %c345 = arith.constant 345 : index
    %1923 = memref.load %arg2[%c345] : memref<528xf32, #tpu.memory_space<smem>>
    %c346 = arith.constant 346 : index
    %1924 = memref.load %arg2[%c346] : memref<528xf32, #tpu.memory_space<smem>>
    %c347 = arith.constant 347 : index
    %1925 = memref.load %arg2[%c347] : memref<528xf32, #tpu.memory_space<smem>>
    %c348 = arith.constant 348 : index
    %1926 = memref.load %arg2[%c348] : memref<528xf32, #tpu.memory_space<smem>>
    %c349 = arith.constant 349 : index
    %1927 = memref.load %arg2[%c349] : memref<528xf32, #tpu.memory_space<smem>>
    %c350 = arith.constant 350 : index
    %1928 = memref.load %arg2[%c350] : memref<528xf32, #tpu.memory_space<smem>>
    %c351 = arith.constant 351 : index
    %1929 = memref.load %arg2[%c351] : memref<528xf32, #tpu.memory_space<smem>>
    %c352 = arith.constant 352 : index
    %1930 = memref.load %arg2[%c352] : memref<528xf32, #tpu.memory_space<smem>>
    %c353 = arith.constant 353 : index
    %1931 = memref.load %arg2[%c353] : memref<528xf32, #tpu.memory_space<smem>>
    %c354 = arith.constant 354 : index
    %1932 = memref.load %arg2[%c354] : memref<528xf32, #tpu.memory_space<smem>>
    %c355 = arith.constant 355 : index
    %1933 = memref.load %arg2[%c355] : memref<528xf32, #tpu.memory_space<smem>>
    %c356 = arith.constant 356 : index
    %1934 = memref.load %arg2[%c356] : memref<528xf32, #tpu.memory_space<smem>>
    %c357 = arith.constant 357 : index
    %1935 = memref.load %arg2[%c357] : memref<528xf32, #tpu.memory_space<smem>>
    %c358 = arith.constant 358 : index
    %1936 = memref.load %arg2[%c358] : memref<528xf32, #tpu.memory_space<smem>>
    %c359 = arith.constant 359 : index
    %1937 = memref.load %arg2[%c359] : memref<528xf32, #tpu.memory_space<smem>>
    %c360 = arith.constant 360 : index
    %1938 = memref.load %arg2[%c360] : memref<528xf32, #tpu.memory_space<smem>>
    %c361 = arith.constant 361 : index
    %1939 = memref.load %arg2[%c361] : memref<528xf32, #tpu.memory_space<smem>>
    %c362 = arith.constant 362 : index
    %1940 = memref.load %arg2[%c362] : memref<528xf32, #tpu.memory_space<smem>>
    %c363 = arith.constant 363 : index
    %1941 = memref.load %arg2[%c363] : memref<528xf32, #tpu.memory_space<smem>>
    %c364 = arith.constant 364 : index
    %1942 = memref.load %arg2[%c364] : memref<528xf32, #tpu.memory_space<smem>>
    %c365 = arith.constant 365 : index
    %1943 = memref.load %arg2[%c365] : memref<528xf32, #tpu.memory_space<smem>>
    %c366 = arith.constant 366 : index
    %1944 = memref.load %arg2[%c366] : memref<528xf32, #tpu.memory_space<smem>>
    %c367 = arith.constant 367 : index
    %1945 = memref.load %arg2[%c367] : memref<528xf32, #tpu.memory_space<smem>>
    %c368 = arith.constant 368 : index
    %1946 = memref.load %arg2[%c368] : memref<528xf32, #tpu.memory_space<smem>>
    %c369 = arith.constant 369 : index
    %1947 = memref.load %arg2[%c369] : memref<528xf32, #tpu.memory_space<smem>>
    %c370 = arith.constant 370 : index
    %1948 = memref.load %arg2[%c370] : memref<528xf32, #tpu.memory_space<smem>>
    %c371 = arith.constant 371 : index
    %1949 = memref.load %arg2[%c371] : memref<528xf32, #tpu.memory_space<smem>>
    %c372 = arith.constant 372 : index
    %1950 = memref.load %arg2[%c372] : memref<528xf32, #tpu.memory_space<smem>>
    %c373 = arith.constant 373 : index
    %1951 = memref.load %arg2[%c373] : memref<528xf32, #tpu.memory_space<smem>>
    %c374 = arith.constant 374 : index
    %1952 = memref.load %arg2[%c374] : memref<528xf32, #tpu.memory_space<smem>>
    %c375 = arith.constant 375 : index
    %1953 = memref.load %arg2[%c375] : memref<528xf32, #tpu.memory_space<smem>>
    %c376 = arith.constant 376 : index
    %1954 = memref.load %arg2[%c376] : memref<528xf32, #tpu.memory_space<smem>>
    %c377 = arith.constant 377 : index
    %1955 = memref.load %arg2[%c377] : memref<528xf32, #tpu.memory_space<smem>>
    %c378 = arith.constant 378 : index
    %1956 = memref.load %arg2[%c378] : memref<528xf32, #tpu.memory_space<smem>>
    %c379 = arith.constant 379 : index
    %1957 = memref.load %arg2[%c379] : memref<528xf32, #tpu.memory_space<smem>>
    %c380 = arith.constant 380 : index
    %1958 = memref.load %arg2[%c380] : memref<528xf32, #tpu.memory_space<smem>>
    %c381 = arith.constant 381 : index
    %1959 = memref.load %arg2[%c381] : memref<528xf32, #tpu.memory_space<smem>>
    %c382 = arith.constant 382 : index
    %1960 = memref.load %arg2[%c382] : memref<528xf32, #tpu.memory_space<smem>>
    %c383 = arith.constant 383 : index
    %1961 = memref.load %arg2[%c383] : memref<528xf32, #tpu.memory_space<smem>>
    %c384 = arith.constant 384 : index
    %1962 = memref.load %arg2[%c384] : memref<528xf32, #tpu.memory_space<smem>>
    %c385 = arith.constant 385 : index
    %1963 = memref.load %arg2[%c385] : memref<528xf32, #tpu.memory_space<smem>>
    %c386 = arith.constant 386 : index
    %1964 = memref.load %arg2[%c386] : memref<528xf32, #tpu.memory_space<smem>>
    %c387 = arith.constant 387 : index
    %1965 = memref.load %arg2[%c387] : memref<528xf32, #tpu.memory_space<smem>>
    %c388 = arith.constant 388 : index
    %1966 = memref.load %arg2[%c388] : memref<528xf32, #tpu.memory_space<smem>>
    %c389 = arith.constant 389 : index
    %1967 = memref.load %arg2[%c389] : memref<528xf32, #tpu.memory_space<smem>>
    %c390 = arith.constant 390 : index
    %1968 = memref.load %arg2[%c390] : memref<528xf32, #tpu.memory_space<smem>>
    %c391 = arith.constant 391 : index
    %1969 = memref.load %arg2[%c391] : memref<528xf32, #tpu.memory_space<smem>>
    %c392 = arith.constant 392 : index
    %1970 = memref.load %arg2[%c392] : memref<528xf32, #tpu.memory_space<smem>>
    %c393 = arith.constant 393 : index
    %1971 = memref.load %arg2[%c393] : memref<528xf32, #tpu.memory_space<smem>>
    %c394 = arith.constant 394 : index
    %1972 = memref.load %arg2[%c394] : memref<528xf32, #tpu.memory_space<smem>>
    %c395 = arith.constant 395 : index
    %1973 = memref.load %arg2[%c395] : memref<528xf32, #tpu.memory_space<smem>>
    %c396 = arith.constant 396 : index
    %1974 = memref.load %arg2[%c396] : memref<528xf32, #tpu.memory_space<smem>>
    %c397 = arith.constant 397 : index
    %1975 = memref.load %arg2[%c397] : memref<528xf32, #tpu.memory_space<smem>>
    %c398 = arith.constant 398 : index
    %1976 = memref.load %arg2[%c398] : memref<528xf32, #tpu.memory_space<smem>>
    %c399 = arith.constant 399 : index
    %1977 = memref.load %arg2[%c399] : memref<528xf32, #tpu.memory_space<smem>>
    %c400 = arith.constant 400 : index
    %1978 = memref.load %arg2[%c400] : memref<528xf32, #tpu.memory_space<smem>>
    %c401 = arith.constant 401 : index
    %1979 = memref.load %arg2[%c401] : memref<528xf32, #tpu.memory_space<smem>>
    %c402 = arith.constant 402 : index
    %1980 = memref.load %arg2[%c402] : memref<528xf32, #tpu.memory_space<smem>>
    %c403 = arith.constant 403 : index
    %1981 = memref.load %arg2[%c403] : memref<528xf32, #tpu.memory_space<smem>>
    %c404 = arith.constant 404 : index
    %1982 = memref.load %arg2[%c404] : memref<528xf32, #tpu.memory_space<smem>>
    %c405 = arith.constant 405 : index
    %1983 = memref.load %arg2[%c405] : memref<528xf32, #tpu.memory_space<smem>>
    %c406 = arith.constant 406 : index
    %1984 = memref.load %arg2[%c406] : memref<528xf32, #tpu.memory_space<smem>>
    %c407 = arith.constant 407 : index
    %1985 = memref.load %arg2[%c407] : memref<528xf32, #tpu.memory_space<smem>>
    %c408 = arith.constant 408 : index
    %1986 = memref.load %arg2[%c408] : memref<528xf32, #tpu.memory_space<smem>>
    %c409 = arith.constant 409 : index
    %1987 = memref.load %arg2[%c409] : memref<528xf32, #tpu.memory_space<smem>>
    %c410 = arith.constant 410 : index
    %1988 = memref.load %arg2[%c410] : memref<528xf32, #tpu.memory_space<smem>>
    %c411 = arith.constant 411 : index
    %1989 = memref.load %arg2[%c411] : memref<528xf32, #tpu.memory_space<smem>>
    %c412 = arith.constant 412 : index
    %1990 = memref.load %arg2[%c412] : memref<528xf32, #tpu.memory_space<smem>>
    %c413 = arith.constant 413 : index
    %1991 = memref.load %arg2[%c413] : memref<528xf32, #tpu.memory_space<smem>>
    %c414 = arith.constant 414 : index
    %1992 = memref.load %arg2[%c414] : memref<528xf32, #tpu.memory_space<smem>>
    %c415 = arith.constant 415 : index
    %1993 = memref.load %arg2[%c415] : memref<528xf32, #tpu.memory_space<smem>>
    %c416 = arith.constant 416 : index
    %1994 = memref.load %arg2[%c416] : memref<528xf32, #tpu.memory_space<smem>>
    %c417 = arith.constant 417 : index
    %1995 = memref.load %arg2[%c417] : memref<528xf32, #tpu.memory_space<smem>>
    %c418 = arith.constant 418 : index
    %1996 = memref.load %arg2[%c418] : memref<528xf32, #tpu.memory_space<smem>>
    %c419 = arith.constant 419 : index
    %1997 = memref.load %arg2[%c419] : memref<528xf32, #tpu.memory_space<smem>>
    %c420 = arith.constant 420 : index
    %1998 = memref.load %arg2[%c420] : memref<528xf32, #tpu.memory_space<smem>>
    %c421 = arith.constant 421 : index
    %1999 = memref.load %arg2[%c421] : memref<528xf32, #tpu.memory_space<smem>>
    %c422 = arith.constant 422 : index
    %2000 = memref.load %arg2[%c422] : memref<528xf32, #tpu.memory_space<smem>>
    %c423 = arith.constant 423 : index
    %2001 = memref.load %arg2[%c423] : memref<528xf32, #tpu.memory_space<smem>>
    %c424 = arith.constant 424 : index
    %2002 = memref.load %arg2[%c424] : memref<528xf32, #tpu.memory_space<smem>>
    %c425 = arith.constant 425 : index
    %2003 = memref.load %arg2[%c425] : memref<528xf32, #tpu.memory_space<smem>>
    %c426 = arith.constant 426 : index
    %2004 = memref.load %arg2[%c426] : memref<528xf32, #tpu.memory_space<smem>>
    %c427 = arith.constant 427 : index
    %2005 = memref.load %arg2[%c427] : memref<528xf32, #tpu.memory_space<smem>>
    %c428 = arith.constant 428 : index
    %2006 = memref.load %arg2[%c428] : memref<528xf32, #tpu.memory_space<smem>>
    %c429 = arith.constant 429 : index
    %2007 = memref.load %arg2[%c429] : memref<528xf32, #tpu.memory_space<smem>>
    %c430 = arith.constant 430 : index
    %2008 = memref.load %arg2[%c430] : memref<528xf32, #tpu.memory_space<smem>>
    %c431 = arith.constant 431 : index
    %2009 = memref.load %arg2[%c431] : memref<528xf32, #tpu.memory_space<smem>>
    %c12_641 = arith.constant 12 : index
    %2010 = memref.load %arg3[%c12_641] : memref<20xf32, #tpu.memory_space<smem>>
    %c13_642 = arith.constant 13 : index
    %2011 = memref.load %arg3[%c13_642] : memref<20xf32, #tpu.memory_space<smem>>
    %c14_643 = arith.constant 14 : index
    %2012 = memref.load %arg3[%c14_643] : memref<20xf32, #tpu.memory_space<smem>>
    %c15_644 = arith.constant 15 : index
    %2013 = memref.load %arg3[%c15_644] : memref<20xf32, #tpu.memory_space<smem>>
    %c0_645 = arith.constant 0 : index
    %c0_646 = arith.constant 0 : index
    %c0_647 = arith.constant 0 : index
    %c0_648 = arith.constant 0 : index
    %2014 = vector.load %arg5[%c0_645, %c0_646, %c0_647, %c0_648] : memref<4x4x10x128xf32, #tpu.memory_space<vmem>>, vector<1x1x8x128xf32>
    %2015 = vector.shape_cast %2014 : vector<1x1x8x128xf32> to vector<8x128xf32>
    %c0_649 = arith.constant 0 : index
    %c0_650 = arith.constant 0 : index
    %c1_651 = arith.constant 1 : index
    %c0_652 = arith.constant 0 : index
    %2016 = vector.load %arg5[%c0_649, %c0_650, %c1_651, %c0_652] : memref<4x4x10x128xf32, #tpu.memory_space<vmem>>, vector<1x1x8x128xf32>
    %2017 = vector.shape_cast %2016 : vector<1x1x8x128xf32> to vector<8x128xf32>
    %c0_653 = arith.constant 0 : index
    %c0_654 = arith.constant 0 : index
    %c2_655 = arith.constant 2 : index
    %c0_656 = arith.constant 0 : index
    %2018 = vector.load %arg5[%c0_653, %c0_654, %c2_655, %c0_656] : memref<4x4x10x128xf32, #tpu.memory_space<vmem>>, vector<1x1x8x128xf32>
    %2019 = vector.shape_cast %2018 : vector<1x1x8x128xf32> to vector<8x128xf32>
    %2020 = vector.broadcast %1818 : f32 to vector<8x128xf32>
    %2021 = arith.mulf %2020, %2015 : vector<8x128xf32>
    %2022 = vector.broadcast %1819 : f32 to vector<8x128xf32>
    %2023 = arith.mulf %2022, %2017 : vector<8x128xf32>
    %2024 = arith.addf %2021, %2023 : vector<8x128xf32>
    %2025 = vector.broadcast %1820 : f32 to vector<8x128xf32>
    %2026 = arith.mulf %2025, %2019 : vector<8x128xf32>
    %2027 = arith.addf %2024, %2026 : vector<8x128xf32>
    %2028 = vector.broadcast %1866 : f32 to vector<8x128xf32>
    %2029 = arith.mulf %2028, %2015 : vector<8x128xf32>
    %2030 = vector.broadcast %1867 : f32 to vector<8x128xf32>
    %2031 = arith.mulf %2030, %2017 : vector<8x128xf32>
    %2032 = arith.addf %2029, %2031 : vector<8x128xf32>
    %2033 = vector.broadcast %1868 : f32 to vector<8x128xf32>
    %2034 = arith.mulf %2033, %2019 : vector<8x128xf32>
    %2035 = arith.addf %2032, %2034 : vector<8x128xf32>
    %2036 = vector.broadcast %1914 : f32 to vector<8x128xf32>
    %2037 = arith.mulf %2036, %2015 : vector<8x128xf32>
    %2038 = vector.broadcast %1915 : f32 to vector<8x128xf32>
    %2039 = arith.mulf %2038, %2017 : vector<8x128xf32>
    %2040 = arith.addf %2037, %2039 : vector<8x128xf32>
    %2041 = vector.broadcast %1916 : f32 to vector<8x128xf32>
    %2042 = arith.mulf %2041, %2019 : vector<8x128xf32>
    %2043 = arith.addf %2040, %2042 : vector<8x128xf32>
    %2044 = vector.broadcast %1962 : f32 to vector<8x128xf32>
    %2045 = arith.mulf %2044, %2015 : vector<8x128xf32>
    %2046 = vector.broadcast %1963 : f32 to vector<8x128xf32>
    %2047 = arith.mulf %2046, %2017 : vector<8x128xf32>
    %2048 = arith.addf %2045, %2047 : vector<8x128xf32>
    %2049 = vector.broadcast %1964 : f32 to vector<8x128xf32>
    %2050 = arith.mulf %2049, %2019 : vector<8x128xf32>
    %2051 = arith.addf %2048, %2050 : vector<8x128xf32>
    %c0_657 = arith.constant 0 : index
    %c1_658 = arith.constant 1 : index
    %c0_659 = arith.constant 0 : index
    %c0_660 = arith.constant 0 : index
    %2052 = vector.load %arg5[%c0_657, %c1_658, %c0_659, %c0_660] : memref<4x4x10x128xf32, #tpu.memory_space<vmem>>, vector<1x1x8x128xf32>
    %2053 = vector.shape_cast %2052 : vector<1x1x8x128xf32> to vector<8x128xf32>
    %c0_661 = arith.constant 0 : index
    %c1_662 = arith.constant 1 : index
    %c1_663 = arith.constant 1 : index
    %c0_664 = arith.constant 0 : index
    %2054 = vector.load %arg5[%c0_661, %c1_662, %c1_663, %c0_664] : memref<4x4x10x128xf32, #tpu.memory_space<vmem>>, vector<1x1x8x128xf32>
    %2055 = vector.shape_cast %2054 : vector<1x1x8x128xf32> to vector<8x128xf32>
    %c0_665 = arith.constant 0 : index
    %c1_666 = arith.constant 1 : index
    %c2_667 = arith.constant 2 : index
    %c0_668 = arith.constant 0 : index
    %2056 = vector.load %arg5[%c0_665, %c1_666, %c2_667, %c0_668] : memref<4x4x10x128xf32, #tpu.memory_space<vmem>>, vector<1x1x8x128xf32>
    %2057 = vector.shape_cast %2056 : vector<1x1x8x128xf32> to vector<8x128xf32>
    %2058 = vector.broadcast %1821 : f32 to vector<8x128xf32>
    %2059 = arith.mulf %2058, %2053 : vector<8x128xf32>
    %2060 = arith.addf %2027, %2059 : vector<8x128xf32>
    %2061 = vector.broadcast %1822 : f32 to vector<8x128xf32>
    %2062 = arith.mulf %2061, %2055 : vector<8x128xf32>
    %2063 = arith.addf %2060, %2062 : vector<8x128xf32>
    %2064 = vector.broadcast %1823 : f32 to vector<8x128xf32>
    %2065 = arith.mulf %2064, %2057 : vector<8x128xf32>
    %2066 = arith.addf %2063, %2065 : vector<8x128xf32>
    %2067 = vector.broadcast %1869 : f32 to vector<8x128xf32>
    %2068 = arith.mulf %2067, %2053 : vector<8x128xf32>
    %2069 = arith.addf %2035, %2068 : vector<8x128xf32>
    %2070 = vector.broadcast %1870 : f32 to vector<8x128xf32>
    %2071 = arith.mulf %2070, %2055 : vector<8x128xf32>
    %2072 = arith.addf %2069, %2071 : vector<8x128xf32>
    %2073 = vector.broadcast %1871 : f32 to vector<8x128xf32>
    %2074 = arith.mulf %2073, %2057 : vector<8x128xf32>
    %2075 = arith.addf %2072, %2074 : vector<8x128xf32>
    %2076 = vector.broadcast %1917 : f32 to vector<8x128xf32>
    %2077 = arith.mulf %2076, %2053 : vector<8x128xf32>
    %2078 = arith.addf %2043, %2077 : vector<8x128xf32>
    %2079 = vector.broadcast %1918 : f32 to vector<8x128xf32>
    %2080 = arith.mulf %2079, %2055 : vector<8x128xf32>
    %2081 = arith.addf %2078, %2080 : vector<8x128xf32>
    %2082 = vector.broadcast %1919 : f32 to vector<8x128xf32>
    %2083 = arith.mulf %2082, %2057 : vector<8x128xf32>
    %2084 = arith.addf %2081, %2083 : vector<8x128xf32>
    %2085 = vector.broadcast %1965 : f32 to vector<8x128xf32>
    %2086 = arith.mulf %2085, %2053 : vector<8x128xf32>
    %2087 = arith.addf %2051, %2086 : vector<8x128xf32>
    %2088 = vector.broadcast %1966 : f32 to vector<8x128xf32>
    %2089 = arith.mulf %2088, %2055 : vector<8x128xf32>
    %2090 = arith.addf %2087, %2089 : vector<8x128xf32>
    %2091 = vector.broadcast %1967 : f32 to vector<8x128xf32>
    %2092 = arith.mulf %2091, %2057 : vector<8x128xf32>
    %2093 = arith.addf %2090, %2092 : vector<8x128xf32>
    %c0_669 = arith.constant 0 : index
    %c2_670 = arith.constant 2 : index
    %c0_671 = arith.constant 0 : index
    %c0_672 = arith.constant 0 : index
    %2094 = vector.load %arg5[%c0_669, %c2_670, %c0_671, %c0_672] : memref<4x4x10x128xf32, #tpu.memory_space<vmem>>, vector<1x1x8x128xf32>
    %2095 = vector.shape_cast %2094 : vector<1x1x8x128xf32> to vector<8x128xf32>
    %c0_673 = arith.constant 0 : index
    %c2_674 = arith.constant 2 : index
    %c1_675 = arith.constant 1 : index
    %c0_676 = arith.constant 0 : index
    %2096 = vector.load %arg5[%c0_673, %c2_674, %c1_675, %c0_676] : memref<4x4x10x128xf32, #tpu.memory_space<vmem>>, vector<1x1x8x128xf32>
    %2097 = vector.shape_cast %2096 : vector<1x1x8x128xf32> to vector<8x128xf32>
    %c0_677 = arith.constant 0 : index
    %c2_678 = arith.constant 2 : index
    %c2_679 = arith.constant 2 : index
    %c0_680 = arith.constant 0 : index
    %2098 = vector.load %arg5[%c0_677, %c2_678, %c2_679, %c0_680] : memref<4x4x10x128xf32, #tpu.memory_space<vmem>>, vector<1x1x8x128xf32>
    %2099 = vector.shape_cast %2098 : vector<1x1x8x128xf32> to vector<8x128xf32>
    %2100 = vector.broadcast %1824 : f32 to vector<8x128xf32>
    %2101 = arith.mulf %2100, %2095 : vector<8x128xf32>
    %2102 = arith.addf %2066, %2101 : vector<8x128xf32>
    %2103 = vector.broadcast %1825 : f32 to vector<8x128xf32>
    %2104 = arith.mulf %2103, %2097 : vector<8x128xf32>
    %2105 = arith.addf %2102, %2104 : vector<8x128xf32>
    %2106 = vector.broadcast %1826 : f32 to vector<8x128xf32>
    %2107 = arith.mulf %2106, %2099 : vector<8x128xf32>
    %2108 = arith.addf %2105, %2107 : vector<8x128xf32>
    %2109 = vector.broadcast %1872 : f32 to vector<8x128xf32>
    %2110 = arith.mulf %2109, %2095 : vector<8x128xf32>
    %2111 = arith.addf %2075, %2110 : vector<8x128xf32>
    %2112 = vector.broadcast %1873 : f32 to vector<8x128xf32>
    %2113 = arith.mulf %2112, %2097 : vector<8x128xf32>
    %2114 = arith.addf %2111, %2113 : vector<8x128xf32>
    %2115 = vector.broadcast %1874 : f32 to vector<8x128xf32>
    %2116 = arith.mulf %2115, %2099 : vector<8x128xf32>
    %2117 = arith.addf %2114, %2116 : vector<8x128xf32>
    %2118 = vector.broadcast %1920 : f32 to vector<8x128xf32>
    %2119 = arith.mulf %2118, %2095 : vector<8x128xf32>
    %2120 = arith.addf %2084, %2119 : vector<8x128xf32>
    %2121 = vector.broadcast %1921 : f32 to vector<8x128xf32>
    %2122 = arith.mulf %2121, %2097 : vector<8x128xf32>
    %2123 = arith.addf %2120, %2122 : vector<8x128xf32>
    %2124 = vector.broadcast %1922 : f32 to vector<8x128xf32>
    %2125 = arith.mulf %2124, %2099 : vector<8x128xf32>
    %2126 = arith.addf %2123, %2125 : vector<8x128xf32>
    %2127 = vector.broadcast %1968 : f32 to vector<8x128xf32>
    %2128 = arith.mulf %2127, %2095 : vector<8x128xf32>
    %2129 = arith.addf %2093, %2128 : vector<8x128xf32>
    %2130 = vector.broadcast %1969 : f32 to vector<8x128xf32>
    %2131 = arith.mulf %2130, %2097 : vector<8x128xf32>
    %2132 = arith.addf %2129, %2131 : vector<8x128xf32>
    %2133 = vector.broadcast %1970 : f32 to vector<8x128xf32>
    %2134 = arith.mulf %2133, %2099 : vector<8x128xf32>
    %2135 = arith.addf %2132, %2134 : vector<8x128xf32>
    %c0_681 = arith.constant 0 : index
    %c3_682 = arith.constant 3 : index
    %c0_683 = arith.constant 0 : index
    %c0_684 = arith.constant 0 : index
    %2136 = vector.load %arg5[%c0_681, %c3_682, %c0_683, %c0_684] : memref<4x4x10x128xf32, #tpu.memory_space<vmem>>, vector<1x1x8x128xf32>
    %2137 = vector.shape_cast %2136 : vector<1x1x8x128xf32> to vector<8x128xf32>
    %c0_685 = arith.constant 0 : index
    %c3_686 = arith.constant 3 : index
    %c1_687 = arith.constant 1 : index
    %c0_688 = arith.constant 0 : index
    %2138 = vector.load %arg5[%c0_685, %c3_686, %c1_687, %c0_688] : memref<4x4x10x128xf32, #tpu.memory_space<vmem>>, vector<1x1x8x128xf32>
    %2139 = vector.shape_cast %2138 : vector<1x1x8x128xf32> to vector<8x128xf32>
    %c0_689 = arith.constant 0 : index
    %c3_690 = arith.constant 3 : index
    %c2_691 = arith.constant 2 : index
    %c0_692 = arith.constant 0 : index
    %2140 = vector.load %arg5[%c0_689, %c3_690, %c2_691, %c0_692] : memref<4x4x10x128xf32, #tpu.memory_space<vmem>>, vector<1x1x8x128xf32>
    %2141 = vector.shape_cast %2140 : vector<1x1x8x128xf32> to vector<8x128xf32>
    %2142 = vector.broadcast %1827 : f32 to vector<8x128xf32>
    %2143 = arith.mulf %2142, %2137 : vector<8x128xf32>
    %2144 = arith.addf %2108, %2143 : vector<8x128xf32>
    %2145 = vector.broadcast %1828 : f32 to vector<8x128xf32>
    %2146 = arith.mulf %2145, %2139 : vector<8x128xf32>
    %2147 = arith.addf %2144, %2146 : vector<8x128xf32>
    %2148 = vector.broadcast %1829 : f32 to vector<8x128xf32>
    %2149 = arith.mulf %2148, %2141 : vector<8x128xf32>
    %2150 = arith.addf %2147, %2149 : vector<8x128xf32>
    %2151 = vector.broadcast %1875 : f32 to vector<8x128xf32>
    %2152 = arith.mulf %2151, %2137 : vector<8x128xf32>
    %2153 = arith.addf %2117, %2152 : vector<8x128xf32>
    %2154 = vector.broadcast %1876 : f32 to vector<8x128xf32>
    %2155 = arith.mulf %2154, %2139 : vector<8x128xf32>
    %2156 = arith.addf %2153, %2155 : vector<8x128xf32>
    %2157 = vector.broadcast %1877 : f32 to vector<8x128xf32>
    %2158 = arith.mulf %2157, %2141 : vector<8x128xf32>
    %2159 = arith.addf %2156, %2158 : vector<8x128xf32>
    %2160 = vector.broadcast %1923 : f32 to vector<8x128xf32>
    %2161 = arith.mulf %2160, %2137 : vector<8x128xf32>
    %2162 = arith.addf %2126, %2161 : vector<8x128xf32>
    %2163 = vector.broadcast %1924 : f32 to vector<8x128xf32>
    %2164 = arith.mulf %2163, %2139 : vector<8x128xf32>
    %2165 = arith.addf %2162, %2164 : vector<8x128xf32>
    %2166 = vector.broadcast %1925 : f32 to vector<8x128xf32>
    %2167 = arith.mulf %2166, %2141 : vector<8x128xf32>
    %2168 = arith.addf %2165, %2167 : vector<8x128xf32>
    %2169 = vector.broadcast %1971 : f32 to vector<8x128xf32>
    %2170 = arith.mulf %2169, %2137 : vector<8x128xf32>
    %2171 = arith.addf %2135, %2170 : vector<8x128xf32>
    %2172 = vector.broadcast %1972 : f32 to vector<8x128xf32>
    %2173 = arith.mulf %2172, %2139 : vector<8x128xf32>
    %2174 = arith.addf %2171, %2173 : vector<8x128xf32>
    %2175 = vector.broadcast %1973 : f32 to vector<8x128xf32>
    %2176 = arith.mulf %2175, %2141 : vector<8x128xf32>
    %2177 = arith.addf %2174, %2176 : vector<8x128xf32>
    %c1_693 = arith.constant 1 : index
    %c0_694 = arith.constant 0 : index
    %c0_695 = arith.constant 0 : index
    %c0_696 = arith.constant 0 : index
    %2178 = vector.load %arg5[%c1_693, %c0_694, %c0_695, %c0_696] : memref<4x4x10x128xf32, #tpu.memory_space<vmem>>, vector<1x1x8x128xf32>
    %2179 = vector.shape_cast %2178 : vector<1x1x8x128xf32> to vector<8x128xf32>
    %c1_697 = arith.constant 1 : index
    %c0_698 = arith.constant 0 : index
    %c1_699 = arith.constant 1 : index
    %c0_700 = arith.constant 0 : index
    %2180 = vector.load %arg5[%c1_697, %c0_698, %c1_699, %c0_700] : memref<4x4x10x128xf32, #tpu.memory_space<vmem>>, vector<1x1x8x128xf32>
    %2181 = vector.shape_cast %2180 : vector<1x1x8x128xf32> to vector<8x128xf32>
    %c1_701 = arith.constant 1 : index
    %c0_702 = arith.constant 0 : index
    %c2_703 = arith.constant 2 : index
    %c0_704 = arith.constant 0 : index
    %2182 = vector.load %arg5[%c1_701, %c0_702, %c2_703, %c0_704] : memref<4x4x10x128xf32, #tpu.memory_space<vmem>>, vector<1x1x8x128xf32>
    %2183 = vector.shape_cast %2182 : vector<1x1x8x128xf32> to vector<8x128xf32>
    %2184 = vector.broadcast %1830 : f32 to vector<8x128xf32>
    %2185 = arith.mulf %2184, %2179 : vector<8x128xf32>
    %2186 = arith.addf %2150, %2185 : vector<8x128xf32>
    %2187 = vector.broadcast %1831 : f32 to vector<8x128xf32>
    %2188 = arith.mulf %2187, %2181 : vector<8x128xf32>
    %2189 = arith.addf %2186, %2188 : vector<8x128xf32>
    %2190 = vector.broadcast %1832 : f32 to vector<8x128xf32>
    %2191 = arith.mulf %2190, %2183 : vector<8x128xf32>
    %2192 = arith.addf %2189, %2191 : vector<8x128xf32>
    %2193 = vector.broadcast %1878 : f32 to vector<8x128xf32>
    %2194 = arith.mulf %2193, %2179 : vector<8x128xf32>
    %2195 = arith.addf %2159, %2194 : vector<8x128xf32>
    %2196 = vector.broadcast %1879 : f32 to vector<8x128xf32>
    %2197 = arith.mulf %2196, %2181 : vector<8x128xf32>
    %2198 = arith.addf %2195, %2197 : vector<8x128xf32>
    %2199 = vector.broadcast %1880 : f32 to vector<8x128xf32>
    %2200 = arith.mulf %2199, %2183 : vector<8x128xf32>
    %2201 = arith.addf %2198, %2200 : vector<8x128xf32>
    %2202 = vector.broadcast %1926 : f32 to vector<8x128xf32>
    %2203 = arith.mulf %2202, %2179 : vector<8x128xf32>
    %2204 = arith.addf %2168, %2203 : vector<8x128xf32>
    %2205 = vector.broadcast %1927 : f32 to vector<8x128xf32>
    %2206 = arith.mulf %2205, %2181 : vector<8x128xf32>
    %2207 = arith.addf %2204, %2206 : vector<8x128xf32>
    %2208 = vector.broadcast %1928 : f32 to vector<8x128xf32>
    %2209 = arith.mulf %2208, %2183 : vector<8x128xf32>
    %2210 = arith.addf %2207, %2209 : vector<8x128xf32>
    %2211 = vector.broadcast %1974 : f32 to vector<8x128xf32>
    %2212 = arith.mulf %2211, %2179 : vector<8x128xf32>
    %2213 = arith.addf %2177, %2212 : vector<8x128xf32>
    %2214 = vector.broadcast %1975 : f32 to vector<8x128xf32>
    %2215 = arith.mulf %2214, %2181 : vector<8x128xf32>
    %2216 = arith.addf %2213, %2215 : vector<8x128xf32>
    %2217 = vector.broadcast %1976 : f32 to vector<8x128xf32>
    %2218 = arith.mulf %2217, %2183 : vector<8x128xf32>
    %2219 = arith.addf %2216, %2218 : vector<8x128xf32>
    %c1_705 = arith.constant 1 : index
    %c1_706 = arith.constant 1 : index
    %c0_707 = arith.constant 0 : index
    %c0_708 = arith.constant 0 : index
    %2220 = vector.load %arg5[%c1_705, %c1_706, %c0_707, %c0_708] : memref<4x4x10x128xf32, #tpu.memory_space<vmem>>, vector<1x1x8x128xf32>
    %2221 = vector.shape_cast %2220 : vector<1x1x8x128xf32> to vector<8x128xf32>
    %c1_709 = arith.constant 1 : index
    %c1_710 = arith.constant 1 : index
    %c1_711 = arith.constant 1 : index
    %c0_712 = arith.constant 0 : index
    %2222 = vector.load %arg5[%c1_709, %c1_710, %c1_711, %c0_712] : memref<4x4x10x128xf32, #tpu.memory_space<vmem>>, vector<1x1x8x128xf32>
    %2223 = vector.shape_cast %2222 : vector<1x1x8x128xf32> to vector<8x128xf32>
    %c1_713 = arith.constant 1 : index
    %c1_714 = arith.constant 1 : index
    %c2_715 = arith.constant 2 : index
    %c0_716 = arith.constant 0 : index
    %2224 = vector.load %arg5[%c1_713, %c1_714, %c2_715, %c0_716] : memref<4x4x10x128xf32, #tpu.memory_space<vmem>>, vector<1x1x8x128xf32>
    %2225 = vector.shape_cast %2224 : vector<1x1x8x128xf32> to vector<8x128xf32>
    %2226 = vector.broadcast %1833 : f32 to vector<8x128xf32>
    %2227 = arith.mulf %2226, %2221 : vector<8x128xf32>
    %2228 = arith.addf %2192, %2227 : vector<8x128xf32>
    %2229 = vector.broadcast %1834 : f32 to vector<8x128xf32>
    %2230 = arith.mulf %2229, %2223 : vector<8x128xf32>
    %2231 = arith.addf %2228, %2230 : vector<8x128xf32>
    %2232 = vector.broadcast %1835 : f32 to vector<8x128xf32>
    %2233 = arith.mulf %2232, %2225 : vector<8x128xf32>
    %2234 = arith.addf %2231, %2233 : vector<8x128xf32>
    %2235 = vector.broadcast %1881 : f32 to vector<8x128xf32>
    %2236 = arith.mulf %2235, %2221 : vector<8x128xf32>
    %2237 = arith.addf %2201, %2236 : vector<8x128xf32>
    %2238 = vector.broadcast %1882 : f32 to vector<8x128xf32>
    %2239 = arith.mulf %2238, %2223 : vector<8x128xf32>
    %2240 = arith.addf %2237, %2239 : vector<8x128xf32>
    %2241 = vector.broadcast %1883 : f32 to vector<8x128xf32>
    %2242 = arith.mulf %2241, %2225 : vector<8x128xf32>
    %2243 = arith.addf %2240, %2242 : vector<8x128xf32>
    %2244 = vector.broadcast %1929 : f32 to vector<8x128xf32>
    %2245 = arith.mulf %2244, %2221 : vector<8x128xf32>
    %2246 = arith.addf %2210, %2245 : vector<8x128xf32>
    %2247 = vector.broadcast %1930 : f32 to vector<8x128xf32>
    %2248 = arith.mulf %2247, %2223 : vector<8x128xf32>
    %2249 = arith.addf %2246, %2248 : vector<8x128xf32>
    %2250 = vector.broadcast %1931 : f32 to vector<8x128xf32>
    %2251 = arith.mulf %2250, %2225 : vector<8x128xf32>
    %2252 = arith.addf %2249, %2251 : vector<8x128xf32>
    %2253 = vector.broadcast %1977 : f32 to vector<8x128xf32>
    %2254 = arith.mulf %2253, %2221 : vector<8x128xf32>
    %2255 = arith.addf %2219, %2254 : vector<8x128xf32>
    %2256 = vector.broadcast %1978 : f32 to vector<8x128xf32>
    %2257 = arith.mulf %2256, %2223 : vector<8x128xf32>
    %2258 = arith.addf %2255, %2257 : vector<8x128xf32>
    %2259 = vector.broadcast %1979 : f32 to vector<8x128xf32>
    %2260 = arith.mulf %2259, %2225 : vector<8x128xf32>
    %2261 = arith.addf %2258, %2260 : vector<8x128xf32>
    %c1_717 = arith.constant 1 : index
    %c2_718 = arith.constant 2 : index
    %c0_719 = arith.constant 0 : index
    %c0_720 = arith.constant 0 : index
    %2262 = vector.load %arg5[%c1_717, %c2_718, %c0_719, %c0_720] : memref<4x4x10x128xf32, #tpu.memory_space<vmem>>, vector<1x1x8x128xf32>
    %2263 = vector.shape_cast %2262 : vector<1x1x8x128xf32> to vector<8x128xf32>
    %c1_721 = arith.constant 1 : index
    %c2_722 = arith.constant 2 : index
    %c1_723 = arith.constant 1 : index
    %c0_724 = arith.constant 0 : index
    %2264 = vector.load %arg5[%c1_721, %c2_722, %c1_723, %c0_724] : memref<4x4x10x128xf32, #tpu.memory_space<vmem>>, vector<1x1x8x128xf32>
    %2265 = vector.shape_cast %2264 : vector<1x1x8x128xf32> to vector<8x128xf32>
    %c1_725 = arith.constant 1 : index
    %c2_726 = arith.constant 2 : index
    %c2_727 = arith.constant 2 : index
    %c0_728 = arith.constant 0 : index
    %2266 = vector.load %arg5[%c1_725, %c2_726, %c2_727, %c0_728] : memref<4x4x10x128xf32, #tpu.memory_space<vmem>>, vector<1x1x8x128xf32>
    %2267 = vector.shape_cast %2266 : vector<1x1x8x128xf32> to vector<8x128xf32>
    %2268 = vector.broadcast %1836 : f32 to vector<8x128xf32>
    %2269 = arith.mulf %2268, %2263 : vector<8x128xf32>
    %2270 = arith.addf %2234, %2269 : vector<8x128xf32>
    %2271 = vector.broadcast %1837 : f32 to vector<8x128xf32>
    %2272 = arith.mulf %2271, %2265 : vector<8x128xf32>
    %2273 = arith.addf %2270, %2272 : vector<8x128xf32>
    %2274 = vector.broadcast %1838 : f32 to vector<8x128xf32>
    %2275 = arith.mulf %2274, %2267 : vector<8x128xf32>
    %2276 = arith.addf %2273, %2275 : vector<8x128xf32>
    %2277 = vector.broadcast %1884 : f32 to vector<8x128xf32>
    %2278 = arith.mulf %2277, %2263 : vector<8x128xf32>
    %2279 = arith.addf %2243, %2278 : vector<8x128xf32>
    %2280 = vector.broadcast %1885 : f32 to vector<8x128xf32>
    %2281 = arith.mulf %2280, %2265 : vector<8x128xf32>
    %2282 = arith.addf %2279, %2281 : vector<8x128xf32>
    %2283 = vector.broadcast %1886 : f32 to vector<8x128xf32>
    %2284 = arith.mulf %2283, %2267 : vector<8x128xf32>
    %2285 = arith.addf %2282, %2284 : vector<8x128xf32>
    %2286 = vector.broadcast %1932 : f32 to vector<8x128xf32>
    %2287 = arith.mulf %2286, %2263 : vector<8x128xf32>
    %2288 = arith.addf %2252, %2287 : vector<8x128xf32>
    %2289 = vector.broadcast %1933 : f32 to vector<8x128xf32>
    %2290 = arith.mulf %2289, %2265 : vector<8x128xf32>
    %2291 = arith.addf %2288, %2290 : vector<8x128xf32>
    %2292 = vector.broadcast %1934 : f32 to vector<8x128xf32>
    %2293 = arith.mulf %2292, %2267 : vector<8x128xf32>
    %2294 = arith.addf %2291, %2293 : vector<8x128xf32>
    %2295 = vector.broadcast %1980 : f32 to vector<8x128xf32>
    %2296 = arith.mulf %2295, %2263 : vector<8x128xf32>
    %2297 = arith.addf %2261, %2296 : vector<8x128xf32>
    %2298 = vector.broadcast %1981 : f32 to vector<8x128xf32>
    %2299 = arith.mulf %2298, %2265 : vector<8x128xf32>
    %2300 = arith.addf %2297, %2299 : vector<8x128xf32>
    %2301 = vector.broadcast %1982 : f32 to vector<8x128xf32>
    %2302 = arith.mulf %2301, %2267 : vector<8x128xf32>
    %2303 = arith.addf %2300, %2302 : vector<8x128xf32>
    %c1_729 = arith.constant 1 : index
    %c3_730 = arith.constant 3 : index
    %c0_731 = arith.constant 0 : index
    %c0_732 = arith.constant 0 : index
    %2304 = vector.load %arg5[%c1_729, %c3_730, %c0_731, %c0_732] : memref<4x4x10x128xf32, #tpu.memory_space<vmem>>, vector<1x1x8x128xf32>
    %2305 = vector.shape_cast %2304 : vector<1x1x8x128xf32> to vector<8x128xf32>
    %c1_733 = arith.constant 1 : index
    %c3_734 = arith.constant 3 : index
    %c1_735 = arith.constant 1 : index
    %c0_736 = arith.constant 0 : index
    %2306 = vector.load %arg5[%c1_733, %c3_734, %c1_735, %c0_736] : memref<4x4x10x128xf32, #tpu.memory_space<vmem>>, vector<1x1x8x128xf32>
    %2307 = vector.shape_cast %2306 : vector<1x1x8x128xf32> to vector<8x128xf32>
    %c1_737 = arith.constant 1 : index
    %c3_738 = arith.constant 3 : index
    %c2_739 = arith.constant 2 : index
    %c0_740 = arith.constant 0 : index
    %2308 = vector.load %arg5[%c1_737, %c3_738, %c2_739, %c0_740] : memref<4x4x10x128xf32, #tpu.memory_space<vmem>>, vector<1x1x8x128xf32>
    %2309 = vector.shape_cast %2308 : vector<1x1x8x128xf32> to vector<8x128xf32>
    %2310 = vector.broadcast %1839 : f32 to vector<8x128xf32>
    %2311 = arith.mulf %2310, %2305 : vector<8x128xf32>
    %2312 = arith.addf %2276, %2311 : vector<8x128xf32>
    %2313 = vector.broadcast %1840 : f32 to vector<8x128xf32>
    %2314 = arith.mulf %2313, %2307 : vector<8x128xf32>
    %2315 = arith.addf %2312, %2314 : vector<8x128xf32>
    %2316 = vector.broadcast %1841 : f32 to vector<8x128xf32>
    %2317 = arith.mulf %2316, %2309 : vector<8x128xf32>
    %2318 = arith.addf %2315, %2317 : vector<8x128xf32>
    %2319 = vector.broadcast %1887 : f32 to vector<8x128xf32>
    %2320 = arith.mulf %2319, %2305 : vector<8x128xf32>
    %2321 = arith.addf %2285, %2320 : vector<8x128xf32>
    %2322 = vector.broadcast %1888 : f32 to vector<8x128xf32>
    %2323 = arith.mulf %2322, %2307 : vector<8x128xf32>
    %2324 = arith.addf %2321, %2323 : vector<8x128xf32>
    %2325 = vector.broadcast %1889 : f32 to vector<8x128xf32>
    %2326 = arith.mulf %2325, %2309 : vector<8x128xf32>
    %2327 = arith.addf %2324, %2326 : vector<8x128xf32>
    %2328 = vector.broadcast %1935 : f32 to vector<8x128xf32>
    %2329 = arith.mulf %2328, %2305 : vector<8x128xf32>
    %2330 = arith.addf %2294, %2329 : vector<8x128xf32>
    %2331 = vector.broadcast %1936 : f32 to vector<8x128xf32>
    %2332 = arith.mulf %2331, %2307 : vector<8x128xf32>
    %2333 = arith.addf %2330, %2332 : vector<8x128xf32>
    %2334 = vector.broadcast %1937 : f32 to vector<8x128xf32>
    %2335 = arith.mulf %2334, %2309 : vector<8x128xf32>
    %2336 = arith.addf %2333, %2335 : vector<8x128xf32>
    %2337 = vector.broadcast %1983 : f32 to vector<8x128xf32>
    %2338 = arith.mulf %2337, %2305 : vector<8x128xf32>
    %2339 = arith.addf %2303, %2338 : vector<8x128xf32>
    %2340 = vector.broadcast %1984 : f32 to vector<8x128xf32>
    %2341 = arith.mulf %2340, %2307 : vector<8x128xf32>
    %2342 = arith.addf %2339, %2341 : vector<8x128xf32>
    %2343 = vector.broadcast %1985 : f32 to vector<8x128xf32>
    %2344 = arith.mulf %2343, %2309 : vector<8x128xf32>
    %2345 = arith.addf %2342, %2344 : vector<8x128xf32>
    %c2_741 = arith.constant 2 : index
    %c0_742 = arith.constant 0 : index
    %c0_743 = arith.constant 0 : index
    %c0_744 = arith.constant 0 : index
    %2346 = vector.load %arg5[%c2_741, %c0_742, %c0_743, %c0_744] : memref<4x4x10x128xf32, #tpu.memory_space<vmem>>, vector<1x1x8x128xf32>
    %2347 = vector.shape_cast %2346 : vector<1x1x8x128xf32> to vector<8x128xf32>
    %c2_745 = arith.constant 2 : index
    %c0_746 = arith.constant 0 : index
    %c1_747 = arith.constant 1 : index
    %c0_748 = arith.constant 0 : index
    %2348 = vector.load %arg5[%c2_745, %c0_746, %c1_747, %c0_748] : memref<4x4x10x128xf32, #tpu.memory_space<vmem>>, vector<1x1x8x128xf32>
    %2349 = vector.shape_cast %2348 : vector<1x1x8x128xf32> to vector<8x128xf32>
    %c2_749 = arith.constant 2 : index
    %c0_750 = arith.constant 0 : index
    %c2_751 = arith.constant 2 : index
    %c0_752 = arith.constant 0 : index
    %2350 = vector.load %arg5[%c2_749, %c0_750, %c2_751, %c0_752] : memref<4x4x10x128xf32, #tpu.memory_space<vmem>>, vector<1x1x8x128xf32>
    %2351 = vector.shape_cast %2350 : vector<1x1x8x128xf32> to vector<8x128xf32>
    %2352 = vector.broadcast %1842 : f32 to vector<8x128xf32>
    %2353 = arith.mulf %2352, %2347 : vector<8x128xf32>
    %2354 = arith.addf %2318, %2353 : vector<8x128xf32>
    %2355 = vector.broadcast %1843 : f32 to vector<8x128xf32>
    %2356 = arith.mulf %2355, %2349 : vector<8x128xf32>
    %2357 = arith.addf %2354, %2356 : vector<8x128xf32>
    %2358 = vector.broadcast %1844 : f32 to vector<8x128xf32>
    %2359 = arith.mulf %2358, %2351 : vector<8x128xf32>
    %2360 = arith.addf %2357, %2359 : vector<8x128xf32>
    %2361 = vector.broadcast %1890 : f32 to vector<8x128xf32>
    %2362 = arith.mulf %2361, %2347 : vector<8x128xf32>
    %2363 = arith.addf %2327, %2362 : vector<8x128xf32>
    %2364 = vector.broadcast %1891 : f32 to vector<8x128xf32>
    %2365 = arith.mulf %2364, %2349 : vector<8x128xf32>
    %2366 = arith.addf %2363, %2365 : vector<8x128xf32>
    %2367 = vector.broadcast %1892 : f32 to vector<8x128xf32>
    %2368 = arith.mulf %2367, %2351 : vector<8x128xf32>
    %2369 = arith.addf %2366, %2368 : vector<8x128xf32>
    %2370 = vector.broadcast %1938 : f32 to vector<8x128xf32>
    %2371 = arith.mulf %2370, %2347 : vector<8x128xf32>
    %2372 = arith.addf %2336, %2371 : vector<8x128xf32>
    %2373 = vector.broadcast %1939 : f32 to vector<8x128xf32>
    %2374 = arith.mulf %2373, %2349 : vector<8x128xf32>
    %2375 = arith.addf %2372, %2374 : vector<8x128xf32>
    %2376 = vector.broadcast %1940 : f32 to vector<8x128xf32>
    %2377 = arith.mulf %2376, %2351 : vector<8x128xf32>
    %2378 = arith.addf %2375, %2377 : vector<8x128xf32>
    %2379 = vector.broadcast %1986 : f32 to vector<8x128xf32>
    %2380 = arith.mulf %2379, %2347 : vector<8x128xf32>
    %2381 = arith.addf %2345, %2380 : vector<8x128xf32>
    %2382 = vector.broadcast %1987 : f32 to vector<8x128xf32>
    %2383 = arith.mulf %2382, %2349 : vector<8x128xf32>
    %2384 = arith.addf %2381, %2383 : vector<8x128xf32>
    %2385 = vector.broadcast %1988 : f32 to vector<8x128xf32>
    %2386 = arith.mulf %2385, %2351 : vector<8x128xf32>
    %2387 = arith.addf %2384, %2386 : vector<8x128xf32>
    %c2_753 = arith.constant 2 : index
    %c1_754 = arith.constant 1 : index
    %c0_755 = arith.constant 0 : index
    %c0_756 = arith.constant 0 : index
    %2388 = vector.load %arg5[%c2_753, %c1_754, %c0_755, %c0_756] : memref<4x4x10x128xf32, #tpu.memory_space<vmem>>, vector<1x1x8x128xf32>
    %2389 = vector.shape_cast %2388 : vector<1x1x8x128xf32> to vector<8x128xf32>
    %c2_757 = arith.constant 2 : index
    %c1_758 = arith.constant 1 : index
    %c1_759 = arith.constant 1 : index
    %c0_760 = arith.constant 0 : index
    %2390 = vector.load %arg5[%c2_757, %c1_758, %c1_759, %c0_760] : memref<4x4x10x128xf32, #tpu.memory_space<vmem>>, vector<1x1x8x128xf32>
    %2391 = vector.shape_cast %2390 : vector<1x1x8x128xf32> to vector<8x128xf32>
    %c2_761 = arith.constant 2 : index
    %c1_762 = arith.constant 1 : index
    %c2_763 = arith.constant 2 : index
    %c0_764 = arith.constant 0 : index
    %2392 = vector.load %arg5[%c2_761, %c1_762, %c2_763, %c0_764] : memref<4x4x10x128xf32, #tpu.memory_space<vmem>>, vector<1x1x8x128xf32>
    %2393 = vector.shape_cast %2392 : vector<1x1x8x128xf32> to vector<8x128xf32>
    %2394 = vector.broadcast %1845 : f32 to vector<8x128xf32>
    %2395 = arith.mulf %2394, %2389 : vector<8x128xf32>
    %2396 = arith.addf %2360, %2395 : vector<8x128xf32>
    %2397 = vector.broadcast %1846 : f32 to vector<8x128xf32>
    %2398 = arith.mulf %2397, %2391 : vector<8x128xf32>
    %2399 = arith.addf %2396, %2398 : vector<8x128xf32>
    %2400 = vector.broadcast %1847 : f32 to vector<8x128xf32>
    %2401 = arith.mulf %2400, %2393 : vector<8x128xf32>
    %2402 = arith.addf %2399, %2401 : vector<8x128xf32>
    %2403 = vector.broadcast %1893 : f32 to vector<8x128xf32>
    %2404 = arith.mulf %2403, %2389 : vector<8x128xf32>
    %2405 = arith.addf %2369, %2404 : vector<8x128xf32>
    %2406 = vector.broadcast %1894 : f32 to vector<8x128xf32>
    %2407 = arith.mulf %2406, %2391 : vector<8x128xf32>
    %2408 = arith.addf %2405, %2407 : vector<8x128xf32>
    %2409 = vector.broadcast %1895 : f32 to vector<8x128xf32>
    %2410 = arith.mulf %2409, %2393 : vector<8x128xf32>
    %2411 = arith.addf %2408, %2410 : vector<8x128xf32>
    %2412 = vector.broadcast %1941 : f32 to vector<8x128xf32>
    %2413 = arith.mulf %2412, %2389 : vector<8x128xf32>
    %2414 = arith.addf %2378, %2413 : vector<8x128xf32>
    %2415 = vector.broadcast %1942 : f32 to vector<8x128xf32>
    %2416 = arith.mulf %2415, %2391 : vector<8x128xf32>
    %2417 = arith.addf %2414, %2416 : vector<8x128xf32>
    %2418 = vector.broadcast %1943 : f32 to vector<8x128xf32>
    %2419 = arith.mulf %2418, %2393 : vector<8x128xf32>
    %2420 = arith.addf %2417, %2419 : vector<8x128xf32>
    %2421 = vector.broadcast %1989 : f32 to vector<8x128xf32>
    %2422 = arith.mulf %2421, %2389 : vector<8x128xf32>
    %2423 = arith.addf %2387, %2422 : vector<8x128xf32>
    %2424 = vector.broadcast %1990 : f32 to vector<8x128xf32>
    %2425 = arith.mulf %2424, %2391 : vector<8x128xf32>
    %2426 = arith.addf %2423, %2425 : vector<8x128xf32>
    %2427 = vector.broadcast %1991 : f32 to vector<8x128xf32>
    %2428 = arith.mulf %2427, %2393 : vector<8x128xf32>
    %2429 = arith.addf %2426, %2428 : vector<8x128xf32>
    %c2_765 = arith.constant 2 : index
    %c2_766 = arith.constant 2 : index
    %c0_767 = arith.constant 0 : index
    %c0_768 = arith.constant 0 : index
    %2430 = vector.load %arg5[%c2_765, %c2_766, %c0_767, %c0_768] : memref<4x4x10x128xf32, #tpu.memory_space<vmem>>, vector<1x1x8x128xf32>
    %2431 = vector.shape_cast %2430 : vector<1x1x8x128xf32> to vector<8x128xf32>
    %c2_769 = arith.constant 2 : index
    %c2_770 = arith.constant 2 : index
    %c1_771 = arith.constant 1 : index
    %c0_772 = arith.constant 0 : index
    %2432 = vector.load %arg5[%c2_769, %c2_770, %c1_771, %c0_772] : memref<4x4x10x128xf32, #tpu.memory_space<vmem>>, vector<1x1x8x128xf32>
    %2433 = vector.shape_cast %2432 : vector<1x1x8x128xf32> to vector<8x128xf32>
    %c2_773 = arith.constant 2 : index
    %c2_774 = arith.constant 2 : index
    %c2_775 = arith.constant 2 : index
    %c0_776 = arith.constant 0 : index
    %2434 = vector.load %arg5[%c2_773, %c2_774, %c2_775, %c0_776] : memref<4x4x10x128xf32, #tpu.memory_space<vmem>>, vector<1x1x8x128xf32>
    %2435 = vector.shape_cast %2434 : vector<1x1x8x128xf32> to vector<8x128xf32>
    %2436 = vector.broadcast %1848 : f32 to vector<8x128xf32>
    %2437 = arith.mulf %2436, %2431 : vector<8x128xf32>
    %2438 = arith.addf %2402, %2437 : vector<8x128xf32>
    %2439 = vector.broadcast %1849 : f32 to vector<8x128xf32>
    %2440 = arith.mulf %2439, %2433 : vector<8x128xf32>
    %2441 = arith.addf %2438, %2440 : vector<8x128xf32>
    %2442 = vector.broadcast %1850 : f32 to vector<8x128xf32>
    %2443 = arith.mulf %2442, %2435 : vector<8x128xf32>
    %2444 = arith.addf %2441, %2443 : vector<8x128xf32>
    %2445 = vector.broadcast %1896 : f32 to vector<8x128xf32>
    %2446 = arith.mulf %2445, %2431 : vector<8x128xf32>
    %2447 = arith.addf %2411, %2446 : vector<8x128xf32>
    %2448 = vector.broadcast %1897 : f32 to vector<8x128xf32>
    %2449 = arith.mulf %2448, %2433 : vector<8x128xf32>
    %2450 = arith.addf %2447, %2449 : vector<8x128xf32>
    %2451 = vector.broadcast %1898 : f32 to vector<8x128xf32>
    %2452 = arith.mulf %2451, %2435 : vector<8x128xf32>
    %2453 = arith.addf %2450, %2452 : vector<8x128xf32>
    %2454 = vector.broadcast %1944 : f32 to vector<8x128xf32>
    %2455 = arith.mulf %2454, %2431 : vector<8x128xf32>
    %2456 = arith.addf %2420, %2455 : vector<8x128xf32>
    %2457 = vector.broadcast %1945 : f32 to vector<8x128xf32>
    %2458 = arith.mulf %2457, %2433 : vector<8x128xf32>
    %2459 = arith.addf %2456, %2458 : vector<8x128xf32>
    %2460 = vector.broadcast %1946 : f32 to vector<8x128xf32>
    %2461 = arith.mulf %2460, %2435 : vector<8x128xf32>
    %2462 = arith.addf %2459, %2461 : vector<8x128xf32>
    %2463 = vector.broadcast %1992 : f32 to vector<8x128xf32>
    %2464 = arith.mulf %2463, %2431 : vector<8x128xf32>
    %2465 = arith.addf %2429, %2464 : vector<8x128xf32>
    %2466 = vector.broadcast %1993 : f32 to vector<8x128xf32>
    %2467 = arith.mulf %2466, %2433 : vector<8x128xf32>
    %2468 = arith.addf %2465, %2467 : vector<8x128xf32>
    %2469 = vector.broadcast %1994 : f32 to vector<8x128xf32>
    %2470 = arith.mulf %2469, %2435 : vector<8x128xf32>
    %2471 = arith.addf %2468, %2470 : vector<8x128xf32>
    %c2_777 = arith.constant 2 : index
    %c3_778 = arith.constant 3 : index
    %c0_779 = arith.constant 0 : index
    %c0_780 = arith.constant 0 : index
    %2472 = vector.load %arg5[%c2_777, %c3_778, %c0_779, %c0_780] : memref<4x4x10x128xf32, #tpu.memory_space<vmem>>, vector<1x1x8x128xf32>
    %2473 = vector.shape_cast %2472 : vector<1x1x8x128xf32> to vector<8x128xf32>
    %c2_781 = arith.constant 2 : index
    %c3_782 = arith.constant 3 : index
    %c1_783 = arith.constant 1 : index
    %c0_784 = arith.constant 0 : index
    %2474 = vector.load %arg5[%c2_781, %c3_782, %c1_783, %c0_784] : memref<4x4x10x128xf32, #tpu.memory_space<vmem>>, vector<1x1x8x128xf32>
    %2475 = vector.shape_cast %2474 : vector<1x1x8x128xf32> to vector<8x128xf32>
    %c2_785 = arith.constant 2 : index
    %c3_786 = arith.constant 3 : index
    %c2_787 = arith.constant 2 : index
    %c0_788 = arith.constant 0 : index
    %2476 = vector.load %arg5[%c2_785, %c3_786, %c2_787, %c0_788] : memref<4x4x10x128xf32, #tpu.memory_space<vmem>>, vector<1x1x8x128xf32>
    %2477 = vector.shape_cast %2476 : vector<1x1x8x128xf32> to vector<8x128xf32>
    %2478 = vector.broadcast %1851 : f32 to vector<8x128xf32>
    %2479 = arith.mulf %2478, %2473 : vector<8x128xf32>
    %2480 = arith.addf %2444, %2479 : vector<8x128xf32>
    %2481 = vector.broadcast %1852 : f32 to vector<8x128xf32>
    %2482 = arith.mulf %2481, %2475 : vector<8x128xf32>
    %2483 = arith.addf %2480, %2482 : vector<8x128xf32>
    %2484 = vector.broadcast %1853 : f32 to vector<8x128xf32>
    %2485 = arith.mulf %2484, %2477 : vector<8x128xf32>
    %2486 = arith.addf %2483, %2485 : vector<8x128xf32>
    %2487 = vector.broadcast %1899 : f32 to vector<8x128xf32>
    %2488 = arith.mulf %2487, %2473 : vector<8x128xf32>
    %2489 = arith.addf %2453, %2488 : vector<8x128xf32>
    %2490 = vector.broadcast %1900 : f32 to vector<8x128xf32>
    %2491 = arith.mulf %2490, %2475 : vector<8x128xf32>
    %2492 = arith.addf %2489, %2491 : vector<8x128xf32>
    %2493 = vector.broadcast %1901 : f32 to vector<8x128xf32>
    %2494 = arith.mulf %2493, %2477 : vector<8x128xf32>
    %2495 = arith.addf %2492, %2494 : vector<8x128xf32>
    %2496 = vector.broadcast %1947 : f32 to vector<8x128xf32>
    %2497 = arith.mulf %2496, %2473 : vector<8x128xf32>
    %2498 = arith.addf %2462, %2497 : vector<8x128xf32>
    %2499 = vector.broadcast %1948 : f32 to vector<8x128xf32>
    %2500 = arith.mulf %2499, %2475 : vector<8x128xf32>
    %2501 = arith.addf %2498, %2500 : vector<8x128xf32>
    %2502 = vector.broadcast %1949 : f32 to vector<8x128xf32>
    %2503 = arith.mulf %2502, %2477 : vector<8x128xf32>
    %2504 = arith.addf %2501, %2503 : vector<8x128xf32>
    %2505 = vector.broadcast %1995 : f32 to vector<8x128xf32>
    %2506 = arith.mulf %2505, %2473 : vector<8x128xf32>
    %2507 = arith.addf %2471, %2506 : vector<8x128xf32>
    %2508 = vector.broadcast %1996 : f32 to vector<8x128xf32>
    %2509 = arith.mulf %2508, %2475 : vector<8x128xf32>
    %2510 = arith.addf %2507, %2509 : vector<8x128xf32>
    %2511 = vector.broadcast %1997 : f32 to vector<8x128xf32>
    %2512 = arith.mulf %2511, %2477 : vector<8x128xf32>
    %2513 = arith.addf %2510, %2512 : vector<8x128xf32>
    %c3_789 = arith.constant 3 : index
    %c0_790 = arith.constant 0 : index
    %c0_791 = arith.constant 0 : index
    %c0_792 = arith.constant 0 : index
    %2514 = vector.load %arg5[%c3_789, %c0_790, %c0_791, %c0_792] : memref<4x4x10x128xf32, #tpu.memory_space<vmem>>, vector<1x1x8x128xf32>
    %2515 = vector.shape_cast %2514 : vector<1x1x8x128xf32> to vector<8x128xf32>
    %c3_793 = arith.constant 3 : index
    %c0_794 = arith.constant 0 : index
    %c1_795 = arith.constant 1 : index
    %c0_796 = arith.constant 0 : index
    %2516 = vector.load %arg5[%c3_793, %c0_794, %c1_795, %c0_796] : memref<4x4x10x128xf32, #tpu.memory_space<vmem>>, vector<1x1x8x128xf32>
    %2517 = vector.shape_cast %2516 : vector<1x1x8x128xf32> to vector<8x128xf32>
    %c3_797 = arith.constant 3 : index
    %c0_798 = arith.constant 0 : index
    %c2_799 = arith.constant 2 : index
    %c0_800 = arith.constant 0 : index
    %2518 = vector.load %arg5[%c3_797, %c0_798, %c2_799, %c0_800] : memref<4x4x10x128xf32, #tpu.memory_space<vmem>>, vector<1x1x8x128xf32>
    %2519 = vector.shape_cast %2518 : vector<1x1x8x128xf32> to vector<8x128xf32>
    %2520 = vector.broadcast %1854 : f32 to vector<8x128xf32>
    %2521 = arith.mulf %2520, %2515 : vector<8x128xf32>
    %2522 = arith.addf %2486, %2521 : vector<8x128xf32>
    %2523 = vector.broadcast %1855 : f32 to vector<8x128xf32>
    %2524 = arith.mulf %2523, %2517 : vector<8x128xf32>
    %2525 = arith.addf %2522, %2524 : vector<8x128xf32>
    %2526 = vector.broadcast %1856 : f32 to vector<8x128xf32>
    %2527 = arith.mulf %2526, %2519 : vector<8x128xf32>
    %2528 = arith.addf %2525, %2527 : vector<8x128xf32>
    %2529 = vector.broadcast %1902 : f32 to vector<8x128xf32>
    %2530 = arith.mulf %2529, %2515 : vector<8x128xf32>
    %2531 = arith.addf %2495, %2530 : vector<8x128xf32>
    %2532 = vector.broadcast %1903 : f32 to vector<8x128xf32>
    %2533 = arith.mulf %2532, %2517 : vector<8x128xf32>
    %2534 = arith.addf %2531, %2533 : vector<8x128xf32>
    %2535 = vector.broadcast %1904 : f32 to vector<8x128xf32>
    %2536 = arith.mulf %2535, %2519 : vector<8x128xf32>
    %2537 = arith.addf %2534, %2536 : vector<8x128xf32>
    %2538 = vector.broadcast %1950 : f32 to vector<8x128xf32>
    %2539 = arith.mulf %2538, %2515 : vector<8x128xf32>
    %2540 = arith.addf %2504, %2539 : vector<8x128xf32>
    %2541 = vector.broadcast %1951 : f32 to vector<8x128xf32>
    %2542 = arith.mulf %2541, %2517 : vector<8x128xf32>
    %2543 = arith.addf %2540, %2542 : vector<8x128xf32>
    %2544 = vector.broadcast %1952 : f32 to vector<8x128xf32>
    %2545 = arith.mulf %2544, %2519 : vector<8x128xf32>
    %2546 = arith.addf %2543, %2545 : vector<8x128xf32>
    %2547 = vector.broadcast %1998 : f32 to vector<8x128xf32>
    %2548 = arith.mulf %2547, %2515 : vector<8x128xf32>
    %2549 = arith.addf %2513, %2548 : vector<8x128xf32>
    %2550 = vector.broadcast %1999 : f32 to vector<8x128xf32>
    %2551 = arith.mulf %2550, %2517 : vector<8x128xf32>
    %2552 = arith.addf %2549, %2551 : vector<8x128xf32>
    %2553 = vector.broadcast %2000 : f32 to vector<8x128xf32>
    %2554 = arith.mulf %2553, %2519 : vector<8x128xf32>
    %2555 = arith.addf %2552, %2554 : vector<8x128xf32>
    %c3_801 = arith.constant 3 : index
    %c1_802 = arith.constant 1 : index
    %c0_803 = arith.constant 0 : index
    %c0_804 = arith.constant 0 : index
    %2556 = vector.load %arg5[%c3_801, %c1_802, %c0_803, %c0_804] : memref<4x4x10x128xf32, #tpu.memory_space<vmem>>, vector<1x1x8x128xf32>
    %2557 = vector.shape_cast %2556 : vector<1x1x8x128xf32> to vector<8x128xf32>
    %c3_805 = arith.constant 3 : index
    %c1_806 = arith.constant 1 : index
    %c1_807 = arith.constant 1 : index
    %c0_808 = arith.constant 0 : index
    %2558 = vector.load %arg5[%c3_805, %c1_806, %c1_807, %c0_808] : memref<4x4x10x128xf32, #tpu.memory_space<vmem>>, vector<1x1x8x128xf32>
    %2559 = vector.shape_cast %2558 : vector<1x1x8x128xf32> to vector<8x128xf32>
    %c3_809 = arith.constant 3 : index
    %c1_810 = arith.constant 1 : index
    %c2_811 = arith.constant 2 : index
    %c0_812 = arith.constant 0 : index
    %2560 = vector.load %arg5[%c3_809, %c1_810, %c2_811, %c0_812] : memref<4x4x10x128xf32, #tpu.memory_space<vmem>>, vector<1x1x8x128xf32>
    %2561 = vector.shape_cast %2560 : vector<1x1x8x128xf32> to vector<8x128xf32>
    %2562 = vector.broadcast %1857 : f32 to vector<8x128xf32>
    %2563 = arith.mulf %2562, %2557 : vector<8x128xf32>
    %2564 = arith.addf %2528, %2563 : vector<8x128xf32>
    %2565 = vector.broadcast %1858 : f32 to vector<8x128xf32>
    %2566 = arith.mulf %2565, %2559 : vector<8x128xf32>
    %2567 = arith.addf %2564, %2566 : vector<8x128xf32>
    %2568 = vector.broadcast %1859 : f32 to vector<8x128xf32>
    %2569 = arith.mulf %2568, %2561 : vector<8x128xf32>
    %2570 = arith.addf %2567, %2569 : vector<8x128xf32>
    %2571 = vector.broadcast %1905 : f32 to vector<8x128xf32>
    %2572 = arith.mulf %2571, %2557 : vector<8x128xf32>
    %2573 = arith.addf %2537, %2572 : vector<8x128xf32>
    %2574 = vector.broadcast %1906 : f32 to vector<8x128xf32>
    %2575 = arith.mulf %2574, %2559 : vector<8x128xf32>
    %2576 = arith.addf %2573, %2575 : vector<8x128xf32>
    %2577 = vector.broadcast %1907 : f32 to vector<8x128xf32>
    %2578 = arith.mulf %2577, %2561 : vector<8x128xf32>
    %2579 = arith.addf %2576, %2578 : vector<8x128xf32>
    %2580 = vector.broadcast %1953 : f32 to vector<8x128xf32>
    %2581 = arith.mulf %2580, %2557 : vector<8x128xf32>
    %2582 = arith.addf %2546, %2581 : vector<8x128xf32>
    %2583 = vector.broadcast %1954 : f32 to vector<8x128xf32>
    %2584 = arith.mulf %2583, %2559 : vector<8x128xf32>
    %2585 = arith.addf %2582, %2584 : vector<8x128xf32>
    %2586 = vector.broadcast %1955 : f32 to vector<8x128xf32>
    %2587 = arith.mulf %2586, %2561 : vector<8x128xf32>
    %2588 = arith.addf %2585, %2587 : vector<8x128xf32>
    %2589 = vector.broadcast %2001 : f32 to vector<8x128xf32>
    %2590 = arith.mulf %2589, %2557 : vector<8x128xf32>
    %2591 = arith.addf %2555, %2590 : vector<8x128xf32>
    %2592 = vector.broadcast %2002 : f32 to vector<8x128xf32>
    %2593 = arith.mulf %2592, %2559 : vector<8x128xf32>
    %2594 = arith.addf %2591, %2593 : vector<8x128xf32>
    %2595 = vector.broadcast %2003 : f32 to vector<8x128xf32>
    %2596 = arith.mulf %2595, %2561 : vector<8x128xf32>
    %2597 = arith.addf %2594, %2596 : vector<8x128xf32>
    %c3_813 = arith.constant 3 : index
    %c2_814 = arith.constant 2 : index
    %c0_815 = arith.constant 0 : index
    %c0_816 = arith.constant 0 : index
    %2598 = vector.load %arg5[%c3_813, %c2_814, %c0_815, %c0_816] : memref<4x4x10x128xf32, #tpu.memory_space<vmem>>, vector<1x1x8x128xf32>
    %2599 = vector.shape_cast %2598 : vector<1x1x8x128xf32> to vector<8x128xf32>
    %c3_817 = arith.constant 3 : index
    %c2_818 = arith.constant 2 : index
    %c1_819 = arith.constant 1 : index
    %c0_820 = arith.constant 0 : index
    %2600 = vector.load %arg5[%c3_817, %c2_818, %c1_819, %c0_820] : memref<4x4x10x128xf32, #tpu.memory_space<vmem>>, vector<1x1x8x128xf32>
    %2601 = vector.shape_cast %2600 : vector<1x1x8x128xf32> to vector<8x128xf32>
    %c3_821 = arith.constant 3 : index
    %c2_822 = arith.constant 2 : index
    %c2_823 = arith.constant 2 : index
    %c0_824 = arith.constant 0 : index
    %2602 = vector.load %arg5[%c3_821, %c2_822, %c2_823, %c0_824] : memref<4x4x10x128xf32, #tpu.memory_space<vmem>>, vector<1x1x8x128xf32>
    %2603 = vector.shape_cast %2602 : vector<1x1x8x128xf32> to vector<8x128xf32>
    %2604 = vector.broadcast %1860 : f32 to vector<8x128xf32>
    %2605 = arith.mulf %2604, %2599 : vector<8x128xf32>
    %2606 = arith.addf %2570, %2605 : vector<8x128xf32>
    %2607 = vector.broadcast %1861 : f32 to vector<8x128xf32>
    %2608 = arith.mulf %2607, %2601 : vector<8x128xf32>
    %2609 = arith.addf %2606, %2608 : vector<8x128xf32>
    %2610 = vector.broadcast %1862 : f32 to vector<8x128xf32>
    %2611 = arith.mulf %2610, %2603 : vector<8x128xf32>
    %2612 = arith.addf %2609, %2611 : vector<8x128xf32>
    %2613 = vector.broadcast %1908 : f32 to vector<8x128xf32>
    %2614 = arith.mulf %2613, %2599 : vector<8x128xf32>
    %2615 = arith.addf %2579, %2614 : vector<8x128xf32>
    %2616 = vector.broadcast %1909 : f32 to vector<8x128xf32>
    %2617 = arith.mulf %2616, %2601 : vector<8x128xf32>
    %2618 = arith.addf %2615, %2617 : vector<8x128xf32>
    %2619 = vector.broadcast %1910 : f32 to vector<8x128xf32>
    %2620 = arith.mulf %2619, %2603 : vector<8x128xf32>
    %2621 = arith.addf %2618, %2620 : vector<8x128xf32>
    %2622 = vector.broadcast %1956 : f32 to vector<8x128xf32>
    %2623 = arith.mulf %2622, %2599 : vector<8x128xf32>
    %2624 = arith.addf %2588, %2623 : vector<8x128xf32>
    %2625 = vector.broadcast %1957 : f32 to vector<8x128xf32>
    %2626 = arith.mulf %2625, %2601 : vector<8x128xf32>
    %2627 = arith.addf %2624, %2626 : vector<8x128xf32>
    %2628 = vector.broadcast %1958 : f32 to vector<8x128xf32>
    %2629 = arith.mulf %2628, %2603 : vector<8x128xf32>
    %2630 = arith.addf %2627, %2629 : vector<8x128xf32>
    %2631 = vector.broadcast %2004 : f32 to vector<8x128xf32>
    %2632 = arith.mulf %2631, %2599 : vector<8x128xf32>
    %2633 = arith.addf %2597, %2632 : vector<8x128xf32>
    %2634 = vector.broadcast %2005 : f32 to vector<8x128xf32>
    %2635 = arith.mulf %2634, %2601 : vector<8x128xf32>
    %2636 = arith.addf %2633, %2635 : vector<8x128xf32>
    %2637 = vector.broadcast %2006 : f32 to vector<8x128xf32>
    %2638 = arith.mulf %2637, %2603 : vector<8x128xf32>
    %2639 = arith.addf %2636, %2638 : vector<8x128xf32>
    %c3_825 = arith.constant 3 : index
    %c3_826 = arith.constant 3 : index
    %c0_827 = arith.constant 0 : index
    %c0_828 = arith.constant 0 : index
    %2640 = vector.load %arg5[%c3_825, %c3_826, %c0_827, %c0_828] : memref<4x4x10x128xf32, #tpu.memory_space<vmem>>, vector<1x1x8x128xf32>
    %2641 = vector.shape_cast %2640 : vector<1x1x8x128xf32> to vector<8x128xf32>
    %c3_829 = arith.constant 3 : index
    %c3_830 = arith.constant 3 : index
    %c1_831 = arith.constant 1 : index
    %c0_832 = arith.constant 0 : index
    %2642 = vector.load %arg5[%c3_829, %c3_830, %c1_831, %c0_832] : memref<4x4x10x128xf32, #tpu.memory_space<vmem>>, vector<1x1x8x128xf32>
    %2643 = vector.shape_cast %2642 : vector<1x1x8x128xf32> to vector<8x128xf32>
    %c3_833 = arith.constant 3 : index
    %c3_834 = arith.constant 3 : index
    %c2_835 = arith.constant 2 : index
    %c0_836 = arith.constant 0 : index
    %2644 = vector.load %arg5[%c3_833, %c3_834, %c2_835, %c0_836] : memref<4x4x10x128xf32, #tpu.memory_space<vmem>>, vector<1x1x8x128xf32>
    %2645 = vector.shape_cast %2644 : vector<1x1x8x128xf32> to vector<8x128xf32>
    %2646 = vector.broadcast %1863 : f32 to vector<8x128xf32>
    %2647 = arith.mulf %2646, %2641 : vector<8x128xf32>
    %2648 = arith.addf %2612, %2647 : vector<8x128xf32>
    %2649 = vector.broadcast %1864 : f32 to vector<8x128xf32>
    %2650 = arith.mulf %2649, %2643 : vector<8x128xf32>
    %2651 = arith.addf %2648, %2650 : vector<8x128xf32>
    %2652 = vector.broadcast %1865 : f32 to vector<8x128xf32>
    %2653 = arith.mulf %2652, %2645 : vector<8x128xf32>
    %2654 = arith.addf %2651, %2653 : vector<8x128xf32>
    %2655 = vector.broadcast %1911 : f32 to vector<8x128xf32>
    %2656 = arith.mulf %2655, %2641 : vector<8x128xf32>
    %2657 = arith.addf %2621, %2656 : vector<8x128xf32>
    %2658 = vector.broadcast %1912 : f32 to vector<8x128xf32>
    %2659 = arith.mulf %2658, %2643 : vector<8x128xf32>
    %2660 = arith.addf %2657, %2659 : vector<8x128xf32>
    %2661 = vector.broadcast %1913 : f32 to vector<8x128xf32>
    %2662 = arith.mulf %2661, %2645 : vector<8x128xf32>
    %2663 = arith.addf %2660, %2662 : vector<8x128xf32>
    %2664 = vector.broadcast %1959 : f32 to vector<8x128xf32>
    %2665 = arith.mulf %2664, %2641 : vector<8x128xf32>
    %2666 = arith.addf %2630, %2665 : vector<8x128xf32>
    %2667 = vector.broadcast %1960 : f32 to vector<8x128xf32>
    %2668 = arith.mulf %2667, %2643 : vector<8x128xf32>
    %2669 = arith.addf %2666, %2668 : vector<8x128xf32>
    %2670 = vector.broadcast %1961 : f32 to vector<8x128xf32>
    %2671 = arith.mulf %2670, %2645 : vector<8x128xf32>
    %2672 = arith.addf %2669, %2671 : vector<8x128xf32>
    %2673 = vector.broadcast %2007 : f32 to vector<8x128xf32>
    %2674 = arith.mulf %2673, %2641 : vector<8x128xf32>
    %2675 = arith.addf %2639, %2674 : vector<8x128xf32>
    %2676 = vector.broadcast %2008 : f32 to vector<8x128xf32>
    %2677 = arith.mulf %2676, %2643 : vector<8x128xf32>
    %2678 = arith.addf %2675, %2677 : vector<8x128xf32>
    %2679 = vector.broadcast %2009 : f32 to vector<8x128xf32>
    %2680 = arith.mulf %2679, %2645 : vector<8x128xf32>
    %2681 = arith.addf %2678, %2680 : vector<8x128xf32>
    %2682 = vector.broadcast %2010 : f32 to vector<8x128xf32>
    %2683 = arith.addf %2654, %2682 : vector<8x128xf32>
    %cst_837 = arith.constant 0.000000e+00 : f32
    %2684 = vector.broadcast %cst_837 : f32 to vector<8x128xf32>
    %2685 = arith.maximumf %2683, %2684 : vector<8x128xf32>
    %c0_838 = arith.constant 0 : index
    %c1_839 = arith.constant 1 : index
    %c1_840 = arith.constant 1 : index
    %c0_841 = arith.constant 0 : index
    %2686 = vector.load %arg6[%c0_838, %c1_839, %c1_840, %c0_841] : memref<4x2x10x128xf32, #tpu.memory_space<vmem>>, vector<1x1x8x128xf32>
    %2687 = vector.shape_cast %2686 : vector<1x1x8x128xf32> to vector<8x128xf32>
    %2688 = vector.shape_cast %2685 : vector<8x128xf32> to vector<1x1x8x128xf32>
    tpu.vector_store %arg6[%c0_838, %c1_839, %c1_840, %c0_841], %2688 {strides = array<i32>} : memref<4x2x10x128xf32, #tpu.memory_space<vmem>>, vector<1x1x8x128xf32>,
    %2689 = vector.broadcast %2011 : f32 to vector<8x128xf32>
    %2690 = arith.addf %2663, %2689 : vector<8x128xf32>
    %cst_842 = arith.constant 0.000000e+00 : f32
    %2691 = vector.broadcast %cst_842 : f32 to vector<8x128xf32>
    %2692 = arith.maximumf %2690, %2691 : vector<8x128xf32>
    %c1_843 = arith.constant 1 : index
    %c1_844 = arith.constant 1 : index
    %c1_845 = arith.constant 1 : index
    %c0_846 = arith.constant 0 : index
    %2693 = vector.load %arg6[%c1_843, %c1_844, %c1_845, %c0_846] : memref<4x2x10x128xf32, #tpu.memory_space<vmem>>, vector<1x1x8x128xf32>
    %2694 = vector.shape_cast %2693 : vector<1x1x8x128xf32> to vector<8x128xf32>
    %2695 = vector.shape_cast %2692 : vector<8x128xf32> to vector<1x1x8x128xf32>
    tpu.vector_store %arg6[%c1_843, %c1_844, %c1_845, %c0_846], %2695 {strides = array<i32>} : memref<4x2x10x128xf32, #tpu.memory_space<vmem>>, vector<1x1x8x128xf32>,
    %2696 = vector.broadcast %2012 : f32 to vector<8x128xf32>
    %2697 = arith.addf %2672, %2696 : vector<8x128xf32>
    %cst_847 = arith.constant 0.000000e+00 : f32
    %2698 = vector.broadcast %cst_847 : f32 to vector<8x128xf32>
    %2699 = arith.maximumf %2697, %2698 : vector<8x128xf32>
    %c2_848 = arith.constant 2 : index
    %c1_849 = arith.constant 1 : index
    %c1_850 = arith.constant 1 : index
    %c0_851 = arith.constant 0 : index
    %2700 = vector.load %arg6[%c2_848, %c1_849, %c1_850, %c0_851] : memref<4x2x10x128xf32, #tpu.memory_space<vmem>>, vector<1x1x8x128xf32>
    %2701 = vector.shape_cast %2700 : vector<1x1x8x128xf32> to vector<8x128xf32>
    %2702 = vector.shape_cast %2699 : vector<8x128xf32> to vector<1x1x8x128xf32>
    tpu.vector_store %arg6[%c2_848, %c1_849, %c1_850, %c0_851], %2702 {strides = array<i32>} : memref<4x2x10x128xf32, #tpu.memory_space<vmem>>, vector<1x1x8x128xf32>,
    %2703 = vector.broadcast %2013 : f32 to vector<8x128xf32>
    %2704 = arith.addf %2681, %2703 : vector<8x128xf32>
    %cst_852 = arith.constant 0.000000e+00 : f32
    %2705 = vector.broadcast %cst_852 : f32 to vector<8x128xf32>
    %2706 = arith.maximumf %2704, %2705 : vector<8x128xf32>
    %c3_853 = arith.constant 3 : index
    %c1_854 = arith.constant 1 : index
    %c1_855 = arith.constant 1 : index
    %c0_856 = arith.constant 0 : index
    %2707 = vector.load %arg6[%c3_853, %c1_854, %c1_855, %c0_856] : memref<4x2x10x128xf32, #tpu.memory_space<vmem>>, vector<1x1x8x128xf32>
    %2708 = vector.shape_cast %2707 : vector<1x1x8x128xf32> to vector<8x128xf32>
    %2709 = vector.shape_cast %2706 : vector<8x128xf32> to vector<1x1x8x128xf32>
    tpu.vector_store %arg6[%c3_853, %c1_854, %c1_855, %c0_856], %2709 {strides = array<i32>} : memref<4x2x10x128xf32, #tpu.memory_space<vmem>>, vector<1x1x8x128xf32>,
    %c432 = arith.constant 432 : index
    %2710 = memref.load %arg2[%c432] : memref<528xf32, #tpu.memory_space<smem>>
    %c433 = arith.constant 433 : index
    %2711 = memref.load %arg2[%c433] : memref<528xf32, #tpu.memory_space<smem>>
    %c434 = arith.constant 434 : index
    %2712 = memref.load %arg2[%c434] : memref<528xf32, #tpu.memory_space<smem>>
    %c435 = arith.constant 435 : index
    %2713 = memref.load %arg2[%c435] : memref<528xf32, #tpu.memory_space<smem>>
    %c436 = arith.constant 436 : index
    %2714 = memref.load %arg2[%c436] : memref<528xf32, #tpu.memory_space<smem>>
    %c437 = arith.constant 437 : index
    %2715 = memref.load %arg2[%c437] : memref<528xf32, #tpu.memory_space<smem>>
    %c438 = arith.constant 438 : index
    %2716 = memref.load %arg2[%c438] : memref<528xf32, #tpu.memory_space<smem>>
    %c439 = arith.constant 439 : index
    %2717 = memref.load %arg2[%c439] : memref<528xf32, #tpu.memory_space<smem>>
    %c440 = arith.constant 440 : index
    %2718 = memref.load %arg2[%c440] : memref<528xf32, #tpu.memory_space<smem>>
    %c441 = arith.constant 441 : index
    %2719 = memref.load %arg2[%c441] : memref<528xf32, #tpu.memory_space<smem>>
    %c442 = arith.constant 442 : index
    %2720 = memref.load %arg2[%c442] : memref<528xf32, #tpu.memory_space<smem>>
    %c443 = arith.constant 443 : index
    %2721 = memref.load %arg2[%c443] : memref<528xf32, #tpu.memory_space<smem>>
    %c444 = arith.constant 444 : index
    %2722 = memref.load %arg2[%c444] : memref<528xf32, #tpu.memory_space<smem>>
    %c445 = arith.constant 445 : index
    %2723 = memref.load %arg2[%c445] : memref<528xf32, #tpu.memory_space<smem>>
    %c446 = arith.constant 446 : index
    %2724 = memref.load %arg2[%c446] : memref<528xf32, #tpu.memory_space<smem>>
    %c447 = arith.constant 447 : index
    %2725 = memref.load %arg2[%c447] : memref<528xf32, #tpu.memory_space<smem>>
    %c448 = arith.constant 448 : index
    %2726 = memref.load %arg2[%c448] : memref<528xf32, #tpu.memory_space<smem>>
    %c449 = arith.constant 449 : index
    %2727 = memref.load %arg2[%c449] : memref<528xf32, #tpu.memory_space<smem>>
    %c450 = arith.constant 450 : index
    %2728 = memref.load %arg2[%c450] : memref<528xf32, #tpu.memory_space<smem>>
    %c451 = arith.constant 451 : index
    %2729 = memref.load %arg2[%c451] : memref<528xf32, #tpu.memory_space<smem>>
    %c452 = arith.constant 452 : index
    %2730 = memref.load %arg2[%c452] : memref<528xf32, #tpu.memory_space<smem>>
    %c453 = arith.constant 453 : index
    %2731 = memref.load %arg2[%c453] : memref<528xf32, #tpu.memory_space<smem>>
    %c454 = arith.constant 454 : index
    %2732 = memref.load %arg2[%c454] : memref<528xf32, #tpu.memory_space<smem>>
    %c455 = arith.constant 455 : index
    %2733 = memref.load %arg2[%c455] : memref<528xf32, #tpu.memory_space<smem>>
    %c456 = arith.constant 456 : index
    %2734 = memref.load %arg2[%c456] : memref<528xf32, #tpu.memory_space<smem>>
    %c457 = arith.constant 457 : index
    %2735 = memref.load %arg2[%c457] : memref<528xf32, #tpu.memory_space<smem>>
    %c458 = arith.constant 458 : index
    %2736 = memref.load %arg2[%c458] : memref<528xf32, #tpu.memory_space<smem>>
    %c459 = arith.constant 459 : index
    %2737 = memref.load %arg2[%c459] : memref<528xf32, #tpu.memory_space<smem>>
    %c460 = arith.constant 460 : index
    %2738 = memref.load %arg2[%c460] : memref<528xf32, #tpu.memory_space<smem>>
    %c461 = arith.constant 461 : index
    %2739 = memref.load %arg2[%c461] : memref<528xf32, #tpu.memory_space<smem>>
    %c462 = arith.constant 462 : index
    %2740 = memref.load %arg2[%c462] : memref<528xf32, #tpu.memory_space<smem>>
    %c463 = arith.constant 463 : index
    %2741 = memref.load %arg2[%c463] : memref<528xf32, #tpu.memory_space<smem>>
    %c464 = arith.constant 464 : index
    %2742 = memref.load %arg2[%c464] : memref<528xf32, #tpu.memory_space<smem>>
    %c465 = arith.constant 465 : index
    %2743 = memref.load %arg2[%c465] : memref<528xf32, #tpu.memory_space<smem>>
    %c466 = arith.constant 466 : index
    %2744 = memref.load %arg2[%c466] : memref<528xf32, #tpu.memory_space<smem>>
    %c467 = arith.constant 467 : index
    %2745 = memref.load %arg2[%c467] : memref<528xf32, #tpu.memory_space<smem>>
    %c468 = arith.constant 468 : index
    %2746 = memref.load %arg2[%c468] : memref<528xf32, #tpu.memory_space<smem>>
    %c469 = arith.constant 469 : index
    %2747 = memref.load %arg2[%c469] : memref<528xf32, #tpu.memory_space<smem>>
    %c470 = arith.constant 470 : index
    %2748 = memref.load %arg2[%c470] : memref<528xf32, #tpu.memory_space<smem>>
    %c471 = arith.constant 471 : index
    %2749 = memref.load %arg2[%c471] : memref<528xf32, #tpu.memory_space<smem>>
    %c472 = arith.constant 472 : index
    %2750 = memref.load %arg2[%c472] : memref<528xf32, #tpu.memory_space<smem>>
    %c473 = arith.constant 473 : index
    %2751 = memref.load %arg2[%c473] : memref<528xf32, #tpu.memory_space<smem>>
    %c474 = arith.constant 474 : index
    %2752 = memref.load %arg2[%c474] : memref<528xf32, #tpu.memory_space<smem>>
    %c475 = arith.constant 475 : index
    %2753 = memref.load %arg2[%c475] : memref<528xf32, #tpu.memory_space<smem>>
    %c476 = arith.constant 476 : index
    %2754 = memref.load %arg2[%c476] : memref<528xf32, #tpu.memory_space<smem>>
    %c477 = arith.constant 477 : index
    %2755 = memref.load %arg2[%c477] : memref<528xf32, #tpu.memory_space<smem>>
    %c478 = arith.constant 478 : index
    %2756 = memref.load %arg2[%c478] : memref<528xf32, #tpu.memory_space<smem>>
    %c479 = arith.constant 479 : index
    %2757 = memref.load %arg2[%c479] : memref<528xf32, #tpu.memory_space<smem>>
    %c480 = arith.constant 480 : index
    %2758 = memref.load %arg2[%c480] : memref<528xf32, #tpu.memory_space<smem>>
    %c481 = arith.constant 481 : index
    %2759 = memref.load %arg2[%c481] : memref<528xf32, #tpu.memory_space<smem>>
    %c482 = arith.constant 482 : index
    %2760 = memref.load %arg2[%c482] : memref<528xf32, #tpu.memory_space<smem>>
    %c483 = arith.constant 483 : index
    %2761 = memref.load %arg2[%c483] : memref<528xf32, #tpu.memory_space<smem>>
    %c484 = arith.constant 484 : index
    %2762 = memref.load %arg2[%c484] : memref<528xf32, #tpu.memory_space<smem>>
    %c485 = arith.constant 485 : index
    %2763 = memref.load %arg2[%c485] : memref<528xf32, #tpu.memory_space<smem>>
    %c486 = arith.constant 486 : index
    %2764 = memref.load %arg2[%c486] : memref<528xf32, #tpu.memory_space<smem>>
    %c487 = arith.constant 487 : index
    %2765 = memref.load %arg2[%c487] : memref<528xf32, #tpu.memory_space<smem>>
    %c488 = arith.constant 488 : index
    %2766 = memref.load %arg2[%c488] : memref<528xf32, #tpu.memory_space<smem>>
    %c489 = arith.constant 489 : index
    %2767 = memref.load %arg2[%c489] : memref<528xf32, #tpu.memory_space<smem>>
    %c490 = arith.constant 490 : index
    %2768 = memref.load %arg2[%c490] : memref<528xf32, #tpu.memory_space<smem>>
    %c491 = arith.constant 491 : index
    %2769 = memref.load %arg2[%c491] : memref<528xf32, #tpu.memory_space<smem>>
    %c492 = arith.constant 492 : index
    %2770 = memref.load %arg2[%c492] : memref<528xf32, #tpu.memory_space<smem>>
    %c493 = arith.constant 493 : index
    %2771 = memref.load %arg2[%c493] : memref<528xf32, #tpu.memory_space<smem>>
    %c494 = arith.constant 494 : index
    %2772 = memref.load %arg2[%c494] : memref<528xf32, #tpu.memory_space<smem>>
    %c495 = arith.constant 495 : index
    %2773 = memref.load %arg2[%c495] : memref<528xf32, #tpu.memory_space<smem>>
    %c496 = arith.constant 496 : index
    %2774 = memref.load %arg2[%c496] : memref<528xf32, #tpu.memory_space<smem>>
    %c497 = arith.constant 497 : index
    %2775 = memref.load %arg2[%c497] : memref<528xf32, #tpu.memory_space<smem>>
    %c498 = arith.constant 498 : index
    %2776 = memref.load %arg2[%c498] : memref<528xf32, #tpu.memory_space<smem>>
    %c499 = arith.constant 499 : index
    %2777 = memref.load %arg2[%c499] : memref<528xf32, #tpu.memory_space<smem>>
    %c500 = arith.constant 500 : index
    %2778 = memref.load %arg2[%c500] : memref<528xf32, #tpu.memory_space<smem>>
    %c501 = arith.constant 501 : index
    %2779 = memref.load %arg2[%c501] : memref<528xf32, #tpu.memory_space<smem>>
    %c502 = arith.constant 502 : index
    %2780 = memref.load %arg2[%c502] : memref<528xf32, #tpu.memory_space<smem>>
    %c503 = arith.constant 503 : index
    %2781 = memref.load %arg2[%c503] : memref<528xf32, #tpu.memory_space<smem>>
    %c504 = arith.constant 504 : index
    %2782 = memref.load %arg2[%c504] : memref<528xf32, #tpu.memory_space<smem>>
    %c505 = arith.constant 505 : index
    %2783 = memref.load %arg2[%c505] : memref<528xf32, #tpu.memory_space<smem>>
    %c506 = arith.constant 506 : index
    %2784 = memref.load %arg2[%c506] : memref<528xf32, #tpu.memory_space<smem>>
    %c507 = arith.constant 507 : index
    %2785 = memref.load %arg2[%c507] : memref<528xf32, #tpu.memory_space<smem>>
    %c508 = arith.constant 508 : index
    %2786 = memref.load %arg2[%c508] : memref<528xf32, #tpu.memory_space<smem>>
    %c509 = arith.constant 509 : index
    %2787 = memref.load %arg2[%c509] : memref<528xf32, #tpu.memory_space<smem>>
    %c510 = arith.constant 510 : index
    %2788 = memref.load %arg2[%c510] : memref<528xf32, #tpu.memory_space<smem>>
    %c511 = arith.constant 511 : index
    %2789 = memref.load %arg2[%c511] : memref<528xf32, #tpu.memory_space<smem>>
    %c512 = arith.constant 512 : index
    %2790 = memref.load %arg2[%c512] : memref<528xf32, #tpu.memory_space<smem>>
    %c513 = arith.constant 513 : index
    %2791 = memref.load %arg2[%c513] : memref<528xf32, #tpu.memory_space<smem>>
    %c514 = arith.constant 514 : index
    %2792 = memref.load %arg2[%c514] : memref<528xf32, #tpu.memory_space<smem>>
    %c515 = arith.constant 515 : index
    %2793 = memref.load %arg2[%c515] : memref<528xf32, #tpu.memory_space<smem>>
    %c516 = arith.constant 516 : index
    %2794 = memref.load %arg2[%c516] : memref<528xf32, #tpu.memory_space<smem>>
    %c517 = arith.constant 517 : index
    %2795 = memref.load %arg2[%c517] : memref<528xf32, #tpu.memory_space<smem>>
    %c518 = arith.constant 518 : index
    %2796 = memref.load %arg2[%c518] : memref<528xf32, #tpu.memory_space<smem>>
    %c519 = arith.constant 519 : index
    %2797 = memref.load %arg2[%c519] : memref<528xf32, #tpu.memory_space<smem>>
    %c520 = arith.constant 520 : index
    %2798 = memref.load %arg2[%c520] : memref<528xf32, #tpu.memory_space<smem>>
    %c521 = arith.constant 521 : index
    %2799 = memref.load %arg2[%c521] : memref<528xf32, #tpu.memory_space<smem>>
    %c522 = arith.constant 522 : index
    %2800 = memref.load %arg2[%c522] : memref<528xf32, #tpu.memory_space<smem>>
    %c523 = arith.constant 523 : index
    %2801 = memref.load %arg2[%c523] : memref<528xf32, #tpu.memory_space<smem>>
    %c524 = arith.constant 524 : index
    %2802 = memref.load %arg2[%c524] : memref<528xf32, #tpu.memory_space<smem>>
    %c525 = arith.constant 525 : index
    %2803 = memref.load %arg2[%c525] : memref<528xf32, #tpu.memory_space<smem>>
    %c526 = arith.constant 526 : index
    %2804 = memref.load %arg2[%c526] : memref<528xf32, #tpu.memory_space<smem>>
    %c527 = arith.constant 527 : index
    %2805 = memref.load %arg2[%c527] : memref<528xf32, #tpu.memory_space<smem>>
    %c16_857 = arith.constant 16 : index
    %2806 = memref.load %arg3[%c16_857] : memref<20xf32, #tpu.memory_space<smem>>
    %c17_858 = arith.constant 17 : index
    %2807 = memref.load %arg3[%c17_858] : memref<20xf32, #tpu.memory_space<smem>>
    %c18_859 = arith.constant 18 : index
    %2808 = memref.load %arg3[%c18_859] : memref<20xf32, #tpu.memory_space<smem>>
    %c19_860 = arith.constant 19 : index
    %2809 = memref.load %arg3[%c19_860] : memref<20xf32, #tpu.memory_space<smem>>
    %c0_861 = arith.constant 0 : index
    %c0_862 = arith.constant 0 : index
    %c0_863 = arith.constant 0 : index
    %c0_864 = arith.constant 0 : index
    %2810 = vector.load %arg6[%c0_861, %c0_862, %c0_863, %c0_864] : memref<4x2x10x128xf32, #tpu.memory_space<vmem>>, vector<1x1x8x128xf32>
    %2811 = vector.shape_cast %2810 : vector<1x1x8x128xf32> to vector<8x128xf32>
    %c0_865 = arith.constant 0 : index
    %c0_866 = arith.constant 0 : index
    %c1_867 = arith.constant 1 : index
    %c0_868 = arith.constant 0 : index
    %2812 = vector.load %arg6[%c0_865, %c0_866, %c1_867, %c0_868] : memref<4x2x10x128xf32, #tpu.memory_space<vmem>>, vector<1x1x8x128xf32>
    %2813 = vector.shape_cast %2812 : vector<1x1x8x128xf32> to vector<8x128xf32>
    %c0_869 = arith.constant 0 : index
    %c0_870 = arith.constant 0 : index
    %c2_871 = arith.constant 2 : index
    %c0_872 = arith.constant 0 : index
    %2814 = vector.load %arg6[%c0_869, %c0_870, %c2_871, %c0_872] : memref<4x2x10x128xf32, #tpu.memory_space<vmem>>, vector<1x1x8x128xf32>
    %2815 = vector.shape_cast %2814 : vector<1x1x8x128xf32> to vector<8x128xf32>
    %2816 = vector.broadcast %2710 : f32 to vector<8x128xf32>
    %2817 = arith.mulf %2816, %2811 : vector<8x128xf32>
    %2818 = vector.broadcast %2711 : f32 to vector<8x128xf32>
    %2819 = arith.mulf %2818, %2813 : vector<8x128xf32>
    %2820 = arith.addf %2817, %2819 : vector<8x128xf32>
    %2821 = vector.broadcast %2712 : f32 to vector<8x128xf32>
    %2822 = arith.mulf %2821, %2815 : vector<8x128xf32>
    %2823 = arith.addf %2820, %2822 : vector<8x128xf32>
    %2824 = vector.broadcast %2734 : f32 to vector<8x128xf32>
    %2825 = arith.mulf %2824, %2811 : vector<8x128xf32>
    %2826 = vector.broadcast %2735 : f32 to vector<8x128xf32>
    %2827 = arith.mulf %2826, %2813 : vector<8x128xf32>
    %2828 = arith.addf %2825, %2827 : vector<8x128xf32>
    %2829 = vector.broadcast %2736 : f32 to vector<8x128xf32>
    %2830 = arith.mulf %2829, %2815 : vector<8x128xf32>
    %2831 = arith.addf %2828, %2830 : vector<8x128xf32>
    %2832 = vector.broadcast %2758 : f32 to vector<8x128xf32>
    %2833 = arith.mulf %2832, %2811 : vector<8x128xf32>
    %2834 = vector.broadcast %2759 : f32 to vector<8x128xf32>
    %2835 = arith.mulf %2834, %2813 : vector<8x128xf32>
    %2836 = arith.addf %2833, %2835 : vector<8x128xf32>
    %2837 = vector.broadcast %2760 : f32 to vector<8x128xf32>
    %2838 = arith.mulf %2837, %2815 : vector<8x128xf32>
    %2839 = arith.addf %2836, %2838 : vector<8x128xf32>
    %2840 = vector.broadcast %2782 : f32 to vector<8x128xf32>
    %2841 = arith.mulf %2840, %2811 : vector<8x128xf32>
    %2842 = vector.broadcast %2783 : f32 to vector<8x128xf32>
    %2843 = arith.mulf %2842, %2813 : vector<8x128xf32>
    %2844 = arith.addf %2841, %2843 : vector<8x128xf32>
    %2845 = vector.broadcast %2784 : f32 to vector<8x128xf32>
    %2846 = arith.mulf %2845, %2815 : vector<8x128xf32>
    %2847 = arith.addf %2844, %2846 : vector<8x128xf32>
    %c0_873 = arith.constant 0 : index
    %c1_874 = arith.constant 1 : index
    %c0_875 = arith.constant 0 : index
    %c0_876 = arith.constant 0 : index
    %2848 = vector.load %arg6[%c0_873, %c1_874, %c0_875, %c0_876] : memref<4x2x10x128xf32, #tpu.memory_space<vmem>>, vector<1x1x8x128xf32>
    %2849 = vector.shape_cast %2848 : vector<1x1x8x128xf32> to vector<8x128xf32>
    %c0_877 = arith.constant 0 : index
    %c1_878 = arith.constant 1 : index
    %c1_879 = arith.constant 1 : index
    %c0_880 = arith.constant 0 : index
    %2850 = vector.load %arg6[%c0_877, %c1_878, %c1_879, %c0_880] : memref<4x2x10x128xf32, #tpu.memory_space<vmem>>, vector<1x1x8x128xf32>
    %2851 = vector.shape_cast %2850 : vector<1x1x8x128xf32> to vector<8x128xf32>
    %c0_881 = arith.constant 0 : index
    %c1_882 = arith.constant 1 : index
    %c2_883 = arith.constant 2 : index
    %c0_884 = arith.constant 0 : index
    %2852 = vector.load %arg6[%c0_881, %c1_882, %c2_883, %c0_884] : memref<4x2x10x128xf32, #tpu.memory_space<vmem>>, vector<1x1x8x128xf32>
    %2853 = vector.shape_cast %2852 : vector<1x1x8x128xf32> to vector<8x128xf32>
    %2854 = vector.broadcast %2713 : f32 to vector<8x128xf32>
    %2855 = arith.mulf %2854, %2849 : vector<8x128xf32>
    %2856 = arith.addf %2823, %2855 : vector<8x128xf32>
    %2857 = vector.broadcast %2714 : f32 to vector<8x128xf32>
    %2858 = arith.mulf %2857, %2851 : vector<8x128xf32>
    %2859 = arith.addf %2856, %2858 : vector<8x128xf32>
    %2860 = vector.broadcast %2715 : f32 to vector<8x128xf32>
    %2861 = arith.mulf %2860, %2853 : vector<8x128xf32>
    %2862 = arith.addf %2859, %2861 : vector<8x128xf32>
    %2863 = vector.broadcast %2737 : f32 to vector<8x128xf32>
    %2864 = arith.mulf %2863, %2849 : vector<8x128xf32>
    %2865 = arith.addf %2831, %2864 : vector<8x128xf32>
    %2866 = vector.broadcast %2738 : f32 to vector<8x128xf32>
    %2867 = arith.mulf %2866, %2851 : vector<8x128xf32>
    %2868 = arith.addf %2865, %2867 : vector<8x128xf32>
    %2869 = vector.broadcast %2739 : f32 to vector<8x128xf32>
    %2870 = arith.mulf %2869, %2853 : vector<8x128xf32>
    %2871 = arith.addf %2868, %2870 : vector<8x128xf32>
    %2872 = vector.broadcast %2761 : f32 to vector<8x128xf32>
    %2873 = arith.mulf %2872, %2849 : vector<8x128xf32>
    %2874 = arith.addf %2839, %2873 : vector<8x128xf32>
    %2875 = vector.broadcast %2762 : f32 to vector<8x128xf32>
    %2876 = arith.mulf %2875, %2851 : vector<8x128xf32>
    %2877 = arith.addf %2874, %2876 : vector<8x128xf32>
    %2878 = vector.broadcast %2763 : f32 to vector<8x128xf32>
    %2879 = arith.mulf %2878, %2853 : vector<8x128xf32>
    %2880 = arith.addf %2877, %2879 : vector<8x128xf32>
    %2881 = vector.broadcast %2785 : f32 to vector<8x128xf32>
    %2882 = arith.mulf %2881, %2849 : vector<8x128xf32>
    %2883 = arith.addf %2847, %2882 : vector<8x128xf32>
    %2884 = vector.broadcast %2786 : f32 to vector<8x128xf32>
    %2885 = arith.mulf %2884, %2851 : vector<8x128xf32>
    %2886 = arith.addf %2883, %2885 : vector<8x128xf32>
    %2887 = vector.broadcast %2787 : f32 to vector<8x128xf32>
    %2888 = arith.mulf %2887, %2853 : vector<8x128xf32>
    %2889 = arith.addf %2886, %2888 : vector<8x128xf32>
    %c1_885 = arith.constant 1 : index
    %c0_886 = arith.constant 0 : index
    %c0_887 = arith.constant 0 : index
    %c0_888 = arith.constant 0 : index
    %2890 = vector.load %arg6[%c1_885, %c0_886, %c0_887, %c0_888] : memref<4x2x10x128xf32, #tpu.memory_space<vmem>>, vector<1x1x8x128xf32>
    %2891 = vector.shape_cast %2890 : vector<1x1x8x128xf32> to vector<8x128xf32>
    %c1_889 = arith.constant 1 : index
    %c0_890 = arith.constant 0 : index
    %c1_891 = arith.constant 1 : index
    %c0_892 = arith.constant 0 : index
    %2892 = vector.load %arg6[%c1_889, %c0_890, %c1_891, %c0_892] : memref<4x2x10x128xf32, #tpu.memory_space<vmem>>, vector<1x1x8x128xf32>
    %2893 = vector.shape_cast %2892 : vector<1x1x8x128xf32> to vector<8x128xf32>
    %c1_893 = arith.constant 1 : index
    %c0_894 = arith.constant 0 : index
    %c2_895 = arith.constant 2 : index
    %c0_896 = arith.constant 0 : index
    %2894 = vector.load %arg6[%c1_893, %c0_894, %c2_895, %c0_896] : memref<4x2x10x128xf32, #tpu.memory_space<vmem>>, vector<1x1x8x128xf32>
    %2895 = vector.shape_cast %2894 : vector<1x1x8x128xf32> to vector<8x128xf32>
    %2896 = vector.broadcast %2716 : f32 to vector<8x128xf32>
    %2897 = arith.mulf %2896, %2891 : vector<8x128xf32>
    %2898 = arith.addf %2862, %2897 : vector<8x128xf32>
    %2899 = vector.broadcast %2717 : f32 to vector<8x128xf32>
    %2900 = arith.mulf %2899, %2893 : vector<8x128xf32>
    %2901 = arith.addf %2898, %2900 : vector<8x128xf32>
    %2902 = vector.broadcast %2718 : f32 to vector<8x128xf32>
    %2903 = arith.mulf %2902, %2895 : vector<8x128xf32>
    %2904 = arith.addf %2901, %2903 : vector<8x128xf32>
    %2905 = vector.broadcast %2740 : f32 to vector<8x128xf32>
    %2906 = arith.mulf %2905, %2891 : vector<8x128xf32>
    %2907 = arith.addf %2871, %2906 : vector<8x128xf32>
    %2908 = vector.broadcast %2741 : f32 to vector<8x128xf32>
    %2909 = arith.mulf %2908, %2893 : vector<8x128xf32>
    %2910 = arith.addf %2907, %2909 : vector<8x128xf32>
    %2911 = vector.broadcast %2742 : f32 to vector<8x128xf32>
    %2912 = arith.mulf %2911, %2895 : vector<8x128xf32>
    %2913 = arith.addf %2910, %2912 : vector<8x128xf32>
    %2914 = vector.broadcast %2764 : f32 to vector<8x128xf32>
    %2915 = arith.mulf %2914, %2891 : vector<8x128xf32>
    %2916 = arith.addf %2880, %2915 : vector<8x128xf32>
    %2917 = vector.broadcast %2765 : f32 to vector<8x128xf32>
    %2918 = arith.mulf %2917, %2893 : vector<8x128xf32>
    %2919 = arith.addf %2916, %2918 : vector<8x128xf32>
    %2920 = vector.broadcast %2766 : f32 to vector<8x128xf32>
    %2921 = arith.mulf %2920, %2895 : vector<8x128xf32>
    %2922 = arith.addf %2919, %2921 : vector<8x128xf32>
    %2923 = vector.broadcast %2788 : f32 to vector<8x128xf32>
    %2924 = arith.mulf %2923, %2891 : vector<8x128xf32>
    %2925 = arith.addf %2889, %2924 : vector<8x128xf32>
    %2926 = vector.broadcast %2789 : f32 to vector<8x128xf32>
    %2927 = arith.mulf %2926, %2893 : vector<8x128xf32>
    %2928 = arith.addf %2925, %2927 : vector<8x128xf32>
    %2929 = vector.broadcast %2790 : f32 to vector<8x128xf32>
    %2930 = arith.mulf %2929, %2895 : vector<8x128xf32>
    %2931 = arith.addf %2928, %2930 : vector<8x128xf32>
    %c1_897 = arith.constant 1 : index
    %c1_898 = arith.constant 1 : index
    %c0_899 = arith.constant 0 : index
    %c0_900 = arith.constant 0 : index
    %2932 = vector.load %arg6[%c1_897, %c1_898, %c0_899, %c0_900] : memref<4x2x10x128xf32, #tpu.memory_space<vmem>>, vector<1x1x8x128xf32>
    %2933 = vector.shape_cast %2932 : vector<1x1x8x128xf32> to vector<8x128xf32>
    %c1_901 = arith.constant 1 : index
    %c1_902 = arith.constant 1 : index
    %c1_903 = arith.constant 1 : index
    %c0_904 = arith.constant 0 : index
    %2934 = vector.load %arg6[%c1_901, %c1_902, %c1_903, %c0_904] : memref<4x2x10x128xf32, #tpu.memory_space<vmem>>, vector<1x1x8x128xf32>
    %2935 = vector.shape_cast %2934 : vector<1x1x8x128xf32> to vector<8x128xf32>
    %c1_905 = arith.constant 1 : index
    %c1_906 = arith.constant 1 : index
    %c2_907 = arith.constant 2 : index
    %c0_908 = arith.constant 0 : index
    %2936 = vector.load %arg6[%c1_905, %c1_906, %c2_907, %c0_908] : memref<4x2x10x128xf32, #tpu.memory_space<vmem>>, vector<1x1x8x128xf32>
    %2937 = vector.shape_cast %2936 : vector<1x1x8x128xf32> to vector<8x128xf32>
    %2938 = vector.broadcast %2719 : f32 to vector<8x128xf32>
    %2939 = arith.mulf %2938, %2933 : vector<8x128xf32>
    %2940 = arith.addf %2904, %2939 : vector<8x128xf32>
    %2941 = vector.broadcast %2720 : f32 to vector<8x128xf32>
    %2942 = arith.mulf %2941, %2935 : vector<8x128xf32>
    %2943 = arith.addf %2940, %2942 : vector<8x128xf32>
    %2944 = vector.broadcast %2721 : f32 to vector<8x128xf32>
    %2945 = arith.mulf %2944, %2937 : vector<8x128xf32>
    %2946 = arith.addf %2943, %2945 : vector<8x128xf32>
    %2947 = vector.broadcast %2743 : f32 to vector<8x128xf32>
    %2948 = arith.mulf %2947, %2933 : vector<8x128xf32>
    %2949 = arith.addf %2913, %2948 : vector<8x128xf32>
    %2950 = vector.broadcast %2744 : f32 to vector<8x128xf32>
    %2951 = arith.mulf %2950, %2935 : vector<8x128xf32>
    %2952 = arith.addf %2949, %2951 : vector<8x128xf32>
    %2953 = vector.broadcast %2745 : f32 to vector<8x128xf32>
    %2954 = arith.mulf %2953, %2937 : vector<8x128xf32>
    %2955 = arith.addf %2952, %2954 : vector<8x128xf32>
    %2956 = vector.broadcast %2767 : f32 to vector<8x128xf32>
    %2957 = arith.mulf %2956, %2933 : vector<8x128xf32>
    %2958 = arith.addf %2922, %2957 : vector<8x128xf32>
    %2959 = vector.broadcast %2768 : f32 to vector<8x128xf32>
    %2960 = arith.mulf %2959, %2935 : vector<8x128xf32>
    %2961 = arith.addf %2958, %2960 : vector<8x128xf32>
    %2962 = vector.broadcast %2769 : f32 to vector<8x128xf32>
    %2963 = arith.mulf %2962, %2937 : vector<8x128xf32>
    %2964 = arith.addf %2961, %2963 : vector<8x128xf32>
    %2965 = vector.broadcast %2791 : f32 to vector<8x128xf32>
    %2966 = arith.mulf %2965, %2933 : vector<8x128xf32>
    %2967 = arith.addf %2931, %2966 : vector<8x128xf32>
    %2968 = vector.broadcast %2792 : f32 to vector<8x128xf32>
    %2969 = arith.mulf %2968, %2935 : vector<8x128xf32>
    %2970 = arith.addf %2967, %2969 : vector<8x128xf32>
    %2971 = vector.broadcast %2793 : f32 to vector<8x128xf32>
    %2972 = arith.mulf %2971, %2937 : vector<8x128xf32>
    %2973 = arith.addf %2970, %2972 : vector<8x128xf32>
    %c2_909 = arith.constant 2 : index
    %c0_910 = arith.constant 0 : index
    %c0_911 = arith.constant 0 : index
    %c0_912 = arith.constant 0 : index
    %2974 = vector.load %arg6[%c2_909, %c0_910, %c0_911, %c0_912] : memref<4x2x10x128xf32, #tpu.memory_space<vmem>>, vector<1x1x8x128xf32>
    %2975 = vector.shape_cast %2974 : vector<1x1x8x128xf32> to vector<8x128xf32>
    %c2_913 = arith.constant 2 : index
    %c0_914 = arith.constant 0 : index
    %c1_915 = arith.constant 1 : index
    %c0_916 = arith.constant 0 : index
    %2976 = vector.load %arg6[%c2_913, %c0_914, %c1_915, %c0_916] : memref<4x2x10x128xf32, #tpu.memory_space<vmem>>, vector<1x1x8x128xf32>
    %2977 = vector.shape_cast %2976 : vector<1x1x8x128xf32> to vector<8x128xf32>
    %c2_917 = arith.constant 2 : index
    %c0_918 = arith.constant 0 : index
    %c2_919 = arith.constant 2 : index
    %c0_920 = arith.constant 0 : index
    %2978 = vector.load %arg6[%c2_917, %c0_918, %c2_919, %c0_920] : memref<4x2x10x128xf32, #tpu.memory_space<vmem>>, vector<1x1x8x128xf32>
    %2979 = vector.shape_cast %2978 : vector<1x1x8x128xf32> to vector<8x128xf32>
    %2980 = vector.broadcast %2722 : f32 to vector<8x128xf32>
    %2981 = arith.mulf %2980, %2975 : vector<8x128xf32>
    %2982 = arith.addf %2946, %2981 : vector<8x128xf32>
    %2983 = vector.broadcast %2723 : f32 to vector<8x128xf32>
    %2984 = arith.mulf %2983, %2977 : vector<8x128xf32>
    %2985 = arith.addf %2982, %2984 : vector<8x128xf32>
    %2986 = vector.broadcast %2724 : f32 to vector<8x128xf32>
    %2987 = arith.mulf %2986, %2979 : vector<8x128xf32>
    %2988 = arith.addf %2985, %2987 : vector<8x128xf32>
    %2989 = vector.broadcast %2746 : f32 to vector<8x128xf32>
    %2990 = arith.mulf %2989, %2975 : vector<8x128xf32>
    %2991 = arith.addf %2955, %2990 : vector<8x128xf32>
    %2992 = vector.broadcast %2747 : f32 to vector<8x128xf32>
    %2993 = arith.mulf %2992, %2977 : vector<8x128xf32>
    %2994 = arith.addf %2991, %2993 : vector<8x128xf32>
    %2995 = vector.broadcast %2748 : f32 to vector<8x128xf32>
    %2996 = arith.mulf %2995, %2979 : vector<8x128xf32>
    %2997 = arith.addf %2994, %2996 : vector<8x128xf32>
    %2998 = vector.broadcast %2770 : f32 to vector<8x128xf32>
    %2999 = arith.mulf %2998, %2975 : vector<8x128xf32>
    %3000 = arith.addf %2964, %2999 : vector<8x128xf32>
    %3001 = vector.broadcast %2771 : f32 to vector<8x128xf32>
    %3002 = arith.mulf %3001, %2977 : vector<8x128xf32>
    %3003 = arith.addf %3000, %3002 : vector<8x128xf32>
    %3004 = vector.broadcast %2772 : f32 to vector<8x128xf32>
    %3005 = arith.mulf %3004, %2979 : vector<8x128xf32>
    %3006 = arith.addf %3003, %3005 : vector<8x128xf32>
    %3007 = vector.broadcast %2794 : f32 to vector<8x128xf32>
    %3008 = arith.mulf %3007, %2975 : vector<8x128xf32>
    %3009 = arith.addf %2973, %3008 : vector<8x128xf32>
    %3010 = vector.broadcast %2795 : f32 to vector<8x128xf32>
    %3011 = arith.mulf %3010, %2977 : vector<8x128xf32>
    %3012 = arith.addf %3009, %3011 : vector<8x128xf32>
    %3013 = vector.broadcast %2796 : f32 to vector<8x128xf32>
    %3014 = arith.mulf %3013, %2979 : vector<8x128xf32>
    %3015 = arith.addf %3012, %3014 : vector<8x128xf32>
    %c2_921 = arith.constant 2 : index
    %c1_922 = arith.constant 1 : index
    %c0_923 = arith.constant 0 : index
    %c0_924 = arith.constant 0 : index
    %3016 = vector.load %arg6[%c2_921, %c1_922, %c0_923, %c0_924] : memref<4x2x10x128xf32, #tpu.memory_space<vmem>>, vector<1x1x8x128xf32>
    %3017 = vector.shape_cast %3016 : vector<1x1x8x128xf32> to vector<8x128xf32>
    %c2_925 = arith.constant 2 : index
    %c1_926 = arith.constant 1 : index
    %c1_927 = arith.constant 1 : index
    %c0_928 = arith.constant 0 : index
    %3018 = vector.load %arg6[%c2_925, %c1_926, %c1_927, %c0_928] : memref<4x2x10x128xf32, #tpu.memory_space<vmem>>, vector<1x1x8x128xf32>
    %3019 = vector.shape_cast %3018 : vector<1x1x8x128xf32> to vector<8x128xf32>
    %c2_929 = arith.constant 2 : index
    %c1_930 = arith.constant 1 : index
    %c2_931 = arith.constant 2 : index
    %c0_932 = arith.constant 0 : index
    %3020 = vector.load %arg6[%c2_929, %c1_930, %c2_931, %c0_932] : memref<4x2x10x128xf32, #tpu.memory_space<vmem>>, vector<1x1x8x128xf32>
    %3021 = vector.shape_cast %3020 : vector<1x1x8x128xf32> to vector<8x128xf32>
    %3022 = vector.broadcast %2725 : f32 to vector<8x128xf32>
    %3023 = arith.mulf %3022, %3017 : vector<8x128xf32>
    %3024 = arith.addf %2988, %3023 : vector<8x128xf32>
    %3025 = vector.broadcast %2726 : f32 to vector<8x128xf32>
    %3026 = arith.mulf %3025, %3019 : vector<8x128xf32>
    %3027 = arith.addf %3024, %3026 : vector<8x128xf32>
    %3028 = vector.broadcast %2727 : f32 to vector<8x128xf32>
    %3029 = arith.mulf %3028, %3021 : vector<8x128xf32>
    %3030 = arith.addf %3027, %3029 : vector<8x128xf32>
    %3031 = vector.broadcast %2749 : f32 to vector<8x128xf32>
    %3032 = arith.mulf %3031, %3017 : vector<8x128xf32>
    %3033 = arith.addf %2997, %3032 : vector<8x128xf32>
    %3034 = vector.broadcast %2750 : f32 to vector<8x128xf32>
    %3035 = arith.mulf %3034, %3019 : vector<8x128xf32>
    %3036 = arith.addf %3033, %3035 : vector<8x128xf32>
    %3037 = vector.broadcast %2751 : f32 to vector<8x128xf32>
    %3038 = arith.mulf %3037, %3021 : vector<8x128xf32>
    %3039 = arith.addf %3036, %3038 : vector<8x128xf32>
    %3040 = vector.broadcast %2773 : f32 to vector<8x128xf32>
    %3041 = arith.mulf %3040, %3017 : vector<8x128xf32>
    %3042 = arith.addf %3006, %3041 : vector<8x128xf32>
    %3043 = vector.broadcast %2774 : f32 to vector<8x128xf32>
    %3044 = arith.mulf %3043, %3019 : vector<8x128xf32>
    %3045 = arith.addf %3042, %3044 : vector<8x128xf32>
    %3046 = vector.broadcast %2775 : f32 to vector<8x128xf32>
    %3047 = arith.mulf %3046, %3021 : vector<8x128xf32>
    %3048 = arith.addf %3045, %3047 : vector<8x128xf32>
    %3049 = vector.broadcast %2797 : f32 to vector<8x128xf32>
    %3050 = arith.mulf %3049, %3017 : vector<8x128xf32>
    %3051 = arith.addf %3015, %3050 : vector<8x128xf32>
    %3052 = vector.broadcast %2798 : f32 to vector<8x128xf32>
    %3053 = arith.mulf %3052, %3019 : vector<8x128xf32>
    %3054 = arith.addf %3051, %3053 : vector<8x128xf32>
    %3055 = vector.broadcast %2799 : f32 to vector<8x128xf32>
    %3056 = arith.mulf %3055, %3021 : vector<8x128xf32>
    %3057 = arith.addf %3054, %3056 : vector<8x128xf32>
    %c3_933 = arith.constant 3 : index
    %c0_934 = arith.constant 0 : index
    %c0_935 = arith.constant 0 : index
    %c0_936 = arith.constant 0 : index
    %3058 = vector.load %arg6[%c3_933, %c0_934, %c0_935, %c0_936] : memref<4x2x10x128xf32, #tpu.memory_space<vmem>>, vector<1x1x8x128xf32>
    %3059 = vector.shape_cast %3058 : vector<1x1x8x128xf32> to vector<8x128xf32>
    %c3_937 = arith.constant 3 : index
    %c0_938 = arith.constant 0 : index
    %c1_939 = arith.constant 1 : index
    %c0_940 = arith.constant 0 : index
    %3060 = vector.load %arg6[%c3_937, %c0_938, %c1_939, %c0_940] : memref<4x2x10x128xf32, #tpu.memory_space<vmem>>, vector<1x1x8x128xf32>
    %3061 = vector.shape_cast %3060 : vector<1x1x8x128xf32> to vector<8x128xf32>
    %c3_941 = arith.constant 3 : index
    %c0_942 = arith.constant 0 : index
    %c2_943 = arith.constant 2 : index
    %c0_944 = arith.constant 0 : index
    %3062 = vector.load %arg6[%c3_941, %c0_942, %c2_943, %c0_944] : memref<4x2x10x128xf32, #tpu.memory_space<vmem>>, vector<1x1x8x128xf32>
    %3063 = vector.shape_cast %3062 : vector<1x1x8x128xf32> to vector<8x128xf32>
    %3064 = vector.broadcast %2728 : f32 to vector<8x128xf32>
    %3065 = arith.mulf %3064, %3059 : vector<8x128xf32>
    %3066 = arith.addf %3030, %3065 : vector<8x128xf32>
    %3067 = vector.broadcast %2729 : f32 to vector<8x128xf32>
    %3068 = arith.mulf %3067, %3061 : vector<8x128xf32>
    %3069 = arith.addf %3066, %3068 : vector<8x128xf32>
    %3070 = vector.broadcast %2730 : f32 to vector<8x128xf32>
    %3071 = arith.mulf %3070, %3063 : vector<8x128xf32>
    %3072 = arith.addf %3069, %3071 : vector<8x128xf32>
    %3073 = vector.broadcast %2752 : f32 to vector<8x128xf32>
    %3074 = arith.mulf %3073, %3059 : vector<8x128xf32>
    %3075 = arith.addf %3039, %3074 : vector<8x128xf32>
    %3076 = vector.broadcast %2753 : f32 to vector<8x128xf32>
    %3077 = arith.mulf %3076, %3061 : vector<8x128xf32>
    %3078 = arith.addf %3075, %3077 : vector<8x128xf32>
    %3079 = vector.broadcast %2754 : f32 to vector<8x128xf32>
    %3080 = arith.mulf %3079, %3063 : vector<8x128xf32>
    %3081 = arith.addf %3078, %3080 : vector<8x128xf32>
    %3082 = vector.broadcast %2776 : f32 to vector<8x128xf32>
    %3083 = arith.mulf %3082, %3059 : vector<8x128xf32>
    %3084 = arith.addf %3048, %3083 : vector<8x128xf32>
    %3085 = vector.broadcast %2777 : f32 to vector<8x128xf32>
    %3086 = arith.mulf %3085, %3061 : vector<8x128xf32>
    %3087 = arith.addf %3084, %3086 : vector<8x128xf32>
    %3088 = vector.broadcast %2778 : f32 to vector<8x128xf32>
    %3089 = arith.mulf %3088, %3063 : vector<8x128xf32>
    %3090 = arith.addf %3087, %3089 : vector<8x128xf32>
    %3091 = vector.broadcast %2800 : f32 to vector<8x128xf32>
    %3092 = arith.mulf %3091, %3059 : vector<8x128xf32>
    %3093 = arith.addf %3057, %3092 : vector<8x128xf32>
    %3094 = vector.broadcast %2801 : f32 to vector<8x128xf32>
    %3095 = arith.mulf %3094, %3061 : vector<8x128xf32>
    %3096 = arith.addf %3093, %3095 : vector<8x128xf32>
    %3097 = vector.broadcast %2802 : f32 to vector<8x128xf32>
    %3098 = arith.mulf %3097, %3063 : vector<8x128xf32>
    %3099 = arith.addf %3096, %3098 : vector<8x128xf32>
    %c3_945 = arith.constant 3 : index
    %c1_946 = arith.constant 1 : index
    %c0_947 = arith.constant 0 : index
    %c0_948 = arith.constant 0 : index
    %3100 = vector.load %arg6[%c3_945, %c1_946, %c0_947, %c0_948] : memref<4x2x10x128xf32, #tpu.memory_space<vmem>>, vector<1x1x8x128xf32>
    %3101 = vector.shape_cast %3100 : vector<1x1x8x128xf32> to vector<8x128xf32>
    %c3_949 = arith.constant 3 : index
    %c1_950 = arith.constant 1 : index
    %c1_951 = arith.constant 1 : index
    %c0_952 = arith.constant 0 : index
    %3102 = vector.load %arg6[%c3_949, %c1_950, %c1_951, %c0_952] : memref<4x2x10x128xf32, #tpu.memory_space<vmem>>, vector<1x1x8x128xf32>
    %3103 = vector.shape_cast %3102 : vector<1x1x8x128xf32> to vector<8x128xf32>
    %c3_953 = arith.constant 3 : index
    %c1_954 = arith.constant 1 : index
    %c2_955 = arith.constant 2 : index
    %c0_956 = arith.constant 0 : index
    %3104 = vector.load %arg6[%c3_953, %c1_954, %c2_955, %c0_956] : memref<4x2x10x128xf32, #tpu.memory_space<vmem>>, vector<1x1x8x128xf32>
    %3105 = vector.shape_cast %3104 : vector<1x1x8x128xf32> to vector<8x128xf32>
    %3106 = vector.broadcast %2731 : f32 to vector<8x128xf32>
    %3107 = arith.mulf %3106, %3101 : vector<8x128xf32>
    %3108 = arith.addf %3072, %3107 : vector<8x128xf32>
    %3109 = vector.broadcast %2732 : f32 to vector<8x128xf32>
    %3110 = arith.mulf %3109, %3103 : vector<8x128xf32>
    %3111 = arith.addf %3108, %3110 : vector<8x128xf32>
    %3112 = vector.broadcast %2733 : f32 to vector<8x128xf32>
    %3113 = arith.mulf %3112, %3105 : vector<8x128xf32>
    %3114 = arith.addf %3111, %3113 : vector<8x128xf32>
    %3115 = vector.broadcast %2755 : f32 to vector<8x128xf32>
    %3116 = arith.mulf %3115, %3101 : vector<8x128xf32>
    %3117 = arith.addf %3081, %3116 : vector<8x128xf32>
    %3118 = vector.broadcast %2756 : f32 to vector<8x128xf32>
    %3119 = arith.mulf %3118, %3103 : vector<8x128xf32>
    %3120 = arith.addf %3117, %3119 : vector<8x128xf32>
    %3121 = vector.broadcast %2757 : f32 to vector<8x128xf32>
    %3122 = arith.mulf %3121, %3105 : vector<8x128xf32>
    %3123 = arith.addf %3120, %3122 : vector<8x128xf32>
    %3124 = vector.broadcast %2779 : f32 to vector<8x128xf32>
    %3125 = arith.mulf %3124, %3101 : vector<8x128xf32>
    %3126 = arith.addf %3090, %3125 : vector<8x128xf32>
    %3127 = vector.broadcast %2780 : f32 to vector<8x128xf32>
    %3128 = arith.mulf %3127, %3103 : vector<8x128xf32>
    %3129 = arith.addf %3126, %3128 : vector<8x128xf32>
    %3130 = vector.broadcast %2781 : f32 to vector<8x128xf32>
    %3131 = arith.mulf %3130, %3105 : vector<8x128xf32>
    %3132 = arith.addf %3129, %3131 : vector<8x128xf32>
    %3133 = vector.broadcast %2803 : f32 to vector<8x128xf32>
    %3134 = arith.mulf %3133, %3101 : vector<8x128xf32>
    %3135 = arith.addf %3099, %3134 : vector<8x128xf32>
    %3136 = vector.broadcast %2804 : f32 to vector<8x128xf32>
    %3137 = arith.mulf %3136, %3103 : vector<8x128xf32>
    %3138 = arith.addf %3135, %3137 : vector<8x128xf32>
    %3139 = vector.broadcast %2805 : f32 to vector<8x128xf32>
    %3140 = arith.mulf %3139, %3105 : vector<8x128xf32>
    %3141 = arith.addf %3138, %3140 : vector<8x128xf32>
    %3142 = vector.broadcast %2806 : f32 to vector<8x128xf32>
    %3143 = arith.addf %3114, %3142 : vector<8x128xf32>
    %cst_957 = arith.constant 0.000000e+00 : f32
    %3144 = vector.broadcast %cst_957 : f32 to vector<8x128xf32>
    %3145 = arith.maximumf %3143, %3144 : vector<8x128xf32>
    %c0_958 = arith.constant 0 : index
    %c0_959 = arith.constant 0 : index
    %c0_960 = arith.constant 0 : index
    %c0_961 = arith.constant 0 : index
    %3146 = vector.load %arg4[%c0_958, %c0_959, %c0_960, %c0_961] : memref<1x4x8x128xf32, #tpu.memory_space<vmem>>, vector<1x1x8x128xf32>
    %3147 = vector.shape_cast %3146 : vector<1x1x8x128xf32> to vector<8x128xf32>
    %3148 = vector.shape_cast %3145 : vector<8x128xf32> to vector<1x1x8x128xf32>
    tpu.vector_store %arg4[%c0_958, %c0_959, %c0_960, %c0_961], %3148 {strides = array<i32>} : memref<1x4x8x128xf32, #tpu.memory_space<vmem>>, vector<1x1x8x128xf32>,
    %3149 = vector.broadcast %2807 : f32 to vector<8x128xf32>
    %3150 = arith.addf %3123, %3149 : vector<8x128xf32>
    %cst_962 = arith.constant 0.000000e+00 : f32
    %3151 = vector.broadcast %cst_962 : f32 to vector<8x128xf32>
    %3152 = arith.maximumf %3150, %3151 : vector<8x128xf32>
    %c0_963 = arith.constant 0 : index
    %c1_964 = arith.constant 1 : index
    %c0_965 = arith.constant 0 : index
    %c0_966 = arith.constant 0 : index
    %3153 = vector.load %arg4[%c0_963, %c1_964, %c0_965, %c0_966] : memref<1x4x8x128xf32, #tpu.memory_space<vmem>>, vector<1x1x8x128xf32>
    %3154 = vector.shape_cast %3153 : vector<1x1x8x128xf32> to vector<8x128xf32>
    %3155 = vector.shape_cast %3152 : vector<8x128xf32> to vector<1x1x8x128xf32>
    tpu.vector_store %arg4[%c0_963, %c1_964, %c0_965, %c0_966], %3155 {strides = array<i32>} : memref<1x4x8x128xf32, #tpu.memory_space<vmem>>, vector<1x1x8x128xf32>,
    %3156 = vector.broadcast %2808 : f32 to vector<8x128xf32>
    %3157 = arith.addf %3132, %3156 : vector<8x128xf32>
    %cst_967 = arith.constant 0.000000e+00 : f32
    %3158 = vector.broadcast %cst_967 : f32 to vector<8x128xf32>
    %3159 = arith.maximumf %3157, %3158 : vector<8x128xf32>
    %c0_968 = arith.constant 0 : index
    %c2_969 = arith.constant 2 : index
    %c0_970 = arith.constant 0 : index
    %c0_971 = arith.constant 0 : index
    %3160 = vector.load %arg4[%c0_968, %c2_969, %c0_970, %c0_971] : memref<1x4x8x128xf32, #tpu.memory_space<vmem>>, vector<1x1x8x128xf32>
    %3161 = vector.shape_cast %3160 : vector<1x1x8x128xf32> to vector<8x128xf32>
    %3162 = vector.shape_cast %3159 : vector<8x128xf32> to vector<1x1x8x128xf32>
    tpu.vector_store %arg4[%c0_968, %c2_969, %c0_970, %c0_971], %3162 {strides = array<i32>} : memref<1x4x8x128xf32, #tpu.memory_space<vmem>>, vector<1x1x8x128xf32>,
    %3163 = vector.broadcast %2809 : f32 to vector<8x128xf32>
    %3164 = arith.addf %3141, %3163 : vector<8x128xf32>
    %cst_972 = arith.constant 0.000000e+00 : f32
    %3165 = vector.broadcast %cst_972 : f32 to vector<8x128xf32>
    %3166 = arith.maximumf %3164, %3165 : vector<8x128xf32>
    %c0_973 = arith.constant 0 : index
    %c3_974 = arith.constant 3 : index
    %c0_975 = arith.constant 0 : index
    %c0_976 = arith.constant 0 : index
    %3167 = vector.load %arg4[%c0_973, %c3_974, %c0_975, %c0_976] : memref<1x4x8x128xf32, #tpu.memory_space<vmem>>, vector<1x1x8x128xf32>
    %3168 = vector.shape_cast %3167 : vector<1x1x8x128xf32> to vector<8x128xf32>
    %3169 = vector.shape_cast %3166 : vector<8x128xf32> to vector<1x1x8x128xf32>
    tpu.vector_store %arg4[%c0_973, %c3_974, %c0_975, %c0_976], %3169 {strides = array<i32>} : memref<1x4x8x128xf32, #tpu.memory_space<vmem>>, vector<1x1x8x128xf32>,
    return
  }
  func.func @transform_0(%arg0: i32) -> (i32, i32, i32, i32, i32) {
    %c0_i32 = arith.constant 0 : i32
    %c0_i32_0 = arith.constant 0 : i32
    %c0_i32_1 = arith.constant 0 : i32
    %c0_i32_2 = arith.constant 0 : i32
    %c0_i32_3 = arith.constant 0 : i32
    return %arg0, %c0_i32, %c0_i32_0, %c0_i32_1, %c0_i32_2 : i32, i32, i32, i32, i32
  }
  func.func @transform_1(%arg0: i32) -> i32 {
    %c0_i32 = arith.constant 0 : i32
    %c0_i32_0 = arith.constant 0 : i32
    return %c0_i32 : i32
  }
  func.func @transform_2(%arg0: i32) -> i32 {
    %c0_i32 = arith.constant 0 : i32
    %c0_i32_0 = arith.constant 0 : i32
    return %c0_i32 : i32
  }
  func.func @transform_3(%arg0: i32) -> (i32, i32, i32, i32) {
    %c0_i32 = arith.constant 0 : i32
    %c0_i32_0 = arith.constant 0 : i32
    %c0_i32_1 = arith.constant 0 : i32
    %c0_i32_2 = arith.constant 0 : i32
    return %arg0, %c0_i32, %c0_i32_0, %c0_i32_1 : i32, i32, i32, i32
  }
}

</mosaic_0001>

<bundles_post_ra>
// kernel: tpu_custom_call.1
= control target key start
LH: loop header
LB: loop body
LE: loop exit
PB: predicated region body
PF: predicated region fallthrough
CT: control target
= control target key end

     0   :  { %s6986_s0 = inlined_call_operand.vmem [shape: f32[1,1,16,10,128], index: 0, kind: input, shape index: {}]   ;;  %s6987_s1 = inlined_call_operand.vmem [shape: f32[528], index: 1, kind: input, shape index: {}]   ;;  %s6988_s2 = inlined_call_operand.vmem [shape: f32[20], index: 2, kind: input, shape index: {}]   ;;  %s6989_s3 = inlined_call_operand.hbm [shape: f32[1,4,8,128], index: 3, kind: output, shape index: {}]  }
   0x1   :  { %7010 = sst [smem:[#allocation35_spill]] %s6989_s3 }
   0x2   :  { %8 = vsyncpa [#allocation6], 0 }
   0x3   :  { %9 = vsyncpa [#allocation8], 0 }
   0x4   :  { %10 = vsyncpa [#allocation5], 0  ;;  %s19_s14 = sshll.u32 %s6987_s1, 4  ;;  %s29_s17 = sshll.u32 %s6988_s2, 4  ;;  %s20_s14 = int_to_ptr.vmem [resolvable:$true] %s19_s14  ;;  %s30_s17 = int_to_ptr.vmem [resolvable:$true] %s29_s17 }
   0x5   :  { %s3535_s18 = scalar_lea.vmem %s20_s14, 80  ;;  %s3539_s19 = scalar_lea.vmem %s20_s14, 128 }
   0x6   :  { %p3536_p0 = scmp.ne.s32.totalorder %s20_s14, %s3535_s18  ;;  %p3540_p1 = scmp.lt.s32.totalorder %s20_s14, %s20_s14 }
   0x7   :  { %p3541_p2 = scmp.lt.s32.totalorder %s3539_s19, %s3535_s18 }
   0x9   :  { %p3542_p3 = por %p3541_p2, %p3540_p1 }
   0xb   :  { %p3543_p4 = pnand %p3542_p3, %p3536_p0 }
   0xd   :  { %3546 = shalt.err (!%p3543_p4)
}
   0xe   :  { %s3585_s20 = smov [#allocation4]   ;;  %s3547_s21 = scalar_lea.vmem %s30_s17, 16 }
   0xf   :  { %22 = dma.vmem_to_smem %s20_s14, 80, %s3585_s20, [#allocation6]  }
  0x10   :  { %p3548_p5 = scmp.ne.s32.totalorder %s30_s17, %s3547_s21  ;;  %p3552_p6 = scmp.lt.s32.totalorder %s30_s17, %s30_s17 }
  0x11   :  { %p3553_p7 = scmp.lt.s32.totalorder %s3547_s21, %s3547_s21 }
  0x13   :  { %p3554_p8 = por %p3553_p7, %p3552_p6 }
  0x15   :  { %p3555_p9 = pnand %p3554_p8, %p3548_p5 }
  0x17   :  { %3558 = shalt.err (!%p3555_p9)
}
  0x18   :  { %s3586_s1 = smov [#allocation7]  }
  0x19   :  { %32 = dma.vmem_to_smem %s30_s17, 16, %s3586_s1, [#allocation8]  }
  0x1a   :  { %3579 = dma.done.wait [#allocation6], 80  }
  0x1b   :  { %3580 = vsyncadd [#allocation6], 4294967216 }
  0x1c   :  { %3581 = dma.done.wait [#allocation8], 16  }
  0x1d   :  { %3582 = vsyncadd [#allocation8], 4294967280 }
  0x1e   :  { %39 = sfence }
  0x1f   :  { %s3617_s2 = sld [smem:[#allocation4]]  ;;  %v3587_v0 = vmov 0.0   ;;  %v3624_v1 = vld [vmem:[%s6986_s0] sm:$0xff]  ;;  %v3670_v12 = vld [vmem:[%s6986_s0 + $0x10] sm:$0xff] }
  0x20   :  { %40 = vst [vmem:[#allocation2] sm:$0x1] %v3587_v0  ;;  %41 = vst [vmem:[#allocation2 + $0x10] sm:$0x1] %v3587_v0  ;;  %s2842_s22 = sld [smem:[#allocation4 + $0x1]]  ;;  %v3629_v2 = vld [vmem:[%s6986_s0 + $0x20] sm:$0xff] }
  0x21   :  { %42 = vst [vmem:[#allocation2 + $0x20] sm:$0x1] %v3587_v0  ;;  %43 = vst [vmem:[#allocation2 + $0x30] sm:$0x1] %v3587_v0  ;;  %s2843_s23 = sld [smem:[#allocation4 + $0x2]]  ;;  %v3636_v3 = vld [vmem:[%s6986_s0 + $0x1] sm:$0xff] }
  0x22   :  { %44 = vst [vmem:[#allocation2 + $0x40] sm:$0x1] %v3587_v0  ;;  %45 = vst [vmem:[#allocation2 + $0x50] sm:$0x1] %v3587_v0  ;;  %s2844_s24 = sld [smem:[#allocation4 + $0x3]]  ;;  %v3641_v4 = vld [vmem:[%s6986_s0 + $0x21] sm:$0xff] }
  0x23   :  { %46 = vst [vmem:[#allocation2 + $0x60] sm:$0x1] %v3587_v0  ;;  %47 = vst [vmem:[#allocation2 + $0x70] sm:$0x1] %v3587_v0  ;;  %s3619_s25 = sld [smem:[#allocation4 + $0x4]]  ;;  %v3646_v5 = vld [vmem:[%s6986_s0 + $0x40] sm:$0xff] }
  0x24   :  { %48 = vst [vmem:[#allocation2 + $0x80] sm:$0x1] %v3587_v0  ;;  %49 = vst [vmem:[#allocation2 + $0x90] sm:$0x1] %v3587_v0  ;;  %s3631_s30 = sld [smem:[#allocation4 + $0x5]]  ;;  %v3653_v6 = vld [vmem:[%s6986_s0 + $0x2] sm:$0xff] }
  0x25   :  { %50 = vst [vmem:[#allocation2 + $0xa0] sm:$0x1] %v3587_v0  ;;  %51 = vst [vmem:[#allocation2 + $0xb0] sm:$0x1] %v3587_v0  ;;  %s3648_s10 = sld [smem:[#allocation7]]  ;;  %v119_v7 = vstv %s3617_s2  ;;  %v3659_v8 = vld [vmem:[%s6986_s0 + $0x22] sm:$0xff] }
  0x26   :  { %52 = vst [vmem:[#allocation2 + $0xc0] sm:$0x1] %v3587_v0  ;;  %53 = vst [vmem:[#allocation2 + $0xd0] sm:$0x1] %v3587_v0  ;;  %v3664_v9 = vld [vmem:[%s6986_s0 + $0x41] sm:$0xff]  ;;  %v120_v10 = vmul.f32 %v119_v7, %v3624_v1  ;;  %v121_v11 = vstv %s2842_s22  ;;  %v214_v13 = vmul.f32 %v3629_v2, %v119_v7  ;;  %s3673_s19 = sld [smem:[#allocation4 + $0x18]]  ;;  %v282_v19 = vmul.f32 %v3646_v5, %v119_v7 }
  0x27   :  { %54 = vst [vmem:[#allocation2 + $0xe0] sm:$0x1] %v3587_v0  ;;  %55 = vst [vmem:[#allocation2 + $0xf0] sm:$0x1] %v3587_v0  ;;  %v122_v14 = vmul.f32 %v121_v11, %v3636_v3  ;;  %v124_v15 = vstv %s2843_s23  ;;  %v215_v16 = vmul.f32 %v3641_v4, %v121_v11  ;;  %v3680_v17 = vld [vmem:[%s6986_s0 + $0x30] sm:$0xff]  ;;  %v3685_v18 = vld [vmem:[%s6986_s0 + $0x42] sm:$0xff]  ;;  %v283_v25 = vmul.f32 %v3664_v9, %v121_v11 }
  0x28   :  { %56 = vst [vmem:[#allocation2 + $0x9] sm:$0x1] %v3587_v0  ;;  %57 = vst [vmem:[#allocation2 + $0x19] sm:$0x1] %v3587_v0  ;;  %s3688_s22 = sld [smem:[#allocation4 + $0x19]]  ;;  %v125_v20 = vmul.f32 %v124_v15, %v3653_v6  ;;  %v3694_v21 = vld [vmem:[%s6986_s0 + $0x11] sm:$0xff]  ;;  %v155_v22 = vstv %s2844_s24  ;;  %v217_v23 = vmul.f32 %v3659_v8, %v124_v15  ;;  %v285_v35 = vmul.f32 %v3685_v18, %v124_v15 }
  0x29   :  { %58 = vst [vmem:[#allocation2 + $0x29] sm:$0x1] %v3587_v0  ;;  %59 = vst [vmem:[#allocation2 + $0x39] sm:$0x1] %v3587_v0  ;;  %v3700_v24 = vld [vmem:[%s6986_s0 + $0x31] sm:$0xff]  ;;  %s3703_s29 = sld [smem:[#allocation4 + $0x1a]]  ;;  %v123_v26 = vadd.f32 %v122_v14, %v120_v10  ;;  %v156_v28 = vmul.f32 %v3670_v12, %v155_v22  ;;  %v158_v29 = vstv %s3619_s25  ;;  %v216_v30 = vadd.f32 %v215_v16, %v214_v13 }
  0x2a   :  { %60 = vst [vmem:[#allocation2 + $0x49] sm:$0x1] %v3587_v0  ;;  %61 = vst [vmem:[#allocation2 + $0x59] sm:$0x1] %v3587_v0  ;;  %v3708_v27 = vld [vmem:[%s6986_s0 + $0x12] sm:$0xff]  ;;  %s3715_s7 = sld [smem:[#allocation4 + $0x48]]  ;;  %v161_v32 = vstv %s3631_s30  ;;  %v238_v34 = vmul.f32 %v3680_v17, %v155_v22  ;;  %v159_v38 = vmul.f32 %v3694_v21, %v158_v29  ;;  %v240_v40 = vmul.f32 %v3700_v24, %v158_v29 }
  0x2b   :  { %62 = vst [vmem:[#allocation2 + $0x69] sm:$0x1] %v3587_v0  ;;  %63 = vst [vmem:[#allocation2 + $0x79] sm:$0x1] %v3587_v0  ;;  %v2880_v31 = vld [vmem:[%s6986_s0 + $0x50] sm:$0xff]  ;;  %v2883_v36 = vld [vmem:[%s6986_s0 + $0x60] sm:$0xff]  ;;  %v126_v37 = vadd.f32 %v125_v20, %v123_v26  ;;  %v218_v39 = vadd.f32 %v217_v23, %v216_v30  ;;  %v162_v44 = vmul.f32 %v3708_v27, %v161_v32  ;;  %v191_v58 = vstv %s3648_s10 }
  0x2c   :  { %64 = vst [vmem:[#allocation2 + $0x89] sm:$0x1] %v3587_v0  ;;  %65 = vst [vmem:[#allocation2 + $0x99] sm:$0x1] %v3587_v0  ;;  %v3721_v33 = vld [vmem:[%s6986_s0 + $0x32] sm:$0xff]  ;;  %s3728_s25 = sld [smem:[#allocation4 + $0x49]]  ;;  %v284_v45 = vadd.f32 %v283_v25, %v282_v19  ;;  %v306_v46 = vmul.f32 %v2880_v31, %v155_v22  ;;  %v350_v51 = vmul.f32 %v2883_v36, %v119_v7  ;;  %v613_v25 = vstv %s3673_s19 }
  0x2d   :  { %66 = vst [vmem:[#allocation2 + $0xa9] sm:$0x1] %v3587_v0  ;;  %67 = vst [vmem:[#allocation2 + $0xb9] sm:$0x1] %v3587_v0  ;;  %v2881_v41 = vld [vmem:[%s6986_s0 + $0x51] sm:$0xff]  ;;  %v2884_v42 = vld [vmem:[%s6986_s0 + $0x61] sm:$0xff]  ;;  %v157_v47 = vadd.f32 %v156_v28, %v126_v37  ;;  %v239_v48 = vadd.f32 %v238_v34, %v218_v39  ;;  %v242_v49 = vmul.f32 %v3721_v33, %v161_v32 }
  0x2e   :  { %68 = vst [vmem:[#allocation2 + $0xc9] sm:$0x1] %v3587_v0  ;;  %69 = vst [vmem:[#allocation2 + $0xd9] sm:$0x1] %v3587_v0  ;;  %v2885_v43 = vld [vmem:[%s6986_s0 + $0x62] sm:$0xff]  ;;  %s3741_s18 = sld [smem:[#allocation4 + $0x4a]]  ;;  %v286_v53 = vadd.f32 %v285_v35, %v284_v45  ;;  %v308_v54 = vmul.f32 %v2881_v41, %v158_v29  ;;  %v351_v55 = vmul.f32 %v2884_v42, %v121_v11 }
  0x2f   :  { %70 = vst [vmem:[#allocation2 + $0xe9] sm:$0x1] %v3587_v0  ;;  %71 = vst [vmem:[#allocation2 + $0xf9] sm:$0x1] %v3587_v0  ;;  %s3744_s20 = sld [smem:[#allocation4 + $0x78]]  ;;  %v2882_v50 = vld [vmem:[%s6986_s0 + $0x52] sm:$0xff]  ;;  %v353_v56 = vmul.f32 %v2885_v43, %v124_v15  ;;  %v160_v57 = vadd.f32 %v159_v38, %v157_v47  ;;  %v241_v59 = vadd.f32 %v240_v40, %v239_v48  ;;  %v618_v30 = vstv %s3703_s29 }
  0x30   :  { %72 = vst [vmem:[#allocation3] sm:$0x1] %v3587_v0  ;;  %73 = vst [vmem:[#allocation3 + $0x10] sm:$0x1] %v3587_v0  ;;  %v2886_v52 = vld [vmem:[%s6986_s0 + $0x70] sm:$0xff]  ;;  %s3753_s26 = sld [smem:[#allocation4 + $0x79]]  ;;  %v307_v61 = vadd.f32 %v306_v46, %v286_v53  ;;  %v310_v62 = vmul.f32 %v2882_v50, %v161_v32  ;;  %v352_v63 = vadd.f32 %v351_v55, %v350_v51  ;;  %v621_v35 = vstv %s3715_s7 }
  0x31   :  { %74 = vst [vmem:[#allocation3 + $0x20] sm:$0x1] %v3587_v0  ;;  %75 = vst [vmem:[#allocation3 + $0x30] sm:$0x1] %v3587_v0  ;;  %s3755_s27 = sld [smem:[#allocation4 + $0x7a]]  ;;  %v2887_v60 = vld [vmem:[%s6986_s0 + $0x71] sm:$0xff]  ;;  %v163_v7 = vadd.f32 %v162_v44, %v160_v57  ;;  %v243_v10 = vadd.f32 %v242_v49, %v241_v59 }
  0x32   :  { %76 = vst [vmem:[#allocation3 + $0x40] sm:$0x1] %v3587_v0  ;;  %77 = vst [vmem:[#allocation3 + $0x50] sm:$0x1] %v3587_v0  ;;  %s3761_s5 = sld [smem:[#allocation4 + $0xa8]]  ;;  %v2888_v11 = vld [vmem:[%s6986_s0 + $0x72] sm:$0xff]  ;;  %v309_v13 = vadd.f32 %v308_v54, %v307_v61  ;;  %v354_v14 = vadd.f32 %v353_v56, %v352_v63  ;;  %v376_v15 = vmul.f32 %v2887_v60, %v158_v29  ;;  %v615_v29 = vstv %s3688_s22 }
  0x33   :  { %78 = vst [vmem:[#allocation3 + $0x60] sm:$0x1] %v3587_v0  ;;  %79 = vst [vmem:[#allocation3 + $0x70] sm:$0x1] %v3587_v0  ;;  %s3763_s24 = sld [smem:[#allocation4 + $0xa9]]  ;;  %v192_v16 = vadd.f32 %v191_v58, %v163_v7  ;;  %v262_v19 = vadd.f32 %v243_v10, %v191_v58  ;;  %v378_v23 = vmul.f32 %v2888_v11, %v161_v32  ;;  %v3113_v31 = vld [vmem:[%s6986_s0 + $0x80] sm:$0xff]  ;;  %v623_v36 = vstv %s3728_s25 }
  0x34   :  { %80 = vst [vmem:[#allocation3 + $0x9] sm:$0x1] %v3587_v0  ;;  %81 = vst [vmem:[#allocation3 + $0x19] sm:$0x1] %v3587_v0  ;;  %s3768_s10 = sld [smem:[#allocation4 + $0xaa]]  ;;  %v311_v20 = vadd.f32 %v310_v62, %v309_v13  ;;  %v3114_v37 = vld [vmem:[%s6986_s0 + $0x81] sm:$0xff]  ;;  %v626_v39 = vstv %s3741_s18 }
  0x35   :  { %82 = vst [vmem:[#allocation3 + $0x29] sm:$0x1] %v3587_v0  ;;  %83 = vst [vmem:[#allocation3 + $0x39] sm:$0x1] %v3587_v0  ;;  %s3770_s9 = sld [smem:[#allocation4 + $0xd8]]  ;;  %v193_v26 = vmax.f32 %v192_v16, 0.0  ;;  %v629_v40 = vstv %s3744_s20 }
  0x36   :  { %84 = vst [vmem:[#allocation3 + $0x49] sm:$0x1] %v3587_v0  ;;  %85 = vst [vmem:[#allocation3 + $0x59] sm:$0x1] %v3587_v0  ;;  %s3772_s11 = sld [smem:[#allocation4 + $0xd9]]  ;;  %v3777_v28 = vmax.f32 %v262_v19, 0.0  ;;  %v330_v34 = vadd.f32 %v311_v20, %v191_v58  ;;  %v631_v41 = vstv %s3753_s26 }
  0x37   :  { %86 = vst [vmem:[#allocation3 + $0x69] sm:$0x1] %v3587_v0  ;;  %87 = vst [vmem:[#allocation3 + $0x79] sm:$0x1] %v3587_v0  ;;  %v374_v0 = vmul.f32 %v2886_v52, %v155_v22  ;;  %s3775_s12 = sld [smem:[#allocation4 + $0xda]]  ;;  %v3115_v38 = vld [vmem:[%s6986_s0 + $0x82] sm:$0xff]  ;;  %v634_v42 = vstv %s3755_s27  ;;  %v616_v49 = vmul.f32 %v615_v29, %v193_v26  ;;  %v624_v54 = vmul.f32 %v623_v36, %v193_v26 }
  0x38   :  { %s3781_s30 = sld [smem:[#allocation4 + $0xdb]]  ;;  %194 = vst [vmem:[#allocation2 + $0x1] sm:$0xff] %v193_v26  ;;  %265 = vst [vmem:[#allocation2 + $0x11] sm:$0xff] %v3777_v28  ;;  %v3803_v43 = vmax.f32 %v330_v34, 0.0  ;;  %v637_v45 = vstv %s3761_s5  ;;  %v3119_v47 = vld [vmem:[%s6986_s0 + $0xa0] sm:$0xff]  ;;  %v3116_v57 = vld [vmem:[%s6986_s0 + $0x90] sm:$0xff]  ;;  %v632_v10 = vmul.f32 %v631_v41, %v193_v26 }
  0x39   :  { %v375_v22 = vadd.f32 %v374_v0, %v354_v14  ;;  %s3788_s15 = sld [smem:[#allocation4 + $0xdc]]  ;;  %v3120_v48 = vld [vmem:[%s6986_s0 + $0xa1] sm:$0xff]  ;;  %v639_v50 = vstv %s3763_s24  ;;  %v3117_v13 = vld [vmem:[%s6986_s0 + $0x91] sm:$0xff] }
  0x3a   :  { %s3801_s7 = sld [smem:[#allocation4 + $0xdd]]  ;;  %333 = vst [vmem:[#allocation2 + $0x21] sm:$0xff] %v3803_v43  ;;  %v3125_v63 = vld [vmem:[%s6986_s0 + $0xc0] sm:$0xff]  ;;  %v642_v16 = vstv %s3768_s10  ;;  %v3118_v19 = vld [vmem:[%s6986_s0 + $0x92] sm:$0xff] }
  0x3b   :  { %v377_v32 = vadd.f32 %v376_v15, %v375_v22  ;;  %s3806_s25 = sld [smem:[#allocation7 + $0x8]]  ;;  %v3809_v46 = vstv %s3770_s9  ;;  %v3126_v0 = vld [vmem:[%s6986_s0 + $0xc1] sm:$0xff]  ;;  %v640_v15 = vmul.f32 %v639_v50, %v193_v26 }
  0x3c   :  { %v1282_v51 = vmul.f32 %v3113_v31, %v3809_v46  ;;  %v3820_v52 = vstv %s3772_s11  ;;  %s3822_s26 = sld [smem:[#allocation4 + $0xf0]]  ;;  %v1373_v61 = vmul.f32 %v3119_v47, %v3809_v46  ;;  %v1437_v34 = vmul.f32 %v3125_v63, %v3809_v46 }
  0x3d   :  { %v379_v44 = vadd.f32 %v378_v23, %v377_v32  ;;  %v1284_v55 = vmul.f32 %v3114_v37, %v3820_v52  ;;  %v3827_v56 = vstv %s3775_s12  ;;  %s3832_s5 = sld [smem:[#allocation4 + $0xf1]]  ;;  %v1374_v62 = vmul.f32 %v3120_v48, %v3820_v52 }
  0x3e   :  { %v1287_v59 = vmul.f32 %v3115_v38, %v3827_v56  ;;  %v3836_v60 = vstv %s3781_s30  ;;  %s3838_s24 = sld [smem:[#allocation4 + $0xf2]]  ;;  %v1438_v32 = vmul.f32 %v3126_v0, %v3820_v52 }
  0x3f   :  { %v398_v53 = vadd.f32 %v379_v44, %v191_v58  ;;  %v3121_v58 = vld [vmem:[%s6986_s0 + $0xa2] sm:$0xff]  ;;  %v1285_v11 = vadd.f32 %v1284_v55, %v1282_v51  ;;  %v3857_v14 = vstv %s3788_s15  ;;  %s3859_s16 = sld [smem:[#allocation4 + $0x120]]  ;;  %v1318_v20 = vmul.f32 %v3116_v57, %v3836_v60  ;;  %v3122_v51 = vld [vmem:[%s6986_s0 + $0xb0] sm:$0xff] }
  0x40   :  { %v3867_v22 = vstv %s3801_s7  ;;  %s3869_s21 = sld [smem:[#allocation4 + $0x121]]  ;;  %v610_v23 = vld [vmem:[#allocation2] sm:$0xff]  ;;  %v1376_v26 = vmul.f32 %v3121_v58, %v3827_v56  ;;  %v1321_v38 = vmul.f32 %v3117_v13, %v3857_v14  ;;  %v1375_v41 = vadd.f32 %v1374_v62, %v1373_v61  ;;  %v3128_v61 = vld [vmem:[%s6986_s0 + $0xd0] sm:$0xff] }
  0x41   :  { %v3851_v7 = vmax.f32 %v398_v53, 0.0  ;;  %v612_v29 = vld [vmem:[#allocation2 + $0x2] sm:$0xff]  ;;  %v1288_v31 = vadd.f32 %v1287_v59, %v1285_v11  ;;  %s3872_s15 = sld [smem:[#allocation4 + $0x122]]  ;;  %v614_v36 = vmul.f32 %v613_v25, %v610_v23  ;;  %v622_v37 = vmul.f32 %v621_v35, %v610_v23 }
  0x42   :  { %s3880_s10 = sld [smem:[#allocation4 + $0x150]]  ;;  %v619_v44 = vmul.f32 %v618_v30, %v612_v29  ;;  %v630_v47 = vmul.f32 %v629_v40, %v610_v23  ;;  %v638_v48 = vmul.f32 %v637_v45, %v610_v23  ;;  %v1324_v50 = vmul.f32 %v3118_v19, %v3867_v22  ;;  %v3123_v30 = vld [vmem:[%s6986_s0 + $0xb1] sm:$0xff] }
  0x43   :  { %401 = vst [vmem:[#allocation2 + $0x31] sm:$0xff] %v3851_v7  ;;  %s3885_s7 = sld [smem:[#allocation4 + $0x151]]  ;;  %v617_v25 = vadd.f32 %v616_v49, %v614_v36  ;;  %v625_v35 = vadd.f32 %v624_v54, %v622_v37  ;;  %v627_v53 = vmul.f32 %v626_v39, %v612_v29  ;;  %v1319_v55 = vadd.f32 %v1318_v20, %v1288_v31  ;;  %v3124_v19 = vld [vmem:[%s6986_s0 + $0xb2] sm:$0xff] }
  0x44   :  { %s3892_s19 = sld [smem:[#allocation4 + $0x152]]  ;;  %v633_v40 = vadd.f32 %v632_v10, %v630_v47  ;;  %v635_v45 = vmul.f32 %v634_v42, %v612_v29  ;;  %v641_v57 = vadd.f32 %v640_v15, %v638_v48  ;;  %v643_v59 = vmul.f32 %v642_v16, %v612_v29  ;;  %v3127_v42 = vld [vmem:[%s6986_s0 + $0xc2] sm:$0xff]  ;;  %v3129_v20 = vld [vmem:[%s6986_s0 + $0xd1] sm:$0xff] }
  0x45   :  { %s3899_s20 = sld [smem:[#allocation4 + $0x180]]  ;;  %v3901_v49 = vadd.f32 %v619_v44, %v617_v25  ;;  %v3903_v39 = vadd.f32 %v627_v53, %v625_v35  ;;  %v1322_v54 = vadd.f32 %v1321_v38, %v1319_v55  ;;  %v1397_v58 = vmul.f32 %v3122_v51, %v3836_v60  ;;  %v3130_v44 = vld [vmem:[%s6986_s0 + $0xd2] sm:$0xff]  ;;  %v3132_v51 = vld [vmem:[%s6986_s0 + $0xe1] sm:$0xff] }
  0x46   :  { %s3905_s18 = sld [smem:[#allocation4 + $0x181]]  ;;  %v3914_v62 = vadd.f32 %v635_v45, %v633_v40  ;;  %v3916_v63 = vadd.f32 %v643_v59, %v641_v57  ;;  %v3919_v0 = vstv %s3806_s25  ;;  %v1399_v10 = vmul.f32 %v3123_v30, %v3857_v14  ;;  %v3133_v59 = vld [vmem:[%s6986_s0 + $0xe2] sm:$0xff] }
  0x47   :  { %s3921_s8 = sld [smem:[#allocation4 + $0x182]]  ;;  %v1325_v11 = vadd.f32 %v1324_v50, %v1322_v54  ;;  %v1760_v13 = vstv %s3822_s26  ;;  %v1762_v15 = vstv %s3832_s5  ;;  %v1377_v16 = vadd.f32 %v1376_v26, %v1375_v41  ;;  %v3131_v50 = vld [vmem:[%s6986_s0 + $0xe0] sm:$0xff]  ;;  %v3134_v54 = vld [vmem:[%s6986_s0 + $0xf0] sm:$0xff] }
  0x48   :  { %s3926_s9 = sld [smem:[#allocation4 + $0x1b]]  ;;  %v1765_v23 = vstv %s3838_s24  ;;  %v1439_v29 = vadd.f32 %v1438_v32, %v1437_v34  ;;  %v1440_v31 = vmul.f32 %v3127_v42, %v3827_v56  ;;  %v1461_v36 = vmul.f32 %v3128_v61, %v3836_v60 }
  0x49   :  { %s3935_s30 = sld [smem:[#allocation4 + $0x1c]]  ;;  %v1354_v26 = vadd.f32 %v3919_v0, %v1325_v11  ;;  %v1768_v37 = vstv %s3859_s16  ;;  %v1770_v38 = vstv %s3869_s21  ;;  %v1398_v41 = vadd.f32 %v1397_v58, %v1377_v16  ;;  %v3984_v11 = vld [vmem:[#allocation2 + $0x10] sm:$0xff] }
  0x4a   :  { %s3942_s5 = sld [smem:[#allocation4 + $0x1d]]  ;;  %v1773_v34 = vstv %s3872_s15  ;;  %v1401_v32 = vmul.f32 %v3124_v19, %v3867_v22  ;;  %v1441_v47 = vadd.f32 %v1440_v31, %v1439_v29  ;;  %v1463_v48 = vmul.f32 %v3129_v20, %v3857_v14 }
  0x4b   :  { %s3948_s22 = sld [smem:[#allocation4 + $0x4b]]  ;;  %v3958_v25 = vmax.f32 %v1354_v26, 0.0  ;;  %v1776_v35 = vstv %s3880_s10  ;;  %v1778_v53 = vstv %s3885_s7  ;;  %v1400_v55 = vadd.f32 %v1399_v10, %v1398_v41 }
  0x4c   :  { %s3962_s28 = sld [smem:[#allocation4 + $0x4c]]  ;;  %v1781_v30 = vstv %s3892_s19  ;;  %v1784_v40 = vstv %s3899_s20  ;;  %v1462_v45 = vadd.f32 %v1461_v36, %v1441_v47  ;;  %v1465_v57 = vmul.f32 %v3130_v44, %v3867_v22  ;;  %v4003_v47 = vld [vmem:[#allocation2 + $0x12] sm:$0xff] }
  0x4d   :  { %s3966_s4 = sld [smem:[#allocation4 + $0x4d]]  ;;  %1356 = vst [vmem:[#allocation2 + $0x1] sm:$0xff] %v3958_v25  ;;  %v1786_v58 = vstv %s3905_s18  ;;  %v1789_v42 = vstv %s3921_s8  ;;  %v1501_v61 = vmul.f32 %v3131_v50, %v3809_v46  ;;  %v1502_v10 = vmul.f32 %v3132_v51, %v3820_v52 }
  0x4e   :  { %s3978_s7 = sld [smem:[#allocation4 + $0x7b]]  ;;  %v648_v16 = vstv %s3926_s9  ;;  %v1402_v20 = vadd.f32 %v1401_v32, %v1400_v55  ;;  %v1464_v29 = vadd.f32 %v1463_v48, %v1462_v45  ;;  %v1504_v46 = vmul.f32 %v3133_v59, %v3827_v56 }
  0x4f   :  { %s3982_s13 = sld [smem:[#allocation4 + $0x7c]]  ;;  %v651_v19 = vstv %s3935_s30  ;;  %v649_v31 = vmul.f32 %v648_v16, %v3984_v11  ;;  %v3994_v52 = vmul.f32 %v3134_v54, %v3836_v60  ;;  %v1763_v26 = vmul.f32 %v1762_v15, %v3958_v25  ;;  %v4020_v16 = vld [vmem:[#allocation2 + $0x20] sm:$0xff] }
  0x50   :  { %s3988_s25 = sld [smem:[#allocation4 + $0x7d]]  ;;  %v652_v36 = vmul.f32 %v651_v19, %v3777_v28  ;;  %v1421_v44 = vadd.f32 %v1402_v20, %v3919_v0  ;;  %v1466_v32 = vadd.f32 %v1465_v57, %v1464_v29  ;;  %v654_v56 = vstv %s3942_s5  ;;  %v4022_v19 = vld [vmem:[#allocation2 + $0x22] sm:$0xff] }
  0x51   :  { %s3997_s18 = sld [smem:[#allocation4 + $0xab]]  ;;  %v657_v41 = vstv %s3948_s22  ;;  %v650_v48 = vadd.f32 %v649_v31, %v3901_v49  ;;  %v1503_v45 = vadd.f32 %v1502_v10, %v1501_v61  ;;  %v1771_v61 = vmul.f32 %v1770_v38, %v3958_v25 }
  0x52   :  { %s4001_s9 = sld [smem:[#allocation4 + $0xac]]  ;;  %v658_v60 = vmul.f32 %v657_v41, %v3984_v11  ;;  %v660_v50 = vstv %s3962_s28  ;;  %v4012_v51 = vmax.f32 %v1421_v44, 0.0  ;;  %v1485_v55 = vadd.f32 %v1466_v32, %v3919_v0 }
  0x53   :  { %s4009_s30 = sld [smem:[#allocation4 + $0xad]]  ;;  %v661_v15 = vmul.f32 %v660_v50, %v3777_v28  ;;  %v653_v57 = vadd.f32 %v652_v36, %v650_v48  ;;  %v663_v49 = vstv %s3966_s4  ;;  %v1779_v10 = vmul.f32 %v1778_v53, %v3958_v25 }
  0x54   :  { %v659_v59 = vadd.f32 %v658_v60, %v3903_v39  ;;  %v666_v54 = vstv %s3978_s7  ;;  %s4018_s5 = sld [smem:[#allocation4 + $0xf3]]  ;;  %v1757_v20 = vld [vmem:[#allocation2] sm:$0xff]  ;;  %1423 = vst [vmem:[#allocation2 + $0x11] sm:$0xff] %v4012_v51  ;;  %v4032_v39 = vmax.f32 %v1485_v55, 0.0  ;;  %v655_v44 = vmul.f32 %v654_v56, %v4003_v47 }
  0x55   :  { %v1759_v29 = vld [vmem:[#allocation2 + $0x2] sm:$0xff]  ;;  %v667_v31 = vmul.f32 %v666_v54, %v3984_v11  ;;  %s4030_s14 = sld [smem:[#allocation4 + $0xf4]]  ;;  %v1761_v36 = vmul.f32 %v1760_v13, %v1757_v20  ;;  %v1769_v41 = vmul.f32 %v1768_v37, %v1757_v20  ;;  %v669_v32 = vstv %s3982_s13 }
  0x56   :  { %s4040_s21 = sld [smem:[#allocation4 + $0xf5]]  ;;  %v1777_v38 = vmul.f32 %v1776_v35, %v1757_v20  ;;  %v1787_v53 = vmul.f32 %v1786_v58, %v3958_v25  ;;  %v664_v48 = vmul.f32 %v663_v49, %v4003_v47  ;;  %1487 = vst [vmem:[#allocation2 + $0x21] sm:$0xff] %v4032_v39  ;;  %v4049_v13 = vadd.f32 %v1504_v46, %v1503_v45 }
  0x57   :  { %s4046_s17 = sld [smem:[#allocation4 + $0x123]]  ;;  %v1764_v37 = vadd.f32 %v1763_v26, %v1761_v36  ;;  %v1766_v56 = vmul.f32 %v1765_v23, %v1759_v29  ;;  %v4053_v60 = vadd.f32 %v655_v44, %v653_v57  ;;  %v662_v35 = vadd.f32 %v661_v15, %v659_v59 }
  0x58   :  { %s4055_s26 = sld [smem:[#allocation4 + $0x124]]  ;;  %v1772_v25 = vadd.f32 %v1771_v61, %v1769_v41  ;;  %v1774_v58 = vmul.f32 %v1773_v34, %v1759_v29  ;;  %v668_v50 = vadd.f32 %v667_v31, %v3914_v62  ;;  %v670_v55 = vmul.f32 %v669_v32, %v3777_v28 }
  0x59   :  { %s4061_s16 = sld [smem:[#allocation4 + $0x125]]  ;;  %v1782_v46 = vmul.f32 %v1781_v30, %v1759_v29  ;;  %v1785_v23 = vmul.f32 %v1784_v40, %v1757_v20  ;;  %v4067_v26 = vadd.f32 %v664_v48, %v662_v35  ;;  %v672_v15 = vstv %s3988_s25 }
  0x5a   :  { %s4070_s24 = sld [smem:[#allocation4 + $0x153]]  ;;  %v1780_v45 = vadd.f32 %v1779_v10, %v1777_v38  ;;  %v1790_v34 = vmul.f32 %v1789_v42, %v1759_v29  ;;  %v671_v57 = vadd.f32 %v670_v55, %v668_v50  ;;  %v673_v62 = vmul.f32 %v672_v15, %v4003_v47 }
  0x5b   :  { %s4075_s15 = sld [smem:[#allocation4 + $0x154]]  ;;  %v1767_v59 = vadd.f32 %v1766_v56, %v1764_v37  ;;  %v675_v30 = vstv %s3997_s18  ;;  %v678_v49 = vstv %s4001_s9  ;;  %v1792_v40 = vld [vmem:[#allocation2 + $0x10] sm:$0xff]  ;;  %v1795_v54 = vstv %s4018_s5 }
  0x5c   :  { %s4079_s10 = sld [smem:[#allocation4 + $0x155]]  ;;  %v1775_v20 = vadd.f32 %v1774_v58, %v1772_v25  ;;  %v4082_v61 = vadd.f32 %v673_v62, %v671_v57  ;;  %v676_v42 = vmul.f32 %v675_v30, %v3984_v11  ;;  %v679_v29 = vmul.f32 %v678_v49, %v3777_v28 }
  0x5d   :  { %s4086_s19 = sld [smem:[#allocation4 + $0x183]]  ;;  %v681_v10 = vstv %s4009_s30  ;;  %v1796_v31 = vmul.f32 %v1795_v54, %v1792_v40  ;;  %v1798_v36 = vstv %s4030_s14  ;;  %v1804_v41 = vstv %s4046_s17 }
  0x5e   :  { %s4089_s20 = sld [smem:[#allocation4 + $0x184]]  ;;  %v1788_v44 = vadd.f32 %v1787_v53, %v1785_v23  ;;  %v677_v32 = vadd.f32 %v676_v42, %v3916_v63  ;;  %v1799_v38 = vmul.f32 %v1798_v36, %v4012_v51  ;;  %v1805_v11 = vmul.f32 %v1804_v41, %v1792_v40  ;;  %v4150_v41 = vld [vmem:[#allocation2 + $0x12] sm:$0xff] }
  0x5f   :  { %s4094_s8 = sld [smem:[#allocation4 + $0x185]]  ;;  %v1783_v48 = vadd.f32 %v1782_v46, %v1780_v45  ;;  %v1797_v37 = vadd.f32 %v1796_v31, %v1767_v59  ;;  %v1807_v28 = vstv %s4055_s26  ;;  %v682_v25 = vmul.f32 %v681_v10, %v4003_v47  ;;  %v4118_v47 = vld [vmem:[%s6986_s0 + $0xf1] sm:$0xff] }
  0x60   :  { %v1813_v56 = vstv %s4070_s24  ;;  %s4099_s22 = sld [smem:[#allocation4 + $0x1e]]  ;;  %v680_v35 = vadd.f32 %v679_v29, %v677_v32  ;;  %v1806_v53 = vadd.f32 %v1805_v11, %v1775_v20  ;;  %v1808_v63 = vmul.f32 %v1807_v28, %v4012_v51 }
  0x61   :  { %s2896_s1 = sld [smem:[#allocation4 + $0x1f]]  ;;  %v4103_v58 = vadd.f32 %v1799_v38, %v1797_v37  ;;  %v1814_v50 = vmul.f32 %v1813_v56, %v1792_v40  ;;  %v1816_v55 = vstv %s4075_s15  ;;  %v1791_v46 = vadd.f32 %v1790_v34, %v1788_v44  ;;  %v4127_v34 = vld [vmem:[%s6986_s0 + $0xf2] sm:$0xff] }
  0x62   :  { %s4106_s2 = sld [smem:[#allocation4 + $0x20]]  ;;  %v4108_v23 = vadd.f32 %v682_v25, %v680_v35  ;;  %v4110_v15 = vadd.f32 %v1808_v63, %v1806_v53  ;;  %v1817_v45 = vmul.f32 %v1816_v55, %v4012_v51  ;;  %v1526_v30 = vadd.f32 %v3994_v52, %v4049_v13 }
  0x63   :  { %s4113_s23 = sld [smem:[#allocation4 + $0x4e]]  ;;  %v1815_v57 = vadd.f32 %v1814_v50, %v1783_v48  ;;  %v1822_v62 = vstv %s4086_s19  ;;  %v1527_v29 = vmul.f32 %v4118_v47, %v3857_v14  ;;  %v1801_v14 = vstv %s4040_s21 }
  0x64   :  { %v1825_v59 = vstv %s4089_s20  ;;  %s4122_s4 = sld [smem:[#allocation4 + $0x4f]]  ;;  %v1823_v49 = vmul.f32 %v1822_v62, %v1792_v40  ;;  %v1802_v25 = vmul.f32 %v1801_v14, %v4150_v41  ;;  %v1819_v14 = vstv %s4079_s10 }
  0x65   :  { %v1826_v54 = vmul.f32 %v1825_v59, %v4012_v51  ;;  %s4132_s11 = sld [smem:[#allocation4 + $0x50]]  ;;  %v4134_v20 = vadd.f32 %v1817_v45, %v1815_v57  ;;  %v1529_v51 = vmul.f32 %v4127_v34, %v3867_v22  ;;  %v1528_v36 = vadd.f32 %v1527_v29, %v1526_v30  ;;  %v4181_v57 = vld [vmem:[#allocation2 + $0x30] sm:$0xff] }
  0x66   :  { %s4136_s12 = sld [smem:[#allocation4 + $0x7e]]  ;;  %v687_v42 = vstv %s4099_s22  ;;  %v1824_v10 = vadd.f32 %v1823_v49, %v1791_v46  ;;  %v1810_v49 = vstv %s4061_s16  ;;  %v1803_v29 = vadd.f32 %v1802_v25, %v4103_v58 }
  0x67   :  { %s4141_s7 = sld [smem:[#allocation4 + $0x7f]]  ;;  %v688_v52 = vmul.f32 %v687_v42, %v4020_v16  ;;  %v690_v13 = vstv %s2896_s1  ;;  %v1530_v48 = vadd.f32 %v1529_v51, %v1528_v36  ;;  %v1831_v51 = vld [vmem:[#allocation2 + $0x20] sm:$0xff]  ;;  %v1811_v58 = vmul.f32 %v1810_v49, %v4150_v41 }
  0x68   :  { %s4146_s13 = sld [smem:[#allocation4 + $0x80]]  ;;  %v691_v40 = vmul.f32 %v690_v13, %v3803_v43  ;;  %v693_v31 = vstv %s4106_s2  ;;  %v4153_v44 = vadd.f32 %v1826_v54, %v1824_v10 }
  0x69   :  { %s4155_s25 = sld [smem:[#allocation4 + $0xae]]  ;;  %v689_v32 = vadd.f32 %v688_v52, %v4053_v60  ;;  %v696_v38 = vstv %s4113_s23  ;;  %v694_v28 = vmul.f32 %v693_v31, %v4022_v19  ;;  %v1549_v63 = vadd.f32 %v1530_v48, %v3919_v0 }
  0x6a   :  { %s4159_s18 = sld [smem:[#allocation4 + $0xaf]]  ;;  %v697_v22 = vmul.f32 %v696_v38, %v4020_v16  ;;  %v699_v11 = vstv %s4122_s4 }
  0x6b   :  { %s4163_s9 = sld [smem:[#allocation4 + $0xb0]]  ;;  %v692_v37 = vadd.f32 %v691_v40, %v689_v32  ;;  %v700_v56 = vmul.f32 %v699_v11, %v3803_v43  ;;  %v702_v35 = vstv %s4132_s11  ;;  %v4189_v0 = vmax.f32 %v1549_v63, 0.0 }
  0x6c   :  { %v698_v60 = vadd.f32 %v697_v22, %v4067_v26  ;;  %v705_v53 = vstv %s4136_s12  ;;  %s4171_s30 = sld [smem:[#allocation4 + $0xf6]]  ;;  %v703_v55 = vmul.f32 %v702_v35, %v4022_v19  ;;  %v4183_v26 = vld [vmem:[#allocation2 + $0x32] sm:$0xff] }
  0x6d   :  { %v4174_v50 = vadd.f32 %v694_v28, %v692_v37  ;;  %v706_v46 = vmul.f32 %v705_v53, %v4020_v16  ;;  %v708_v45 = vstv %s4141_s7  ;;  %s4179_s5 = sld [smem:[#allocation4 + $0xf7]]  ;;  %1551 = vst [vmem:[#allocation2 + $0x31] sm:$0xff] %v4189_v0 }
  0x6e   :  { %v701_v62 = vadd.f32 %v700_v56, %v698_v60  ;;  %v709_v59 = vmul.f32 %v708_v45, %v3803_v43  ;;  %v711_v30 = vstv %s4146_s13  ;;  %s4187_s14 = sld [smem:[#allocation4 + $0xf8]]  ;;  %v1828_v56 = vstv %s4094_s8 }
  0x6f   :  { %v707_v54 = vadd.f32 %v706_v46, %v4082_v61  ;;  %v714_v42 = vstv %s4155_s25  ;;  %s4194_s21 = sld [smem:[#allocation4 + $0x126]]  ;;  %v712_v61 = vmul.f32 %v711_v30, %v4022_v19  ;;  %v1829_v46 = vmul.f32 %v1828_v56, %v4150_v41 }
  0x70   :  { %v4197_v10 = vadd.f32 %v703_v55, %v701_v62  ;;  %v715_v52 = vmul.f32 %v714_v42, %v4020_v16  ;;  %v717_v13 = vstv %s4159_s18  ;;  %s4201_s17 = sld [smem:[#allocation4 + $0x127]] }
  0x71   :  { %v710_v40 = vadd.f32 %v709_v59, %v707_v54  ;;  %v718_v31 = vmul.f32 %v717_v13, %v3803_v43  ;;  %v720_v36 = vstv %s4163_s9  ;;  %s4207_s26 = sld [smem:[#allocation4 + $0x128]]  ;;  %v1812_v43 = vadd.f32 %v1811_v58, %v4110_v15  ;;  %v4236_v54 = vld [vmem:[#allocation2 + $0x22] sm:$0xff] }
  0x72   :  { %v716_v16 = vadd.f32 %v715_v52, %v4108_v23  ;;  %s3239_s16 = sld [smem:[#allocation4 + $0x156]]  ;;  %v1834_v32 = vstv %s4171_s30  ;;  %v721_v37 = vmul.f32 %v720_v36, %v4022_v19  ;;  %v1820_v23 = vmul.f32 %v1819_v14, %v4150_v41 }
  0x73   :  { %v4213_v38 = vadd.f32 %v712_v61, %v710_v40  ;;  %s4215_s24 = sld [smem:[#allocation4 + $0x157]]  ;;  %v1835_v22 = vmul.f32 %v1834_v32, %v1831_v51  ;;  %v1837_v11 = vstv %s4179_s5  ;;  %v1830_v49 = vadd.f32 %v1829_v46, %v4153_v44 }
  0x74   :  { %v719_v48 = vadd.f32 %v718_v31, %v716_v16  ;;  %s4220_s15 = sld [smem:[#allocation4 + $0x158]]  ;;  %v1838_v28 = vmul.f32 %v1837_v11, %v4032_v39  ;;  %v1821_v63 = vadd.f32 %v1820_v23, %v4134_v20  ;;  %v1840_v42 = vstv %s4187_s14 }
  0x75   :  { %s3287_s10 = sld [smem:[#allocation4 + $0x186]]  ;;  %v1836_v35 = vadd.f32 %v1835_v22, %v1803_v29  ;;  %v1843_v25 = vstv %s4194_s21  ;;  %v1841_v31 = vmul.f32 %v1840_v42, %v4236_v54 }
  0x76   :  { %v4226_v60 = vadd.f32 %v721_v37, %v719_v48  ;;  %s3288_s19 = sld [smem:[#allocation4 + $0x187]]  ;;  %v1844_v53 = vmul.f32 %v1843_v25, %v1831_v51  ;;  %v1846_v15 = vstv %s4201_s17 }
  0x77   :  { %s4230_s20 = sld [smem:[#allocation4 + $0x188]]  ;;  %v1839_v19 = vadd.f32 %v1838_v28, %v1836_v35  ;;  %v1847_v55 = vmul.f32 %v1846_v15, %v4032_v39  ;;  %v1849_v52 = vstv %s4207_s26 }
  0x78   :  { %v1845_v45 = vadd.f32 %v1844_v53, %v1812_v43  ;;  %v1852_v62 = vstv %s3239_s16  ;;  %s2847_s8 = sld [smem:[#allocation4 + $0x6]]  ;;  %v4248_v58 = vmul.f32 %v1849_v52, %v4236_v54 }
  0x79   :  { %v1853_v59 = vmul.f32 %v1852_v62, %v1831_v51  ;;  %v1855_v30 = vstv %s4215_s24  ;;  %s2848_s22 = sld [smem:[#allocation4 + $0x7]]  ;;  %v4253_v22 = vadd.f32 %v1841_v31, %v1839_v19 }
  0x7a   :  { %v4239_v20 = vadd.f32 %v1847_v55, %v1845_v45  ;;  %v1856_v29 = vmul.f32 %v1855_v30, %v4032_v39  ;;  %s2849_s1 = sld [smem:[#allocation4 + $0x8]]  ;;  %v1858_v14 = vstv %s4220_s15 }
  0x7b   :  { %v1854_v13 = vadd.f32 %v1853_v59, %v1821_v63  ;;  %v1861_v41 = vstv %s3287_s10  ;;  %s2850_s2 = sld [smem:[#allocation4 + $0x9]] }
  0x7c   :  { %v1862_v40 = vmul.f32 %v1861_v41, %v1831_v51  ;;  %v1864_v61 = vstv %s3288_s19  ;;  %s2851_s23 = sld [smem:[#allocation4 + $0xa]] }
  0x7d   :  { %v4244_v36 = vadd.f32 %v1856_v29, %v1854_v13  ;;  %v1865_v44 = vmul.f32 %v1864_v61, %v4032_v39  ;;  %s2852_s29 = sld [smem:[#allocation4 + $0xb]] }
  0x7e   :  { %v1863_v16 = vadd.f32 %v1862_v40, %v1830_v49  ;;  %s2865_s28 = sld [smem:[#allocation7 + $0x1]]  ;;  %v4251_v32 = vstv %s2847_s8 }
  0x7f   :  { %v128_v51 = vmul.f32 %v4251_v32, %v3624_v1  ;;  %v4257_v11 = vstv %s2848_s22  ;;  %s4259_s4 = sld [smem:[#allocation4 + $0x21]]  ;;  %v219_v39 = vmul.f32 %v3629_v2, %v4251_v32  ;;  %v4274_v1 = vmul.f32 %v1858_v14, %v4236_v54 }
  0x80   :  { %v4263_v43 = vadd.f32 %v1865_v44, %v1863_v16  ;;  %v130_v48 = vmul.f32 %v4257_v11, %v3636_v3  ;;  %v4267_v37 = vstv %s2849_s1  ;;  %s4269_s27 = sld [smem:[#allocation4 + $0x22]]  ;;  %v220_v28 = vmul.f32 %v3641_v4, %v4257_v11 }
  0x81   :  { %v133_v23 = vmul.f32 %v4267_v37, %v3653_v6  ;;  %v4278_v56 = vstv %s2850_s2  ;;  %s4280_s6 = sld [smem:[#allocation4 + $0x23]]  ;;  %v222_v2 = vmul.f32 %v3659_v8, %v4267_v37  ;;  %v287_v4 = vmul.f32 %v3646_v5, %v4251_v32 }
  0x82   :  { %v131_v3 = vadd.f32 %v130_v48, %v128_v51  ;;  %v165_v35 = vmul.f32 %v3670_v12, %v4278_v56  ;;  %v4286_v25 = vstv %s2851_s23  ;;  %s4288_s11 = sld [smem:[#allocation4 + $0x51]]  ;;  %v221_v8 = vadd.f32 %v220_v28, %v219_v39 }
  0x83   :  { %v168_v6 = vmul.f32 %v3694_v21, %v4286_v25  ;;  %v4294_v53 = vstv %s2852_s29  ;;  %s4296_s12 = sld [smem:[#allocation4 + $0x52]]  ;;  %v244_v15 = vmul.f32 %v3680_v17, %v4278_v56  ;;  %v246_v5 = vmul.f32 %v3700_v24, %v4286_v25 }
  0x84   :  { %v134_v12 = vadd.f32 %v133_v23, %v131_v3  ;;  %v171_v63 = vmul.f32 %v3708_v27, %v4294_v53  ;;  %v4302_v19 = vstv %s2865_s28  ;;  %s4304_s7 = sld [smem:[#allocation4 + $0x53]]  ;;  %v223_v55 = vadd.f32 %v222_v2, %v221_v8 }
  0x85   :  { %s4308_s13 = sld [smem:[#allocation4 + $0x81]]  ;;  %v726_v21 = vstv %s4259_s4  ;;  %v248_v46 = vmul.f32 %v3721_v33, %v4294_v53  ;;  %v288_v17 = vmul.f32 %v3664_v9, %v4257_v11  ;;  %v290_v24 = vmul.f32 %v3685_v18, %v4267_v37 }
  0x86   :  { %v166_v27 = vadd.f32 %v165_v35, %v134_v12  ;;  %s4315_s25 = sld [smem:[#allocation4 + $0x82]]  ;;  %v727_v45 = vmul.f32 %v726_v21, %v4181_v57  ;;  %v729_v62 = vstv %s4269_s27  ;;  %v245_v33 = vadd.f32 %v244_v15, %v223_v55  ;;  %v1870_v55 = vld [vmem:[#allocation2 + $0x30] sm:$0xff] }
  0x87   :  { %s4321_s18 = sld [smem:[#allocation4 + $0x83]]  ;;  %v730_v59 = vmul.f32 %v729_v62, %v3851_v7  ;;  %v732_v30 = vstv %s4280_s6  ;;  %v289_v49 = vadd.f32 %v288_v17, %v287_v4  ;;  %v1851_v62 = vadd.f32 %v4248_v58, %v4239_v20 }
  0x88   :  { %v169_v42 = vadd.f32 %v168_v6, %v166_v27  ;;  %s4325_s9 = sld [smem:[#allocation4 + $0xb1]]  ;;  %v728_v9 = vadd.f32 %v727_v45, %v4174_v50  ;;  %v733_v29 = vmul.f32 %v732_v30, %v4183_v26  ;;  %v735_v52 = vstv %s4288_s11  ;;  %v3439_v45 = vld [vmem:[%s6986_s0 + $0x50] sm:$0xff] }
  0x89   :  { %s4330_s30 = sld [smem:[#allocation4 + $0xb2]]  ;;  %v736_v18 = vmul.f32 %v735_v52, %v4181_v57  ;;  %v738_v13 = vstv %s4296_s12  ;;  %v247_v41 = vadd.f32 %v246_v5, %v245_v33  ;;  %v291_v40 = vadd.f32 %v290_v24, %v289_v49 }
  0x8a   :  { %v172_v61 = vadd.f32 %v171_v63, %v169_v42  ;;  %s4334_s5 = sld [smem:[#allocation4 + $0xb3]]  ;;  %v731_v31 = vadd.f32 %v730_v59, %v728_v9  ;;  %v739_v44 = vmul.f32 %v738_v13, %v3851_v7  ;;  %v741_v14 = vstv %s4304_s7 }
  0x8b   :  { %v737_v50 = vadd.f32 %v736_v18, %v4197_v10  ;;  %v742_v16 = vmul.f32 %v741_v14, %v4183_v26  ;;  %v744_v51 = vstv %s4308_s13  ;;  %s4341_s14 = sld [smem:[#allocation4 + $0xf9]]  ;;  %v249_v39 = vadd.f32 %v248_v46, %v247_v41 }
  0x8c   :  { %v196_v48 = vadd.f32 %v4302_v19, %v172_v61  ;;  %v4344_v28 = vadd.f32 %v733_v29, %v731_v31  ;;  %v745_v23 = vmul.f32 %v744_v51, %v4181_v57  ;;  %v747_v2 = vstv %s4315_s25  ;;  %s4348_s21 = sld [smem:[#allocation4 + $0xfa]]  ;;  %v3441_v29 = vld [vmem:[%s6986_s0 + $0x52] sm:$0xff] }
  0x8d   :  { %v740_v3 = vadd.f32 %v739_v44, %v737_v50  ;;  %v748_v10 = vmul.f32 %v747_v2, %v3851_v7  ;;  %v750_v35 = vstv %s4321_s18  ;;  %s4352_s17 = sld [smem:[#allocation4 + $0xfb]]  ;;  %v266_v4 = vadd.f32 %v249_v39, %v4302_v19  ;;  %v3442_v44 = vld [vmem:[%s6986_s0 + $0x60] sm:$0xff] }
  0x8e   :  { %v4355_v6 = vmax.f32 %v196_v48, 0.0  ;;  %v746_v8 = vadd.f32 %v745_v23, %v4213_v38  ;;  %v751_v15 = vmul.f32 %v750_v35, %v4183_v26  ;;  %v753_v12 = vstv %s4325_s9  ;;  %s4360_s26 = sld [smem:[#allocation4 + $0x129]] }
  0x8f   :  { %v4362_v63 = vadd.f32 %v742_v16, %v740_v3  ;;  %v754_v5 = vmul.f32 %v753_v12, %v4181_v57  ;;  %v756_v21 = vstv %s4330_s30  ;;  %s4366_s16 = sld [smem:[#allocation4 + $0x12a]]  ;;  %v4368_v46 = vmax.f32 %v266_v4, 0.0 }
  0x90   :  { %199 = vst [vmem:[#allocation2 + $0x41] sm:$0xff] %v4355_v6  ;;  %v749_v17 = vadd.f32 %v748_v10, %v746_v8  ;;  %v757_v38 = vmul.f32 %v756_v21, %v3851_v7  ;;  %v759_v27 = vstv %s4334_s5  ;;  %s4373_s24 = sld [smem:[#allocation4 + $0x12b]]  ;;  %v312_v57 = vmul.f32 %v3439_v45, %v4278_v56  ;;  %v3440_v7 = vld [vmem:[%s6986_s0 + $0x51] sm:$0xff] }
  0x91   :  { %v755_v24 = vadd.f32 %v754_v5, %v4226_v60  ;;  %s4382_s19 = sld [smem:[#allocation4 + $0x159]]  ;;  %v1873_v59 = vstv %s4341_s14  ;;  %269 = vst [vmem:[#allocation2 + $0x51] sm:$0xff] %v4368_v46  ;;  %v314_v30 = vmul.f32 %v3440_v7, %v4286_v25  ;;  %v760_v42 = vmul.f32 %v759_v27, %v4183_v26 }
  0x92   :  { %v4390_v33 = vadd.f32 %v751_v15, %v749_v17  ;;  %s4392_s1 = sld [smem:[#allocation4 + $0x15a]]  ;;  %v1874_v20 = vmul.f32 %v1873_v59, %v1870_v55  ;;  %v1876_v58 = vstv %s4348_s21  ;;  %v313_v60 = vadd.f32 %v312_v57, %v291_v40  ;;  %v3446_v59 = vld [vmem:[%s6986_s0 + $0x71] sm:$0xff] }
  0x93   :  { %v758_v49 = vadd.f32 %v757_v38, %v755_v24  ;;  %s4396_s2 = sld [smem:[#allocation4 + $0x15b]]  ;;  %v1877_v9 = vmul.f32 %v1876_v58, %v4189_v0  ;;  %v316_v52 = vmul.f32 %v3441_v29, %v4294_v53  ;;  %v1867_v18 = vstv %s4230_s20 }
  0x94   :  { %s4404_s28 = sld [smem:[#allocation4 + $0x189]]  ;;  %v1875_v13 = vadd.f32 %v1874_v20, %v4253_v22  ;;  %v1882_v41 = vstv %s4360_s26  ;;  %v315_v40 = vadd.f32 %v314_v30, %v313_v60  ;;  %v355_v14 = vmul.f32 %v3442_v44, %v4251_v32  ;;  %v3443_v32 = vld [vmem:[%s6986_s0 + $0x61] sm:$0xff] }
  0x95   :  { %v4408_v61 = vadd.f32 %v760_v42, %v758_v49  ;;  %s4410_s4 = sld [smem:[#allocation4 + $0x18a]]  ;;  %v1883_v26 = vmul.f32 %v1882_v41, %v1870_v55  ;;  %v1885_v31 = vstv %s4366_s16  ;;  %v1860_v50 = vadd.f32 %v4274_v1, %v4244_v36  ;;  %v3447_v42 = vld [vmem:[%s6986_s0 + $0x72] sm:$0xff] }
  0x96   :  { %s4419_s20 = sld [smem:[#allocation4 + $0x18b]]  ;;  %v4421_v22 = vadd.f32 %v1877_v9, %v1875_v13  ;;  %v1886_v16 = vmul.f32 %v1885_v31, %v4189_v0  ;;  %v317_v51 = vadd.f32 %v316_v52, %v315_v40  ;;  %v1868_v39 = vmul.f32 %v1867_v18, %v4236_v54 }
  0x97   :  { %v1884_v48 = vadd.f32 %v1883_v26, %v1851_v62  ;;  %v1891_v23 = vstv %s4382_s19  ;;  %s4426_s11 = sld [smem:[#allocation4 + $0x24]]  ;;  %v356_v36 = vmul.f32 %v3443_v32, %v4257_v11  ;;  %v382_v7 = vmul.f32 %v3446_v59, %v4286_v25  ;;  %v764_v9 = vld [vmem:[#allocation2 + $0x42] sm:$0xff] }
  0x98   :  { %v1892_v1 = vmul.f32 %v1891_v23, %v1870_v55  ;;  %v1894_v2 = vstv %s4392_s1  ;;  %s4433_s13 = sld [smem:[#allocation4 + $0x25]]  ;;  %v334_v3 = vadd.f32 %v317_v51, %v4302_v19  ;;  %v1869_v54 = vadd.f32 %v1868_v39, %v4263_v43  ;;  %v3444_v43 = vld [vmem:[%s6986_s0 + $0x62] sm:$0xff]  ;;  %v4507_v23 = vld [vmem:[#allocation2 + $0x32] sm:$0xff] }
  0x99   :  { %v4437_v10 = vadd.f32 %v1886_v16, %v1884_v48  ;;  %v1895_v35 = vmul.f32 %v1894_v2, %v4189_v0  ;;  %s4440_s25 = sld [smem:[#allocation4 + $0x26]]  ;;  %v357_v4 = vadd.f32 %v356_v36, %v355_v14  ;;  %v358_v21 = vmul.f32 %v3444_v43, %v4267_v37  ;;  %v762_v37 = vld [vmem:[#allocation2 + $0x40] sm:$0xff] }
  0x9a   :  { %v1893_v8 = vadd.f32 %v1892_v1, %v1860_v50  ;;  %v1900_v15 = vstv %s4404_s28  ;;  %s4443_s18 = sld [smem:[#allocation4 + $0x54]]  ;;  %v4445_v11 = vmax.f32 %v334_v3, 0.0  ;;  %v384_v25 = vmul.f32 %v3447_v42, %v4294_v53 }
  0x9b   :  { %v1901_v12 = vmul.f32 %v1900_v15, %v1870_v55  ;;  %v1903_v5 = vstv %s4410_s4  ;;  %s4448_s9 = sld [smem:[#allocation4 + $0x55]]  ;;  %v3445_v55 = vld [vmem:[%s6986_s0 + $0x70] sm:$0xff]  ;;  %v359_v62 = vadd.f32 %v358_v21, %v357_v4  ;;  %v1879_v32 = vstv %s4352_s17 }
  0x9c   :  { %v4454_v17 = vadd.f32 %v1895_v35, %v1893_v8  ;;  %v1904_v38 = vmul.f32 %v1903_v5, %v4189_v0  ;;  %s4457_s14 = sld [smem:[#allocation4 + $0x56]]  ;;  %337 = vst [vmem:[#allocation2 + $0x61] sm:$0xff] %v4445_v11  ;;  %v380_v27 = vmul.f32 %v3445_v55, %v4278_v56  ;;  %v1888_v59 = vstv %s4373_s24 }
  0x9d   :  { %v1902_v45 = vadd.f32 %v1901_v12, %v1869_v54  ;;  %s4464_s16 = sld [smem:[#allocation4 + $0x84]]  ;;  %v765_v57 = vstv %s4426_s11 }
  0x9e   :  { %s4467_s15 = sld [smem:[#allocation4 + $0x85]]  ;;  %v766_v0 = vmul.f32 %v765_v57, %v762_v37  ;;  %v768_v24 = vstv %s4433_s13  ;;  %v381_v58 = vadd.f32 %v380_v27, %v359_v62 }
  0x9f   :  { %v4474_v30 = vadd.f32 %v1904_v38, %v1902_v45  ;;  %s4476_s8 = sld [smem:[#allocation4 + $0x86]]  ;;  %v769_v56 = vmul.f32 %v768_v24, %v4355_v6  ;;  %v771_v20 = vstv %s4440_s25 }
  0xa0   :  { %s4480_s22 = sld [smem:[#allocation4 + $0xb4]]  ;;  %v767_v60 = vadd.f32 %v766_v0, %v4344_v28  ;;  %v774_v49 = vstv %s4443_s18  ;;  %v383_v18 = vadd.f32 %v382_v7, %v381_v58  ;;  %v772_v41 = vmul.f32 %v771_v20, %v764_v9  ;;  %v3451_v0 = vld [vmem:[%s6986_s0 + $0xa1] sm:$0xff] }
  0xa1   :  { %s4488_s29 = sld [smem:[#allocation4 + $0xb5]]  ;;  %v775_v29 = vmul.f32 %v774_v49, %v762_v37  ;;  %v777_v52 = vstv %s4448_s9  ;;  %v3452_v7 = vld [vmem:[%s6986_s0 + $0x82] sm:$0xff] }
  0xa2   :  { %s4491_s28 = sld [smem:[#allocation4 + $0xb6]]  ;;  %v770_v13 = vadd.f32 %v769_v56, %v767_v60  ;;  %v778_v28 = vmul.f32 %v777_v52, %v4355_v6  ;;  %v780_v40 = vstv %s4457_s14  ;;  %v385_v53 = vadd.f32 %v384_v25, %v383_v18  ;;  %v3453_v58 = vld [vmem:[%s6986_s0 + $0xa2] sm:$0xff]  ;;  %v3454_v25 = vld [vmem:[%s6986_s0 + $0x90] sm:$0xff] }
  0xa3   :  { %v776_v26 = vadd.f32 %v775_v29, %v4362_v63  ;;  %v783_v31 = vstv %s4464_s16  ;;  %s4497_s4 = sld [smem:[#allocation4 + $0xde]]  ;;  %v781_v14 = vmul.f32 %v780_v40, %v764_v9 }
  0xa4   :  { %v4499_v44 = vadd.f32 %v772_v41, %v770_v13  ;;  %v784_v50 = vmul.f32 %v783_v31, %v762_v37  ;;  %v786_v16 = vstv %s4467_s15  ;;  %s3092_s27 = sld [smem:[#allocation4 + $0xdf]]  ;;  %v402_v63 = vadd.f32 %v385_v53, %v4302_v19  ;;  %v3455_v13 = vld [vmem:[%s6986_s0 + $0xb0] sm:$0xff] }
  0xa5   :  { %v779_v51 = vadd.f32 %v778_v28, %v776_v26  ;;  %v787_v39 = vmul.f32 %v786_v16, %v4355_v6  ;;  %v789_v48 = vstv %s4476_s8  ;;  %s4504_s6 = sld [smem:[#allocation4 + $0xe0]]  ;;  %v3456_v28 = vld [vmem:[%s6986_s0 + $0xc0] sm:$0xff]  ;;  %v1889_v26 = vmul.f32 %v1888_v59, %v4507_v23  ;;  %v3457_v53 = vld [vmem:[%s6986_s0 + $0x91] sm:$0xff] }
  0xa6   :  { %v785_v36 = vadd.f32 %v784_v50, %v4390_v33  ;;  %v792_v1 = vstv %s4480_s22  ;;  %s4512_s11 = sld [smem:[#allocation4 + $0xe1]]  ;;  %v4519_v35 = vmax.f32 %v402_v63, 0.0  ;;  %v790_v8 = vmul.f32 %v789_v48, %v764_v9  ;;  %v3459_v48 = vld [vmem:[%s6986_s0 + $0xc1] sm:$0xff] }
  0xa7   :  { %v4514_v2 = vadd.f32 %v781_v14, %v779_v51  ;;  %v793_v3 = vmul.f32 %v792_v1, %v762_v37  ;;  %v795_v54 = vstv %s4488_s29  ;;  %s4517_s12 = sld [smem:[#allocation4 + $0xe2]]  ;;  %v1880_v33 = vmul.f32 %v1879_v32, %v4507_v23  ;;  %v3450_v37 = vld [vmem:[%s6986_s0 + $0x81] sm:$0xff]  ;;  %v3458_v51 = vld [vmem:[%s6986_s0 + $0xb1] sm:$0xff] }
  0xa8   :  { %v788_v4 = vadd.f32 %v787_v39, %v785_v36  ;;  %v796_v19 = vmul.f32 %v795_v54, %v4355_v6  ;;  %v798_v15 = vstv %s4491_s28  ;;  %s4523_s17 = sld [smem:[#allocation4 + $0xe3]]  ;;  %405 = vst [vmem:[#allocation2 + $0x71] sm:$0xff] %v4519_v35  ;;  %v3448_v6 = vld [vmem:[%s6986_s0 + $0x80] sm:$0xff]  ;;  %v1897_v32 = vstv %s4396_s2  ;;  %v3460_v36 = vld [vmem:[%s6986_s0 + $0x92] sm:$0xff] }
  0xa9   :  { %v794_v12 = vadd.f32 %v793_v3, %v4408_v61  ;;  %v799_v5 = vmul.f32 %v798_v15, %v764_v9  ;;  %s4527_s7 = sld [smem:[#allocation7 + $0x9]]  ;;  %v4530_v43 = vstv %s4497_s4  ;;  %v3449_v61 = vld [vmem:[%s6986_s0 + $0xa0] sm:$0xff]  ;;  %v4606_v50 = vadd.f32 %v1880_v33, %v4421_v22  ;;  %v3463_v33 = vld [vmem:[%s6986_s0 + $0xd0] sm:$0xff] }
  0xaa   :  { %v4533_v21 = vadd.f32 %v790_v8, %v788_v4  ;;  %v1290_v38 = vmul.f32 %v3448_v6, %v4530_v43  ;;  %v4539_v55 = vstv %s3092_s27  ;;  %s4541_s18 = sld [smem:[#allocation4 + $0xfc]]  ;;  %v1378_v27 = vmul.f32 %v3449_v61, %v4530_v43  ;;  %v3461_v3 = vld [vmem:[%s6986_s0 + $0xc2] sm:$0xff]  ;;  %v3462_v8 = vld [vmem:[%s6986_s0 + $0xb2] sm:$0xff] }
  0xab   :  { %v797_v45 = vadd.f32 %v796_v19, %v794_v12  ;;  %v1292_v57 = vmul.f32 %v3450_v37, %v4539_v55  ;;  %v4552_v62 = vstv %s4504_s6  ;;  %s4554_s21 = sld [smem:[#allocation4 + $0xfd]]  ;;  %v1379_v24 = vmul.f32 %v3451_v0, %v4539_v55  ;;  %v3464_v61 = vld [vmem:[%s6986_s0 + $0xe0] sm:$0xff] }
  0xac   :  { %v1295_v56 = vmul.f32 %v3452_v7, %v4552_v62  ;;  %v4566_v20 = vstv %s4512_s11  ;;  %s4568_s19 = sld [smem:[#allocation4 + $0xfe]]  ;;  %v1381_v60 = vmul.f32 %v3453_v58, %v4552_v62  ;;  %v1442_v40 = vmul.f32 %v3456_v28, %v4530_v43 }
  0xad   :  { %v4574_v49 = vadd.f32 %v799_v5, %v797_v45  ;;  %v1293_v42 = vadd.f32 %v1292_v57, %v1290_v38  ;;  %v1327_v9 = vmul.f32 %v3454_v25, %v4566_v20  ;;  %v4581_v29 = vstv %s4517_s12  ;;  %s4583_s23 = sld [smem:[#allocation4 + $0x12c]]  ;;  %v3465_v57 = vld [vmem:[%s6986_s0 + $0xd1] sm:$0xff] }
  0xae   :  { %v4586_v52 = vstv %s4523_s17  ;;  %s4588_s29 = sld [smem:[#allocation4 + $0x12d]]  ;;  %v1380_v18 = vadd.f32 %v1379_v24, %v1378_v27  ;;  %v1403_v41 = vmul.f32 %v3455_v13, %v4566_v20  ;;  %v1330_v14 = vmul.f32 %v3457_v53, %v4581_v29  ;;  %v3466_v24 = vld [vmem:[%s6986_s0 + $0xe1] sm:$0xff] }
  0xaf   :  { %v1296_v31 = vadd.f32 %v1295_v56, %v1293_v42  ;;  %s4603_s17 = sld [smem:[#allocation4 + $0x12e]]  ;;  %v1405_v39 = vmul.f32 %v3458_v51, %v4581_v29  ;;  %v1443_v63 = vmul.f32 %v3459_v48, %v4539_v55  ;;  %v1333_v1 = vmul.f32 %v3460_v36, %v4586_v52  ;;  %v4700_v51 = vld [vmem:[#allocation2 + $0x52] sm:$0xff] }
  0xb0   :  { %s4608_s13 = sld [smem:[#allocation4 + $0x15c]]  ;;  %v1382_v16 = vadd.f32 %v1381_v60, %v1380_v18  ;;  %v1445_v54 = vmul.f32 %v3461_v3, %v4552_v62  ;;  %v1407_v19 = vmul.f32 %v3462_v8, %v4586_v52  ;;  %v1467_v12 = vmul.f32 %v3463_v33, %v4566_v20  ;;  %v3468_v60 = vld [vmem:[%s6986_s0 + $0xe2] sm:$0xff]  ;;  %v3469_v18 = vld [vmem:[%s6986_s0 + $0xf0] sm:$0xff] }
  0xb1   :  { %v1328_v22 = vadd.f32 %v1327_v9, %v1296_v31  ;;  %s4623_s16 = sld [smem:[#allocation4 + $0x15d]]  ;;  %v1444_v15 = vadd.f32 %v1443_v63, %v1442_v40  ;;  %v1906_v5 = vstv %s4419_s20  ;;  %v4641_v38 = vstv %s4527_s7 }
  0xb2   :  { %s4629_s8 = sld [smem:[#allocation4 + $0x15e]]  ;;  %v1404_v4 = vadd.f32 %v1403_v41, %v1382_v16  ;;  %v1506_v27 = vmul.f32 %v3464_v61, %v4530_v43  ;;  %v1469_v0 = vmul.f32 %v3465_v57, %v4581_v29  ;;  %v1507_v59 = vmul.f32 %v3466_v24, %v4539_v55  ;;  %v3467_v43 = vld [vmem:[%s6986_s0 + $0xd2] sm:$0xff] }
  0xb3   :  { %v1331_v6 = vadd.f32 %v1330_v14, %v1328_v22  ;;  %s4643_s28 = sld [smem:[#allocation4 + $0x18c]]  ;;  %v1446_v37 = vadd.f32 %v1445_v54, %v1444_v15  ;;  %v1898_v7 = vmul.f32 %v1897_v32, %v4507_v23  ;;  %v1471_v58 = vmul.f32 %v3467_v43, %v4586_v52  ;;  %v4698_v16 = vld [vmem:[#allocation2 + $0x50] sm:$0xff]  ;;  %v4728_v15 = vld [vmem:[#allocation2 + $0x62] sm:$0xff] }
  0xb4   :  { %s4649_s6 = sld [smem:[#allocation4 + $0x18d]]  ;;  %v1406_v45 = vadd.f32 %v1405_v39, %v1404_v4  ;;  %v1509_v42 = vmul.f32 %v3468_v60, %v4552_v62  ;;  %v1508_v9 = vadd.f32 %v1507_v59, %v1506_v27  ;;  %v1531_v13 = vmul.f32 %v3469_v18, %v4566_v20  ;;  %v4754_v60 = vld [vmem:[#allocation2 + $0x72] sm:$0xff] }
  0xb5   :  { %v1334_v56 = vadd.f32 %v1333_v1, %v1331_v6  ;;  %s4660_s25 = sld [smem:[#allocation4 + $0x18e]]  ;;  %v1468_v25 = vadd.f32 %v1467_v12, %v1446_v37  ;;  %v4677_v41 = vadd.f32 %v1889_v26, %v4437_v10  ;;  %v4680_v28 = vadd.f32 %v1898_v7, %v4454_v17 }
  0xb6   :  { %s4670_s26 = sld [smem:[#allocation4 + $0x27]]  ;;  %v1408_v55 = vadd.f32 %v1407_v19, %v1406_v45  ;;  %v1907_v62 = vmul.f32 %v1906_v5, %v4507_v23  ;;  %v1510_v14 = vadd.f32 %v1509_v42, %v1508_v9  ;;  %v1533_v10 = vmul.f32 %v4118_v47, %v4581_v29  ;;  %v4726_v19 = vld [vmem:[#allocation2 + $0x60] sm:$0xff] }
  0xb7   :  { %v1358_v40 = vadd.f32 %v4641_v38, %v1334_v56  ;;  %s4684_s2 = sld [smem:[#allocation4 + $0x28]]  ;;  %v1470_v53 = vadd.f32 %v1469_v0, %v1468_v25  ;;  %v1912_v20 = vstv %s4541_s18  ;;  %v1915_v26 = vstv %s4554_s21 }
  0xb8   :  { %s4686_s22 = sld [smem:[#allocation4 + $0x29]]  ;;  %v1424_v31 = vadd.f32 %v1408_v55, %v4641_v38  ;;  %v4692_v17 = vadd.f32 %v1907_v62, %v4474_v30  ;;  %v1532_v30 = vadd.f32 %v1531_v13, %v1510_v14  ;;  %v1535_v29 = vmul.f32 %v4127_v34, %v4586_v52 }
  0xb9   :  { %v1359_v23 = vmax.f32 %v1358_v40, 0.0  ;;  %s4696_s24 = sld [smem:[#allocation4 + $0x57]]  ;;  %v1472_v47 = vadd.f32 %v1471_v58, %v1470_v53  ;;  %v1918_v48 = vstv %s4568_s19  ;;  %v1921_v63 = vstv %s4583_s23 }
  0xba   :  { %s4702_s1 = sld [smem:[#allocation4 + $0x58]]  ;;  %v4704_v39 = vmax.f32 %v1424_v31, 0.0  ;;  %v1924_v32 = vstv %s4588_s29  ;;  %v1927_v22 = vstv %s4603_s17  ;;  %v1930_v36 = vstv %s4608_s13 }
  0xbb   :  { %1360 = vst [vmem:[#allocation2 + $0x41] sm:$0xff] %v1359_v23  ;;  %s4712_s18 = sld [smem:[#allocation4 + $0x59]]  ;;  %v1488_v3 = vadd.f32 %v1472_v47, %v4641_v38  ;;  %v1534_v54 = vadd.f32 %v1533_v10, %v1532_v30  ;;  %v1933_v34 = vstv %s4623_s16  ;;  %v1936_v52 = vstv %s4629_s8 }
  0xbc   :  { %s4715_s21 = sld [smem:[#allocation4 + $0x87]]  ;;  %v804_v1 = vstv %s4670_s26  ;;  %1426 = vst [vmem:[#allocation2 + $0x51] sm:$0xff] %v4704_v39  ;;  %v1939_v33 = vstv %s4643_s28  ;;  %v1916_v61 = vmul.f32 %v1915_v26, %v1359_v23  ;;  %v1942_v27 = vstv %s4649_s6 }
  0xbd   :  { %s4722_s19 = sld [smem:[#allocation4 + $0x88]]  ;;  %v805_v4 = vmul.f32 %v804_v1, %v4698_v16  ;;  %v807_v8 = vstv %s4684_s2  ;;  %v4734_v5 = vmax.f32 %v1488_v3, 0.0  ;;  %v1536_v6 = vadd.f32 %v1535_v29, %v1534_v54 }
  0xbe   :  { %s4731_s23 = sld [smem:[#allocation4 + $0x89]]  ;;  %v808_v12 = vmul.f32 %v807_v8, %v4368_v46  ;;  %v810_v57 = vstv %s4686_s22  ;;  %v1925_v7 = vmul.f32 %v1924_v32, %v1359_v23  ;;  %v1934_v25 = vmul.f32 %v1933_v34, %v1359_v23 }
  0xbf   :  { %s4737_s29 = sld [smem:[#allocation4 + $0xb7]]  ;;  %v806_v45 = vadd.f32 %v805_v4, %v4499_v44  ;;  %v813_v37 = vstv %s4696_s24  ;;  %1490 = vst [vmem:[#allocation2 + $0x61] sm:$0xff] %v4734_v5  ;;  %v1552_v59 = vadd.f32 %v1536_v6, %v4641_v38  ;;  %v4752_v44 = vld [vmem:[#allocation2 + $0x70] sm:$0xff]  ;;  %v1943_v9 = vmul.f32 %v1942_v27, %v1359_v23 }
  0xc0   :  { %s4741_s13 = sld [smem:[#allocation4 + $0xb8]]  ;;  %v814_v0 = vmul.f32 %v813_v37, %v4698_v16  ;;  %v816_v24 = vstv %s4702_s1  ;;  %v811_v40 = vmul.f32 %v810_v57, %v4700_v51  ;;  %v1945_v4 = vstv %s4660_s25 }
  0xc1   :  { %s4748_s16 = sld [smem:[#allocation4 + $0xb9]]  ;;  %v809_v56 = vadd.f32 %v808_v12, %v806_v45  ;;  %v817_v43 = vmul.f32 %v816_v24, %v4368_v46  ;;  %v819_v58 = vstv %s4712_s18  ;;  %v4761_v38 = vmax.f32 %v1552_v59, 0.0 }
  0xc2   :  { %v1909_v42 = vld [vmem:[#allocation2 + $0x40] sm:$0xff]  ;;  %v815_v18 = vadd.f32 %v814_v0, %v4514_v2  ;;  %s4759_s28 = sld [smem:[#allocation4 + $0xff]]  ;;  %v822_v31 = vstv %s4715_s21  ;;  %v820_v23 = vmul.f32 %v819_v58, %v4700_v51 }
  0xc3   :  { %v4756_v55 = vld [vmem:[#allocation2 + $0x42] sm:$0xff]  ;;  %v1913_v13 = vmul.f32 %v1912_v20, %v1909_v42  ;;  %v1922_v62 = vmul.f32 %v1921_v63, %v1909_v42  ;;  %s4765_s4 = sld [smem:[#allocation4 + $0x100]]  ;;  %v1931_v14 = vmul.f32 %v1930_v36, %v1909_v42  ;;  %v1940_v10 = vmul.f32 %v1939_v33, %v1909_v42  ;;  %1554 = vst [vmem:[#allocation2 + $0x71] sm:$0xff] %v4761_v38 }
  0xc4   :  { %v1919_v53 = vmul.f32 %v1918_v48, %v4756_v55  ;;  %s4769_s27 = sld [smem:[#allocation4 + $0x101]]  ;;  %v4774_v26 = vadd.f32 %v811_v40, %v809_v56  ;;  %v818_v47 = vadd.f32 %v817_v43, %v815_v18  ;;  %v823_v48 = vmul.f32 %v822_v31, %v4698_v16 }
  0xc5   :  { %v1914_v2 = vadd.f32 %v1913_v13, %v4606_v50  ;;  %v1923_v20 = vadd.f32 %v1922_v62, %v4677_v41  ;;  %s4776_s6 = sld [smem:[#allocation4 + $0x12f]]  ;;  %v1932_v30 = vadd.f32 %v1931_v14, %v4680_v28  ;;  %v1941_v29 = vadd.f32 %v1940_v10, %v4692_v17 }
  0xc6   :  { %v825_v63 = vstv %s4722_s19  ;;  %s4782_s11 = sld [smem:[#allocation4 + $0x130]]  ;;  %v4784_v32 = vadd.f32 %v820_v23, %v818_v47  ;;  %v824_v17 = vadd.f32 %v823_v48, %v4533_v21  ;;  %v828_v3 = vstv %s4731_s23 }
  0xc7   :  { %v1917_v50 = vadd.f32 %v1916_v61, %v1914_v2  ;;  %v1926_v41 = vadd.f32 %v1925_v7, %v1923_v20  ;;  %v826_v36 = vmul.f32 %v825_v63, %v4368_v46  ;;  %s4787_s12 = sld [smem:[#allocation4 + $0x131]]  ;;  %v1935_v1 = vadd.f32 %v1934_v25, %v1932_v30  ;;  %v1948_v61 = vld [vmem:[#allocation2 + $0x50] sm:$0xff] }
  0xc8   :  { %v1944_v28 = vadd.f32 %v1943_v9, %v1941_v29  ;;  %s4791_s20 = sld [smem:[#allocation4 + $0x15f]]  ;;  %v1928_v54 = vmul.f32 %v1927_v22, %v4756_v55  ;;  %v1937_v34 = vmul.f32 %v1936_v52, %v4756_v55  ;;  %v831_v8 = vstv %s4737_s29 }
  0xc9   :  { %s4801_s7 = sld [smem:[#allocation4 + $0x160]]  ;;  %v1920_v33 = vadd.f32 %v1919_v53, %v1917_v50  ;;  %v827_v12 = vadd.f32 %v826_v36, %v824_v17  ;;  %v829_v6 = vmul.f32 %v828_v3, %v4700_v51  ;;  %v832_v21 = vmul.f32 %v831_v8, %v4698_v16  ;;  %v4852_v17 = vld [vmem:[#allocation2 + $0x52] sm:$0xff] }
  0xca   :  { %s4805_s9 = sld [smem:[#allocation4 + $0x161]]  ;;  %v834_v27 = vstv %s4741_s13  ;;  %v837_v45 = vstv %s4748_s16  ;;  %v1951_v22 = vstv %s4759_s28  ;;  %v1954_v52 = vstv %s4765_s4 }
  0xcb   :  { %s4809_s17 = sld [smem:[#allocation4 + $0x18f]]  ;;  %v1929_v37 = vadd.f32 %v1928_v54, %v1926_v41  ;;  %v4813_v57 = vadd.f32 %v829_v6, %v827_v12  ;;  %v833_v0 = vadd.f32 %v832_v21, %v4574_v49  ;;  %v835_v24 = vmul.f32 %v834_v27, %v4368_v46 }
  0xcc   :  { %s4817_s8 = sld [smem:[#allocation4 + $0x190]]  ;;  %v1938_v16 = vadd.f32 %v1937_v34, %v1935_v1  ;;  %v1952_v59 = vmul.f32 %v1951_v22, %v1948_v61  ;;  %v1955_v7 = vmul.f32 %v1954_v52, %v4704_v39  ;;  %v1960_v56 = vstv %s4776_s6 }
  0xcd   :  { %s4819_s25 = sld [smem:[#allocation4 + $0x191]]  ;;  %v836_v43 = vadd.f32 %v835_v24, %v833_v0  ;;  %v838_v58 = vmul.f32 %v837_v45, %v4700_v51  ;;  %v1961_v42 = vmul.f32 %v1960_v56, %v1948_v61  ;;  %v1963_v25 = vstv %s4782_s11 }
  0xce   :  { %s2907_s30 = sld [smem:[#allocation4 + $0x2a]]  ;;  %v1946_v49 = vmul.f32 %v1945_v4, %v4756_v55  ;;  %v1953_v46 = vadd.f32 %v1952_v59, %v1920_v33  ;;  %v1964_v9 = vmul.f32 %v1963_v25, %v4704_v39  ;;  %v1969_v18 = vstv %s4791_s20 }
  0xcf   :  { %s2908_s5 = sld [smem:[#allocation4 + $0x2b]]  ;;  %v4828_v13 = vadd.f32 %v838_v58, %v836_v43  ;;  %v1962_v62 = vadd.f32 %v1961_v42, %v1929_v37  ;;  %v1970_v40 = vmul.f32 %v1969_v18, %v1948_v61  ;;  %v1972_v53 = vstv %s4801_s7  ;;  %v1987_v58 = vld [vmem:[#allocation2 + $0x60] sm:$0xff] }
  0xd0   :  { %s4830_s14 = sld [smem:[#allocation4 + $0x2c]]  ;;  %v1947_v31 = vadd.f32 %v1946_v49, %v1944_v28  ;;  %v1956_v51 = vadd.f32 %v1955_v7, %v1953_v46  ;;  %v1973_v23 = vmul.f32 %v1972_v53, %v4704_v39  ;;  %v1966_v0 = vstv %s4787_s12 }
  0xd1   :  { %v1978_v14 = vstv %s4809_s17  ;;  %s2955_s26 = sld [smem:[#allocation4 + $0x5a]]  ;;  %v4834_v10 = vadd.f32 %v1964_v9, %v1962_v62  ;;  %v1971_v55 = vadd.f32 %v1970_v40, %v1938_v16  ;;  %v1967_v46 = vmul.f32 %v1966_v0, %v4852_v17 }
  0xd2   :  { %s2956_s15 = sld [smem:[#allocation4 + $0x5b]]  ;;  %v1979_v2 = vmul.f32 %v1978_v14, %v1948_v61  ;;  %v1981_v20 = vstv %s4817_s8  ;;  %v1975_v9 = vstv %s4805_s9 }
  0xd3   :  { %s2957_s10 = sld [smem:[#allocation4 + $0x5c]]  ;;  %v4838_v47 = vadd.f32 %v1973_v23, %v1971_v55  ;;  %v1982_v30 = vmul.f32 %v1981_v20, %v4704_v39  ;;  %v1957_v39 = vstv %s4769_s27  ;;  %v1984_v55 = vstv %s4819_s25 }
  0xd4   :  { %s3003_s2 = sld [smem:[#allocation4 + $0x8a]]  ;;  %v1980_v29 = vadd.f32 %v1979_v2, %v1947_v31  ;;  %v843_v48 = vstv %s2907_s30 }
  0xd5   :  { %s4841_s22 = sld [smem:[#allocation4 + $0x8b]]  ;;  %v846_v63 = vstv %s2908_s5  ;;  %v844_v50 = vmul.f32 %v843_v48, %v4726_v19 }
  0xd6   :  { %s4843_s24 = sld [smem:[#allocation4 + $0x8c]]  ;;  %v847_v41 = vmul.f32 %v846_v63, %v4445_v11  ;;  %v4847_v36 = vadd.f32 %v1982_v30, %v1980_v29  ;;  %v849_v1 = vstv %s4830_s14  ;;  %v1985_v63 = vmul.f32 %v1984_v55, %v4852_v17  ;;  %v5037_v55 = vld [vmem:[%s6986_s0 + $0x12] sm:$0xff] }
  0xd7   :  { %s4849_s1 = sld [smem:[#allocation4 + $0xba]]  ;;  %v852_v28 = vstv %s2955_s26  ;;  %v845_v3 = vadd.f32 %v844_v50, %v4774_v26  ;;  %v850_v12 = vmul.f32 %v849_v1, %v4728_v15  ;;  %v1958_v26 = vmul.f32 %v1957_v39, %v4852_v17 }
  0xd8   :  { %s4855_s18 = sld [smem:[#allocation4 + $0xbb]]  ;;  %v853_v54 = vmul.f32 %v852_v28, %v4726_v19  ;;  %v855_v34 = vstv %s2956_s15  ;;  %v1986_v39 = vadd.f32 %v1985_v63, %v4847_v36  ;;  %v5059_v63 = vld [vmem:[%s6986_s0 + $0x32] sm:$0xff] }
  0xd9   :  { %s4859_s21 = sld [smem:[#allocation4 + $0xbc]]  ;;  %v856_v4 = vmul.f32 %v855_v34, %v4445_v11  ;;  %v858_v8 = vstv %s2957_s10  ;;  %v848_v33 = vadd.f32 %v847_v41, %v845_v3  ;;  %v1959_v59 = vadd.f32 %v1958_v26, %v1956_v51  ;;  %v4940_v26 = vld [vmem:[%s6986_s0] sm:$0xff] }
  0xda   :  { %v854_v6 = vadd.f32 %v853_v54, %v4784_v32  ;;  %v861_v21 = vstv %s3003_s2  ;;  %s4864_s19 = sld [smem:[#allocation4 + $0x102]]  ;;  %v859_v61 = vmul.f32 %v858_v8, %v4728_v15 }
  0xdb   :  { %v862_v27 = vmul.f32 %v861_v21, %v4726_v19  ;;  %v864_v45 = vstv %s4841_s22  ;;  %s4870_s23 = sld [smem:[#allocation4 + $0x103]]  ;;  %v4872_v22 = vadd.f32 %v850_v12, %v848_v33  ;;  %v4930_v12 = vld [vmem:[#allocation2 + $0x62] sm:$0xff] }
  0xdc   :  { %v857_v52 = vadd.f32 %v856_v4, %v854_v6  ;;  %v865_v37 = vmul.f32 %v864_v45, %v4445_v11  ;;  %v867_v32 = vstv %s4843_s24  ;;  %s4876_s29 = sld [smem:[#allocation4 + $0x104]] }
  0xdd   :  { %v863_v24 = vadd.f32 %v862_v27, %v4813_v57  ;;  %v870_v16 = vstv %s4849_s1  ;;  %s4881_s13 = sld [smem:[#allocation4 + $0x132]]  ;;  %v868_v25 = vmul.f32 %v867_v32, %v4728_v15 }
  0xde   :  { %v4883_v7 = vadd.f32 %v859_v61, %v857_v52  ;;  %v871_v56 = vmul.f32 %v870_v16, %v4726_v19  ;;  %v873_v43 = vstv %s4855_s18  ;;  %s4887_s16 = sld [smem:[#allocation4 + $0x133]] }
  0xdf   :  { %v866_v42 = vadd.f32 %v865_v37, %v863_v24  ;;  %v874_v49 = vmul.f32 %v873_v43, %v4445_v11  ;;  %v876_v57 = vstv %s4859_s21  ;;  %s4892_s28 = sld [smem:[#allocation4 + $0x134]]  ;;  %v1968_v11 = vadd.f32 %v1967_v46, %v4834_v10  ;;  %v4960_v37 = vld [vmem:[%s6986_s0 + $0x1] sm:$0xff] }
  0xe0   :  { %v872_v18 = vadd.f32 %v871_v56, %v4828_v13  ;;  %s3251_s4 = sld [smem:[#allocation4 + $0x162]]  ;;  %v1990_v19 = vstv %s4864_s19  ;;  %v877_v53 = vmul.f32 %v876_v57, %v4728_v15  ;;  %v1976_v13 = vmul.f32 %v1975_v9, %v4852_v17  ;;  %v4971_v24 = vld [vmem:[%s6986_s0 + $0x21] sm:$0xff]  ;;  %v4999_v57 = vld [vmem:[%s6986_s0 + $0x10] sm:$0xff] }
  0xe1   :  { %v4898_v62 = vadd.f32 %v868_v25, %v866_v42  ;;  %s3252_s27 = sld [smem:[#allocation4 + $0x163]]  ;;  %v1991_v40 = vmul.f32 %v1990_v19, %v1987_v58  ;;  %v1993_v31 = vstv %s4870_s23  ;;  %v4981_v56 = vld [vmem:[%s6986_s0 + $0x2] sm:$0xff] }
  0xe2   :  { %v875_v51 = vadd.f32 %v874_v49, %v872_v18  ;;  %s4903_s6 = sld [smem:[#allocation4 + $0x164]]  ;;  %v1994_v14 = vmul.f32 %v1993_v31, %v4734_v5  ;;  %v1977_v10 = vadd.f32 %v1976_v13, %v4838_v47  ;;  %v1996_v36 = vstv %s4876_s29  ;;  %v4992_v42 = vld [vmem:[%s6986_s0 + $0x22] sm:$0xff] }
  0xe3   :  { %s3299_s11 = sld [smem:[#allocation4 + $0x192]]  ;;  %v1992_v23 = vadd.f32 %v1991_v40, %v1959_v59  ;;  %v1999_v2 = vstv %s4881_s13  ;;  %v4976_v59 = vmul.f32 %v1996_v36, %v4930_v12  ;;  %v5011_v18 = vld [vmem:[%s6986_s0 + $0x40] sm:$0xff]  ;;  %v5018_v40 = vld [vmem:[%s6986_s0 + $0x11] sm:$0xff] }
  0xe4   :  { %v4909_v20 = vadd.f32 %v877_v53, %v875_v51  ;;  %s3300_s12 = sld [smem:[#allocation4 + $0x193]]  ;;  %v2000_v30 = vmul.f32 %v1999_v2, %v1987_v58  ;;  %v2002_v29 = vstv %s4887_s16  ;;  %v5030_v53 = vld [vmem:[%s6986_s0 + $0x30] sm:$0xff] }
  0xe5   :  { %s4913_s20 = sld [smem:[#allocation4 + $0x194]]  ;;  %v4915_v15 = vadd.f32 %v1994_v14, %v1992_v23  ;;  %v2003_v48 = vmul.f32 %v2002_v29, %v4734_v5 }
  0xe6   :  { %v2001_v50 = vadd.f32 %v2000_v30, %v1968_v11  ;;  %v2008_v41 = vstv %s3251_s4  ;;  %s2853_s7 = sld [smem:[#allocation4 + $0xc]]  ;;  %v5049_v30 = vld [vmem:[%s6986_s0 + $0x31] sm:$0xff] }
  0xe7   :  { %v2009_v1 = vmul.f32 %v2008_v41, %v1987_v58  ;;  %v2011_v28 = vstv %s3252_s27  ;;  %s2854_s9 = sld [smem:[#allocation4 + $0xd]]  ;;  %v5066_v41 = vld [vmem:[%s6986_s0 + $0x41] sm:$0xff] }
  0xe8   :  { %v4920_v3 = vadd.f32 %v2003_v48, %v2001_v50  ;;  %v2012_v47 = vmul.f32 %v2011_v28, %v4734_v5  ;;  %s2855_s17 = sld [smem:[#allocation4 + $0xe]] }
  0xe9   :  { %v2010_v54 = vadd.f32 %v2009_v1, %v1977_v10  ;;  %v2017_v34 = vstv %s3299_s11  ;;  %s2856_s8 = sld [smem:[#allocation4 + $0xf]] }
  0xea   :  { %v2018_v4 = vmul.f32 %v2017_v34, %v1987_v58  ;;  %v2020_v8 = vstv %s3300_s12  ;;  %s4923_s25 = sld [smem:[#allocation4 + $0x10]] }
  0xeb   :  { %v4925_v17 = vadd.f32 %v2012_v47, %v2010_v54  ;;  %v2021_v33 = vmul.f32 %v2020_v8, %v4734_v5  ;;  %s4928_s30 = sld [smem:[#allocation4 + $0x11]]  ;;  %v4951_v5 = vld [vmem:[%s6986_s0 + $0x20] sm:$0xff] }
  0xec   :  { %v2019_v6 = vadd.f32 %v2018_v4, %v1986_v39  ;;  %s4933_s5 = sld [smem:[#allocation7 + $0x2]]  ;;  %v4935_v21 = vstv %s2853_s7  ;;  %v5077_v54 = vld [vmem:[%s6986_s0 + $0x42] sm:$0xff] }
  0xed   :  { %v136_v61 = vmul.f32 %v4940_v26, %v4935_v21  ;;  %v4944_v27 = vstv %s2854_s9  ;;  %s4946_s15 = sld [smem:[#allocation4 + $0x2d]]  ;;  %v224_v45 = vmul.f32 %v4951_v5, %v4935_v21  ;;  %v292_v19 = vmul.f32 %v5011_v18, %v4935_v21 }
  0xee   :  { %v4955_v52 = vadd.f32 %v2021_v33, %v2019_v6  ;;  %v138_v32 = vmul.f32 %v4960_v37, %v4944_v27  ;;  %v4964_v0 = vstv %s2855_s17  ;;  %s4966_s1 = sld [smem:[#allocation4 + $0x2e]]  ;;  %v225_v16 = vmul.f32 %v4971_v24, %v4944_v27 }
  0xef   :  { %v141_v43 = vmul.f32 %v4981_v56, %v4964_v0  ;;  %v4985_v58 = vstv %s2856_s8  ;;  %s4987_s29 = sld [smem:[#allocation4 + $0x2f]]  ;;  %v227_v25 = vmul.f32 %v4992_v42, %v4964_v0  ;;  %v293_v1 = vmul.f32 %v5066_v41, %v4944_v27 }
  0xf0   :  { %v139_v49 = vadd.f32 %v138_v32, %v136_v61  ;;  %v174_v46 = vmul.f32 %v4999_v57, %v4985_v58  ;;  %v5004_v9 = vstv %s4923_s25  ;;  %s5006_s11 = sld [smem:[#allocation4 + $0x5d]]  ;;  %v226_v51 = vadd.f32 %v225_v16, %v224_v45 }
  0xf1   :  { %v177_v31 = vmul.f32 %v5018_v40, %v5004_v9  ;;  %v5023_v11 = vstv %s4928_s30  ;;  %s5025_s8 = sld [smem:[#allocation4 + $0x5e]]  ;;  %v250_v14 = vmul.f32 %v5030_v53, %v4985_v58  ;;  %v252_v29 = vmul.f32 %v5049_v30, %v5004_v9 }
  0xf2   :  { %v142_v13 = vadd.f32 %v141_v43, %v139_v49  ;;  %v180_v23 = vmul.f32 %v5037_v55, %v5023_v11  ;;  %v5042_v2 = vstv %s4933_s5  ;;  %s5044_s30 = sld [smem:[#allocation4 + $0x5f]]  ;;  %v228_v48 = vadd.f32 %v227_v25, %v226_v51 }
  0xf3   :  { %s5053_s24 = sld [smem:[#allocation4 + $0x8d]]  ;;  %v882_v10 = vstv %s4946_s15  ;;  %v254_v50 = vmul.f32 %v5059_v63, %v5023_v11  ;;  %v295_v34 = vmul.f32 %v5077_v54, %v4964_v0  ;;  %v294_v36 = vadd.f32 %v293_v1, %v292_v19 }
  0xf4   :  { %v175_v28 = vadd.f32 %v174_v46, %v142_v13  ;;  %s5070_s15 = sld [smem:[#allocation4 + $0x8e]]  ;;  %v883_v39 = vmul.f32 %v882_v10, %v4752_v44  ;;  %v885_v47 = vstv %s4966_s1  ;;  %v251_v33 = vadd.f32 %v250_v14, %v228_v48 }
  0xf5   :  { %s5081_s16 = sld [smem:[#allocation4 + $0x8f]]  ;;  %v886_v4 = vmul.f32 %v885_v47, %v4519_v35  ;;  %v888_v8 = vstv %s4987_s29  ;;  %v296_v49 = vadd.f32 %v295_v34, %v294_v36 }
  0xf6   :  { %v178_v6 = vadd.f32 %v177_v31, %v175_v28  ;;  %s5085_s4 = sld [smem:[#allocation4 + $0xbd]]  ;;  %v884_v61 = vadd.f32 %v883_v39, %v4872_v22  ;;  %v889_v45 = vmul.f32 %v888_v8, %v4754_v60  ;;  %v891_v32 = vstv %s5006_s11 }
  0xf7   :  { %s5090_s1 = sld [smem:[#allocation4 + $0xbe]]  ;;  %v892_v16 = vmul.f32 %v891_v32, %v4752_v44  ;;  %v894_v43 = vstv %s5025_s8  ;;  %v253_v25 = vadd.f32 %v252_v29, %v251_v33 }
  0xf8   :  { %v181_v46 = vadd.f32 %v180_v23, %v178_v6  ;;  %s5094_s29 = sld [smem:[#allocation4 + $0xbf]]  ;;  %v887_v19 = vadd.f32 %v886_v4, %v884_v61  ;;  %v895_v31 = vmul.f32 %v894_v43, %v4519_v35  ;;  %v897_v51 = vstv %s5044_s30 }
  0xf9   :  { %v893_v22 = vadd.f32 %v892_v16, %v4883_v7  ;;  %v898_v14 = vmul.f32 %v897_v51, %v4754_v60  ;;  %v900_v13 = vstv %s5053_s24  ;;  %s5101_s27 = sld [smem:[#allocation4 + $0x105]]  ;;  %v255_v10 = vadd.f32 %v254_v50, %v253_v25  ;;  %v5135_v16 = vld [vmem:[#allocation2 + $0x70] sm:$0xff] }
  0xfa   :  { %v201_v29 = vadd.f32 %v5042_v2, %v181_v46  ;;  %v5104_v48 = vadd.f32 %v889_v45, %v887_v19  ;;  %v901_v23 = vmul.f32 %v900_v13, %v4752_v44  ;;  %v903_v1 = vstv %s5070_s15  ;;  %s5108_s11 = sld [smem:[#allocation4 + $0x106]]  ;;  %v5154_v19 = vld [vmem:[%s6986_s0 + $0x51] sm:$0xff] }
  0xfb   :  { %v896_v28 = vadd.f32 %v895_v31, %v893_v22  ;;  %v904_v7 = vmul.f32 %v903_v1, %v4519_v35  ;;  %v906_v39 = vstv %s5081_s16  ;;  %s5112_s12 = sld [smem:[#allocation4 + $0x107]]  ;;  %v270_v47 = vadd.f32 %v255_v10, %v5042_v2  ;;  %v5171_v10 = vld [vmem:[%s6986_s0 + $0x52] sm:$0xff] }
  0xfc   :  { %v5115_v50 = vmax.f32 %v201_v29, 0.0  ;;  %v902_v34 = vadd.f32 %v901_v23, %v4898_v62  ;;  %v907_v4 = vmul.f32 %v906_v39, %v4754_v60  ;;  %v909_v8 = vstv %s5085_s4  ;;  %s5120_s7 = sld [smem:[#allocation4 + $0x135]]  ;;  %7011 = vst [vmem:[#allocation13_spill] sm:$0xff] %v5171_v10 }
  0xfd   :  { %v5122_v33 = vadd.f32 %v898_v14, %v896_v28  ;;  %v910_v36 = vmul.f32 %v909_v8, %v4752_v44  ;;  %v912_v6 = vstv %s5090_s1  ;;  %s5126_s9 = sld [smem:[#allocation4 + $0x136]]  ;;  %v5128_v61 = vmax.f32 %v270_v47, 0.0  ;;  %v5140_v44 = vld [vmem:[%s6986_s0 + $0x50] sm:$0xff] }
  0xfe   :  { %204 = vst [vmem:[#allocation2 + $0x81] sm:$0xff] %v5115_v50  ;;  %v905_v45 = vadd.f32 %v904_v7, %v902_v34  ;;  %v913_v62 = vmul.f32 %v912_v6, %v4519_v35  ;;  %v915_v32 = vstv %s5094_s29  ;;  %s5133_s17 = sld [smem:[#allocation4 + $0x137]]  ;;  %v318_v43 = vmul.f32 %v5140_v44, %v4985_v58  ;;  %v5186_v7 = vld [vmem:[%s6986_s0 + $0x60] sm:$0xff] }
  0xff   :  { %v1998_v25 = vadd.f32 %v4976_v59, %v4915_v15  ;;  %v911_v46 = vadd.f32 %v910_v36, %v4909_v20  ;;  %s5147_s14 = sld [smem:[#allocation4 + $0x165]]  ;;  %v2029_v35 = vstv %s5101_s27  ;;  %273 = vst [vmem:[#allocation2 + $0x91] sm:$0xff] %v5128_v61  ;;  %v320_v31 = vmul.f32 %v5154_v19, %v5004_v9  ;;  %7012 = vst [vmem:[#allocation14_spill] sm:$0xff] %v5186_v7  ;;  %v5200_v36 = vld [vmem:[%s6986_s0 + $0x61] sm:$0xff] }
 0x100   :  { %v2005_v51 = vstv %s4892_s28  ;;  %v5159_v22 = vadd.f32 %v907_v4, %v905_v45  ;;  %s5161_s30 = sld [smem:[#allocation4 + $0x166]]  ;;  %v2032_v20 = vstv %s5108_s11  ;;  %v319_v15 = vadd.f32 %v318_v43, %v296_v49  ;;  %7013 = vst [vmem:[#allocation15_spill] sm:$0xff] %v5200_v36 }
 0x101   :  { %v914_v59 = vadd.f32 %v913_v62, %v911_v46  ;;  %v916_v14 = vmul.f32 %v915_v32, %v4754_v60  ;;  %s5165_s2 = sld [smem:[#allocation4 + $0x167]]  ;;  %v2030_v13 = vmul.f32 %v2029_v35, %v5135_v16  ;;  %v322_v29 = vmul.f32 %v5171_v10, %v5023_v11  ;;  %v5206_v62 = vld [vmem:[#allocation2 + $0x72] sm:$0xff] }
 0x102   :  { %v2014_v23 = vstv %s4903_s6  ;;  %s5176_s28 = sld [smem:[#allocation4 + $0x195]]  ;;  %v321_v49 = vadd.f32 %v320_v31, %v319_v15  ;;  %v2033_v28 = vmul.f32 %v2032_v20, %v4761_v38  ;;  %v360_v39 = vmul.f32 %v5186_v7, %v4935_v21 }
 0x103   :  { %v5178_v1 = vadd.f32 %v916_v14, %v914_v59  ;;  %s5180_s18 = sld [smem:[#allocation4 + $0x196]]  ;;  %v2031_v60 = vadd.f32 %v2030_v13, %v1998_v25  ;;  %v2006_v47 = vmul.f32 %v2005_v51, %v4930_v12  ;;  %v2023_v34 = vstv %s4913_s20  ;;  %v5232_v59 = vld [vmem:[%s6986_s0 + $0x62] sm:$0xff] }
 0x104   :  { %s5192_s6 = sld [smem:[#allocation4 + $0x197]]  ;;  %v323_v4 = vadd.f32 %v322_v29, %v321_v49  ;;  %v2038_v8 = vstv %s5120_s7  ;;  %v361_v6 = vmul.f32 %v5200_v36, %v4944_v27  ;;  %v2015_v45 = vmul.f32 %v2014_v23, %v4930_v12  ;;  %7014 = vst [vmem:[#allocation16_spill] sm:$0xff] %v5232_v59  ;;  %v5244_v29 = vld [vmem:[%s6986_s0 + $0x70] sm:$0xff] }
 0x105   :  { %s5195_s19 = sld [smem:[#allocation4 + $0x30]]  ;;  %v2007_v21 = vadd.f32 %v2006_v47, %v4920_v3  ;;  %v2035_v32 = vstv %s5112_s12  ;;  %v2024_v25 = vmul.f32 %v2023_v34, %v4930_v12  ;;  %v2034_v46 = vadd.f32 %v2033_v28, %v2031_v60  ;;  %7015 = vst [vmem:[#allocation17_spill] sm:$0xff] %v5244_v29  ;;  %v918_v60 = vld [vmem:[#allocation2 + $0x80] sm:$0xff] }
 0x106   :  { %s5209_s20 = sld [smem:[#allocation4 + $0x31]]  ;;  %v338_v43 = vadd.f32 %v323_v4, %v5042_v2  ;;  %v2041_v35 = vstv %s5126_s9  ;;  %v362_v31 = vadd.f32 %v361_v6, %v360_v39  ;;  %v2039_v27 = vmul.f32 %v2038_v8, %v5135_v16 }
 0x107   :  { %s5214_s13 = sld [smem:[#allocation4 + $0x32]]  ;;  %v2044_v3 = vstv %s5133_s17  ;;  %v2016_v20 = vadd.f32 %v2015_v45, %v4925_v17  ;;  %v5224_v15 = vadd.f32 %v2024_v25, %v4955_v52  ;;  %v2036_v12 = vmul.f32 %v2035_v32, %v5206_v62 }
 0x108   :  { %s5218_s16 = sld [smem:[#allocation4 + $0x60]]  ;;  %v5220_v51 = vmax.f32 %v338_v43, 0.0  ;;  %v363_v14 = vmul.f32 %v5232_v59, %v4964_v0  ;;  %v2040_v13 = vadd.f32 %v2039_v27, %v2007_v21  ;;  %v2042_v17 = vmul.f32 %v2041_v35, %v4761_v38  ;;  %v920_v27 = vld [vmem:[#allocation2 + $0x82] sm:$0xff] }
 0x109   :  { %s5227_s4 = sld [smem:[#allocation4 + $0x61]]  ;;  %v2047_v52 = vstv %s5147_s14  ;;  %v386_v23 = vmul.f32 %v5244_v29, %v4985_v58  ;;  %v5248_v49 = vadd.f32 %v2036_v12, %v2034_v46  ;;  %v5251_v0 = vmul.f32 %v2044_v3, %v5206_v62  ;;  %v5263_v58 = vld [vmem:[%s6986_s0 + $0x71] sm:$0xff] }
 0x10a   :  { %s5238_s27 = sld [smem:[#allocation4 + $0x62]]  ;;  %341 = vst [vmem:[#allocation2 + $0xa1] sm:$0xff] %v5220_v51  ;;  %v364_v39 = vadd.f32 %v363_v14, %v362_v31  ;;  %v2050_v47 = vstv %s5161_s30  ;;  %7016 = vst [vmem:[#allocation18_spill] sm:$0xff] %v5263_v58  ;;  %v388_v8 = vmul.f32 %v5263_v58, %v5004_v9  ;;  %v2048_v6 = vmul.f32 %v2047_v52, %v5135_v16  ;;  %v5281_v9 = vld [vmem:[%s6986_s0 + $0x72] sm:$0xff] }
 0x10b   :  { %s5253_s7 = sld [smem:[#allocation4 + $0x90]]  ;;  %v921_v28 = vstv %s5195_s19  ;;  %v5272_v43 = vadd.f32 %v2042_v17, %v2040_v13  ;;  %7017 = vst [vmem:[#allocation19_spill] sm:$0xff] %v5281_v9  ;;  %v390_v35 = vmul.f32 %v5281_v9, %v5023_v11  ;;  %v5286_v31 = vmul.f32 %v2050_v47, %v4761_v38 }
 0x10c   :  { %s5257_s9 = sld [smem:[#allocation4 + $0x91]]  ;;  %v922_v34 = vmul.f32 %v921_v28, %v918_v60  ;;  %v924_v4 = vstv %s5209_s20  ;;  %v387_v32 = vadd.f32 %v386_v23, %v364_v39  ;;  %v2053_v23 = vstv %s5165_s2 }
 0x10d   :  { %s5268_s25 = sld [smem:[#allocation4 + $0x92]]  ;;  %v925_v21 = vmul.f32 %v924_v4, %v5115_v50  ;;  %v927_v45 = vstv %s5214_s13 }
 0x10e   :  { %s5274_s14 = sld [smem:[#allocation4 + $0xc0]]  ;;  %v923_v25 = vadd.f32 %v922_v34, %v5104_v48  ;;  %v930_v46 = vstv %s5218_s16  ;;  %v389_v48 = vadd.f32 %v388_v8, %v387_v32  ;;  %v928_v13 = vmul.f32 %v927_v45, %v920_v27 }
 0x10f   :  { %s5288_s30 = sld [smem:[#allocation4 + $0xc1]]  ;;  %v931_v3 = vmul.f32 %v930_v46, %v918_v60  ;;  %v933_v12 = vstv %s5227_s4  ;;  %v5309_v46 = vmul.f32 %v2053_v23, %v5206_v62 }
 0x110   :  { %s5291_s22 = sld [smem:[#allocation4 + $0xc2]]  ;;  %v926_v14 = vadd.f32 %v925_v21, %v923_v25  ;;  %v934_v17 = vmul.f32 %v933_v12, %v5115_v50  ;;  %v936_v52 = vstv %s5238_s27  ;;  %v391_v39 = vadd.f32 %v390_v35, %v389_v48 }
 0x111   :  { %v932_v11 = vadd.f32 %v931_v3, %v5122_v33  ;;  %v939_v28 = vstv %s5253_s7  ;;  %s5298_s24 = sld [smem:[#allocation4 + $0xe4]]  ;;  %v937_v34 = vmul.f32 %v936_v52, %v920_v27  ;;  %v2049_v25 = vadd.f32 %v2048_v6, %v2016_v20 }
 0x112   :  { %v5300_v47 = vadd.f32 %v928_v13, %v926_v14  ;;  %v940_v4 = vmul.f32 %v939_v28, %v918_v60  ;;  %v942_v8 = vstv %s5257_s9  ;;  %s3098_s21 = sld [smem:[#allocation4 + $0xe5]]  ;;  %v406_v33 = vadd.f32 %v391_v39, %v5042_v2 }
 0x113   :  { %v935_v21 = vadd.f32 %v934_v17, %v932_v11  ;;  %v943_v45 = vmul.f32 %v942_v8, %v5115_v50  ;;  %v945_v32 = vstv %s5268_s25  ;;  %s5305_s2 = sld [smem:[#allocation4 + $0xe6]] }
 0x114   :  { %v941_v35 = vadd.f32 %v940_v4, %v5159_v22  ;;  %v948_v3 = vstv %s5274_s14  ;;  %s5313_s5 = sld [smem:[#allocation4 + $0xe7]]  ;;  %v5320_v13 = vmax.f32 %v406_v33, 0.0  ;;  %v946_v17 = vmul.f32 %v945_v32, %v920_v27  ;;  %v5357_v4 = vld [vmem:[%s6986_s0 + $0x81] sm:$0xff] }
 0x115   :  { %v5315_v12 = vadd.f32 %v937_v34, %v935_v21  ;;  %v949_v48 = vmul.f32 %v948_v3, %v918_v60  ;;  %v951_v14 = vstv %s5288_s30  ;;  %s5318_s19 = sld [smem:[#allocation4 + $0xe8]]  ;;  %v2056_v22 = vstv %s5176_s28  ;;  %7020 = vst [vmem:[#allocation22_spill] sm:$0xff] %v5357_v4 }
 0x116   :  { %v944_v2 = vadd.f32 %v943_v45, %v941_v35  ;;  %v952_v20 = vmul.f32 %v951_v14, %v5115_v50  ;;  %v954_v6 = vstv %s5291_s22  ;;  %s5324_s15 = sld [smem:[#allocation4 + $0xe9]]  ;;  %409 = vst [vmem:[#allocation2 + $0xb1] sm:$0xff] %v5320_v13  ;;  %v5339_v50 = vld [vmem:[%s6986_s0 + $0x80] sm:$0xff]  ;;  %v2059_v33 = vstv %s5180_s18 }
 0x117   :  { %v950_v52 = vadd.f32 %v949_v48, %v5178_v1  ;;  %v955_v23 = vmul.f32 %v954_v6, %v920_v27  ;;  %s5328_s23 = sld [smem:[#allocation7 + $0xa]]  ;;  %v5331_v60 = vstv %s5298_s24  ;;  %7018 = vst [vmem:[#allocation20_spill] sm:$0xff] %v5339_v50  ;;  %v5350_v27 = vld [vmem:[%s6986_s0 + $0xa0] sm:$0xff]  ;;  %v5398_v6 = vld [vmem:[%s6986_s0 + $0x90] sm:$0xff] }
 0x118   :  { %v5334_v11 = vadd.f32 %v946_v17, %v944_v2  ;;  %v1298_v28 = vmul.f32 %v5339_v50, %v5331_v60  ;;  %v5343_v1 = vstv %s3098_s21  ;;  %s5345_s28 = sld [smem:[#allocation4 + $0x108]]  ;;  %7019 = vst [vmem:[#allocation21_spill] sm:$0xff] %v5350_v27  ;;  %v1383_v39 = vmul.f32 %v5350_v27, %v5331_v60  ;;  %v5369_v45 = vld [vmem:[%s6986_s0 + $0xa1] sm:$0xff]  ;;  %7024 = vst [vmem:[#allocation26_spill] sm:$0xff] %v5398_v6 }
 0x119   :  { %v953_v34 = vadd.f32 %v952_v20, %v950_v52  ;;  %v1300_v8 = vmul.f32 %v5357_v4, %v5343_v1  ;;  %v5362_v21 = vstv %s5305_s2  ;;  %s5364_s27 = sld [smem:[#allocation4 + $0x109]]  ;;  %7021 = vst [vmem:[#allocation23_spill] sm:$0xff] %v5369_v45  ;;  %v1384_v32 = vmul.f32 %v5369_v45, %v5343_v1  ;;  %v5377_v35 = vld [vmem:[%s6986_s0 + $0x82] sm:$0xff] }
 0x11a   :  { %7022 = vst [vmem:[#allocation24_spill] sm:$0xff] %v5377_v35  ;;  %v1303_v3 = vmul.f32 %v5377_v35, %v5362_v21  ;;  %v5382_v48 = vstv %s5313_s5  ;;  %s5384_s17 = sld [smem:[#allocation4 + $0x10a]]  ;;  %v5389_v14 = vld [vmem:[%s6986_s0 + $0xa2] sm:$0xff]  ;;  %v2057_v35 = vmul.f32 %v2056_v22, %v5135_v16  ;;  %v5440_v16 = vld [vmem:[%s6986_s0 + $0xb1] sm:$0xff] }
 0x11b   :  { %7023 = vst [vmem:[#allocation25_spill] sm:$0xff] %v5389_v14  ;;  %v1386_v2 = vmul.f32 %v5389_v14, %v5362_v21  ;;  %v5393_v17 = vadd.f32 %v955_v23, %v953_v34  ;;  %v1301_v20 = vadd.f32 %v1300_v8, %v1298_v28  ;;  %v1336_v52 = vmul.f32 %v5398_v6, %v5382_v48  ;;  %s5405_s26 = sld [smem:[#allocation4 + $0x138]]  ;;  %v5415_v23 = vld [vmem:[%s6986_s0 + $0xb0] sm:$0xff]  ;;  %v3502_v34 = vld [vmem:[%s6986_s0 + $0xc0] sm:$0xff] }
 0x11c   :  { %v5403_v45 = vstv %s5318_s19  ;;  %v5408_v27 = vstv %s5324_s15  ;;  %s5410_s10 = sld [smem:[#allocation4 + $0x139]]  ;;  %v1385_v14 = vadd.f32 %v1384_v32, %v1383_v39  ;;  %7025 = vst [vmem:[#allocation27_spill] sm:$0xff] %v5415_v23  ;;  %v1409_v28 = vmul.f32 %v5415_v23, %v5382_v48  ;;  %v5428_v39 = vld [vmem:[%s6986_s0 + $0x91] sm:$0xff]  ;;  %7027 = vst [vmem:[#allocation29_spill] sm:$0xff] %v5440_v16 }
 0x11d   :  { %v1447_v8 = vmul.f32 %v3502_v34, %v5331_v60  ;;  %v2052_v6 = vadd.f32 %v5286_v31, %v2049_v25  ;;  %v1304_v4 = vadd.f32 %v1303_v3, %v1301_v20  ;;  %7026 = vst [vmem:[#allocation28_spill] sm:$0xff] %v5428_v39  ;;  %v1339_v32 = vmul.f32 %v5428_v39, %v5403_v45  ;;  %s5432_s19 = sld [smem:[#allocation4 + $0x13a]]  ;;  %v3505_v25 = vld [vmem:[%s6986_s0 + $0xc1] sm:$0xff]  ;;  %v5452_v3 = vld [vmem:[%s6986_s0 + $0x92] sm:$0xff] }
 0x11e   :  { %v2060_v23 = vmul.f32 %v2059_v33, %v4761_v38  ;;  %s5435_s15 = sld [smem:[#allocation4 + $0x168]]  ;;  %v1387_v34 = vadd.f32 %v1386_v2, %v1385_v14  ;;  %v1411_v31 = vmul.f32 %v5440_v16, %v5403_v45  ;;  %v1448_v22 = vmul.f32 %v3505_v25, %v5343_v1  ;;  %7028 = vst [vmem:[#allocation30_spill] sm:$0xff] %v5452_v3  ;;  %v3507_v2 = vld [vmem:[%s6986_s0 + $0xc2] sm:$0xff]  ;;  %v3509_v25 = vld [vmem:[%s6986_s0 + $0xd0] sm:$0xff] }
 0x11f   :  { %v2058_v38 = vadd.f32 %v2057_v35, %v5224_v15  ;;  %v1337_v33 = vadd.f32 %v1336_v52, %v1304_v4  ;;  %v1342_v14 = vmul.f32 %v5452_v3, %v5408_v27  ;;  %s5456_s11 = sld [smem:[#allocation4 + $0x169]]  ;;  %v1450_v20 = vmul.f32 %v3507_v2, %v5362_v21  ;;  %v5467_v4 = vld [vmem:[%s6986_s0 + $0xb2] sm:$0xff] }
 0x120   :  { %s5462_s9 = sld [smem:[#allocation4 + $0x16a]]  ;;  %v1410_v15 = vadd.f32 %v1409_v28, %v1387_v34  ;;  %7029 = vst [vmem:[#allocation31_spill] sm:$0xff] %v5467_v4  ;;  %v1413_v35 = vmul.f32 %v5467_v4, %v5408_v27  ;;  %v1449_v52 = vadd.f32 %v1448_v22, %v1447_v8  ;;  %v1473_v3 = vmul.f32 %v3509_v25, %v5382_v48  ;;  %v3510_v28 = vld [vmem:[%s6986_s0 + $0xe0] sm:$0xff]  ;;  %v3511_v25 = vld [vmem:[%s6986_s0 + $0xd1] sm:$0xff] }
 0x121   :  { %v2062_v16 = vstv %s5192_s6  ;;  %v1340_v2 = vadd.f32 %v1339_v32, %v1337_v33  ;;  %v5477_v39 = vstv %s5328_s23  ;;  %s5479_s30 = sld [smem:[#allocation4 + $0x198]]  ;;  %v1511_v34 = vmul.f32 %v3510_v28, %v5331_v60  ;;  %v3512_v33 = vld [vmem:[%s6986_s0 + $0xe1] sm:$0xff]  ;;  %v3513_v60 = vld [vmem:[%s6986_s0 + $0xd2] sm:$0xff] }
 0x122   :  { %s5485_s21 = sld [smem:[#allocation4 + $0x199]]  ;;  %v1412_v8 = vadd.f32 %v1411_v31, %v1410_v15  ;;  %v1451_v22 = vadd.f32 %v1450_v20, %v1449_v52  ;;  %v1475_v32 = vmul.f32 %v3511_v25, %v5403_v45  ;;  %v1512_v4 = vmul.f32 %v3512_v33, %v5343_v1  ;;  %v3514_v20 = vld [vmem:[%s6986_s0 + $0xe2] sm:$0xff] }
 0x123   :  { %v2061_v50 = vadd.f32 %v2060_v23, %v2058_v38  ;;  %v1343_v9 = vadd.f32 %v1342_v14, %v1340_v2  ;;  %s5495_s20 = sld [smem:[#allocation4 + $0x19a]]  ;;  %v1477_v31 = vmul.f32 %v3513_v60, %v5408_v27  ;;  %v1514_v15 = vmul.f32 %v3514_v20, %v5362_v21  ;;  %v3515_v38 = vld [vmem:[%s6986_s0 + $0xf0] sm:$0xff] }
 0x124   :  { %s5505_s29 = sld [smem:[#allocation4 + $0x33]]  ;;  %v1414_v52 = vadd.f32 %v1413_v35, %v1412_v8  ;;  %v1474_v1 = vadd.f32 %v1473_v3, %v1451_v22  ;;  %v1513_v23 = vadd.f32 %v1512_v4, %v1511_v34  ;;  %v1537_v14 = vmul.f32 %v3515_v38, %v5382_v48  ;;  %v3517_v22 = vld [vmem:[%s6986_s0 + $0xf2] sm:$0xff] }
 0x125   :  { %v5513_v2 = vadd.f32 %v5251_v0, %v5272_v43  ;;  %v5516_v28 = vadd.f32 %v5309_v46, %v2052_v6  ;;  %v2063_v21 = vmul.f32 %v2062_v16, %v5206_v62  ;;  %v1362_v3 = vadd.f32 %v5477_v39, %v1343_v9  ;;  %s5520_s8 = sld [smem:[#allocation4 + $0x34]]  ;;  %v3516_v0 = vld [vmem:[%s6986_s0 + $0xf1] sm:$0xff] }
 0x126   :  { %s5522_s25 = sld [smem:[#allocation4 + $0x35]]  ;;  %v1427_v4 = vadd.f32 %v1414_v52, %v5477_v39  ;;  %v1476_v35 = vadd.f32 %v1475_v32, %v1474_v1  ;;  %v1515_v34 = vadd.f32 %v1514_v15, %v1513_v23  ;;  %v1539_v43 = vmul.f32 %v3516_v0, %v5403_v45  ;;  %v5535_v6 = vld [vmem:[#allocation2 + $0x90] sm:$0xff] }
 0x127   :  { %v5529_v46 = vadd.f32 %v2063_v21, %v2061_v50  ;;  %v1363_v62 = vmax.f32 %v1362_v3, 0.0  ;;  %v2068_v9 = vstv %s5345_s28  ;;  %v2071_v48 = vstv %s5364_s27  ;;  %s5533_s22 = sld [smem:[#allocation4 + $0x63]]  ;;  %v5537_v16 = vld [vmem:[#allocation2 + $0x92] sm:$0xff]  ;;  %v5565_v21 = vld [vmem:[#allocation2 + $0xa0] sm:$0xff] }
 0x128   :  { %s5539_s24 = sld [smem:[#allocation4 + $0x64]]  ;;  %v5541_v8 = vmax.f32 %v1427_v4, 0.0  ;;  %v1478_v45 = vadd.f32 %v1477_v31, %v1476_v35  ;;  %v1538_v50 = vadd.f32 %v1537_v14, %v1515_v34  ;;  %v1541_v25 = vmul.f32 %v3517_v22, %v5408_v27  ;;  %v5567_v3 = vld [vmem:[#allocation2 + $0xa2] sm:$0xff] }
 0x129   :  { %1364 = vst [vmem:[#allocation2 + $0x81] sm:$0xff] %v1363_v62  ;;  %v2074_v32 = vstv %s5384_s17  ;;  %v2077_v33 = vstv %s5405_s26  ;;  %v2080_v60 = vstv %s5410_s10  ;;  %s5551_s28 = sld [smem:[#allocation4 + $0x65]]  ;;  %v2086_v15 = vstv %s5435_s15 }
 0x12a   :  { %s5554_s27 = sld [smem:[#allocation4 + $0x93]]  ;;  %v960_v31 = vstv %s5505_s29  ;;  %1429 = vst [vmem:[#allocation2 + $0x91] sm:$0xff] %v5541_v8  ;;  %v1491_v52 = vadd.f32 %v1478_v45, %v5477_v39  ;;  %v1540_v1 = vadd.f32 %v1539_v43, %v1538_v50  ;;  %v2089_v27 = vstv %s5456_s11 }
 0x12b   :  { %s5561_s17 = sld [smem:[#allocation4 + $0x94]]  ;;  %v961_v38 = vmul.f32 %v960_v31, %v5535_v6  ;;  %v963_v14 = vstv %s5520_s8  ;;  %v2095_v4 = vstv %s5479_s30  ;;  %v2072_v43 = vmul.f32 %v2071_v48, %v1363_v62 }
 0x12c   :  { %s5570_s26 = sld [smem:[#allocation4 + $0x95]]  ;;  %v964_v35 = vmul.f32 %v963_v14, %v5128_v61  ;;  %v5573_v34 = vmax.f32 %v1491_v52, 0.0  ;;  %v1542_v0 = vadd.f32 %v1541_v25, %v1540_v1  ;;  %v2098_v45 = vstv %s5485_s21 }
 0x12d   :  { %s5576_s10 = sld [smem:[#allocation4 + $0xc3]]  ;;  %v962_v50 = vadd.f32 %v961_v38, %v5300_v47  ;;  %v969_v22 = vstv %s5533_s22  ;;  %v966_v31 = vstv %s5522_s25  ;;  %v2081_v14 = vmul.f32 %v2080_v60, %v1363_v62  ;;  %v5591_v47 = vld [vmem:[#allocation2 + $0xb0] sm:$0xff] }
 0x12e   :  { %s5580_s15 = sld [smem:[#allocation4 + $0xc4]]  ;;  %v970_v23 = vmul.f32 %v969_v22, %v5535_v6  ;;  %v972_v20 = vstv %s5539_s24  ;;  %1493 = vst [vmem:[#allocation2 + $0xa1] sm:$0xff] %v5573_v34  ;;  %v1555_v52 = vadd.f32 %v1542_v0, %v5477_v39  ;;  %v5593_v38 = vld [vmem:[#allocation2 + $0xb2] sm:$0xff]  ;;  %v2090_v22 = vmul.f32 %v2089_v27, %v1363_v62 }
 0x12f   :  { %s5587_s11 = sld [smem:[#allocation4 + $0xc5]]  ;;  %v965_v48 = vadd.f32 %v964_v35, %v962_v50  ;;  %v973_v25 = vmul.f32 %v972_v20, %v5128_v61  ;;  %v975_v1 = vstv %s5551_s28  ;;  %v2099_v59 = vmul.f32 %v2098_v45, %v1363_v62 }
 0x130   :  { %v2065_v58 = vld [vmem:[#allocation2 + $0x80] sm:$0xff]  ;;  %v971_v36 = vadd.f32 %v970_v23, %v5315_v12  ;;  %s5598_s30 = sld [smem:[#allocation4 + $0x10b]]  ;;  %v1556_v39 = vmax.f32 %v1555_v52, 0.0  ;;  %v967_v35 = vmul.f32 %v966_v31, %v5537_v16  ;;  %v978_v20 = vstv %s5554_s27 }
 0x131   :  { %v5595_v29 = vld [vmem:[#allocation2 + $0x82] sm:$0xff]  ;;  %v2069_v60 = vmul.f32 %v2068_v9, %v2065_v58  ;;  %v2078_v0 = vmul.f32 %v2077_v33, %v2065_v58  ;;  %s5602_s21 = sld [smem:[#allocation4 + $0x10c]]  ;;  %v2087_v7 = vmul.f32 %v2086_v15, %v2065_v58  ;;  %v2096_v10 = vmul.f32 %v2095_v4, %v2065_v58 }
 0x132   :  { %v2075_v50 = vmul.f32 %v2074_v32, %v5595_v29  ;;  %v976_v27 = vmul.f32 %v975_v1, %v5537_v16  ;;  %1557 = vst [vmem:[#allocation2 + $0xb1] sm:$0xff] %v1556_v39  ;;  %v5608_v9 = vadd.f32 %v967_v35, %v965_v48  ;;  %v974_v33 = vadd.f32 %v973_v25, %v971_v36  ;;  %s5610_s6 = sld [smem:[#allocation4 + $0x13b]] }
 0x133   :  { %v2070_v12 = vadd.f32 %v2069_v60, %v5248_v49  ;;  %v2079_v62 = vadd.f32 %v2078_v0, %v5513_v2  ;;  %v2088_v23 = vadd.f32 %v2087_v7, %v5516_v28  ;;  %v2097_v58 = vadd.f32 %v2096_v10, %v5529_v46  ;;  %s5616_s23 = sld [smem:[#allocation4 + $0x13c]] }
 0x134   :  { %v979_v32 = vmul.f32 %v978_v20, %v5535_v6  ;;  %v981_v15 = vstv %s5561_s17  ;;  %v5618_v4 = vadd.f32 %v976_v27, %v974_v33  ;;  %v984_v28 = vstv %s5570_s26  ;;  %s5623_s13 = sld [smem:[#allocation4 + $0x16b]] }
 0x135   :  { %v2073_v49 = vadd.f32 %v2072_v43, %v2070_v12  ;;  %v2082_v2 = vadd.f32 %v2081_v14, %v2079_v62  ;;  %v982_v36 = vmul.f32 %v981_v15, %v5128_v61  ;;  %v2091_v45 = vadd.f32 %v2090_v22, %v2088_v23  ;;  %s5633_s16 = sld [smem:[#allocation4 + $0x16c]]  ;;  %v2104_v22 = vld [vmem:[#allocation2 + $0x90] sm:$0xff] }
 0x136   :  { %v2100_v31 = vadd.f32 %v2099_v59, %v2097_v58  ;;  %v980_v7 = vadd.f32 %v979_v32, %v5334_v11  ;;  %v7030_v10 = vstv %s5432_s19  ;;  %v7031_v43 = vstv %s5462_s9  ;;  %s5637_s4 = sld [smem:[#allocation4 + $0x10d]] }
 0x137   :  { %v2084_v46 = vmul.f32 %v7030_v10, %v5595_v29  ;;  %v2093_v52 = vmul.f32 %v7031_v43, %v5595_v29  ;;  %v2101_v14 = vstv %s5495_s20  ;;  %v987_v48 = vstv %s5576_s10  ;;  %s5641_s19 = sld [smem:[#allocation4 + $0x19b]] }
 0x138   :  { %v2076_v25 = vadd.f32 %v2075_v50, %v2073_v49  ;;  %v983_v59 = vadd.f32 %v982_v36, %v980_v7  ;;  %v985_v1 = vmul.f32 %v984_v28, %v5537_v16  ;;  %v988_v11 = vmul.f32 %v987_v48, %v5535_v6  ;;  %s5649_s9 = sld [smem:[#allocation4 + $0x19c]] }
 0x139   :  { %v990_v39 = vstv %s5580_s15  ;;  %v993_v60 = vstv %s5587_s11  ;;  %v2107_v0 = vstv %s5598_s30  ;;  %v2110_v35 = vstv %s5602_s21  ;;  %s5651_s20 = sld [smem:[#allocation4 + $0x13d]] }
 0x13a   :  { %v2085_v20 = vadd.f32 %v2084_v46, %v2082_v2  ;;  %v5645_v27 = vadd.f32 %v985_v1, %v983_v59  ;;  %v989_v50 = vadd.f32 %v988_v11, %v5393_v17  ;;  %v991_v12 = vmul.f32 %v990_v39, %v5128_v61  ;;  %s2919_s1 = sld [smem:[#allocation4 + $0x36]] }
 0x13b   :  { %v2094_v6 = vadd.f32 %v2093_v52, %v2091_v45  ;;  %v2108_v62 = vmul.f32 %v2107_v0, %v2104_v22  ;;  %v2111_v33 = vmul.f32 %v2110_v35, %v5541_v8  ;;  %v2116_v23 = vstv %s5610_s6  ;;  %s2920_s29 = sld [smem:[#allocation4 + $0x37]] }
 0x13c   :  { %v992_v58 = vadd.f32 %v991_v12, %v989_v50  ;;  %v994_v32 = vmul.f32 %v993_v60, %v5537_v16  ;;  %v2117_v15 = vmul.f32 %v2116_v23, %v2104_v22  ;;  %v2119_v49 = vstv %s5616_s23  ;;  %s5662_s12 = sld [smem:[#allocation4 + $0x38]]  ;;  %v5684_v50 = vld [vmem:[#allocation2 + $0x92] sm:$0xff] }
 0x13d   :  { %v2102_v17 = vmul.f32 %v2101_v14, %v5595_v29  ;;  %v2109_v61 = vadd.f32 %v2108_v62, %v2076_v25  ;;  %v2120_v2 = vmul.f32 %v2119_v49, %v5541_v8  ;;  %v2125_v36 = vstv %s5623_s13  ;;  %s2967_s7 = sld [smem:[#allocation4 + $0x66]] }
 0x13e   :  { %v5660_v45 = vadd.f32 %v994_v32, %v992_v58  ;;  %v2118_v7 = vadd.f32 %v2117_v15, %v2085_v20  ;;  %v2126_v28 = vmul.f32 %v2125_v36, %v2104_v22  ;;  %v2128_v46 = vstv %s5633_s16  ;;  %s2968_s8 = sld [smem:[#allocation4 + $0x67]] }
 0x13f   :  { %v2103_v10 = vadd.f32 %v2102_v17, %v2100_v31  ;;  %v2112_v16 = vadd.f32 %v2111_v33, %v2109_v61  ;;  %v2134_v43 = vstv %s5641_s19  ;;  %v2129_v14 = vmul.f32 %v2128_v46, %v5541_v8  ;;  %s2969_s25 = sld [smem:[#allocation4 + $0x68]] }
 0x140   :  { %v5666_v52 = vadd.f32 %v2120_v2, %v2118_v7  ;;  %v2127_v29 = vadd.f32 %v2126_v28, %v2094_v6  ;;  %v2135_v48 = vmul.f32 %v2134_v43, %v2104_v22  ;;  %v2137_v25 = vstv %s5649_s9  ;;  %s3015_s18 = sld [smem:[#allocation4 + $0x96]] }
 0x141   :  { %v2138_v1 = vmul.f32 %v2137_v25, %v5541_v8  ;;  %s5673_s14 = sld [smem:[#allocation4 + $0x97]]  ;;  %v999_v11 = vstv %s2919_s1  ;;  %v1002_v39 = vstv %s2920_s29  ;;  %v2113_v8 = vstv %s5637_s4  ;;  %v5716_v25 = vld [vmem:[#allocation2 + $0xa0] sm:$0xff] }
 0x142   :  { %v5670_v59 = vadd.f32 %v2129_v14, %v2127_v29  ;;  %v2136_v31 = vadd.f32 %v2135_v48, %v2103_v10  ;;  %s5675_s22 = sld [smem:[#allocation4 + $0x98]]  ;;  %v1000_v60 = vmul.f32 %v999_v11, %v5565_v21  ;;  %v1003_v0 = vmul.f32 %v1002_v39, %v5220_v51 }
 0x143   :  { %s5681_s24 = sld [smem:[#allocation4 + $0xc6]]  ;;  %v1005_v35 = vstv %s5662_s12  ;;  %v1008_v20 = vstv %s2967_s7  ;;  %v2114_v17 = vmul.f32 %v2113_v8, %v5684_v50 }
 0x144   :  { %v5679_v22 = vadd.f32 %v2138_v1, %v2136_v31  ;;  %s5687_s2 = sld [smem:[#allocation4 + $0xc7]]  ;;  %v1001_v12 = vadd.f32 %v1000_v60, %v5608_v9  ;;  %v1009_v6 = vmul.f32 %v1008_v20, %v5565_v21  ;;  %v1011_v62 = vstv %s2968_s8 }
 0x145   :  { %s5691_s5 = sld [smem:[#allocation4 + $0xc8]]  ;;  %v1012_v33 = vmul.f32 %v1011_v62, %v5220_v51  ;;  %v1014_v23 = vstv %s2969_s25  ;;  %v1006_v32 = vmul.f32 %v1005_v35, %v5567_v3  ;;  %v2115_v43 = vadd.f32 %v2114_v17, %v2112_v16 }
 0x146   :  { %v1004_v58 = vadd.f32 %v1003_v0, %v1001_v12  ;;  %v1010_v15 = vadd.f32 %v1009_v6, %v5618_v4  ;;  %v1017_v49 = vstv %s3015_s18  ;;  %s3167_s28 = sld [smem:[#allocation4 + $0x10e]]  ;;  %v1015_v9 = vmul.f32 %v1014_v23, %v5567_v3 }
 0x147   :  { %v1018_v61 = vmul.f32 %v1017_v49, %v5565_v21  ;;  %v1020_v2 = vstv %s5673_s14  ;;  %s3168_s27 = sld [smem:[#allocation4 + $0x10f]]  ;;  %v2122_v6 = vstv %s5651_s20 }
 0x148   :  { %s5700_s17 = sld [smem:[#allocation4 + $0x16d]]  ;;  %v5702_v36 = vadd.f32 %v1006_v32, %v1004_v58  ;;  %v1013_v7 = vadd.f32 %v1012_v33, %v1010_v15  ;;  %v1021_v28 = vmul.f32 %v1020_v2, %v5220_v51  ;;  %v1023_v4 = vstv %s5675_s22 }
 0x149   :  { %s5706_s26 = sld [smem:[#allocation4 + $0x19d]]  ;;  %v1019_v10 = vadd.f32 %v1018_v61, %v5645_v27  ;;  %v1026_v46 = vstv %s5681_s24  ;;  %v1024_v31 = vmul.f32 %v1023_v4, %v5567_v3 }
 0x14a   :  { %v5710_v29 = vadd.f32 %v1015_v9, %v1013_v7  ;;  %v1027_v14 = vmul.f32 %v1026_v46, %v5565_v21  ;;  %v1029_v48 = vstv %s5687_s2  ;;  %s5714_s10 = sld [smem:[#allocation4 + $0x13e]] }
 0x14b   :  { %v1022_v1 = vadd.f32 %v1021_v28, %v1019_v10  ;;  %v1030_v11 = vmul.f32 %v1029_v48, %v5220_v51  ;;  %v1032_v39 = vstv %s5691_s5  ;;  %s5721_s15 = sld [smem:[#allocation4 + $0x13f]] }
 0x14c   :  { %v1028_v27 = vadd.f32 %v1027_v14, %v5660_v45  ;;  %s5724_s11 = sld [smem:[#allocation4 + $0x16e]]  ;;  %v2146_v16 = vstv %s3167_s28  ;;  %v1033_v51 = vmul.f32 %v1032_v39, %v5567_v3 }
 0x14d   :  { %v5726_v60 = vadd.f32 %v1024_v31, %v1022_v1  ;;  %s5728_s30 = sld [smem:[#allocation4 + $0x16f]]  ;;  %v2147_v21 = vmul.f32 %v2146_v16, %v5716_v25  ;;  %v2149_v0 = vstv %s3168_s27 }
 0x14e   :  { %v1031_v35 = vadd.f32 %v1030_v11, %v1028_v27  ;;  %v2150_v20 = vmul.f32 %v2149_v0, %v5573_v34  ;;  %s2859_s21 = sld [smem:[#allocation4 + $0x12]]  ;;  %v2131_v62 = vstv %s5700_s17 }
 0x14f   :  { %s2860_s6 = sld [smem:[#allocation4 + $0x13]]  ;;  %v2148_v45 = vadd.f32 %v2147_v21, %v2115_v43 }
 0x150   :  { %v5733_v8 = vadd.f32 %v1033_v51, %v1031_v35  ;;  %s2861_s23 = sld [smem:[#allocation4 + $0x14]] }
 0x151   :  { %s2862_s13 = sld [smem:[#allocation4 + $0x15]]  ;;  %v5735_v12 = vadd.f32 %v2150_v20, %v2148_v45 }
 0x152   :  { %s2863_s16 = sld [smem:[#allocation4 + $0x16]] }
 0x153   :  { %s2864_s4 = sld [smem:[#allocation4 + $0x17]] }
 0x154   :  { %s2867_s19 = sld [smem:[#allocation7 + $0x3]]  ;;  %v5739_v33 = vstv %s2859_s21 }
 0x155   :  { %v144_v3 = vmul.f32 %v4940_v26, %v5739_v33  ;;  %v5743_v23 = vstv %s2860_s6  ;;  %s5745_s9 = sld [smem:[#allocation4 + $0x39]]  ;;  %v229_v58 = vmul.f32 %v4951_v5, %v5739_v33  ;;  %v297_v32 = vmul.f32 %v5011_v18, %v5739_v33 }
 0x156   :  { %v146_v15 = vmul.f32 %v4960_v37, %v5743_v23  ;;  %v5753_v49 = vstv %s2861_s23  ;;  %s5755_s1 = sld [smem:[#allocation4 + $0x3a]]  ;;  %v230_v26 = vmul.f32 %v4971_v24, %v5743_v23  ;;  %v298_v17 = vmul.f32 %v5066_v41, %v5743_v23 }
 0x157   :  { %v149_v9 = vmul.f32 %v4981_v56, %v5753_v49  ;;  %v5763_v5 = vstv %s2862_s13  ;;  %s5765_s29 = sld [smem:[#allocation4 + $0x3b]]  ;;  %v232_v37 = vmul.f32 %v4992_v42, %v5753_v49  ;;  %v300_v18 = vmul.f32 %v5077_v54, %v5753_v49 }
 0x158   :  { %v147_v61 = vadd.f32 %v146_v15, %v144_v3  ;;  %v183_v24 = vmul.f32 %v4999_v57, %v5763_v5  ;;  %v5773_v2 = vstv %s2863_s16  ;;  %s5775_s12 = sld [smem:[#allocation4 + $0x69]]  ;;  %v231_v56 = vadd.f32 %v230_v26, %v229_v58 }
 0x159   :  { %v186_v41 = vmul.f32 %v5018_v40, %v5773_v2  ;;  %v5779_v7 = vstv %s2864_s4  ;;  %s5781_s7 = sld [smem:[#allocation4 + $0x6a]]  ;;  %v256_v42 = vmul.f32 %v5030_v53, %v5763_v5  ;;  %v258_v54 = vmul.f32 %v5049_v30, %v5773_v2 }
 0x15a   :  { %v150_v57 = vadd.f32 %v149_v9, %v147_v61  ;;  %v189_v28 = vmul.f32 %v5037_v55, %v5779_v7  ;;  %v5789_v4 = vstv %s2867_s19  ;;  %s5791_s8 = sld [smem:[#allocation4 + $0x6b]]  ;;  %v233_v40 = vadd.f32 %v232_v37, %v231_v56 }
 0x15b   :  { %s5793_s25 = sld [smem:[#allocation4 + $0x99]]  ;;  %v1038_v10 = vstv %s5745_s9  ;;  %v260_v46 = vmul.f32 %v5059_v63, %v5779_v7  ;;  %v299_v53 = vadd.f32 %v298_v17, %v297_v32  ;;  %v324_v30 = vmul.f32 %v5140_v44, %v5763_v5 }
 0x15c   :  { %v184_v43 = vadd.f32 %v183_v24, %v150_v57  ;;  %s5800_s18 = sld [smem:[#allocation4 + $0x9a]]  ;;  %v1039_v55 = vmul.f32 %v1038_v10, %v5591_v47  ;;  %v1041_v14 = vstv %s5755_s1  ;;  %v257_v48 = vadd.f32 %v256_v42, %v233_v40 }
 0x15d   :  { %s5804_s14 = sld [smem:[#allocation4 + $0x9b]]  ;;  %v1042_v1 = vmul.f32 %v1041_v14, %v5320_v13  ;;  %v1044_v31 = vstv %s5765_s29  ;;  %v301_v11 = vadd.f32 %v300_v18, %v299_v53  ;;  %v326_v63 = vmul.f32 %v5154_v19, %v5773_v2 }
 0x15e   :  { %v187_v39 = vadd.f32 %v186_v41, %v184_v43  ;;  %s5810_s22 = sld [smem:[#allocation4 + $0xc9]]  ;;  %v1040_v44 = vadd.f32 %v1039_v55, %v5702_v36  ;;  %v1045_v27 = vmul.f32 %v1044_v31, %v5593_v38  ;;  %v1047_v16 = vstv %s5775_s12 }
 0x15f   :  { %s5815_s24 = sld [smem:[#allocation4 + $0xca]]  ;;  %v1048_v21 = vmul.f32 %v1047_v16, %v5591_v47  ;;  %v1050_v0 = vstv %s5781_s7  ;;  %v259_v35 = vadd.f32 %v258_v54, %v257_v48  ;;  %v325_v51 = vadd.f32 %v324_v30, %v301_v11 }
 0x160   :  { %v190_v20 = vadd.f32 %v189_v28, %v187_v39  ;;  %s5819_s2 = sld [smem:[#allocation4 + $0xcb]]  ;;  %v1043_v19 = vadd.f32 %v1042_v1, %v1040_v44  ;;  %v1051_v45 = vmul.f32 %v1050_v0, %v5320_v13  ;;  %v1053_v36 = vstv %s5791_s8  ;;  %v7033_v1 = vld [vmem:[#allocation14_spill] sm:$0xff] }
 0x161   :  { %s5823_s5 = sld [smem:[#allocation4 + $0x19e]]  ;;  %v1049_v3 = vadd.f32 %v1048_v21, %v5710_v29  ;;  %v1054_v58 = vmul.f32 %v1053_v36, %v5593_v38  ;;  %v1056_v32 = vstv %s5793_s25  ;;  %v261_v15 = vadd.f32 %v260_v46, %v259_v35 }
 0x162   :  { %v206_v26 = vadd.f32 %v5789_v4, %v190_v20  ;;  %v5829_v17 = vadd.f32 %v1045_v27, %v1043_v19  ;;  %v1057_v9 = vmul.f32 %v1056_v32, %v5591_v47  ;;  %v1059_v37 = vstv %s5800_s18  ;;  %s5833_s28 = sld [smem:[#allocation4 + $0x3c]]  ;;  %v7036_v19 = vld [vmem:[#allocation17_spill] sm:$0xff] }
 0x163   :  { %v1052_v18 = vadd.f32 %v1051_v45, %v1049_v3  ;;  %v1060_v61 = vmul.f32 %v1059_v37, %v5320_v13  ;;  %v1062_v24 = vstv %s5804_s14  ;;  %v274_v29 = vadd.f32 %v261_v15, %v5789_v4  ;;  %s5838_s27 = sld [smem:[#allocation4 + $0x3d]] }
 0x164   :  { %v5840_v56 = vmax.f32 %v206_v26, 0.0  ;;  %v1058_v41 = vadd.f32 %v1057_v9, %v5726_v60  ;;  %v1063_v42 = vmul.f32 %v1062_v24, %v5593_v38  ;;  %v1065_v54 = vstv %s5810_s22  ;;  %s5845_s21 = sld [smem:[#allocation4 + $0x3e]] }
 0x165   :  { %v5847_v57 = vadd.f32 %v1054_v58, %v1052_v18  ;;  %v1066_v28 = vmul.f32 %v1065_v54, %v5591_v47  ;;  %v1068_v40 = vstv %s5815_s24  ;;  %v5851_v10 = vmax.f32 %v274_v29, 0.0  ;;  %s5853_s6 = sld [smem:[#allocation4 + $0x6c]]  ;;  %v7032_v47 = vld [vmem:[#allocation13_spill] sm:$0xff]  ;;  %v7037_v29 = vld [vmem:[#allocation18_spill] sm:$0xff] }
 0x166   :  { %209 = vst [vmem:[#allocation2 + $0xc1] sm:$0xff] %v5840_v56  ;;  %v1061_v46 = vadd.f32 %v1060_v61, %v1058_v41  ;;  %v1069_v60 = vmul.f32 %v1068_v40, %v5320_v13  ;;  %v1071_v53 = vstv %s5819_s2  ;;  %s5858_s23 = sld [smem:[#allocation4 + $0x6d]]  ;;  %v327_v30 = vadd.f32 %v326_v63, %v325_v51 }
 0x167   :  { %v2140_v43 = vstv %s5706_s26  ;;  %v1067_v55 = vadd.f32 %v1066_v28, %v5733_v8  ;;  %277 = vst [vmem:[#allocation2 + $0xd1] sm:$0xff] %v5851_v10  ;;  %s5863_s13 = sld [smem:[#allocation4 + $0x9c]]  ;;  %v328_v14 = vmul.f32 %v7032_v47, %v5779_v7  ;;  %v2123_v48 = vmul.f32 %v2122_v6, %v5684_v50  ;;  %v7034_v8 = vld [vmem:[#allocation15_spill] sm:$0xff] }
 0x168   :  { %v5870_v13 = vadd.f32 %v1063_v42, %v1061_v46  ;;  %s5872_s16 = sld [smem:[#allocation4 + $0x6e]]  ;;  %v365_v31 = vmul.f32 %v7033_v1, %v5739_v33  ;;  %v366_v11 = vmul.f32 %v7034_v8, %v5743_v23  ;;  %v2132_v63 = vmul.f32 %v2131_v62, %v5684_v50  ;;  %v7035_v23 = vld [vmem:[#allocation16_spill] sm:$0xff] }
 0x169   :  { %v1070_v39 = vadd.f32 %v1069_v60, %v1067_v55  ;;  %v1072_v44 = vmul.f32 %v1071_v53, %v5593_v38  ;;  %s5882_s20 = sld [smem:[#allocation4 + $0x9d]]  ;;  %v329_v6 = vadd.f32 %v328_v14, %v327_v30  ;;  %v2141_v27 = vmul.f32 %v2140_v43, %v5684_v50  ;;  %v7038_v14 = vld [vmem:[#allocation19_spill] sm:$0xff] }
 0x16a   :  { %v2155_v16 = vstv %s5714_s10  ;;  %s5886_s26 = sld [smem:[#allocation4 + $0xcc]]  ;;  %v367_v33 = vadd.f32 %v366_v11, %v365_v31  ;;  %v368_v21 = vmul.f32 %v7035_v23, %v5753_v49  ;;  %v2158_v0 = vstv %s5721_s15 }
 0x16b   :  { %v2164_v35 = vstv %s5724_s11  ;;  %v1073_v62 = vadd.f32 %v1072_v44, %v1070_v39  ;;  %s5892_s17 = sld [smem:[#allocation4 + $0xcd]]  ;;  %v342_v38 = vadd.f32 %v329_v6, %v5789_v4  ;;  %v2167_v51 = vstv %s5728_s30  ;;  %v7039_v39 = vld [vmem:[#allocation20_spill] sm:$0xff] }
 0x16c   :  { %s5896_s4 = sld [smem:[#allocation4 + $0x9e]]  ;;  %v1080_v50 = vstv %s5838_s27  ;;  %v369_v20 = vadd.f32 %v368_v21, %v367_v33  ;;  %v392_v45 = vmul.f32 %v7036_v19, %v5763_v5  ;;  %v5902_v36 = vadd.f32 %v2123_v48, %v5666_v52 }
 0x16d   :  { %v5905_v49 = vadd.f32 %v2132_v63, %v5670_v59  ;;  %v1077_v3 = vstv %s5833_s28  ;;  %s5908_s10 = sld [smem:[#allocation4 + $0xea]]  ;;  %v5910_v58 = vmax.f32 %v342_v38, 0.0  ;;  %v5913_v32 = vadd.f32 %v2141_v27, %v5679_v22  ;;  %v1074_v22 = vld [vmem:[#allocation2 + $0xc0] sm:$0xff] }
 0x16e   :  { %v5916_v15 = vmul.f32 %v2155_v16, %v5716_v25  ;;  %v5919_v5 = vmul.f32 %v2158_v0, %v5573_v34  ;;  %v1095_v52 = vstv %s5863_s13  ;;  %s5922_s15 = sld [smem:[#allocation4 + $0xeb]]  ;;  %v5925_v59 = vmul.f32 %v2164_v35, %v5716_v25  ;;  %v5943_v46 = vld [vmem:[#allocation2 + $0xc2] sm:$0xff]  ;;  %v7041_v16 = vld [vmem:[#allocation24_spill] sm:$0xff] }
 0x16f   :  { %v5928_v26 = vmul.f32 %v2167_v51, %v5573_v34  ;;  %v1081_v9 = vmul.f32 %v1080_v50, %v5840_v56  ;;  %v1089_v37 = vstv %s5858_s23  ;;  %s5932_s11 = sld [smem:[#allocation4 + $0xec]]  ;;  %345 = vst [vmem:[#allocation2 + $0xe1] sm:$0xff] %v5910_v58  ;;  %v1078_v18 = vmul.f32 %v1077_v3, %v1074_v22  ;;  %v7042_v0 = vld [vmem:[#allocation21_spill] sm:$0xff] }
 0x170   :  { %v1083_v61 = vstv %s5845_s21  ;;  %s5936_s30 = sld [smem:[#allocation4 + $0xed]]  ;;  %v393_v24 = vadd.f32 %v392_v45, %v369_v20  ;;  %v394_v41 = vmul.f32 %v7037_v29, %v5773_v2  ;;  %v1096_v42 = vmul.f32 %v1095_v52, %v1074_v22  ;;  %v7044_v20 = vld [vmem:[#allocation26_spill] sm:$0xff]  ;;  %v7046_v29 = vld [vmem:[#allocation28_spill] sm:$0xff] }
 0x171   :  { %v1098_v54 = vstv %s5882_s20  ;;  %v1104_v28 = vstv %s5886_s26  ;;  %v1107_v40 = vstv %s5892_s17  ;;  %s3107_s19 = sld [smem:[#allocation4 + $0xee]]  ;;  %v1086_v60 = vstv %s5853_s6 }
 0x172   :  { %v5947_v53 = vmul.f32 %v1089_v37, %v5840_v56  ;;  %v1105_v30 = vmul.f32 %v1104_v28, %v1074_v22  ;;  %v1108_v43 = vmul.f32 %v1107_v40, %v5840_v56  ;;  %s5950_s9 = sld [smem:[#allocation4 + $0xef]]  ;;  %v1084_v2 = vmul.f32 %v1083_v61, %v5943_v46  ;;  %v7045_v37 = vld [vmem:[#allocation25_spill] sm:$0xff] }
 0x173   :  { %s5952_s1 = sld [smem:[#allocation4 + $0xce]]  ;;  %v1092_v55 = vstv %s5872_s16  ;;  %v5957_v47 = vstv %s5908_s10  ;;  %v396_v48 = vmul.f32 %v7038_v14, %v5779_v7  ;;  %v1079_v1 = vadd.f32 %v1078_v18, %v5829_v17  ;;  %v7040_v17 = vld [vmem:[#allocation22_spill] sm:$0xff] }
 0x174   :  { %v1099_v31 = vmul.f32 %v1098_v54, %v5840_v56  ;;  %v1106_v8 = vadd.f32 %v1105_v30, %v1073_v62  ;;  %s5963_s29 = sld [smem:[#allocation4 + $0x3f]]  ;;  %v395_v11 = vadd.f32 %v394_v41, %v393_v24  ;;  %v1097_v63 = vadd.f32 %v1096_v42, %v5870_v13  ;;  %v7043_v62 = vld [vmem:[#allocation23_spill] sm:$0xff] }
 0x175   :  { %s5965_s12 = sld [smem:[#allocation4 + $0x19f]]  ;;  %v1306_v44 = vmul.f32 %v7039_v39, %v5957_v47  ;;  %v5971_v6 = vstv %s5922_s15  ;;  %v5974_v27 = vstv %s5932_s11  ;;  %v1087_v13 = vmul.f32 %v1086_v60, %v1074_v22  ;;  %v7047_v42 = vld [vmem:[#allocation27_spill] sm:$0xff]  ;;  %v7048_v60 = vld [vmem:[#allocation29_spill] sm:$0xff] }
 0x176   :  { %v1109_v7 = vadd.f32 %v1108_v43, %v1106_v8  ;;  %s5976_s7 = sld [smem:[#allocation7 + $0xb]]  ;;  %v1308_v56 = vmul.f32 %v7040_v17, %v5971_v6  ;;  %v1311_v33 = vmul.f32 %v7041_v16, %v5974_v27  ;;  %v5983_v23 = vstv %s5936_s30 }
 0x177   :  { %v5985_v21 = vstv %s3107_s19  ;;  %s5987_s8 = sld [smem:[#allocation4 + $0x40]]  ;;  %v1388_v35 = vmul.f32 %v7042_v0, %v5957_v47  ;;  %v1389_v38 = vmul.f32 %v7043_v62, %v5971_v6  ;;  %v1101_v51 = vstv %s5896_s4 }
 0x178   :  { %v1309_v50 = vadd.f32 %v1308_v56, %v1306_v44  ;;  %v1345_v19 = vmul.f32 %v7044_v20, %v5983_v23  ;;  %s5996_s25 = sld [smem:[#allocation4 + $0x41]]  ;;  %v397_v45 = vadd.f32 %v396_v48, %v395_v11  ;;  %v1082_v3 = vadd.f32 %v1081_v9, %v1079_v1  ;;  %v7049_v48 = vld [vmem:[#allocation30_spill] sm:$0xff] }
 0x179   :  { %v5999_v52 = vstv %s5950_s9  ;;  %s6001_s18 = sld [smem:[#allocation4 + $0x6f]]  ;;  %v1390_v22 = vadd.f32 %v1389_v38, %v1388_v35  ;;  %v1391_v18 = vmul.f32 %v7045_v37, %v5974_v27  ;;  %v1100_v61 = vadd.f32 %v1099_v31, %v1097_v63  ;;  %v1113_v63 = vld [vmem:[#allocation2 + $0xd0] sm:$0xff] }
 0x17a   :  { %v1312_v24 = vadd.f32 %v1311_v33, %v1309_v50  ;;  %v1348_v41 = vmul.f32 %v7046_v29, %v5985_v21  ;;  %s6007_s14 = sld [smem:[#allocation4 + $0x9f]]  ;;  %v1415_v54 = vmul.f32 %v7047_v42, %v5983_v23  ;;  %v1110_v28 = vstv %s5952_s1  ;;  %v6063_v29 = vld [vmem:[#allocation2 + $0xd2] sm:$0xff] }
 0x17b   :  { %s6012_s22 = sld [smem:[#allocation4 + $0xa0]]  ;;  %v1116_v9 = vstv %s5963_s29  ;;  %v1392_v40 = vadd.f32 %v1391_v18, %v1390_v22  ;;  %v1417_v30 = vmul.f32 %v7048_v60, %v5985_v21  ;;  %v1088_v43 = vadd.f32 %v1087_v13, %v5847_v57  ;;  %v7050_v57 = vld [vmem:[#allocation31_spill] sm:$0xff] }
 0x17c   :  { %v1346_v14 = vadd.f32 %v1345_v19, %v1312_v24  ;;  %v1351_v1 = vmul.f32 %v7049_v48, %v5999_v52  ;;  %s6020_s24 = sld [smem:[#allocation4 + $0x70]]  ;;  %v410_v31 = vadd.f32 %v397_v45, %v5789_v4  ;;  %v1085_v8 = vadd.f32 %v1084_v2, %v1082_v3 }
 0x17d   :  { %v1102_v11 = vmul.f32 %v1101_v51, %v5943_v46  ;;  %s6024_s2 = sld [smem:[#allocation4 + $0xcf]]  ;;  %v1416_v39 = vadd.f32 %v1415_v54, %v1392_v40  ;;  %v1419_v44 = vmul.f32 %v7050_v57, %v5999_v52  ;;  %v1111_v17 = vmul.f32 %v1110_v28, %v5943_v46 }
 0x17e   :  { %v1349_v56 = vadd.f32 %v1348_v41, %v1346_v14  ;;  %s6029_s28 = sld [smem:[#allocation4 + $0xd0]]  ;;  %v1117_v16 = vmul.f32 %v1116_v9, %v1113_v63  ;;  %v6031_v4 = vmax.f32 %v410_v31, 0.0  ;;  %v6034_v33 = vstv %s5976_s7  ;;  %v3518_v14 = vld [vmem:[%s6986_s0 + $0xc0] sm:$0xff] }
 0x17f   :  { %v1103_v2 = vadd.f32 %v1102_v11, %v1100_v61  ;;  %s6036_s27 = sld [smem:[#allocation4 + $0x71]]  ;;  %v1119_v13 = vstv %s5987_s8  ;;  %v1418_v0 = vadd.f32 %v1417_v30, %v1416_v39  ;;  %v1091_v35 = vadd.f32 %v5947_v53, %v1088_v43  ;;  %v3519_v11 = vld [vmem:[%s6986_s0 + $0xc1] sm:$0xff] }
 0x180   :  { %v1093_v62 = vmul.f32 %v1092_v55, %v5943_v46  ;;  %v1352_v38 = vadd.f32 %v1351_v1, %v1349_v56  ;;  %v1134_v51 = vstv %s6007_s14  ;;  %413 = vst [vmem:[#allocation2 + $0xf1] sm:$0xff] %v6031_v4  ;;  %s6045_s21 = sld [smem:[#allocation4 + $0x42]]  ;;  %v1112_v50 = vadd.f32 %v1111_v17, %v1109_v7 }
 0x181   :  { %s6047_s6 = sld [smem:[#allocation4 + $0xd1]]  ;;  %v1135_v20 = vmul.f32 %v1134_v51, %v1113_v63  ;;  %v1137_v19 = vstv %s6012_s22  ;;  %v1420_v45 = vadd.f32 %v1419_v44, %v1418_v0  ;;  %v1118_v3 = vadd.f32 %v1117_v16, %v1085_v8  ;;  %v3520_v44 = vld [vmem:[%s6986_s0 + $0xc2] sm:$0xff]  ;;  %v3521_v0 = vld [vmem:[%s6986_s0 + $0xd0] sm:$0xff] }
 0x182   :  { %v1366_v53 = vadd.f32 %v6034_v33, %v1352_v38  ;;  %v1120_v46 = vmul.f32 %v1119_v13, %v5851_v10  ;;  %v1138_v55 = vmul.f32 %v1137_v19, %v5851_v10  ;;  %s6053_s23 = sld [smem:[#allocation4 + $0x43]]  ;;  %v1125_v22 = vstv %s6001_s18 }
 0x183   :  { %v1136_v37 = vadd.f32 %v1135_v20, %v1103_v2  ;;  %v1143_v18 = vstv %s6024_s2  ;;  %v1430_v7 = vadd.f32 %v1420_v45, %v6034_v33  ;;  %v2173_v61 = vstv %s5823_s5  ;;  %s6061_s13 = sld [smem:[#allocation4 + $0xa1]]  ;;  %v3522_v45 = vld [vmem:[%s6986_s0 + $0xd1] sm:$0xff] }
 0x184   :  { %v6059_v24 = vmax.f32 %v1366_v53, 0.0  ;;  %v1144_v41 = vmul.f32 %v1143_v18, %v1113_v63  ;;  %v1146_v42 = vstv %s6029_s28  ;;  %v1094_v54 = vadd.f32 %v1093_v62, %v1091_v35  ;;  %s6071_s16 = sld [smem:[#allocation4 + $0x72]] }
 0x185   :  { %v6066_v28 = vadd.f32 %v1138_v55, %v1136_v37  ;;  %v1147_v9 = vmul.f32 %v1146_v42, %v5851_v10  ;;  %v6069_v40 = vmax.f32 %v1430_v7, 0.0  ;;  %v1122_v60 = vstv %s5996_s25  ;;  %s6075_s20 = sld [smem:[#allocation4 + $0xd2]]  ;;  %v3526_v42 = vld [vmem:[%s6986_s0 + $0xe2] sm:$0xff] }
 0x186   :  { %1368 = vst [vmem:[#allocation2 + $0xc1] sm:$0xff] %v6059_v24  ;;  %v1126_v30 = vmul.f32 %v1125_v22, %v1113_v63  ;;  %v1145_v43 = vadd.f32 %v1144_v41, %v1112_v50  ;;  %v1452_v48 = vmul.f32 %v3518_v14, %v5957_v47  ;;  %v2176_v1 = vstv %s5965_s12  ;;  %s6084_s4 = sld [smem:[#allocation4 + $0xd3]]  ;;  %v6111_v50 = vld [vmem:[#allocation2 + $0xe0] sm:$0xff]  ;;  %v3525_v41 = vld [vmem:[%s6986_s0 + $0xd2] sm:$0xff] }
 0x187   :  { %v1121_v31 = vadd.f32 %v1120_v46, %v1118_v3  ;;  %v1128_v8 = vstv %s6020_s24  ;;  %1432 = vst [vmem:[#allocation2 + $0xd1] sm:$0xff] %v6069_v40  ;;  %v1453_v63 = vmul.f32 %v3519_v11, %v5971_v6  ;;  %v1155_v57 = vstv %s6045_s21  ;;  %s6095_s19 = sld [smem:[#allocation4 + $0x44]]  ;;  %v3523_v46 = vld [vmem:[%s6986_s0 + $0xe0] sm:$0xff]  ;;  %v6159_v11 = vld [vmem:[#allocation2 + $0xf0] sm:$0xff] }
 0x188   :  { %v1148_v39 = vadd.f32 %v1147_v9, %v1145_v43  ;;  %v1455_v17 = vmul.f32 %v3520_v44, %v5974_v27  ;;  %v6099_v56 = vadd.f32 %v5916_v15, %v5902_v36  ;;  %v1123_v16 = vmul.f32 %v1122_v60, %v6063_v29  ;;  %s6107_s29 = sld [smem:[#allocation4 + $0x45]]  ;;  %v3524_v22 = vld [vmem:[%s6986_s0 + $0xe1] sm:$0xff] }
 0x189   :  { %v1149_v2 = vstv %s6047_s6  ;;  %v1454_v13 = vadd.f32 %v1453_v63, %v1452_v48  ;;  %v1479_v35 = vmul.f32 %v3521_v0, %v5983_v23  ;;  %v1127_v62 = vadd.f32 %v1126_v30, %v1094_v54  ;;  %s6114_s7 = sld [smem:[#allocation4 + $0x46]]  ;;  %v3527_v30 = vld [vmem:[%s6986_s0 + $0xf0] sm:$0xff] }
 0x18a   :  { %v1129_v38 = vmul.f32 %v1128_v8, %v5851_v10  ;;  %v1131_v51 = vstv %s6036_s27  ;;  %v1158_v36 = vstv %s6053_s23  ;;  %v1124_v15 = vadd.f32 %v1123_v16, %v1121_v31  ;;  %s6116_s8 = sld [smem:[#allocation4 + $0x73]]  ;;  %v6157_v8 = vld [vmem:[#allocation2 + $0xe2] sm:$0xff] }
 0x18b   :  { %v1156_v20 = vmul.f32 %v1155_v57, %v6111_v50  ;;  %v1456_v19 = vadd.f32 %v1455_v17, %v1454_v13  ;;  %v1481_v53 = vmul.f32 %v3522_v45, %v5985_v21  ;;  %v1150_v10 = vmul.f32 %v1149_v2, %v6063_v29  ;;  %s6133_s28 = sld [smem:[#allocation4 + $0x47]] }
 0x18c   :  { %v1182_v3 = vstv %s6075_s20  ;;  %v1516_v55 = vmul.f32 %v3523_v46, %v5957_v47  ;;  %v1517_v37 = vmul.f32 %v3524_v22, %v5971_v6  ;;  %s6135_s27 = sld [smem:[#allocation4 + $0xa2]]  ;;  %v1159_v18 = vmul.f32 %v1158_v36, %v5910_v58 }
 0x18d   :  { %v1480_v7 = vadd.f32 %v1479_v35, %v1456_v19  ;;  %v1483_v47 = vmul.f32 %v3525_v41, %v5999_v52  ;;  %v1519_v6 = vmul.f32 %v3526_v42, %v5974_v27  ;;  %v1151_v54 = vadd.f32 %v1150_v10, %v1148_v39  ;;  %s6146_s26 = sld [smem:[#allocation4 + $0xa3]]  ;;  %v3528_v39 = vld [vmem:[%s6986_s0 + $0xf1] sm:$0xff] }
 0x18e   :  { %v1183_v9 = vmul.f32 %v1182_v3, %v6111_v50  ;;  %v1518_v60 = vadd.f32 %v1517_v37, %v1516_v55  ;;  %v1543_v43 = vmul.f32 %v3527_v30, %v5983_v23  ;;  %v1185_v14 = vstv %s6084_s4  ;;  %s6154_s15 = sld [smem:[#allocation7 + $0x4]] }
 0x18f   :  { %v1482_v48 = vadd.f32 %v1481_v53, %v1480_v7  ;;  %v1157_v31 = vadd.f32 %v1156_v20, %v1124_v15  ;;  %v1161_v27 = vstv %s6095_s19  ;;  %v1545_v57 = vmul.f32 %v3528_v39, %v5985_v21  ;;  %s6167_s4 = sld [smem:[#allocation4 + $0x1b0]]  ;;  %v3529_v21 = vld [vmem:[%s6986_s0 + $0xf2] sm:$0xff] }
 0x190   :  { %v1520_v63 = vadd.f32 %v1519_v6, %v1518_v60  ;;  %v1194_v44 = vstv %s6107_s29  ;;  %v1197_v23 = vstv %s6114_s7  ;;  %v1162_v2 = vmul.f32 %v1161_v27, %v6157_v8  ;;  %s6171_s19 = sld [smem:[#allocation4 + $0x1b1]] }
 0x191   :  { %v1484_v17 = vadd.f32 %v1483_v47, %v1482_v48  ;;  %v1160_v16 = vadd.f32 %v1159_v18, %v1157_v31  ;;  %v1195_v13 = vmul.f32 %v1194_v44, %v6159_v11  ;;  %v1130_v0 = vadd.f32 %v1129_v38, %v1127_v62  ;;  %s6178_s29 = sld [smem:[#allocation4 + $0x1b2]] }
 0x192   :  { %v1164_v35 = vstv %s6071_s16  ;;  %v1544_v36 = vadd.f32 %v1543_v43, %v1520_v63  ;;  %v1547_v15 = vmul.f32 %v3529_v21, %v5999_v52  ;;  %v1186_v20 = vmul.f32 %v1185_v14, %v5910_v58  ;;  %s6183_s7 = sld [smem:[#allocation4 + $0x1c8]] }
 0x193   :  { %v1494_v19 = vadd.f32 %v1484_v17, %v6034_v33  ;;  %v1163_v45 = vadd.f32 %v1162_v2, %v1160_v16  ;;  %v1198_v53 = vmul.f32 %v1197_v23, %v6031_v4  ;;  %v2174_v62 = vmul.f32 %v2173_v61, %v5716_v25  ;;  %s6190_s0 = sld [smem:[#allocation4 + $0x1c9]]  ;;  %v6200_v61 = vld [vmem:[#allocation2 + $0xf2] sm:$0xff] }
 0x194   :  { %v1132_v38 = vmul.f32 %v1131_v51, %v6063_v29  ;;  %v1546_v10 = vadd.f32 %v1545_v57, %v1544_v36  ;;  %v1200_v3 = vstv %s6133_s28  ;;  %v2177_v52 = vmul.f32 %v2176_v1, %v5573_v34  ;;  %s6197_s16 = sld [smem:[#allocation4 + $0x1ca]] }
 0x195   :  { %v6195_v46 = vmax.f32 %v1494_v19, 0.0  ;;  %v1196_v55 = vadd.f32 %v1195_v13, %v1163_v45  ;;  %v1184_v22 = vadd.f32 %v1183_v9, %v1151_v54  ;;  %v1165_v25 = vmul.f32 %v1164_v35, %v6111_v50  ;;  %s6202_s5 = sld [smem:[#allocation4 + $0x1e0]] }
 0x196   :  { %v1133_v37 = vadd.f32 %v1132_v38, %v1130_v0  ;;  %v1548_v51 = vadd.f32 %v1547_v15, %v1546_v10  ;;  %v6206_v18 = vadd.f32 %v5919_v5, %v6099_v56  ;;  %v1201_v1 = vmul.f32 %v1200_v3, %v6200_v61  ;;  %s6210_s12 = sld [smem:[#allocation4 + $0x1e1]] }
 0x197   :  { %1496 = vst [vmem:[#allocation2 + $0xe1] sm:$0xff] %v6195_v46  ;;  %v1199_v34 = vadd.f32 %v1198_v53, %v1196_v55  ;;  %v6212_v7 = vadd.f32 %v1186_v20, %v1184_v22  ;;  %v2166_v41 = vadd.f32 %v5925_v59, %v5905_v49  ;;  %v1167_v47 = vstv %s6116_s8  ;;  %s6219_s25 = sld [smem:[#allocation4 + $0x1e2]] }
 0x198   :  { %v1558_v42 = vadd.f32 %v1548_v51, %v6034_v33  ;;  %v1230_v6 = vstv %s6154_s15  ;;  %v2175_v5 = vadd.f32 %v2174_v62, %v5913_v32  ;;  %s2981_s18 = sld [smem:[#allocation4 + $0x74]]  ;;  %v1168_v49 = vmul.f32 %v1167_v47, %v5910_v58 }
 0x199   :  { %v1202_v56 = vadd.f32 %v1201_v1, %v1199_v34  ;;  %v6223_v54 = vadd.f32 %v5928_v26, %v2166_v41  ;;  %s2982_s14 = sld [smem:[#allocation4 + $0x75]]  ;;  %v1166_v33 = vadd.f32 %v1165_v25, %v1133_v37  ;;  %v1140_v26 = vstv %s6061_s13  ;;  %v6290_v41 = vld [vmem:[#allocation2 + $0xa2] sm:$0xff] }
 0x19a   :  { %v6225_v9 = vmax.f32 %v1558_v42, 0.0  ;;  %v6227_v60 = vadd.f32 %v2177_v52, %v2175_v5  ;;  %s2983_s8 = sld [smem:[#allocation4 + $0x76]]  ;;  %v1173_v43 = vstv %s6135_s27  ;;  %v1141_v31 = vmul.f32 %v1140_v26, %v6063_v29 }
 0x19b   :  { %v1231_v59 = vadd.f32 %v1230_v6, %v1202_v56  ;;  %s6231_s22 = sld [smem:[#allocation4 + $0x1f8]]  ;;  %v1169_v30 = vadd.f32 %v1168_v49, %v1166_v33  ;;  %v1174_v44 = vmul.f32 %v1173_v43, %v6111_v50  ;;  %v1176_v17 = vstv %s6146_s26 }
 0x19c   :  { %1560 = vst [vmem:[#allocation2 + $0xf1] sm:$0xff] %v6225_v9  ;;  %s6235_s24 = sld [smem:[#allocation4 + $0x1f9]]  ;;  %v1142_v57 = vadd.f32 %v1141_v31, %v6066_v28  ;;  %v1177_v13 = vmul.f32 %v1176_v17, %v5910_v58  ;;  %v6318_v31 = vld [vmem:[#allocation2 + $0xb1] sm:$0xff] }
 0x19d   :  { %v6233_v32 = vmax.f32 %v1231_v59, 0.0  ;;  %s2984_s2 = sld [smem:[#allocation4 + $0x77]] }
 0x19e   :  { %s6239_s28 = sld [smem:[#allocation4 + $0x1fa]]  ;;  %v1170_v14 = vstv %s2981_s18  ;;  %v1175_v28 = vadd.f32 %v1174_v44, %v1142_v57 }
 0x19f   :  { %1233 = vst [vmem:[#allocation3 + $0x1] sm:$0xff] %v6233_v32  ;;  %s6242_s21 = sld [smem:[#allocation7 + $0x5]]  ;;  %v1203_v48 = vstv %s2982_s14  ;;  %v1171_v27 = vmul.f32 %v1170_v14, %v6157_v8 }
 0x1a0   :  { %v1204_v63 = vmul.f32 %v1203_v48, %v6159_v11  ;;  %s6247_s6 = sld [smem:[#allocation4 + $0x1b6]]  ;;  %v1206_v39 = vstv %s2983_s8  ;;  %v1178_v21 = vadd.f32 %v1177_v13, %v1175_v28 }
 0x1a1   :  { %s6249_s13 = sld [smem:[#allocation4 + $0x1b7]]  ;;  %v1172_v23 = vadd.f32 %v1171_v27, %v1169_v30  ;;  %v1207_v16 = vmul.f32 %v1206_v39, %v6031_v4 }
 0x1a2   :  { %s6253_s27 = sld [smem:[#allocation4 + $0x1ce]] }
 0x1a3   :  { %s6256_s23 = sld [smem:[#allocation4 + $0x1cf]]  ;;  %v1205_v29 = vadd.f32 %v1204_v63, %v1172_v23  ;;  %v1209_v2 = vstv %s2984_s2  ;;  %v6321_v63 = vld [vmem:[#allocation2 + $0xb2] sm:$0xff] }
 0x1a4   :  { %s6259_s20 = sld [smem:[#allocation4 + $0x1e6]]  ;;  %v1210_v0 = vmul.f32 %v1209_v2, %v6200_v61 }
 0x1a5   :  { %s3029_s17 = sld [smem:[#allocation4 + $0xa4]]  ;;  %v1208_v50 = vadd.f32 %v1207_v16, %v1205_v29  ;;  %v1234_v35 = vstv %s6242_s21 }
 0x1a6   :  { %s3030_s10 = sld [smem:[#allocation4 + $0xa5]] }
 0x1a7   :  { %s3031_s15 = sld [smem:[#allocation4 + $0xa6]]  ;;  %v1211_v36 = vadd.f32 %v1210_v0, %v1208_v50 }
 0x1a8   :  { %s6263_s11 = sld [smem:[#allocation4 + $0xa7]] }
 0x1a9   :  { %s6266_s26 = sld [smem:[#allocation7 + $0x6]]  ;;  %v1235_v20 = vadd.f32 %v1234_v35, %v1211_v36  ;;  %v6349_v35 = vld [vmem:[#allocation2 + $0xc2] sm:$0xff] }
 0x1aa   :  { %s3077_s30 = sld [smem:[#allocation4 + $0xd4]] }
 0x1ab   :  { %v1179_v15 = vstv %s3029_s17  ;;  %s3078_s9 = sld [smem:[#allocation4 + $0xd5]]  ;;  %v6272_v62 = vmax.f32 %v1235_v20, 0.0 }
 0x1ac   :  { %v1180_v58 = vmul.f32 %v1179_v15, %v6157_v8  ;;  %v1212_v19 = vstv %s3030_s10  ;;  %s3079_s1 = sld [smem:[#allocation4 + $0xd6]]  ;;  %v6357_v15 = vld [vmem:[#allocation2 + $0xd0] sm:$0xff] }
 0x1ad   :  { %v1213_v45 = vmul.f32 %v1212_v19, %v6159_v11  ;;  %v1215_v53 = vstv %s3031_s15  ;;  %s6270_s18 = sld [smem:[#allocation4 + $0xd7]]  ;;  %1238 = vst [vmem:[#allocation3 + $0x21] sm:$0xff] %v6272_v62 }
 0x1ae   :  { %v1181_v38 = vadd.f32 %v1180_v58, %v1178_v21  ;;  %s6274_s14 = sld [smem:[#allocation7 + $0x7]]  ;;  %v1216_v10 = vmul.f32 %v1215_v53, %v6031_v4  ;;  %v1218_v3 = vstv %s6263_s11 }
 0x1af   :  { %s3169_s8 = sld [smem:[#allocation4 + $0x110]]  ;;  %v1219_v1 = vmul.f32 %v1218_v3, %v6200_v61  ;;  %v1239_v47 = vstv %s6266_s26  ;;  %v6370_v3 = vld [vmem:[#allocation2 + $0xd2] sm:$0xff] }
 0x1b0   :  { %s6279_s2 = sld [smem:[#allocation4 + $0x111]]  ;;  %v1214_v52 = vadd.f32 %v1213_v45, %v1181_v38  ;;  %v1188_v55 = vstv %s3077_s30 }
 0x1b1   :  { %v1221_v22 = vstv %s3078_s9  ;;  %s6281_s21 = sld [smem:[#allocation4 + $0x112]]  ;;  %v1189_v37 = vmul.f32 %v1188_v55, %v6157_v8  ;;  %v6296_v8 = vld [vmem:[#allocation2 + $0xb0] sm:$0xff]  ;;  %v2500_v55 = vstv %s6167_s4 }
 0x1b2   :  { %v1222_v25 = vmul.f32 %v1221_v22, %v6159_v11  ;;  %v1224_v51 = vstv %s3079_s1  ;;  %s6285_s17 = sld [smem:[#allocation4 + $0x113]]  ;;  %v1217_v34 = vadd.f32 %v1216_v10, %v1214_v52  ;;  %v2502_v22 = vstv %s6171_s19 }
 0x1b3   :  { %s6288_s10 = sld [smem:[#allocation4 + $0x114]]  ;;  %v1190_v42 = vadd.f32 %v1189_v37, %v6212_v7  ;;  %v1225_v6 = vmul.f32 %v1224_v51, %v6031_v4  ;;  %v1227_v5 = vstv %s6270_s18  ;;  %v2508_v51 = vstv %s6183_s7 }
 0x1b4   :  { %s6294_s15 = sld [smem:[#allocation4 + $0x115]]  ;;  %v1220_v11 = vadd.f32 %v1219_v1, %v1217_v34  ;;  %v1228_v30 = vmul.f32 %v1227_v5, %v6200_v61  ;;  %v1244_v61 = vstv %s6274_s14  ;;  %v6381_v34 = vld [vmem:[#allocation2 + $0xe0] sm:$0xff] }
 0x1b5   :  { %s6298_s11 = sld [smem:[#allocation4 + $0x1e7]]  ;;  %v2152_v56 = vstv %s3169_s8  ;;  %v1223_v49 = vadd.f32 %v1222_v25, %v1190_v42  ;;  %v2505_v25 = vstv %s6178_s29  ;;  %v2510_v42 = vstv %s6190_s0 }
 0x1b6   :  { %s6302_s30 = sld [smem:[#allocation4 + $0x1fe]]  ;;  %v2185_v59 = vstv %s6279_s2  ;;  %v1240_v7 = vadd.f32 %v1239_v47, %v1220_v11  ;;  %v2153_v33 = vmul.f32 %v2152_v56, %v6290_v41  ;;  %v2513_v11 = vstv %s6197_s16 }
 0x1b7   :  { %s6305_s9 = sld [smem:[#allocation4 + $0x1ff]]  ;;  %v2188_v26 = vstv %s6281_s21  ;;  %v2186_v4 = vmul.f32 %v2185_v59, %v6296_v8  ;;  %v1226_v14 = vadd.f32 %v1225_v6, %v1223_v49  ;;  %v2516_v56 = vstv %s6202_s5 }
 0x1b8   :  { %s6310_s26 = sld [smem:[#allocation4 + $0x116]]  ;;  %v6313_v43 = vmax.f32 %v1240_v7, 0.0  ;;  %v2154_v48 = vadd.f32 %v2153_v33, %v5735_v12  ;;  %v2189_v27 = vmul.f32 %v6318_v31, %v2188_v26  ;;  %v2191_v39 = vstv %s6285_s17  ;;  %v6332_v12 = vld [vmem:[#allocation2 + $0xc0] sm:$0xff] }
 0x1b9   :  { %s6315_s1 = sld [smem:[#allocation4 + $0x117]]  ;;  %v1229_v57 = vadd.f32 %v1228_v30, %v1226_v14  ;;  %v2224_v23 = vstv %s6288_s10  ;;  %v2192_v2 = vmul.f32 %v2191_v39, %v6321_v63  ;;  %v2518_v49 = vstv %s6210_s12  ;;  %v2497_v33 = vld [vmem:[#allocation3] sm:$0xff] }
 0x1ba   :  { %s6324_s18 = sld [smem:[#allocation4 + $0x118]]  ;;  %1243 = vst [vmem:[#allocation3 + $0x41] sm:$0xff] %v6313_v43  ;;  %v2187_v44 = vadd.f32 %v2186_v4, %v2154_v48  ;;  %v2227_v17 = vstv %s6294_s15  ;;  %v2225_v50 = vmul.f32 %v2224_v23, %v6332_v12  ;;  %v2521_v59 = vstv %s6219_s25  ;;  %v6406_v39 = vld [vmem:[#allocation2 + $0xe2] sm:$0xff] }
 0x1bb   :  { %s6328_s8 = sld [smem:[#allocation4 + $0x119]]  ;;  %v1245_v29 = vadd.f32 %v1244_v61, %v1229_v57  ;;  %v2228_v0 = vmul.f32 %v2227_v17, %v6059_v24  ;;  %v2526_v7 = vstv %s6235_s24  ;;  %v2524_v26 = vstv %s6231_s22 }
 0x1bc   :  { %s6330_s2 = sld [smem:[#allocation4 + $0x11a]]  ;;  %v2190_v16 = vadd.f32 %v2189_v27, %v2187_v44  ;;  %v2503_v48 = vmul.f32 %v2502_v22, %v6233_v32  ;;  %v2511_v27 = vmul.f32 %v2510_v42, %v6233_v32  ;;  %v2529_v61 = vstv %s6239_s28  ;;  %v2499_v44 = vld [vmem:[#allocation3 + $0x2] sm:$0xff] }
 0x1bd   :  { %7051 = sst [smem:[#allocation32_spill]] %s6305_s9  ;;  %v6341_v13 = vmax.f32 %v1245_v29, 0.0  ;;  %v2519_v23 = vmul.f32 %v2518_v49, %v6233_v32  ;;  %v2527_v17 = vmul.f32 %v2526_v7, %v6233_v32  ;;  %v2574_v29 = vstv %s6247_s6 }
 0x1be   :  { %s6336_s21 = sld [smem:[#allocation4 + $0x11b]]  ;;  %v2193_v28 = vadd.f32 %v2192_v2, %v2190_v16  ;;  %v2230_v36 = vstv %s6310_s26  ;;  %v2501_v2 = vmul.f32 %v2500_v55, %v2497_v33  ;;  %v2506_v32 = vmul.f32 %v2505_v25, %v2499_v44 }
 0x1bf   :  { %s6339_s14 = sld [smem:[#allocation4 + $0x11c]]  ;;  %1248 = vst [vmem:[#allocation3 + $0x61] sm:$0xff] %v6341_v13  ;;  %v2263_v20 = vstv %s6315_s1  ;;  %v2231_v45 = vmul.f32 %v2230_v36, %v6349_v35  ;;  %v2525_v25 = vmul.f32 %v2524_v26, %v2497_v33 }
 0x1c0   :  { %s6343_s17 = sld [smem:[#allocation4 + $0x11d]]  ;;  %v2226_v21 = vadd.f32 %v2225_v50, %v2193_v28  ;;  %v2266_v58 = vstv %s6324_s18  ;;  %v2264_v38 = vmul.f32 %v2263_v20, %v6357_v15  ;;  %v2577_v28 = vstv %s6249_s13  ;;  %v6417_v50 = vld [vmem:[#allocation2 + $0xf0] sm:$0xff] }
 0x1c1   :  { %s6347_s10 = sld [smem:[#allocation4 + $0x11e]]  ;;  %v2267_v10 = vmul.f32 %v2266_v58, %v6069_v40  ;;  %v2269_v52 = vstv %s6328_s8  ;;  %v2583_v20 = vstv %s6253_s27 }
 0x1c2   :  { %s6353_s15 = sld [smem:[#allocation4 + $0x11f]]  ;;  %v2229_v19 = vadd.f32 %v2228_v0, %v2226_v21  ;;  %v2302_v1 = vstv %s6330_s2  ;;  %v2270_v5 = vmul.f32 %v2269_v52, %v6370_v3  ;;  %v2509_v21 = vmul.f32 %v2508_v51, %v2497_v33  ;;  %v6429_v52 = vld [vmem:[#allocation2 + $0xf2] sm:$0xff] }
 0x1c3   :  { %s6355_s3 = sld [smem:[#allocation7 + $0xc]]  ;;  %v2303_v4 = vmul.f32 %v2302_v1, %v6381_v34  ;;  %v2504_v51 = vadd.f32 %v2503_v48, %v2501_v2  ;;  %v2530_v1 = vmul.f32 %v2529_v61, %v2499_v44  ;;  %v2528_v48 = vadd.f32 %v2527_v17, %v2525_v25  ;;  %v2571_v17 = vld [vmem:[#allocation3 + $0x20] sm:$0xff] }
 0x1c4   :  { %s6362_s26 = sld [smem:[#allocation4 + $0x1b3]]  ;;  %v2232_v53 = vadd.f32 %v2231_v45, %v2229_v19  ;;  %v2305_v47 = vstv %s6336_s21  ;;  %v2514_v45 = vmul.f32 %v2513_v11, %v2499_v44  ;;  %v2512_v42 = vadd.f32 %v2511_v27, %v2509_v21 }
 0x1c5   :  { %s6364_s9 = sld [smem:[#allocation4 + $0x1b4]]  ;;  %v2306_v14 = vmul.f32 %v2305_v47, %v6195_v46  ;;  %v2308_v57 = vstv %s6339_s14  ;;  %v2592_v27 = vstv %s6259_s20  ;;  %v6502_v25 = vmul.f32 %v2583_v20, %v2571_v17 }
 0x1c6   :  { %s6368_s1 = sld [smem:[#allocation4 + $0x1b5]]  ;;  %v2265_v37 = vadd.f32 %v2264_v38, %v2232_v53  ;;  %v2341_v0 = vstv %s6343_s17  ;;  %v2309_v19 = vmul.f32 %v2308_v57, %v6406_v39  ;;  %v2517_v53 = vmul.f32 %v2516_v56, %v2497_v33 }
 0x1c7   :  { %s6373_s18 = sld [smem:[#allocation4 + $0x1cb]]  ;;  %v2344_v36 = vstv %s6347_s10  ;;  %v2522_v38 = vmul.f32 %v2521_v59, %v2499_v44  ;;  %v2342_v55 = vmul.f32 %v2341_v0, %v6417_v50  ;;  %v2586_v56 = vstv %s6256_s23 }
 0x1c8   :  { %v2268_v6 = vadd.f32 %v2267_v10, %v2265_v37  ;;  %s6390_s4 = sld [smem:[#allocation4 + $0x1e3]]  ;;  %v2345_v22 = vmul.f32 %v2344_v36, %v6225_v9  ;;  %v2347_v37 = vstv %s6353_s15  ;;  %v6458_v57 = vadd.f32 %v2506_v32, %v2504_v51 }
 0x1c9   :  { %s6396_s19 = sld [smem:[#allocation4 + $0x1e4]]  ;;  %v2348_v49 = vmul.f32 %v2347_v37, %v6429_v52  ;;  %v2377_v61 = vstv %s6355_s3  ;;  %v2595_v44 = vstv %s6298_s11  ;;  %v2601_v0 = vstv %s6302_s30 }
 0x1ca   :  { %v2271_v30 = vadd.f32 %v2270_v5, %v2268_v6  ;;  %s6401_s29 = sld [smem:[#allocation4 + $0x1e5]]  ;;  %v6498_v51 = vmul.f32 %v2574_v29, %v2571_v17  ;;  %v2535_v29 = vstv %s6362_s26 }
 0x1cb   :  { %7052 = sst [smem:[#allocation33_spill]] %s6364_s9 }
 0x1cc   :  { %7053 = sst [smem:[#allocation34_spill]] %s6368_s1  ;;  %v2304_v16 = vadd.f32 %v2303_v4, %v2271_v30 }
 0x1cd   :  { %s6377_s9 = sld [smem:[#allocation4 + $0x1cc]] }
 0x1ce   :  { %s6385_s1 = sld [smem:[#allocation4 + $0x1cd]]  ;;  %v2307_v58 = vadd.f32 %v2306_v14, %v2304_v16  ;;  %v2520_v14 = vadd.f32 %v2519_v23, %v2517_v53 }
 0x1cf   :  { %s6409_s7 = sld [smem:[#allocation4 + $0x140]] }
 0x1d0   :  { %s6414_s0 = sld [smem:[#allocation4 + $0x141]]  ;;  %v2310_v10 = vadd.f32 %v2309_v19, %v2307_v58  ;;  %v6474_v53 = vadd.f32 %v2522_v38, %v2520_v14 }
 0x1d1   :  { %s6421_s16 = sld [smem:[#allocation4 + $0x142]] }
 0x1d2   :  { %s6425_s5 = sld [smem:[#allocation4 + $0x143]]  ;;  %v2343_v11 = vadd.f32 %v2342_v55, %v2310_v10  ;;  %v6476_v10 = vadd.f32 %v2530_v1, %v2528_v48  ;;  %v6484_v55 = vmul.f32 %v2586_v56, %v6272_v62 }
 0x1d3   :  { %s6427_s12 = sld [smem:[#allocation4 + $0x144]] }
 0x1d4   :  { %s6434_s25 = sld [smem:[#allocation4 + $0x145]]  ;;  %v2346_v33 = vadd.f32 %v2345_v22, %v2343_v11  ;;  %v6489_v22 = vmul.f32 %v2595_v44, %v6272_v62 }
 0x1d5   :  { %s6436_s22 = sld [smem:[#allocation4 + $0x1fb]]  ;;  %v2161_v47 = vstv %s6409_s7 }
 0x1d6   :  { %s6439_s24 = sld [smem:[#allocation4 + $0x1fc]]  ;;  %v2162_v6 = vmul.f32 %v2161_v47, %v6290_v41  ;;  %v2194_v5 = vstv %s6414_s0  ;;  %v2349_v16 = vadd.f32 %v2348_v49, %v2346_v33  ;;  %v6508_v47 = vmul.f32 %v2592_v27, %v2571_v17 }
 0x1d7   :  { %s6445_s28 = sld [smem:[#allocation4 + $0x146]]  ;;  %v2195_v59 = vmul.f32 %v2194_v5, %v6296_v8  ;;  %v2197_v7 = vstv %s6421_s16  ;;  %v2544_v49 = vstv %s6373_s18 }
 0x1d8   :  { %s6449_s8 = sld [smem:[#allocation4 + $0x147]]  ;;  %v2163_v26 = vadd.f32 %v2162_v6, %v6206_v18  ;;  %v2198_v30 = vmul.f32 %v6318_v31, %v2197_v7  ;;  %v2200_v4 = vstv %s6425_s5  ;;  %v6463_v18 = vadd.f32 %v2514_v45, %v2512_v42 }
 0x1d9   :  { %s7054_s2 = sld [smem:[#allocation32_spill]]  ;;  %v2201_v23 = vmul.f32 %v2200_v4, %v6321_v63  ;;  %v2378_v21 = vadd.f32 %v2377_v61, %v2349_v16  ;;  %v2233_v19 = vstv %s6427_s12  ;;  %v6481_v45 = vmul.f32 %v2577_v28, %v6272_v62 }
 0x1da   :  { %s6456_s23 = sld [smem:[#allocation4 + $0x148]]  ;;  %v2196_v2 = vadd.f32 %v2195_v59, %v2163_v26  ;;  %v2236_v32 = vstv %s6434_s25  ;;  %v2234_v1 = vmul.f32 %v2233_v19, %v6332_v12  ;;  %v6510_v42 = vmul.f32 %v2601_v0, %v2571_v17 }
 0x1db   :  { %s6461_s21 = sld [smem:[#allocation4 + $0x149]]  ;;  %v2379_v37 = vmax.f32 %v2378_v21, 0.0  ;;  %v2547_v59 = vstv %s6377_s9  ;;  %v2553_v26 = vstv %s6390_s4  ;;  %v2562_v48 = vstv %s6436_s22 }
 0x1dc   :  { %s6467_s14 = sld [smem:[#allocation4 + $0x1fd]]  ;;  %v2199_v58 = vadd.f32 %v2198_v30, %v2196_v2  ;;  %v2556_v30 = vstv %s6396_s19  ;;  %v2565_v27 = vstv %s6439_s24 }
 0x1dd   :  { %s6470_s3 = sld [smem:[#allocation4 + $0x14a]]  ;;  %2381 = vst [vmem:[#allocation3 + $0x11] sm:$0xff] %v2379_v37  ;;  %v2239_v11 = vstv %s6445_s28  ;;  %v2557_v17 = vmul.f32 %v2556_v30, %v2379_v37 }
 0x1de   :  { %s6486_s20 = sld [smem:[#allocation4 + $0x14b]]  ;;  %v2202_v28 = vadd.f32 %v2201_v23, %v2199_v58  ;;  %v2272_v56 = vstv %s6449_s8  ;;  %v2240_v14 = vmul.f32 %v2239_v11, %v6349_v35  ;;  %v2548_v23 = vmul.f32 %v2547_v59, %v2379_v37 }
 0x1df   :  { %v2604_v36 = vstv %s7054_s2  ;;  %s7055_s11 = sld [smem:[#allocation33_spill]]  ;;  %v2273_v61 = vmul.f32 %v2272_v56, %v6357_v15 }
 0x1e0   :  { %v6492_v38 = vmul.f32 %v2604_v36, %v6272_v62  ;;  %s7056_s30 = sld [smem:[#allocation34_spill]]  ;;  %v2237_v62 = vmul.f32 %v2236_v32, %v6059_v24  ;;  %v2235_v5 = vadd.f32 %v2234_v1, %v2202_v28  ;;  %v2275_v7 = vstv %s6456_s23 }
 0x1e1   :  { %s6494_s17 = sld [smem:[#allocation4 + $0x14c]]  ;;  %v2278_v33 = vstv %s6461_s21  ;;  %v2276_v0 = vmul.f32 %v2275_v7, %v6069_v40  ;;  %v2566_v32 = vmul.f32 %v2565_v27, %v2379_v37 }
 0x1e2   :  { %s6504_s13 = sld [smem:[#allocation4 + $0x14d]]  ;;  %v2238_v4 = vadd.f32 %v2237_v62, %v2235_v5  ;;  %v2279_v36 = vmul.f32 %v2278_v33, %v6370_v3 }
 0x1e3   :  { %s6514_s6 = sld [smem:[#allocation4 + $0x170]]  ;;  %v2311_v44 = vstv %s6470_s3 }
 0x1e4   :  { %s6519_s27 = sld [smem:[#allocation4 + $0x171]]  ;;  %v2241_v2 = vadd.f32 %v2240_v14, %v2238_v4  ;;  %v2314_v21 = vstv %s6486_s20  ;;  %v2532_v19 = vld [vmem:[#allocation3 + $0x10] sm:$0xff]  ;;  %v2312_v1 = vmul.f32 %v2311_v44, %v6381_v34 }
 0x1e5   :  { %v2538_v20 = vstv %s7055_s11  ;;  %s6523_s10 = sld [smem:[#allocation4 + $0x14e]]  ;;  %v2536_v11 = vmul.f32 %v2535_v29, %v2532_v19  ;;  %v2554_v59 = vmul.f32 %v2553_v26, %v2532_v19  ;;  %v2563_v7 = vmul.f32 %v2562_v48, %v2532_v19 }
 0x1e6   :  { %v2541_v6 = vstv %s7056_s30  ;;  %s6530_s15 = sld [smem:[#allocation4 + $0x172]]  ;;  %v2539_v16 = vmul.f32 %v2538_v20, %v2379_v37  ;;  %v2274_v28 = vadd.f32 %v2273_v61, %v2241_v2  ;;  %v2545_v20 = vmul.f32 %v2544_v49, %v2532_v19 }
 0x1e7   :  { %s6534_s26 = sld [smem:[#allocation4 + $0x14f]]  ;;  %v2317_v62 = vstv %s6494_s17  ;;  %v2315_v33 = vmul.f32 %v2314_v21, %v6195_v46  ;;  %v2537_v37 = vadd.f32 %v2536_v11, %v6458_v57  ;;  %v2555_v49 = vadd.f32 %v2554_v59, %v6474_v53 }
 0x1e8   :  { %s6540_s9 = sld [smem:[#allocation4 + $0x173]]  ;;  %v2350_v30 = vstv %s6504_s13  ;;  %v2546_v4 = vadd.f32 %v2545_v20, %v6463_v18  ;;  %v2277_v14 = vadd.f32 %v2276_v0, %v2274_v28  ;;  %v2564_v26 = vadd.f32 %v2563_v7, %v6476_v10 }
 0x1e9   :  { %s6542_s18 = sld [smem:[#allocation7 + $0xd]]  ;;  %v2170_v58 = vstv %s6514_s6  ;;  %v2540_v27 = vadd.f32 %v2539_v16, %v2537_v37  ;;  %v2558_v44 = vadd.f32 %v2557_v17, %v2555_v49  ;;  %v2550_v0 = vstv %s6385_s1  ;;  %v2534_v16 = vld [vmem:[#allocation3 + $0x12] sm:$0xff] }
 0x1ea   :  { %s6548_s4 = sld [smem:[#allocation4 + $0x174]]  ;;  %v2171_v5 = vmul.f32 %v2170_v58, %v6290_v41  ;;  %v2203_v56 = vstv %s6519_s27  ;;  %v2549_v18 = vadd.f32 %v2548_v23, %v2546_v4  ;;  %v2280_v61 = vadd.f32 %v2279_v36, %v2277_v14 }
 0x1eb   :  { %s6550_s19 = sld [smem:[#allocation4 + $0x175]]  ;;  %v2204_v48 = vmul.f32 %v2203_v56, %v6296_v8  ;;  %v2567_v53 = vadd.f32 %v2566_v32, %v2564_v26  ;;  %v2559_v21 = vstv %s6401_s29  ;;  %v2353_v19 = vstv %s6523_s10 }
 0x1ec   :  { %s6556_s7 = sld [smem:[#allocation4 + $0x176]]  ;;  %v2172_v29 = vadd.f32 %v2171_v5, %v6223_v54  ;;  %v2206_v57 = vstv %s6530_s15  ;;  %v2313_v58 = vadd.f32 %v2312_v1, %v2280_v61  ;;  %v2568_v36 = vstv %s6467_s14 }
 0x1ed   :  { %s6560_s0 = sld [smem:[#allocation4 + $0x177]]  ;;  %v2207_v54 = vmul.f32 %v6318_v31, %v2206_v57  ;;  %v2318_v11 = vmul.f32 %v2317_v62, %v6406_v39  ;;  %v2351_v20 = vmul.f32 %v2350_v30, %v6417_v50  ;;  %v2354_v5 = vmul.f32 %v2353_v19, %v6225_v9 }
 0x1ee   :  { %s6565_s16 = sld [smem:[#allocation4 + $0x178]]  ;;  %v2205_v10 = vadd.f32 %v2204_v48, %v2172_v29  ;;  %v2209_v2 = vstv %s6540_s9  ;;  %v2316_v28 = vadd.f32 %v2315_v33, %v2313_v58  ;;  %v2542_v33 = vmul.f32 %v2541_v6, %v2534_v16 }
 0x1ef   :  { %s6569_s5 = sld [smem:[#allocation4 + $0x179]]  ;;  %v2210_v17 = vmul.f32 %v2209_v2, %v6321_v63  ;;  %v2356_v37 = vstv %s6534_s26  ;;  %v2551_v4 = vmul.f32 %v2550_v0, %v2534_v16  ;;  %v2560_v14 = vmul.f32 %v2559_v21, %v2534_v16 }
 0x1f0   :  { %s6572_s12 = sld [smem:[#allocation4 + $0x17a]]  ;;  %v2208_v23 = vadd.f32 %v2207_v54, %v2205_v10  ;;  %v2242_v32 = vstv %s6548_s4  ;;  %v2319_v62 = vadd.f32 %v2318_v11, %v2316_v28  ;;  %v2569_v29 = vmul.f32 %v2568_v36, %v2534_v16 }
 0x1f1   :  { %s6578_s25 = sld [smem:[#allocation4 + $0x17b]]  ;;  %v2245_v1 = vstv %s6550_s19  ;;  %v2243_v59 = vmul.f32 %v2242_v32, %v6332_v12  ;;  %v2543_v26 = vadd.f32 %v2542_v33, %v2540_v27  ;;  %v2357_v6 = vmul.f32 %v2356_v37, %v6429_v52 }
 0x1f2   :  { %s6581_s22 = sld [smem:[#allocation4 + $0x17c]]  ;;  %v2211_v56 = vadd.f32 %v2210_v17, %v2208_v23  ;;  %v2246_v7 = vmul.f32 %v2245_v1, %v6059_v24  ;;  %v2248_v30 = vstv %s6556_s7  ;;  %v2352_v48 = vadd.f32 %v2351_v20, %v2319_v62 }
 0x1f3   :  { %s6587_s1 = sld [smem:[#allocation4 + $0x17d]]  ;;  %v2281_v57 = vstv %s6560_s0  ;;  %v2382_v61 = vstv %s6542_s18  ;;  %v2249_v10 = vmul.f32 %v2248_v30, %v6349_v35  ;;  %v2552_v2 = vadd.f32 %v2551_v4, %v2549_v18 }
 0x1f4   :  { %s6593_s29 = sld [smem:[#allocation4 + $0x1a0]]  ;;  %v2244_v49 = vadd.f32 %v2243_v59, %v2211_v56  ;;  %v2284_v24 = vstv %s6565_s16  ;;  %v2561_v0 = vadd.f32 %v2560_v14, %v2558_v44  ;;  %v2570_v27 = vadd.f32 %v2569_v29, %v2567_v53 }
 0x1f5   :  { %s6599_s24 = sld [smem:[#allocation4 + $0x1a1]]  ;;  %v2355_v21 = vadd.f32 %v2354_v5, %v2352_v48  ;;  %v2282_v19 = vmul.f32 %v2281_v57, %v6357_v15  ;;  %v2285_v16 = vmul.f32 %v2284_v24, %v6069_v40  ;;  %v2287_v36 = vstv %s6569_s5 }
 0x1f6   :  { %s6601_s28 = sld [smem:[#allocation4 + $0x1a2]]  ;;  %v2247_v54 = vadd.f32 %v2246_v7, %v2244_v49  ;;  %v2576_v53 = vadd.f32 %v6498_v51, %v2543_v26  ;;  %v2320_v32 = vstv %s6572_s12  ;;  %v2288_v1 = vmul.f32 %v2287_v36, %v6370_v3 }
 0x1f7   :  { %s6605_s8 = sld [smem:[#allocation4 + $0x1a3]]  ;;  %v2358_v23 = vadd.f32 %v2357_v6, %v2355_v21  ;;  %v2323_v40 = vstv %s6578_s25  ;;  %v2321_v33 = vmul.f32 %v2320_v32, %v6381_v34  ;;  %v2585_v62 = vadd.f32 %v6502_v25, %v2552_v2  ;;  %v3532_v32 = vld [vmem:[#allocation2 + $0xd1] sm:$0xff] }
 0x1f8   :  { %s6610_s2 = sld [smem:[#allocation4 + $0x1a4]]  ;;  %v2250_v58 = vadd.f32 %v2249_v10, %v2247_v54  ;;  %v6634_v5 = vadd.f32 %v6481_v45, %v2576_v53  ;;  %v2324_v30 = vmul.f32 %v2323_v40, %v6195_v46  ;;  %v2594_v29 = vadd.f32 %v6508_v47, %v2561_v0  ;;  %v3531_v10 = vld [vmem:[#allocation2 + $0xc1] sm:$0xff] }
 0x1f9   :  { %s6612_s23 = sld [smem:[#allocation4 + $0x1a5]]  ;;  %v2383_v20 = vadd.f32 %v2382_v61, %v2358_v23  ;;  %v6658_v14 = vadd.f32 %v6484_v55, %v2585_v62  ;;  %v2359_v49 = vstv %s6587_s1  ;;  %v2603_v55 = vadd.f32 %v6510_v42, %v2570_v27 }
 0x1fa   :  { %s6614_s21 = sld [smem:[#allocation4 + $0x17e]]  ;;  %v2179_v18 = vstv %s6593_s29  ;;  %v2283_v17 = vadd.f32 %v2282_v19, %v2250_v58  ;;  %v6670_v6 = vadd.f32 %v6489_v22, %v2594_v29  ;;  %v2360_v2 = vmul.f32 %v2359_v49, %v6417_v50 }
 0x1fb   :  { %s6619_s14 = sld [smem:[#allocation4 + $0x17f]]  ;;  %v2212_v44 = vstv %s6599_s24  ;;  %v2180_v28 = vmul.f32 %v2179_v18, %v6290_v41  ;;  %v6641_v7 = vmax.f32 %v2383_v20, 0.0  ;;  %v6682_v22 = vadd.f32 %v6492_v38, %v2603_v55  ;;  %v6694_v38 = vld [vmem:[#allocation3 + $0x22] sm:$0xff] }
 0x1fc   :  { %s6624_s3 = sld [smem:[#allocation7 + $0xe]]  ;;  %v2215_v11 = vstv %s6601_s28  ;;  %v2286_v56 = vadd.f32 %v2285_v16, %v2283_v17  ;;  %v2213_v41 = vmul.f32 %v2212_v44, %v6296_v8 }
 0x1fd   :  { %s6631_s20 = sld [smem:[#allocation4 + $0x1a6]]  ;;  %v2181_v51 = vadd.f32 %v2180_v28, %v6227_v60  ;;  %v2216_v59 = vmul.f32 %v6318_v31, %v2215_v11  ;;  %v2218_v45 = vstv %s6605_s8  ;;  %v2326_v60 = vstv %s6581_s22  ;;  %2386 = vst [vmem:[#allocation3 + $0x31] sm:$0xff] %v6641_v7 }
 0x1fe   :  { %s6636_s11 = sld [smem:[#allocation4 + $0x1a7]]  ;;  %v2289_v37 = vadd.f32 %v2288_v1, %v2286_v56  ;;  %v2251_v31 = vstv %s6610_s2  ;;  %v2219_v48 = vmul.f32 %v2218_v45, %v6321_v63  ;;  %v2327_v57 = vmul.f32 %v2326_v60, %v6406_v39 }
 0x1ff   :  { %s6644_s30 = sld [smem:[#allocation4 + $0x1a8]]  ;;  %v2214_v8 = vadd.f32 %v2213_v41, %v2181_v51  ;;  %v2254_v4 = vstv %s6612_s23  ;;  %v2252_v54 = vmul.f32 %v2251_v31, %v6332_v12 }
 0x200   :  { %s6650_s17 = sld [smem:[#allocation4 + $0x1a9]]  ;;  %v2322_v25 = vadd.f32 %v2321_v33, %v2289_v37  ;;  %v2362_v24 = vstv %s6614_s21  ;;  %v2255_v63 = vmul.f32 %v3531_v10, %v2254_v4 }
 0x201   :  { %s6653_s13 = sld [smem:[#allocation4 + $0x1aa]]  ;;  %v2217_v26 = vadd.f32 %v2216_v59, %v2214_v8  ;;  %v2365_v0 = vstv %s6619_s14  ;;  %v2363_v42 = vmul.f32 %v2362_v24, %v6225_v9 }
 0x202   :  { %s6662_s6 = sld [smem:[#allocation4 + $0x1ab]]  ;;  %v2325_v47 = vadd.f32 %v2324_v30, %v2322_v25  ;;  %v2366_v18 = vmul.f32 %v2365_v0, %v6429_v52  ;;  %v2387_v20 = vstv %s6624_s3 }
 0x203   :  { %s6667_s27 = sld [smem:[#allocation4 + $0x1ac]]  ;;  %v2220_v61 = vadd.f32 %v2219_v48, %v2217_v26  ;;  %v2257_v21 = vstv %s6631_s20  ;;  %v6736_v48 = vld [vmem:[#allocation3 + $0x40] sm:$0xff] }
 0x204   :  { %s6673_s10 = sld [smem:[#allocation4 + $0x1ad]]  ;;  %v2328_v58 = vadd.f32 %v2327_v57, %v2325_v47  ;;  %v2290_v19 = vstv %s6636_s11  ;;  %v2258_v23 = vmul.f32 %v2257_v21, %v6349_v35  ;;  %v6703_v11 = vld [vmem:[#allocation3 + $0x30] sm:$0xff]  ;;  %v6755_v21 = vld [vmem:[#allocation3 + $0x42] sm:$0xff] }
 0x205   :  { %s6679_s15 = sld [smem:[#allocation4 + $0x1b8]]  ;;  %v2253_v27 = vadd.f32 %v2252_v54, %v2220_v61  ;;  %v2293_v12 = vstv %s6644_s30  ;;  %v2291_v44 = vmul.f32 %v2290_v19, %v6357_v15  ;;  %v6721_v8 = vld [vmem:[#allocation3 + $0x32] sm:$0xff] }
 0x206   :  { %s6686_s26 = sld [smem:[#allocation4 + $0x1b9]]  ;;  %v2361_v16 = vadd.f32 %v2360_v2, %v2328_v58  ;;  %v2294_v28 = vmul.f32 %v3532_v32, %v2293_v12  ;;  %v2296_v35 = vstv %s6650_s17 }
 0x207   :  { %s6689_s9 = sld [smem:[#allocation4 + $0x1ba]]  ;;  %v2256_v36 = vadd.f32 %v2255_v63, %v2253_v27  ;;  %v2329_v1 = vstv %s6653_s13  ;;  %v2297_v33 = vmul.f32 %v2296_v35, %v6370_v3 }
 0x208   :  { %s6692_s18 = sld [smem:[#allocation4 + $0x1bb]]  ;;  %v2364_v53 = vadd.f32 %v2363_v42, %v2361_v16  ;;  %v2332_v40 = vstv %s6662_s6  ;;  %v2330_v31 = vmul.f32 %v2329_v1, %v6381_v34 }
 0x209   :  { %s6698_s4 = sld [smem:[#allocation4 + $0x1bc]]  ;;  %v2259_v17 = vadd.f32 %v2258_v23, %v2256_v36  ;;  %v2333_v3 = vmul.f32 %v2332_v40, %v6195_v46  ;;  %v2335_v26 = vstv %s6667_s27 }
 0x20a   :  { %s6700_s19 = sld [smem:[#allocation4 + $0x1ae]]  ;;  %v2367_v15 = vadd.f32 %v2366_v18, %v2364_v53  ;;  %v2368_v57 = vstv %s6673_s10  ;;  %v2336_v10 = vmul.f32 %v2335_v26, %v6406_v39 }
 0x20b   :  { %s6708_s7 = sld [smem:[#allocation4 + $0x1bd]]  ;;  %v2580_v56 = vstv %s6679_s15  ;;  %v2292_v51 = vadd.f32 %v2291_v44, %v2259_v17  ;;  %v2369_v0 = vmul.f32 %v2368_v57, %v6417_v50  ;;  %v6815_v57 = vld [vmem:[#allocation3 + $0x62] sm:$0xff] }
 0x20c   :  { %v2581_v41 = vmul.f32 %v2580_v56, %v6694_v38  ;;  %v2613_v59 = vstv %s6686_s26  ;;  %s6714_s0 = sld [smem:[#allocation4 + $0x1be]]  ;;  %v2388_v62 = vadd.f32 %v2387_v20, %v2367_v15  ;;  %v6787_v15 = vld [vmem:[#allocation3 + $0x60] sm:$0xff] }
 0x20d   :  { %v2616_v45 = vstv %s6689_s9  ;;  %s6717_s16 = sld [smem:[#allocation4 + $0x1af]]  ;;  %v2295_v37 = vadd.f32 %v2294_v28, %v2292_v51  ;;  %v2614_v60 = vmul.f32 %v2613_v59, %v6703_v11 }
 0x20e   :  { %v2582_v30 = vadd.f32 %v2581_v41, %v6634_v5  ;;  %s6725_s5 = sld [smem:[#allocation4 + $0x1bf]]  ;;  %v2619_v4 = vstv %s6692_s18  ;;  %v6728_v29 = vmax.f32 %v2388_v62, 0.0  ;;  %v2617_v49 = vmul.f32 %v2616_v45, %v6641_v7 }
 0x20f   :  { %s6730_s12 = sld [smem:[#allocation7 + $0xf]]  ;;  %v2298_v25 = vadd.f32 %v2297_v33, %v2295_v37  ;;  %v2652_v34 = vstv %s6698_s4  ;;  %v2620_v55 = vmul.f32 %v2619_v4, %v6721_v8 }
 0x210   :  { %v2615_v5 = vadd.f32 %v2614_v60, %v2582_v30  ;;  %s6734_s25 = sld [smem:[#allocation4 + $0x1c0]]  ;;  %2391 = vst [vmem:[#allocation3 + $0x51] sm:$0xff] %v6728_v29  ;;  %v2371_v47 = vstv %s6700_s19  ;;  %v2653_v2 = vmul.f32 %v2652_v34, %v6736_v48 }
 0x211   :  { %v2331_v46 = vadd.f32 %v2330_v31, %v2298_v25  ;;  %s6741_s22 = sld [smem:[#allocation4 + $0x1c1]]  ;;  %v2655_v61 = vstv %s6708_s7  ;;  %v2372_v27 = vmul.f32 %v2371_v47, %v6225_v9 }
 0x212   :  { %v2618_v24 = vadd.f32 %v2617_v49, %v2615_v5  ;;  %s6745_s1 = sld [smem:[#allocation4 + $0x1c2]]  ;;  %v2658_v58 = vstv %s6714_s0  ;;  %v2656_v12 = vmul.f32 %v2655_v61, %v6313_v43 }
 0x213   :  { %v2334_v54 = vadd.f32 %v2333_v3, %v2331_v46  ;;  %s6749_s29 = sld [smem:[#allocation4 + $0x1c3]]  ;;  %v2374_v39 = vstv %s6717_s16  ;;  %v2659_v23 = vmul.f32 %v2658_v58, %v6755_v21 }
 0x214   :  { %v2621_v63 = vadd.f32 %v2620_v55, %v2618_v24  ;;  %s6753_s24 = sld [smem:[#allocation4 + $0x1c4]]  ;;  %v2691_v16 = vstv %s6725_s5  ;;  %v2375_v53 = vmul.f32 %v2374_v39, %v6429_v52 }
 0x215   :  { %v2337_v42 = vadd.f32 %v2336_v10, %v2334_v54  ;;  %s3365_s28 = sld [smem:[#allocation4 + $0x1d0]]  ;;  %v2392_v28 = vstv %s6730_s12 }
 0x216   :  { %v2654_v19 = vadd.f32 %v2653_v2, %v2621_v63  ;;  %s6762_s8 = sld [smem:[#allocation4 + $0x1d1]]  ;;  %v2694_v44 = vstv %s6734_s25 }
 0x217   :  { %v2370_v50 = vadd.f32 %v2369_v0, %v2337_v42  ;;  %s6765_s2 = sld [smem:[#allocation4 + $0x1d2]]  ;;  %v6767_v18 = vld [vmem:[#allocation3 + $0x50] sm:$0xff]  ;;  %v2697_v20 = vstv %s6741_s22  ;;  %v2695_v56 = vmul.f32 %v2694_v44, %v6728_v29 }
 0x218   :  { %v2657_v36 = vadd.f32 %v2656_v12, %v2654_v19  ;;  %s6770_s23 = sld [smem:[#allocation4 + $0x1d3]]  ;;  %v2692_v32 = vmul.f32 %v2691_v16, %v6767_v18  ;;  %v6779_v35 = vld [vmem:[#allocation3 + $0x52] sm:$0xff]  ;;  %v2730_v51 = vstv %s6745_s1 }
 0x219   :  { %v2373_v9 = vadd.f32 %v2372_v27, %v2370_v50  ;;  %s6774_s21 = sld [smem:[#allocation4 + $0x1d4]]  ;;  %v2698_v62 = vmul.f32 %v2697_v20, %v6779_v35  ;;  %v2733_v30 = vstv %s6749_s29  ;;  %v2731_v25 = vmul.f32 %v2730_v51, %v6787_v15 }
 0x21a   :  { %v2660_v17 = vadd.f32 %v2659_v23, %v2657_v36  ;;  %s6777_s14 = sld [smem:[#allocation4 + $0x1c5]]  ;;  %v2734_v34 = vmul.f32 %v2733_v30, %v6341_v13  ;;  %v2736_v24 = vstv %s6753_s24 }
 0x21b   :  { %v2376_v1 = vadd.f32 %v2375_v53, %v2373_v9  ;;  %s6783_s3 = sld [smem:[#allocation4 + $0x1d5]]  ;;  %v2589_v52 = vstv %s3365_s28  ;;  %v2737_v2 = vmul.f32 %v2736_v24, %v6815_v57 }
 0x21c   :  { %v2693_v40 = vadd.f32 %v2692_v32, %v2660_v17  ;;  %s6785_s20 = sld [smem:[#allocation4 + $0x1c6]]  ;;  %v2590_v41 = vmul.f32 %v2589_v52, %v6694_v38  ;;  %v2622_v59 = vstv %s6762_s8 }
 0x21d   :  { %v2393_v33 = vadd.f32 %v2392_v28, %v2376_v1  ;;  %s6793_s11 = sld [smem:[#allocation4 + $0x1d6]]  ;;  %v2625_v37 = vstv %s6765_s2  ;;  %v2623_v31 = vmul.f32 %v2622_v59, %v6703_v11 }
 0x21e   :  { %v2696_v45 = vadd.f32 %v2695_v56, %v2693_v40  ;;  %s6796_s30 = sld [smem:[#allocation4 + $0x1c7]]  ;;  %v2591_v60 = vadd.f32 %v2590_v41, %v6658_v14  ;;  %v2628_v5 = vstv %s6770_s23  ;;  %v2626_v26 = vmul.f32 %v2625_v37, %v6641_v7 }
 0x21f   :  { %v6801_v3 = vmax.f32 %v2393_v33, 0.0  ;;  %s6804_s17 = sld [smem:[#allocation4 + $0x1d7]]  ;;  %v2661_v46 = vstv %s6774_s21  ;;  %v2629_v47 = vmul.f32 %v2628_v5, %v6721_v8 }
 0x220   :  { %v2699_v4 = vadd.f32 %v2698_v62, %v2696_v45  ;;  %s6807_s13 = sld [smem:[#allocation7 + $0x10]]  ;;  %v2624_v49 = vadd.f32 %v2623_v31, %v2591_v60  ;;  %v2662_v63 = vmul.f32 %v2661_v46, %v6736_v48  ;;  %v2769_v58 = vstv %s6777_s14 }
 0x221   :  { %2396 = vst [vmem:[#allocation3 + $0x71] sm:$0xff] %v6801_v3  ;;  %s6812_s6 = sld [smem:[#allocation4 + $0x1d8]]  ;;  %v2664_v54 = vstv %s6783_s3 }
 0x222   :  { %v2732_v14 = vadd.f32 %v2731_v25, %v2699_v4  ;;  %s6818_s27 = sld [smem:[#allocation4 + $0x1d9]]  ;;  %v2627_v55 = vadd.f32 %v2626_v26, %v2624_v49  ;;  %v2665_v27 = vmul.f32 %v2664_v54, %v6313_v43  ;;  %v2772_v16 = vstv %s6785_s20 }
 0x223   :  { %s6821_s10 = sld [smem:[#allocation4 + $0x1da]]  ;;  %v2667_v0 = vstv %s6793_s11  ;;  %v2773_v28 = vmul.f32 %v2772_v16, %v6801_v3 }
 0x224   :  { %v2735_v61 = vadd.f32 %v2734_v34, %v2732_v14  ;;  %s6824_s15 = sld [smem:[#allocation4 + $0x1db]]  ;;  %v2630_v10 = vadd.f32 %v2629_v47, %v2627_v55  ;;  %v2668_v36 = vmul.f32 %v2667_v0, %v6755_v21  ;;  %v2775_v9 = vstv %s6796_s30 }
 0x225   :  { %s6828_s26 = sld [smem:[#allocation4 + $0x1dc]]  ;;  %v2700_v12 = vstv %s6804_s17 }
 0x226   :  { %v2663_v42 = vadd.f32 %v2662_v63, %v2630_v10  ;;  %s3389_s9 = sld [smem:[#allocation4 + $0x1e8]]  ;;  %v2738_v19 = vadd.f32 %v2737_v2, %v2735_v61  ;;  %v2701_v17 = vmul.f32 %v2700_v12, %v6767_v18  ;;  %v2805_v45 = vstv %s6807_s13 }
 0x227   :  { %s6834_s18 = sld [smem:[#allocation4 + $0x1e9]]  ;;  %v2703_v44 = vstv %s6812_s6 }
 0x228   :  { %v6836_v39 = vld [vmem:[#allocation3 + $0x70] sm:$0xff]  ;;  %v2666_v50 = vadd.f32 %v2665_v27, %v2663_v42  ;;  %s6840_s4 = sld [smem:[#allocation4 + $0x1ea]]  ;;  %v2706_v20 = vstv %s6818_s27  ;;  %v2704_v40 = vmul.f32 %v2703_v44, %v6728_v29 }
 0x229   :  { %v2770_v23 = vmul.f32 %v2769_v58, %v6836_v39  ;;  %s6844_s19 = sld [smem:[#allocation4 + $0x1eb]]  ;;  %v6846_v43 = vld [vmem:[#allocation3 + $0x72] sm:$0xff]  ;;  %v2739_v56 = vstv %s6821_s10  ;;  %v2707_v37 = vmul.f32 %v2706_v20, %v6779_v35 }
 0x22a   :  { %v2669_v53 = vadd.f32 %v2668_v36, %v2666_v50  ;;  %s6850_s7 = sld [smem:[#allocation4 + $0x1ec]]  ;;  %v2776_v41 = vmul.f32 %v2775_v9, %v6846_v43  ;;  %v2742_v31 = vstv %s6824_s15  ;;  %v2740_v49 = vmul.f32 %v2739_v56, %v6787_v15 }
 0x22b   :  { %v2771_v32 = vadd.f32 %v2770_v23, %v2738_v19  ;;  %s6853_s0 = sld [smem:[#allocation4 + $0x1dd]]  ;;  %v2745_v34 = vstv %s6828_s26  ;;  %v6904_v23 = vld [vmem:[#allocation3 + $0x41] sm:$0xff] }
 0x22c   :  { %v2702_v1 = vadd.f32 %v2701_v17, %v2669_v53  ;;  %s6858_s16 = sld [smem:[#allocation4 + $0x1ed]]  ;;  %v2598_v52 = vstv %s3389_s9  ;;  %v2746_v0 = vmul.f32 %v2745_v34, %v6815_v57 }
 0x22d   :  { %v2774_v51 = vadd.f32 %v2773_v28, %v2771_v32  ;;  %s6861_s5 = sld [smem:[#allocation4 + $0x1de]]  ;;  %v2599_v59 = vmul.f32 %v2598_v52, %v6694_v38  ;;  %v2631_v33 = vstv %s6834_s18 }
 0x22e   :  { %v2705_v62 = vadd.f32 %v2704_v40, %v2702_v1  ;;  %s6867_s12 = sld [smem:[#allocation4 + $0x1ee]]  ;;  %v2634_v30 = vstv %s6840_s4  ;;  %v2632_v25 = vmul.f32 %v2631_v33, %v6703_v11 }
 0x22f   :  { %v2777_v60 = vadd.f32 %v2776_v41, %v2774_v51  ;;  %s6870_s25 = sld [smem:[#allocation4 + $0x1df]]  ;;  %v2600_v4 = vadd.f32 %v2599_v59, %v6670_v6  ;;  %v2637_v26 = vstv %s6844_s19  ;;  %v2635_v24 = vmul.f32 %v2634_v30, %v6641_v7 }
 0x230   :  { %v2708_v5 = vadd.f32 %v2707_v37, %v2705_v62  ;;  %s6876_s22 = sld [smem:[#allocation4 + $0x1ef]]  ;;  %v2743_v6 = vmul.f32 %v2742_v31, %v6341_v13  ;;  %v2670_v47 = vstv %s6850_s7  ;;  %v2638_v63 = vmul.f32 %v2637_v26, %v6721_v8 }
 0x231   :  { %v2806_v14 = vadd.f32 %v2805_v45, %v2777_v60  ;;  %s6879_s1 = sld [smem:[#allocation7 + $0x11]]  ;;  %v2633_v46 = vadd.f32 %v2632_v25, %v2600_v4  ;;  %v2778_v54 = vstv %s6853_s0  ;;  %v2671_v27 = vmul.f32 %v2670_v47, %v6736_v48 }
 0x232   :  { %v2741_v55 = vadd.f32 %v2740_v49, %v2708_v5  ;;  %s6884_s29 = sld [smem:[#allocation4 + $0x1f0]]  ;;  %v2673_v58 = vstv %s6858_s16  ;;  %v2779_v12 = vmul.f32 %v2778_v54, %v6836_v39  ;;  %v3534_v54 = vld [vmem:[#allocation3 + $0x61] sm:$0xff] }
 0x233   :  { %v2807_v61 = vmax.f32 %v2806_v14, 0.0  ;;  %s6888_s24 = sld [smem:[#allocation4 + $0x1f1]]  ;;  %v2636_v10 = vadd.f32 %v2635_v24, %v2633_v46  ;;  %v2781_v13 = vstv %s6861_s5  ;;  %v2674_v44 = vmul.f32 %v6904_v23, %v2673_v58  ;;  %s3588_s5 = smov [#allocation9]  }
 0x234   :  { %v2744_v2 = vadd.f32 %v2743_v6, %v2741_v55  ;;  %s6892_s28 = sld [smem:[#allocation4 + $0x1f2]]  ;;  %v2676_v16 = vstv %s6867_s12  ;;  %v2782_v53 = vmul.f32 %v2781_v13, %v6801_v3  ;;  %s2829_s12 = sshll.u32 %s3588_s5, 4  ;;  %s2830_s12 = int_to_ptr.vmem [resolvable:$true] %s2829_s12 }
 0x235   :  { %2808 = vst [vmem:[#allocation9] sm:$0xff] %v2807_v61  ;;  %s6896_s8 = sld [smem:[#allocation4 + $0x1f3]]  ;;  %v2639_v42 = vadd.f32 %v2638_v63, %v2636_v10  ;;  %v2784_v50 = vstv %s6870_s25  ;;  %v2677_v28 = vmul.f32 %v2676_v16, %v6755_v21  ;;  %s3559_s25 = scalar_lea.vmem %s2830_s12, 512 }
 0x236   :  { %v2747_v19 = vadd.f32 %v2746_v0, %v2744_v2  ;;  %s6900_s2 = sld [smem:[#allocation4 + $0x1f4]]  ;;  %v2709_v17 = vstv %s6876_s22  ;;  %v2785_v1 = vmul.f32 %v2784_v50, %v6846_v43  ;;  %p3560_p10 = scmp.ne.s32.totalorder %s2830_s12, %s3559_s25 }
 0x237   :  { %v2672_v36 = vadd.f32 %v2671_v27, %v2639_v42  ;;  %s3413_s23 = sld [smem:[#allocation4 + $0x200]]  ;;  %v2809_v56 = vstv %s6879_s1  ;;  %v2710_v51 = vmul.f32 %v2709_v17, %v6767_v18  ;;  %p3564_p11 = scmp.lt.s32.totalorder %s2830_s12, %s2830_s12 }
 0x238   :  { %v2780_v9 = vadd.f32 %v2779_v12, %v2747_v19  ;;  %s6909_s21 = sld [smem:[#allocation4 + $0x201]]  ;;  %v2712_v40 = vstv %s6884_s29  ;;  %p3565_p12 = scmp.lt.s32.totalorder %s3559_s25, %s3559_s25 }
 0x239   :  { %v2675_v32 = vadd.f32 %v2674_v44, %v2672_v36  ;;  %s6912_s14 = sld [smem:[#allocation4 + $0x202]]  ;;  %v2715_v59 = vstv %s6888_s24  ;;  %v2713_v45 = vmul.f32 %v2712_v40, %v6728_v29 }
 0x23a   :  { %v2783_v20 = vadd.f32 %v2782_v53, %v2780_v9  ;;  %s6916_s3 = sld [smem:[#allocation4 + $0x203]]  ;;  %v2748_v30 = vstv %s6892_s28  ;;  %v2716_v25 = vmul.f32 %v2715_v59, %v6779_v35  ;;  %p3566_p13 = por %p3565_p12, %p3564_p11 }
 0x23b   :  { %v2678_v52 = vadd.f32 %v2677_v28, %v2675_v32  ;;  %s6920_s20 = sld [smem:[#allocation4 + $0x204]]  ;;  %v2751_v26 = vstv %s6896_s8 }
 0x23c   :  { %v2786_v41 = vadd.f32 %v2785_v1, %v2783_v20  ;;  %s6922_s11 = sld [smem:[#allocation4 + $0x1f5]]  ;;  %v2754_v55 = vstv %s6900_s2  ;;  %v2752_v10 = vmul.f32 %v3534_v54, %v2751_v26  ;;  %p3567_p0 = pnand %p3566_p13, %p3560_p10 }
 0x23d   :  { %v2711_v33 = vadd.f32 %v2710_v51, %v2678_v52  ;;  %s6926_s30 = sld [smem:[#allocation4 + $0x205]]  ;;  %v2607_v62 = vstv %s3413_s23  ;;  %v2755_v58 = vmul.f32 %v2754_v55, %v6815_v57 }
 0x23e   :  { %v2810_v37 = vadd.f32 %v2809_v56, %v2786_v41  ;;  %s6928_s17 = sld [smem:[#allocation4 + $0x1f6]]  ;;  %v2608_v60 = vmul.f32 %v2607_v62, %v6694_v38  ;;  %v2640_v31 = vstv %s6909_s21  ;;  %v2749_v38 = vmul.f32 %v2748_v30, %v6787_v15 }
 0x23f   :  { %v2714_v4 = vadd.f32 %v2713_v45, %v2711_v33  ;;  %s6934_s13 = sld [smem:[#allocation4 + $0x206]]  ;;  %v2643_v5 = vstv %s6912_s14  ;;  %v2641_v34 = vmul.f32 %v2640_v31, %v6703_v11 }
 0x240   :  { %v2811_v49 = vmax.f32 %v2810_v37, 0.0  ;;  %s6937_s6 = sld [smem:[#allocation4 + $0x1f7]]  ;;  %v2609_v14 = vadd.f32 %v2608_v60, %v6682_v22  ;;  %v2646_v24 = vstv %s6916_s3  ;;  %v2644_v47 = vmul.f32 %v2643_v5, %v6641_v7 }
 0x241   :  { %v2717_v46 = vadd.f32 %v2716_v25, %v2714_v4  ;;  %s6943_s27 = sld [smem:[#allocation4 + $0x207]]  ;;  %v2679_v22 = vstv %s6920_s20  ;;  %v2647_v2 = vmul.f32 %v2646_v24, %v6721_v8 }
 0x242   :  { %2813 = vst [vmem:[#allocation9 + $0x8] sm:$0xff] %v2811_v49  ;;  %v2642_v6 = vadd.f32 %v2641_v34, %v2609_v14  ;;  %s6948_s10 = sld [smem:[#allocation4 + $0x208]]  ;;  %v2787_v11 = vstv %s6922_s11  ;;  %v2680_v27 = vmul.f32 %v2679_v22, %v6736_v48 }
 0x243   :  { %v2750_v61 = vadd.f32 %v2749_v38, %v2717_v46  ;;  %s6951_s15 = sld [smem:[#allocation7 + $0x12]]  ;;  %v2682_v7 = vstv %s6926_s30  ;;  %v2788_v12 = vmul.f32 %v2787_v11, %v6836_v39 }
 0x244   :  { %v2645_v63 = vadd.f32 %v2644_v47, %v2642_v6  ;;  %s6956_s26 = sld [smem:[#allocation4 + $0x209]]  ;;  %v2790_v13 = vstv %s6928_s17  ;;  %v2683_v36 = vmul.f32 %v6904_v23, %v2682_v7 }
 0x245   :  { %v2753_v0 = vadd.f32 %v2752_v10, %v2750_v61  ;;  %s6962_s9 = sld [smem:[#allocation4 + $0x20a]]  ;;  %v2685_v16 = vstv %s6934_s13  ;;  %v2791_v9 = vmul.f32 %v2790_v13, %v6801_v3 }
 0x246   :  { %v2648_v42 = vadd.f32 %v2647_v2, %v2645_v63  ;;  %v2793_v8 = vstv %s6937_s6  ;;  %s3424_s18 = sld [smem:[#allocation4 + $0x20b]]  ;;  %v2686_v48 = vmul.f32 %v2685_v16, %v6755_v21 }
 0x247   :  { %v2756_v19 = vadd.f32 %v2755_v58, %v2753_v0  ;;  %v2718_v53 = vstv %s6943_s27  ;;  %v2794_v28 = vmul.f32 %v2793_v8, %v6846_v43  ;;  %s3425_s4 = sld [smem:[#allocation4 + $0x20c]] }
 0x248   :  { %v2681_v50 = vadd.f32 %v2680_v27, %v2648_v42  ;;  %v2721_v20 = vstv %s6948_s10  ;;  %v2719_v56 = vmul.f32 %v2718_v53, %v6767_v18  ;;  %s3426_s19 = sld [smem:[#allocation4 + $0x20d]] }
 0x249   :  { %v2789_v44 = vadd.f32 %v2788_v12, %v2756_v19  ;;  %v2814_v1 = vstv %s6951_s15  ;;  %v2722_v41 = vmul.f32 %v2721_v20, %v6728_v29  ;;  %s3427_s7 = sld [smem:[#allocation4 + $0x20e]] }
 0x24a   :  { %v2684_v17 = vadd.f32 %v2683_v36, %v2681_v50  ;;  %v2724_v52 = vstv %s6956_s26  ;;  %s3428_s0 = sld [smem:[#allocation4 + $0x20f]] }
 0x24b   :  { %v2792_v32 = vadd.f32 %v2791_v9, %v2789_v44  ;;  %v2757_v33 = vstv %s6962_s9  ;;  %v2725_v21 = vmul.f32 %v2724_v52, %v6779_v35  ;;  %s3432_s16 = sld [smem:[#allocation7 + $0x13]] }
 0x24c   :  { %v2687_v40 = vadd.f32 %v2686_v48, %v2684_v17  ;;  %v2760_v37 = vstv %s3424_s18  ;;  %v2758_v60 = vmul.f32 %v2757_v33, %v6787_v15 }
 0x24d   :  { %v2795_v23 = vadd.f32 %v2794_v28, %v2792_v32  ;;  %v2763_v18 = vstv %s3425_s4  ;;  %v2761_v4 = vmul.f32 %v3534_v54, %v2760_v37 }
 0x24e   :  { %v2720_v51 = vadd.f32 %v2719_v56, %v2687_v40  ;;  %v2796_v25 = vstv %s3426_s19  ;;  %v2764_v29 = vmul.f32 %v2763_v18, %v6815_v57 }
 0x24f   :  { %v2815_v59 = vadd.f32 %v2814_v1, %v2795_v23  ;;  %v2799_v49 = vstv %s3427_s7  ;;  %v2797_v14 = vmul.f32 %v2796_v25, %v6836_v39 }
 0x250   :  { %v2723_v45 = vadd.f32 %v2722_v41, %v2720_v51  ;;  %v2802_v35 = vstv %s3428_s0  ;;  %v2800_v46 = vmul.f32 %v2799_v49, %v6801_v3 }
 0x251   :  { %v2816_v62 = vmax.f32 %v2815_v59, 0.0  ;;  %v2803_v15 = vmul.f32 %v2802_v35, %v6846_v43  ;;  %v2819_v24 = vstv %s3432_s16 }
 0x252   :  { %v2726_v30 = vadd.f32 %v2725_v21, %v2723_v45 }
 0x253   :  { %2818 = vst [vmem:[#allocation9 + $0x10] sm:$0xff] %v2816_v62 }
 0x254   :  { %v2759_v31 = vadd.f32 %v2758_v60, %v2726_v30 }
 0x256   :  { %v2762_v5 = vadd.f32 %v2761_v4, %v2759_v31 }
 0x258   :  { %v2765_v26 = vadd.f32 %v2764_v29, %v2762_v5 }
 0x25a   :  { %v2798_v34 = vadd.f32 %v2797_v14, %v2765_v26 }
 0x25c   :  { %v2801_v38 = vadd.f32 %v2800_v46, %v2798_v34 }
 0x25e   :  { %v2804_v55 = vadd.f32 %v2803_v15, %v2801_v38 }
 0x260   :  { %v2820_v6 = vadd.f32 %v2819_v24, %v2804_v55 }
 0x262   :  { %v2821_v47 = vmax.f32 %v2820_v6, 0.0 }
 0x264   :  { %2823 = vst [vmem:[#allocation9 + $0x18] sm:$0xff] %v2821_v47 }
 0x265   :  { %3570 = shalt.err (!%p3567_p0)
}
 0x266   :  { %s3589_s22 = smov 128   ;;  %s3590_s1 = smov 8  }
 0x267   :  { %s7057_s28 = sld [smem:[#allocation35_spill]] }
 0x26d   :  { %2835 = dma.vmem_to_hbm [thread:$0]  %s2830_s12, 512, %s7057_s28, [#allocation5], %s3589_s22, %s3589_s22, %s3590_s1  }
 0x26e   :  { %3583 = dma.done.wait [#allocation5], 512  }
 0x26f   :  { %3584 = vsyncadd [#allocation5], 4294966784 }
 0x270   :  { %2839 = vsyncpa [#allocation5], 1 }
 0x271   :  { %2840 = vsyncpa [#allocation6], 1 }
 0x272   :  { %2841 = vsyncpa [#allocation8], 1 }

</bundles_post_ra>
